<compile_context>
chip_gen: v6e
topology: v6e:2x2x1
jax: 0.10.0
libtpu: 0.0.40
codegen_flags: <defaults>
</compile_context>

<pallas_src>
import functools

import jax
import jax.numpy as jnp
from jax.experimental import pallas as pl
from jax.experimental.pallas import tpu as pltpu


def _vmem_limit_bytes():
    """Generation-aware VMEM budget: ~3/4 of physical VMEM (96 MiB on
    v5e/v6e's 128 MiB, 48 MiB on v7x's 64 MiB); conservative fallback."""
    cap = 64 * 2 ** 20
    try:
        info = pltpu.get_tpu_info()
        cap = int(getattr(info, "vmem_capacity_bytes", cap)) or cap
    except Exception:
        pass
    return min(cap * 3 // 4, 96 * 2 ** 20)


_VMEM_LIMIT = _vmem_limit_bytes()


# -----------------------------------------------------------------------------
# Fused per-frame kernel: Conv3d -> surrogate stem conv+ReLU -> global pool -> head
# -----------------------------------------------------------------------------
def _inception3d_kernel(x_ref, w3_ref, b3_ref, ws_ref, bs_ref, hw_ref, hb_ref,
                        o_ref, ypad_ref, *, h, w, inv_hw):
    """One output frame per grid step (grid = (T,), "parallel").

    x_ref   : (1, h+2, w+2, 30) bf16  depth-folded (frames t-1,t,t+1 x 10ch), spatial halo
    w3_ref  : (9, 30, 32)       bf16  Conv3d weights, spatial-tap major, K = kd*10+ci
    b3_ref  : (1, 32)           f32
    ws_ref  : (9, 32, 64)       bf16  surrogate stem conv weights, spatial-tap major
    bs_ref  : (1, 64)           f32
    hw_ref  : (64, 6)           f32   fc(64->1000) @ linear(1000->6), collapsed
    hb_ref  : (1, 6)            f32
    o_ref   : (1, 1, 6)         f32
    ypad_ref: (h+2, w+2, 32)    bf16  VMEM scratch: spatially padded Conv3d output
    """
    # ---- Conv3d(10->32, 3x3x3, pad=1): 9 spatial taps, 3 depth taps folded (K=30).
    acc3 = jnp.zeros((h * w, 32), jnp.float32)
    for kh in range(3):
        for kw in range(3):
            patch = x_ref[0, kh:kh + h, kw:kw + w, :].reshape(h * w, 30)
            acc3 += jnp.dot(patch, w3_ref[kh * 3 + kw],
                            preferred_element_type=jnp.float32)
    y = (acc3 + b3_ref[...]).astype(jnp.bfloat16)   # no activation (matches PyTorch)

    # Spatially padded copy for the next 3x3 conv; the 32-ch activation never
    # touches HBM.  Re-zeroing the whole (small) scratch each step keeps grid
    # iterations independent, which megacore "parallel" sharding requires.
    ypad_ref[...] = jnp.zeros_like(ypad_ref)
    ypad_ref[1:h + 1, 1:w + 1, :] = y.reshape(h, w, 32)

    # ---- Inception-v3 surrogate stem: Conv2d(32->64, 3x3, pad=1) + ReLU (f32 epilogue).
    acc2 = jnp.zeros((h * w, 64), jnp.float32)
    for kh in range(3):
        for kw in range(3):
            patch = ypad_ref[kh:kh + h, kw:kw + w, :].reshape(h * w, 32)
            acc2 += jnp.dot(patch, ws_ref[kh * 3 + kw],
                            preferred_element_type=jnp.float32)
    act = jnp.maximum(acc2 + bs_ref[...], 0.0)

    # ---- Global average pool + collapsed FC∘Linear head, all in f32.
    pooled = jnp.sum(act, axis=0, keepdims=True) * inv_hw            # (1, 64)
    o_ref[0] = jnp.dot(pooled, hw_ref[...],
                       preferred_element_type=jnp.float32) + hb_ref[...]


# -----------------------------------------------------------------------------
# Wrapper-side data prep (cheap pad/concat on the small 10-channel input only)
# -----------------------------------------------------------------------------
def _fold_depth_and_pad(x):
    """(T, 10, H, W) f32 -> (T, H+2, W+2, 30) bf16.

    Folds the 3 Conv3d depth taps (frames t-1, t, t+1 with zero D-padding) into
    the channel dim and adds the spatial halo, so the kernel's 9 spatial taps
    are read implicitly from VMEM — no 27x/9x im2col materialisation in HBM.
    """
    t = x.shape[0]
    xc = jnp.transpose(x, (0, 2, 3, 1)).astype(jnp.bfloat16)          # (T, H, W, 10)
    xd = jnp.pad(xc, ((1, 1), (0, 0), (0, 0), (0, 0)))                # depth halo
    x3 = jnp.concatenate([xd[0:t], xd[1:t + 1], xd[2:t + 2]], axis=-1)  # (T, H, W, 30)
    return jnp.pad(x3, ((0, 0), (1, 1), (1, 1), (0, 0)))              # spatial halo


def inception3d_forward(x, params):
    """x: (T, 10, H, W) float32 -> (T, 6) float32."""
    t, cin, h, w = x.shape
    assert cin == 10
    x3 = _fold_depth_and_pad(x)

    kernel = functools.partial(_inception3d_kernel, h=h, w=w, inv_hw=1.0 / (h * w))
    out = pl.pallas_call(
        kernel,
        out_shape=jax.ShapeDtypeStruct((t, 1, 6), jnp.float32),
        grid=(t,),
        in_specs=[
            pl.BlockSpec((1, h + 2, w + 2, 30), lambda i: (i, 0, 0, 0)),
            pl.BlockSpec((9, 30, 32), lambda i: (0, 0, 0)),   # weights VMEM-resident
            pl.BlockSpec((1, 32), lambda i: (0, 0)),
            pl.BlockSpec((9, 32, 64), lambda i: (0, 0, 0)),
            pl.BlockSpec((1, 64), lambda i: (0, 0)),
            pl.BlockSpec((64, 6), lambda i: (0, 0)),
            pl.BlockSpec((1, 6), lambda i: (0, 0)),
        ],
        out_specs=pl.BlockSpec((1, 1, 6), lambda i: (i, 0, 0)),
        scratch_shapes=[pltpu.VMEM((h + 2, w + 2, 32), jnp.bfloat16)],
        compiler_params=pltpu.CompilerParams(
            dimension_semantics=("parallel",),
            vmem_limit_bytes=_VMEM_LIMIT),
    )(x3, params["w3"], params["b3"], params["ws"], params["bs"],
      params["head_w"], params["head_b"])
    return out.reshape(t, 6)


# -----------------------------------------------------------------------------
# Parameters (random — no checkpoint I/O; layouts prepared once at init)
# -----------------------------------------------------------------------------
def init_params(key):
    ks = jax.random.split(key, 8)
    f32 = jnp.float32
    conv3d_w = 0.05 * jax.random.normal(ks[0], (3, 3, 3, 10, 32), f32)  # (kd,kh,kw,ci,co)
    conv3d_b = 0.05 * jax.random.normal(ks[1], (32,), f32)
    stem_w = 0.05 * jax.random.normal(ks[2], (3, 3, 32, 64), f32)       # (kh,kw,ci,co)
    stem_b = 0.05 * jax.random.normal(ks[3], (64,), f32)
    fc_w = 0.02 * jax.random.normal(ks[4], (64, 1000), f32)
    fc_b = 0.02 * jax.random.normal(ks[5], (1000,), f32)
    lin_w = 0.02 * jax.random.normal(ks[6], (1000, 6), f32)
    lin_b = 0.02 * jax.random.normal(ks[7], (6,), f32)

    # Conv3d weights: spatial-tap major, depth taps folded into K (kd*10 + ci).
    w3 = jnp.transpose(conv3d_w, (1, 2, 0, 3, 4)).reshape(9, 30, 32).astype(jnp.bfloat16)
    ws = stem_w.reshape(9, 32, 64).astype(jnp.bfloat16)
    # FC(64->1000) ∘ Linear(1000->6) collapsed (no nonlinearity in between), f32.
    head_w = fc_w @ lin_w                       # (64, 6)
    head_b = fc_b @ lin_w + lin_b               # (6,)

    return {
        "w3": w3, "b3": conv3d_b.reshape(1, 32),
        "ws": ws, "bs": stem_b.reshape(1, 64),
        "head_w": head_w, "head_b": head_b.reshape(1, 6),
    }


# -----------------------------------------------------------------------------
# Pure-JAX reference (same math; bf16 matmul inputs -> tight tolerance)
# -----------------------------------------------------------------------------
def _reference_forward(x, params):
    t, _, h, w = x.shape
    x3 = _fold_depth_and_pad(x)
    acc3 = jnp.zeros((t, h * w, 32), jnp.float32)
    for kh in range(3):
        for kw in range(3):
            patch = x3[:, kh:kh + h, kw:kw + w, :].reshape(t, h * w, 30)
            acc3 += jnp.einsum('tpk,kc->tpc', patch, params["w3"][kh * 3 + kw],
                               preferred_element_type=jnp.float32)
    y = (acc3 + params["b3"][0]).astype(jnp.bfloat16).reshape(t, h, w, 32)
    ypad = jnp.pad(y, ((0, 0), (1, 1), (1, 1), (0, 0)))
    acc2 = jnp.zeros((t, h * w, 64), jnp.float32)
    for kh in range(3):
        for kw in range(3):
            patch = ypad[:, kh:kh + h, kw:kw + w, :].reshape(t, h * w, 32)
            acc2 += jnp.einsum('tpk,kc->tpc', patch, params["ws"][kh * 3 + kw],
                               preferred_element_type=jnp.float32)
    act = jnp.maximum(acc2 + params["bs"][0], 0.0)
    pooled = jnp.mean(act, axis=1)                                     # (T, 64)
    return pooled @ params["head_w"] + params["head_b"][0]


# -----------------------------------------------------------------------------
if __name__ == "__main__":
    key = jax.random.PRNGKey(0)
    k_param, k_x = jax.random.split(key)

    params = init_params(k_param)
    # Input consistent with the module: dim 1 must be 10 (Conv3d in_channels).
    x = jax.random.normal(k_x, (8, 10, 16, 16), jnp.float32)  # (T=8, 10, 16, 16)

    out = jax.jit(inception3d_forward)(x, params)
    out = jax.block_until_ready(out)

    assert out.shape == (8, 6) and out.dtype == jnp.float32
    assert bool(jnp.all(jnp.isfinite(out)))

    # Tolerance check vs. pure-JAX reference (bf16 matmul path on both sides).
    ref = _reference_forward(x, params)
    assert bool(jnp.allclose(out, ref, rtol=2e-2, atol=2e-2)), \
        float(jnp.max(jnp.abs(out - ref)))

    print("KERNEL_OK")
</pallas_src>

<mosaic_0001>
module attributes {stable_mosaic.version = 11 : i64} {
  func.func @_inception3d_kernel(%arg0: i32, %arg1: memref<1x18x18x30xbf16, #tpu.memory_space<vmem>>, %arg2: memref<9x30x32xbf16, #tpu.memory_space<vmem>>, %arg3: memref<1x32xf32, #tpu.memory_space<vmem>>, %arg4: memref<9x32x64xbf16, #tpu.memory_space<vmem>>, %arg5: memref<1x64xf32, #tpu.memory_space<vmem>>, %arg6: memref<64x6xf32, #tpu.memory_space<vmem>>, %arg7: memref<1x6xf32, #tpu.memory_space<vmem>>, %arg8: memref<1x1x6xf32, #tpu.memory_space<vmem>>, %arg9: memref<18x18x32xbf16, #tpu.memory_space<vmem>>) attributes {dimension_semantics = [#tpu.dimension_semantics<parallel>], iteration_bounds = array<i64: 8>, scalar_prefetch = 0 : i64, scratch_operands = 1 : i64, tpu.core_type = #tpu.core_type<tc>, window_params = [{transform_indices = @transform_0, window_bounds = array<i64: 1, 18, 18, 30>}, {pipeline_mode = #tpu.pipeline_mode<synchronous>, transform_indices = @transform_1, window_bounds = array<i64: 9, 30, 32>}, {pipeline_mode = #tpu.pipeline_mode<synchronous>, transform_indices = @transform_2, window_bounds = array<i64: 1, 32>}, {pipeline_mode = #tpu.pipeline_mode<synchronous>, transform_indices = @transform_3, window_bounds = array<i64: 9, 32, 64>}, {pipeline_mode = #tpu.pipeline_mode<synchronous>, transform_indices = @transform_4, window_bounds = array<i64: 1, 64>}, {pipeline_mode = #tpu.pipeline_mode<synchronous>, transform_indices = @transform_5, window_bounds = array<i64: 64, 6>}, {pipeline_mode = #tpu.pipeline_mode<synchronous>, transform_indices = @transform_6, window_bounds = array<i64: 1, 6>}, {transform_indices = @transform_7, window_bounds = array<i64: 1, 1, 6>}]} {
    %cst = arith.constant 0.000000e+00 : f32
    %0 = vector.broadcast %cst : f32 to vector<256x32xf32>
    %c0 = arith.constant 0 : index
    %c0_0 = arith.constant 0 : index
    %c0_1 = arith.constant 0 : index
    %c0_2 = arith.constant 0 : index
    %1 = vector.load %arg1[%c0, %c0_0, %c0_1, %c0_2] : memref<1x18x18x30xbf16, #tpu.memory_space<vmem>>, vector<1x16x16x30xbf16>
    %2 = vector.shape_cast %1 : vector<1x16x16x30xbf16> to vector<16x16x30xbf16>
    %3 = vector.shape_cast %2 : vector<16x16x30xbf16> to vector<256x30xbf16>
    %c0_3 = arith.constant 0 : index
    %c0_4 = arith.constant 0 : index
    %c0_5 = arith.constant 0 : index
    %4 = vector.load %arg2[%c0_3, %c0_4, %c0_5] : memref<9x30x32xbf16, #tpu.memory_space<vmem>>, vector<1x30x32xbf16>
    %5 = vector.shape_cast %4 : vector<1x30x32xbf16> to vector<30x32xbf16>
    %cst_6 = arith.constant dense<0.000000e+00> : vector<256x32xf32>
    %6 = tpu.matmul %3, %5, %cst_6 {dimension_numbers = #tpu.dot_dimension_numbers<[1], [0], [0], [1], [0, 0, 1, 1], [], []>} : vector<256x30xbf16>, vector<30x32xbf16>, vector<256x32xf32> -> vector<256x32xf32>
    %7 = arith.addf %0, %6 : vector<256x32xf32>
    %c0_7 = arith.constant 0 : index
    %c0_8 = arith.constant 0 : index
    %c1 = arith.constant 1 : index
    %c0_9 = arith.constant 0 : index
    %8 = vector.load %arg1[%c0_7, %c0_8, %c1, %c0_9] : memref<1x18x18x30xbf16, #tpu.memory_space<vmem>>, vector<1x16x16x30xbf16>
    %9 = vector.shape_cast %8 : vector<1x16x16x30xbf16> to vector<16x16x30xbf16>
    %10 = vector.shape_cast %9 : vector<16x16x30xbf16> to vector<256x30xbf16>
    %c1_10 = arith.constant 1 : index
    %c0_11 = arith.constant 0 : index
    %c0_12 = arith.constant 0 : index
    %11 = vector.load %arg2[%c1_10, %c0_11, %c0_12] : memref<9x30x32xbf16, #tpu.memory_space<vmem>>, vector<1x30x32xbf16>
    %12 = vector.shape_cast %11 : vector<1x30x32xbf16> to vector<30x32xbf16>
    %cst_13 = arith.constant dense<0.000000e+00> : vector<256x32xf32>
    %13 = tpu.matmul %10, %12, %cst_13 {dimension_numbers = #tpu.dot_dimension_numbers<[1], [0], [0], [1], [0, 0, 1, 1], [], []>} : vector<256x30xbf16>, vector<30x32xbf16>, vector<256x32xf32> -> vector<256x32xf32>
    %14 = arith.addf %7, %13 : vector<256x32xf32>
    %c0_14 = arith.constant 0 : index
    %c0_15 = arith.constant 0 : index
    %c2 = arith.constant 2 : index
    %c0_16 = arith.constant 0 : index
    %15 = vector.load %arg1[%c0_14, %c0_15, %c2, %c0_16] : memref<1x18x18x30xbf16, #tpu.memory_space<vmem>>, vector<1x16x16x30xbf16>
    %16 = vector.shape_cast %15 : vector<1x16x16x30xbf16> to vector<16x16x30xbf16>
    %17 = vector.shape_cast %16 : vector<16x16x30xbf16> to vector<256x30xbf16>
    %c2_17 = arith.constant 2 : index
    %c0_18 = arith.constant 0 : index
    %c0_19 = arith.constant 0 : index
    %18 = vector.load %arg2[%c2_17, %c0_18, %c0_19] : memref<9x30x32xbf16, #tpu.memory_space<vmem>>, vector<1x30x32xbf16>
    %19 = vector.shape_cast %18 : vector<1x30x32xbf16> to vector<30x32xbf16>
    %cst_20 = arith.constant dense<0.000000e+00> : vector<256x32xf32>
    %20 = tpu.matmul %17, %19, %cst_20 {dimension_numbers = #tpu.dot_dimension_numbers<[1], [0], [0], [1], [0, 0, 1, 1], [], []>} : vector<256x30xbf16>, vector<30x32xbf16>, vector<256x32xf32> -> vector<256x32xf32>
    %21 = arith.addf %14, %20 : vector<256x32xf32>
    %c0_21 = arith.constant 0 : index
    %c1_22 = arith.constant 1 : index
    %c0_23 = arith.constant 0 : index
    %c0_24 = arith.constant 0 : index
    %22 = vector.load %arg1[%c0_21, %c1_22, %c0_23, %c0_24] : memref<1x18x18x30xbf16, #tpu.memory_space<vmem>>, vector<1x16x16x30xbf16>
    %23 = vector.shape_cast %22 : vector<1x16x16x30xbf16> to vector<16x16x30xbf16>
    %24 = vector.shape_cast %23 : vector<16x16x30xbf16> to vector<256x30xbf16>
    %c3 = arith.constant 3 : index
    %c0_25 = arith.constant 0 : index
    %c0_26 = arith.constant 0 : index
    %25 = vector.load %arg2[%c3, %c0_25, %c0_26] : memref<9x30x32xbf16, #tpu.memory_space<vmem>>, vector<1x30x32xbf16>
    %26 = vector.shape_cast %25 : vector<1x30x32xbf16> to vector<30x32xbf16>
    %cst_27 = arith.constant dense<0.000000e+00> : vector<256x32xf32>
    %27 = tpu.matmul %24, %26, %cst_27 {dimension_numbers = #tpu.dot_dimension_numbers<[1], [0], [0], [1], [0, 0, 1, 1], [], []>} : vector<256x30xbf16>, vector<30x32xbf16>, vector<256x32xf32> -> vector<256x32xf32>
    %28 = arith.addf %21, %27 : vector<256x32xf32>
    %c0_28 = arith.constant 0 : index
    %c1_29 = arith.constant 1 : index
    %c1_30 = arith.constant 1 : index
    %c0_31 = arith.constant 0 : index
    %29 = vector.load %arg1[%c0_28, %c1_29, %c1_30, %c0_31] : memref<1x18x18x30xbf16, #tpu.memory_space<vmem>>, vector<1x16x16x30xbf16>
    %30 = vector.shape_cast %29 : vector<1x16x16x30xbf16> to vector<16x16x30xbf16>
    %31 = vector.shape_cast %30 : vector<16x16x30xbf16> to vector<256x30xbf16>
    %c4 = arith.constant 4 : index
    %c0_32 = arith.constant 0 : index
    %c0_33 = arith.constant 0 : index
    %32 = vector.load %arg2[%c4, %c0_32, %c0_33] : memref<9x30x32xbf16, #tpu.memory_space<vmem>>, vector<1x30x32xbf16>
    %33 = vector.shape_cast %32 : vector<1x30x32xbf16> to vector<30x32xbf16>
    %cst_34 = arith.constant dense<0.000000e+00> : vector<256x32xf32>
    %34 = tpu.matmul %31, %33, %cst_34 {dimension_numbers = #tpu.dot_dimension_numbers<[1], [0], [0], [1], [0, 0, 1, 1], [], []>} : vector<256x30xbf16>, vector<30x32xbf16>, vector<256x32xf32> -> vector<256x32xf32>
    %35 = arith.addf %28, %34 : vector<256x32xf32>
    %c0_35 = arith.constant 0 : index
    %c1_36 = arith.constant 1 : index
    %c2_37 = arith.constant 2 : index
    %c0_38 = arith.constant 0 : index
    %36 = vector.load %arg1[%c0_35, %c1_36, %c2_37, %c0_38] : memref<1x18x18x30xbf16, #tpu.memory_space<vmem>>, vector<1x16x16x30xbf16>
    %37 = vector.shape_cast %36 : vector<1x16x16x30xbf16> to vector<16x16x30xbf16>
    %38 = vector.shape_cast %37 : vector<16x16x30xbf16> to vector<256x30xbf16>
    %c5 = arith.constant 5 : index
    %c0_39 = arith.constant 0 : index
    %c0_40 = arith.constant 0 : index
    %39 = vector.load %arg2[%c5, %c0_39, %c0_40] : memref<9x30x32xbf16, #tpu.memory_space<vmem>>, vector<1x30x32xbf16>
    %40 = vector.shape_cast %39 : vector<1x30x32xbf16> to vector<30x32xbf16>
    %cst_41 = arith.constant dense<0.000000e+00> : vector<256x32xf32>
    %41 = tpu.matmul %38, %40, %cst_41 {dimension_numbers = #tpu.dot_dimension_numbers<[1], [0], [0], [1], [0, 0, 1, 1], [], []>} : vector<256x30xbf16>, vector<30x32xbf16>, vector<256x32xf32> -> vector<256x32xf32>
    %42 = arith.addf %35, %41 : vector<256x32xf32>
    %c0_42 = arith.constant 0 : index
    %c2_43 = arith.constant 2 : index
    %c0_44 = arith.constant 0 : index
    %c0_45 = arith.constant 0 : index
    %43 = vector.load %arg1[%c0_42, %c2_43, %c0_44, %c0_45] : memref<1x18x18x30xbf16, #tpu.memory_space<vmem>>, vector<1x16x16x30xbf16>
    %44 = vector.shape_cast %43 : vector<1x16x16x30xbf16> to vector<16x16x30xbf16>
    %45 = vector.shape_cast %44 : vector<16x16x30xbf16> to vector<256x30xbf16>
    %c6 = arith.constant 6 : index
    %c0_46 = arith.constant 0 : index
    %c0_47 = arith.constant 0 : index
    %46 = vector.load %arg2[%c6, %c0_46, %c0_47] : memref<9x30x32xbf16, #tpu.memory_space<vmem>>, vector<1x30x32xbf16>
    %47 = vector.shape_cast %46 : vector<1x30x32xbf16> to vector<30x32xbf16>
    %cst_48 = arith.constant dense<0.000000e+00> : vector<256x32xf32>
    %48 = tpu.matmul %45, %47, %cst_48 {dimension_numbers = #tpu.dot_dimension_numbers<[1], [0], [0], [1], [0, 0, 1, 1], [], []>} : vector<256x30xbf16>, vector<30x32xbf16>, vector<256x32xf32> -> vector<256x32xf32>
    %49 = arith.addf %42, %48 : vector<256x32xf32>
    %c0_49 = arith.constant 0 : index
    %c2_50 = arith.constant 2 : index
    %c1_51 = arith.constant 1 : index
    %c0_52 = arith.constant 0 : index
    %50 = vector.load %arg1[%c0_49, %c2_50, %c1_51, %c0_52] : memref<1x18x18x30xbf16, #tpu.memory_space<vmem>>, vector<1x16x16x30xbf16>
    %51 = vector.shape_cast %50 : vector<1x16x16x30xbf16> to vector<16x16x30xbf16>
    %52 = vector.shape_cast %51 : vector<16x16x30xbf16> to vector<256x30xbf16>
    %c7 = arith.constant 7 : index
    %c0_53 = arith.constant 0 : index
    %c0_54 = arith.constant 0 : index
    %53 = vector.load %arg2[%c7, %c0_53, %c0_54] : memref<9x30x32xbf16, #tpu.memory_space<vmem>>, vector<1x30x32xbf16>
    %54 = vector.shape_cast %53 : vector<1x30x32xbf16> to vector<30x32xbf16>
    %cst_55 = arith.constant dense<0.000000e+00> : vector<256x32xf32>
    %55 = tpu.matmul %52, %54, %cst_55 {dimension_numbers = #tpu.dot_dimension_numbers<[1], [0], [0], [1], [0, 0, 1, 1], [], []>} : vector<256x30xbf16>, vector<30x32xbf16>, vector<256x32xf32> -> vector<256x32xf32>
    %56 = arith.addf %49, %55 : vector<256x32xf32>
    %c0_56 = arith.constant 0 : index
    %c2_57 = arith.constant 2 : index
    %c2_58 = arith.constant 2 : index
    %c0_59 = arith.constant 0 : index
    %57 = vector.load %arg1[%c0_56, %c2_57, %c2_58, %c0_59] : memref<1x18x18x30xbf16, #tpu.memory_space<vmem>>, vector<1x16x16x30xbf16>
    %58 = vector.shape_cast %57 : vector<1x16x16x30xbf16> to vector<16x16x30xbf16>
    %59 = vector.shape_cast %58 : vector<16x16x30xbf16> to vector<256x30xbf16>
    %c8 = arith.constant 8 : index
    %c0_60 = arith.constant 0 : index
    %c0_61 = arith.constant 0 : index
    %60 = vector.load %arg2[%c8, %c0_60, %c0_61] : memref<9x30x32xbf16, #tpu.memory_space<vmem>>, vector<1x30x32xbf16>
    %61 = vector.shape_cast %60 : vector<1x30x32xbf16> to vector<30x32xbf16>
    %cst_62 = arith.constant dense<0.000000e+00> : vector<256x32xf32>
    %62 = tpu.matmul %59, %61, %cst_62 {dimension_numbers = #tpu.dot_dimension_numbers<[1], [0], [0], [1], [0, 0, 1, 1], [], []>} : vector<256x30xbf16>, vector<30x32xbf16>, vector<256x32xf32> -> vector<256x32xf32>
    %63 = arith.addf %56, %62 : vector<256x32xf32>
    %c0_63 = arith.constant 0 : index
    %c0_64 = arith.constant 0 : index
    %64 = vector.load %arg3[%c0_63, %c0_64] : memref<1x32xf32, #tpu.memory_space<vmem>>, vector<1x32xf32>
    %65 = vector.broadcast %64 : vector<1x32xf32> to vector<256x32xf32>
    %66 = arith.addf %63, %65 : vector<256x32xf32>
    %67 = arith.truncf %66 : vector<256x32xf32> to vector<256x32xbf16>
    %cst_65 = arith.constant 0.000000e+00 : bf16
    %68 = vector.broadcast %cst_65 : bf16 to vector<18x18x32xbf16>
    %c0_66 = arith.constant 0 : index
    %c0_67 = arith.constant 0 : index
    %c0_68 = arith.constant 0 : index
    %69 = vector.load %arg9[%c0_66, %c0_67, %c0_68] : memref<18x18x32xbf16, #tpu.memory_space<vmem>>, vector<18x18x32xbf16>
    tpu.vector_store %arg9[%c0_66, %c0_67, %c0_68], %68 {strides = array<i32>} : memref<18x18x32xbf16, #tpu.memory_space<vmem>>, vector<18x18x32xbf16>,
    %70 = vector.shape_cast %67 : vector<256x32xbf16> to vector<16x16x32xbf16>
    %c1_69 = arith.constant 1 : index
    %c1_70 = arith.constant 1 : index
    %c0_71 = arith.constant 0 : index
    %71 = vector.load %arg9[%c1_69, %c1_70, %c0_71] : memref<18x18x32xbf16, #tpu.memory_space<vmem>>, vector<16x16x32xbf16>
    tpu.vector_store %arg9[%c1_69, %c1_70, %c0_71], %70 {strides = array<i32>} : memref<18x18x32xbf16, #tpu.memory_space<vmem>>, vector<16x16x32xbf16>,
    %cst_72 = arith.constant 0.000000e+00 : f32
    %72 = vector.broadcast %cst_72 : f32 to vector<256x64xf32>
    %c0_73 = arith.constant 0 : index
    %c0_74 = arith.constant 0 : index
    %c0_75 = arith.constant 0 : index
    %73 = vector.load %arg9[%c0_73, %c0_74, %c0_75] : memref<18x18x32xbf16, #tpu.memory_space<vmem>>, vector<16x16x32xbf16>
    %74 = vector.shape_cast %73 : vector<16x16x32xbf16> to vector<256x32xbf16>
    %c0_76 = arith.constant 0 : index
    %c0_77 = arith.constant 0 : index
    %c0_78 = arith.constant 0 : index
    %75 = vector.load %arg4[%c0_76, %c0_77, %c0_78] : memref<9x32x64xbf16, #tpu.memory_space<vmem>>, vector<1x32x64xbf16>
    %76 = vector.shape_cast %75 : vector<1x32x64xbf16> to vector<32x64xbf16>
    %cst_79 = arith.constant dense<0.000000e+00> : vector<256x64xf32>
    %77 = tpu.matmul %74, %76, %cst_79 {dimension_numbers = #tpu.dot_dimension_numbers<[1], [0], [0], [1], [0, 0, 1, 1], [], []>} : vector<256x32xbf16>, vector<32x64xbf16>, vector<256x64xf32> -> vector<256x64xf32>
    %78 = arith.addf %72, %77 : vector<256x64xf32>
    %c0_80 = arith.constant 0 : index
    %c1_81 = arith.constant 1 : index
    %c0_82 = arith.constant 0 : index
    %79 = vector.load %arg9[%c0_80, %c1_81, %c0_82] : memref<18x18x32xbf16, #tpu.memory_space<vmem>>, vector<16x16x32xbf16>
    %80 = vector.shape_cast %79 : vector<16x16x32xbf16> to vector<256x32xbf16>
    %c1_83 = arith.constant 1 : index
    %c0_84 = arith.constant 0 : index
    %c0_85 = arith.constant 0 : index
    %81 = vector.load %arg4[%c1_83, %c0_84, %c0_85] : memref<9x32x64xbf16, #tpu.memory_space<vmem>>, vector<1x32x64xbf16>
    %82 = vector.shape_cast %81 : vector<1x32x64xbf16> to vector<32x64xbf16>
    %cst_86 = arith.constant dense<0.000000e+00> : vector<256x64xf32>
    %83 = tpu.matmul %80, %82, %cst_86 {dimension_numbers = #tpu.dot_dimension_numbers<[1], [0], [0], [1], [0, 0, 1, 1], [], []>} : vector<256x32xbf16>, vector<32x64xbf16>, vector<256x64xf32> -> vector<256x64xf32>
    %84 = arith.addf %78, %83 : vector<256x64xf32>
    %c0_87 = arith.constant 0 : index
    %c2_88 = arith.constant 2 : index
    %c0_89 = arith.constant 0 : index
    %85 = vector.load %arg9[%c0_87, %c2_88, %c0_89] : memref<18x18x32xbf16, #tpu.memory_space<vmem>>, vector<16x16x32xbf16>
    %86 = vector.shape_cast %85 : vector<16x16x32xbf16> to vector<256x32xbf16>
    %c2_90 = arith.constant 2 : index
    %c0_91 = arith.constant 0 : index
    %c0_92 = arith.constant 0 : index
    %87 = vector.load %arg4[%c2_90, %c0_91, %c0_92] : memref<9x32x64xbf16, #tpu.memory_space<vmem>>, vector<1x32x64xbf16>
    %88 = vector.shape_cast %87 : vector<1x32x64xbf16> to vector<32x64xbf16>
    %cst_93 = arith.constant dense<0.000000e+00> : vector<256x64xf32>
    %89 = tpu.matmul %86, %88, %cst_93 {dimension_numbers = #tpu.dot_dimension_numbers<[1], [0], [0], [1], [0, 0, 1, 1], [], []>} : vector<256x32xbf16>, vector<32x64xbf16>, vector<256x64xf32> -> vector<256x64xf32>
    %90 = arith.addf %84, %89 : vector<256x64xf32>
    %c1_94 = arith.constant 1 : index
    %c0_95 = arith.constant 0 : index
    %c0_96 = arith.constant 0 : index
    %91 = vector.load %arg9[%c1_94, %c0_95, %c0_96] : memref<18x18x32xbf16, #tpu.memory_space<vmem>>, vector<16x16x32xbf16>
    %92 = vector.shape_cast %91 : vector<16x16x32xbf16> to vector<256x32xbf16>
    %c3_97 = arith.constant 3 : index
    %c0_98 = arith.constant 0 : index
    %c0_99 = arith.constant 0 : index
    %93 = vector.load %arg4[%c3_97, %c0_98, %c0_99] : memref<9x32x64xbf16, #tpu.memory_space<vmem>>, vector<1x32x64xbf16>
    %94 = vector.shape_cast %93 : vector<1x32x64xbf16> to vector<32x64xbf16>
    %cst_100 = arith.constant dense<0.000000e+00> : vector<256x64xf32>
    %95 = tpu.matmul %92, %94, %cst_100 {dimension_numbers = #tpu.dot_dimension_numbers<[1], [0], [0], [1], [0, 0, 1, 1], [], []>} : vector<256x32xbf16>, vector<32x64xbf16>, vector<256x64xf32> -> vector<256x64xf32>
    %96 = arith.addf %90, %95 : vector<256x64xf32>
    %c1_101 = arith.constant 1 : index
    %c1_102 = arith.constant 1 : index
    %c0_103 = arith.constant 0 : index
    %97 = vector.load %arg9[%c1_101, %c1_102, %c0_103] : memref<18x18x32xbf16, #tpu.memory_space<vmem>>, vector<16x16x32xbf16>
    %98 = vector.shape_cast %97 : vector<16x16x32xbf16> to vector<256x32xbf16>
    %c4_104 = arith.constant 4 : index
    %c0_105 = arith.constant 0 : index
    %c0_106 = arith.constant 0 : index
    %99 = vector.load %arg4[%c4_104, %c0_105, %c0_106] : memref<9x32x64xbf16, #tpu.memory_space<vmem>>, vector<1x32x64xbf16>
    %100 = vector.shape_cast %99 : vector<1x32x64xbf16> to vector<32x64xbf16>
    %cst_107 = arith.constant dense<0.000000e+00> : vector<256x64xf32>
    %101 = tpu.matmul %98, %100, %cst_107 {dimension_numbers = #tpu.dot_dimension_numbers<[1], [0], [0], [1], [0, 0, 1, 1], [], []>} : vector<256x32xbf16>, vector<32x64xbf16>, vector<256x64xf32> -> vector<256x64xf32>
    %102 = arith.addf %96, %101 : vector<256x64xf32>
    %c1_108 = arith.constant 1 : index
    %c2_109 = arith.constant 2 : index
    %c0_110 = arith.constant 0 : index
    %103 = vector.load %arg9[%c1_108, %c2_109, %c0_110] : memref<18x18x32xbf16, #tpu.memory_space<vmem>>, vector<16x16x32xbf16>
    %104 = vector.shape_cast %103 : vector<16x16x32xbf16> to vector<256x32xbf16>
    %c5_111 = arith.constant 5 : index
    %c0_112 = arith.constant 0 : index
    %c0_113 = arith.constant 0 : index
    %105 = vector.load %arg4[%c5_111, %c0_112, %c0_113] : memref<9x32x64xbf16, #tpu.memory_space<vmem>>, vector<1x32x64xbf16>
    %106 = vector.shape_cast %105 : vector<1x32x64xbf16> to vector<32x64xbf16>
    %cst_114 = arith.constant dense<0.000000e+00> : vector<256x64xf32>
    %107 = tpu.matmul %104, %106, %cst_114 {dimension_numbers = #tpu.dot_dimension_numbers<[1], [0], [0], [1], [0, 0, 1, 1], [], []>} : vector<256x32xbf16>, vector<32x64xbf16>, vector<256x64xf32> -> vector<256x64xf32>
    %108 = arith.addf %102, %107 : vector<256x64xf32>
    %c2_115 = arith.constant 2 : index
    %c0_116 = arith.constant 0 : index
    %c0_117 = arith.constant 0 : index
    %109 = vector.load %arg9[%c2_115, %c0_116, %c0_117] : memref<18x18x32xbf16, #tpu.memory_space<vmem>>, vector<16x16x32xbf16>
    %110 = vector.shape_cast %109 : vector<16x16x32xbf16> to vector<256x32xbf16>
    %c6_118 = arith.constant 6 : index
    %c0_119 = arith.constant 0 : index
    %c0_120 = arith.constant 0 : index
    %111 = vector.load %arg4[%c6_118, %c0_119, %c0_120] : memref<9x32x64xbf16, #tpu.memory_space<vmem>>, vector<1x32x64xbf16>
    %112 = vector.shape_cast %111 : vector<1x32x64xbf16> to vector<32x64xbf16>
    %cst_121 = arith.constant dense<0.000000e+00> : vector<256x64xf32>
    %113 = tpu.matmul %110, %112, %cst_121 {dimension_numbers = #tpu.dot_dimension_numbers<[1], [0], [0], [1], [0, 0, 1, 1], [], []>} : vector<256x32xbf16>, vector<32x64xbf16>, vector<256x64xf32> -> vector<256x64xf32>
    %114 = arith.addf %108, %113 : vector<256x64xf32>
    %c2_122 = arith.constant 2 : index
    %c1_123 = arith.constant 1 : index
    %c0_124 = arith.constant 0 : index
    %115 = vector.load %arg9[%c2_122, %c1_123, %c0_124] : memref<18x18x32xbf16, #tpu.memory_space<vmem>>, vector<16x16x32xbf16>
    %116 = vector.shape_cast %115 : vector<16x16x32xbf16> to vector<256x32xbf16>
    %c7_125 = arith.constant 7 : index
    %c0_126 = arith.constant 0 : index
    %c0_127 = arith.constant 0 : index
    %117 = vector.load %arg4[%c7_125, %c0_126, %c0_127] : memref<9x32x64xbf16, #tpu.memory_space<vmem>>, vector<1x32x64xbf16>
    %118 = vector.shape_cast %117 : vector<1x32x64xbf16> to vector<32x64xbf16>
    %cst_128 = arith.constant dense<0.000000e+00> : vector<256x64xf32>
    %119 = tpu.matmul %116, %118, %cst_128 {dimension_numbers = #tpu.dot_dimension_numbers<[1], [0], [0], [1], [0, 0, 1, 1], [], []>} : vector<256x32xbf16>, vector<32x64xbf16>, vector<256x64xf32> -> vector<256x64xf32>
    %120 = arith.addf %114, %119 : vector<256x64xf32>
    %c2_129 = arith.constant 2 : index
    %c2_130 = arith.constant 2 : index
    %c0_131 = arith.constant 0 : index
    %121 = vector.load %arg9[%c2_129, %c2_130, %c0_131] : memref<18x18x32xbf16, #tpu.memory_space<vmem>>, vector<16x16x32xbf16>
    %122 = vector.shape_cast %121 : vector<16x16x32xbf16> to vector<256x32xbf16>
    %c8_132 = arith.constant 8 : index
    %c0_133 = arith.constant 0 : index
    %c0_134 = arith.constant 0 : index
    %123 = vector.load %arg4[%c8_132, %c0_133, %c0_134] : memref<9x32x64xbf16, #tpu.memory_space<vmem>>, vector<1x32x64xbf16>
    %124 = vector.shape_cast %123 : vector<1x32x64xbf16> to vector<32x64xbf16>
    %cst_135 = arith.constant dense<0.000000e+00> : vector<256x64xf32>
    %125 = tpu.matmul %122, %124, %cst_135 {dimension_numbers = #tpu.dot_dimension_numbers<[1], [0], [0], [1], [0, 0, 1, 1], [], []>} : vector<256x32xbf16>, vector<32x64xbf16>, vector<256x64xf32> -> vector<256x64xf32>
    %126 = arith.addf %120, %125 : vector<256x64xf32>
    %c0_136 = arith.constant 0 : index
    %c0_137 = arith.constant 0 : index
    %127 = vector.load %arg5[%c0_136, %c0_137] : memref<1x64xf32, #tpu.memory_space<vmem>>, vector<1x64xf32>
    %128 = vector.broadcast %127 : vector<1x64xf32> to vector<256x64xf32>
    %129 = arith.addf %126, %128 : vector<256x64xf32>
    %cst_138 = arith.constant 0.000000e+00 : f32
    %130 = vector.broadcast %cst_138 : f32 to vector<256x64xf32>
    %131 = arith.maximumf %129, %130 : vector<256x64xf32>
    %cst_139 = arith.constant dense<0.000000e+00> : vector<64xf32>
    %132 = vector.multi_reduction <add>, %131, %cst_139 [0] : vector<256x64xf32> to vector<64xf32>
    %133 = vector.shape_cast %132 : vector<64xf32> to vector<1x64xf32>
    %cst_140 = arith.constant 3.906250e-03 : f32
    %134 = vector.broadcast %cst_140 : f32 to vector<1x64xf32>
    %135 = arith.mulf %133, %134 : vector<1x64xf32>
    %c0_141 = arith.constant 0 : index
    %c0_142 = arith.constant 0 : index
    %136 = vector.load %arg6[%c0_141, %c0_142] : memref<64x6xf32, #tpu.memory_space<vmem>>, vector<64x6xf32>
    %cst_143 = arith.constant dense<0.000000e+00> : vector<1x6xf32>
    %137 = tpu.matmul %135, %136, %cst_143 {dimension_numbers = #tpu.dot_dimension_numbers<[1], [0], [0], [1], [0, 0, 1, 1], [], []>} : vector<1x64xf32>, vector<64x6xf32>, vector<1x6xf32> -> vector<1x6xf32>
    %c0_144 = arith.constant 0 : index
    %c0_145 = arith.constant 0 : index
    %138 = vector.load %arg7[%c0_144, %c0_145] : memref<1x6xf32, #tpu.memory_space<vmem>>, vector<1x6xf32>
    %139 = arith.addf %137, %138 : vector<1x6xf32>
    %c0_146 = arith.constant 0 : index
    %c0_147 = arith.constant 0 : index
    %c0_148 = arith.constant 0 : index
    %140 = vector.load %arg8[%c0_146, %c0_147, %c0_148] : memref<1x1x6xf32, #tpu.memory_space<vmem>>, vector<1x1x6xf32>
    %141 = vector.shape_cast %140 : vector<1x1x6xf32> to vector<1x6xf32>
    %142 = vector.shape_cast %139 : vector<1x6xf32> to vector<1x1x6xf32>
    tpu.vector_store %arg8[%c0_146, %c0_147, %c0_148], %142 {strides = array<i32>} : memref<1x1x6xf32, #tpu.memory_space<vmem>>, vector<1x1x6xf32>,
    return
  }
  func.func @transform_0(%arg0: i32) -> (i32, i32, i32, i32) {
    %c0_i32 = arith.constant 0 : i32
    %c0_i32_0 = arith.constant 0 : i32
    %c0_i32_1 = arith.constant 0 : i32
    %c0_i32_2 = arith.constant 0 : i32
    return %arg0, %c0_i32, %c0_i32_0, %c0_i32_1 : i32, i32, i32, i32
  }
  func.func @transform_1(%arg0: i32) -> (i32, i32, i32) {
    %c0_i32 = arith.constant 0 : i32
    %c0_i32_0 = arith.constant 0 : i32
    %c0_i32_1 = arith.constant 0 : i32
    %c0_i32_2 = arith.constant 0 : i32
    return %c0_i32, %c0_i32_0, %c0_i32_1 : i32, i32, i32
  }
  func.func @transform_2(%arg0: i32) -> (i32, i32) {
    %c0_i32 = arith.constant 0 : i32
    %c0_i32_0 = arith.constant 0 : i32
    %c0_i32_1 = arith.constant 0 : i32
    return %c0_i32, %c0_i32_0 : i32, i32
  }
  func.func @transform_3(%arg0: i32) -> (i32, i32, i32) {
    %c0_i32 = arith.constant 0 : i32
    %c0_i32_0 = arith.constant 0 : i32
    %c0_i32_1 = arith.constant 0 : i32
    %c0_i32_2 = arith.constant 0 : i32
    return %c0_i32, %c0_i32_0, %c0_i32_1 : i32, i32, i32
  }
  func.func @transform_4(%arg0: i32) -> (i32, i32) {
    %c0_i32 = arith.constant 0 : i32
    %c0_i32_0 = arith.constant 0 : i32
    %c0_i32_1 = arith.constant 0 : i32
    return %c0_i32, %c0_i32_0 : i32, i32
  }
  func.func @transform_5(%arg0: i32) -> (i32, i32) {
    %c0_i32 = arith.constant 0 : i32
    %c0_i32_0 = arith.constant 0 : i32
    %c0_i32_1 = arith.constant 0 : i32
    return %c0_i32, %c0_i32_0 : i32, i32
  }
  func.func @transform_6(%arg0: i32) -> (i32, i32) {
    %c0_i32 = arith.constant 0 : i32
    %c0_i32_0 = arith.constant 0 : i32
    %c0_i32_1 = arith.constant 0 : i32
    return %c0_i32, %c0_i32_0 : i32, i32
  }
  func.func @transform_7(%arg0: i32) -> (i32, i32, i32) {
    %c0_i32 = arith.constant 0 : i32
    %c0_i32_0 = arith.constant 0 : i32
    %c0_i32_1 = arith.constant 0 : i32
    return %arg0, %c0_i32, %c0_i32_0 : i32, i32, i32
  }
}

</mosaic_0001>

<bundles_post_ra>
// kernel: inception3d_forward.1
= control target key start
LH: loop header
LB: loop body
LE: loop exit
PB: predicated region body
PF: predicated region fallthrough
CT: control target
= control target key end

     0   :  { %12 = vsyncpa [#allocation4], 0  ;;  %s17788_s0 = inlined_call_operand.vmem [shape: bf16[8,18,18,30], index: 0, kind: input, shape index: {}]   ;;  %s17789_s1 = inlined_call_operand.vmem [shape: bf16[9,30,32], index: 1, kind: input, shape index: {}]   ;;  %s17790_s2 = inlined_call_operand.vmem [shape: f32[1,32], index: 2, kind: input, shape index: {}]   ;;  %s17791_s3 = inlined_call_operand.vmem [shape: bf16[9,32,64], index: 3, kind: input, shape index: {}]   ;;  %s17792_s4 = inlined_call_operand.vmem [shape: f32[1,64], index: 4, kind: input, shape index: {}]   ;;  %s17793_s5 = inlined_call_operand.vmem [shape: f32[64,6], index: 5, kind: input, shape index: {}]   ;;  %s17794_s6 = inlined_call_operand.vmem [shape: f32[1,6], index: 6, kind: input, shape index: {}]   ;;  %s17795_s7 = inlined_call_operand.hbm [shape: f32[8,1,6], index: 7, kind: output, shape index: {}]  }
   0x1   :  { %14 = vsyncpa [#allocation4 + $0x1], 0  ;;  %s12888_s24 = smov 0   ;;  %s12890_s25 = smov 0  }
   0x2   :  { %s12892_s26 = smov 0   ;;  %s12894_s27 = smov 0  }
   0x3 LB: > { %s12909_s28 = sadd.s32 4294967295, %s12842_s27   ;;  %s10547_s29 = sadd.s32 4294967294, %s12842_s27   ;;  %s12842_s27 = sphi %s12894_s27, %s18138_s27   ;;  %s12838_s26 = sphi %s12892_s26, %s18137_s26   ;;  %s12834_s25 = sphi %s12890_s25, %s18136_s25   ;;  %s12830_s24 = sphi %s12888_s24, %s18135_s24  }
   0x4   : > { %s12913_s30 = sadd.s32 1, %s12842_s27   ;;  %s179_s8 = sadd.s32 1, %s12838_s26 }
   0x5   : > { %s176_s9 = ssub.s32 %s12842_s27, %s12913_s30  ;;  %p189_p0 = scmp.ne.s32.totalorder %s12838_s26, %s12834_s25 }
   0x6   : > { %p177_p1 = scmp.eq.s32.totalorder %s176_s9, 0  ;;  %p190_p2 = scmp.eq.s32.totalorder %s12909_s28, 7 }
   0x7   : > { %p195_p3 = scmp.ne.s32.totalorder %s12834_s25, %s12830_s24  ;;  %p196_p4 = scmp.eq.s32.totalorder %s10547_s29, 7 }
   0x8   : > { %s12924_s10 = scalar_select %p177_p1, %s12838_s26, %s179_s8  }
   0x9   : > { %p12926_p5 = por %p190_p2, %p189_p0  ;;  %p12930_p6 = por %p196_p4, %p195_p3 }
   0xa   : > { %p10550_p7 = scmp.ge.s32.totalorder %s12842_s27, 1  ;;  %p240_p8 = scmp.lt.s32.totalorder %s12842_s27, 9 }
   0xc   : > { %p241_p9 = pnand %p10550_p7, %p240_p8 }
   0xe   : > { %244 = sbr.rel (%p241_p9) target bundleno = 1357 (0x54d), region = 48 }
  0x13   : > { %v12638_v0 = vld [vmem:[%s17789_s1 + $0x18] sm:$0x7f]   ;;  %vm829_vm0 = vcmask 1046528   ;;  %v12640_v1 = vld [vmem:[%s17789_s1 + $0x10] sm:$0xff]   ;;  %v12639_v3 = vld [vmem:[%s17789_s1 + $0x8] sm:$0x7f]  }
  0x14   : > { %12586 = vmatprep.subr.msk.bf16.mxu0 %vm829_vm0, %v12638_v0  ;;  %v831_v2 = vsel %vm829_vm0, %v12638_v0, 0  ;;  %v12641_v4 = vld [vmem:[%s17789_s1] sm:$0xff]   ;;  %12587 = vmatprep.subr.msk.bf16.mxu1 %vm829_vm0, %v12639_v3  ;;  %v1134_v5 = vsel %vm829_vm0, %v12639_v3, 0  ;;  %p271_p10 = scmp.lt.s32.totalorder %s12909_s28, 7  ;;  %vm329_vm1 = vsmask.f32 3328 }
  0x15   : > { %11920 = vmatpush3.bf16.msra.mxu0 %v831_v2  ;;  %11956 = vmatpush3.bf16.msra.mxu1 %v1134_v5  ;;  %v12643_v6 = vld [vmem:[%s17789_s1 + $0x28] sm:$0x7f]   ;;  %v12660_v7 = vld [vmem:[%s17789_s1 + $0x38] sm:$0x7f]   ;;  %vm330_vm2 = vsmask.f32 7440 }
  0x16   : > { %11921 = vmatprep.subr.bf16.mxu0 %v12640_v1  ;;  %11957 = vmatprep.subr.bf16.mxu1 %v12641_v4  ;;  %s272_s21 = scalar_select %p271_p10, %s12909_s28, 7  ;;  %vm780_vm3 = vcmask 244736   ;;  %v12967_v8 = vsel %vm829_vm0, %v12643_v6, 0  ;;  %v1946_v9 = vsel %vm829_vm0, %v12660_v7, 0  ;;  %vm12997_vm4 = vmor %vm329_vm1, %vm330_vm2  ;;  %v17822_v36 = vmov 0  ;;  %v12661_v51 = vld [vmem:[%s17789_s1 + $0x30] sm:$0xff]  }
  0x17   : > { %v17823_v36 = vsel %vm12997_vm4, 4294967295, %v17822_v36  ;;  %vm1345_vm5 = vcmask 1042432   ;;  %vm1346_vm6 = vcmask 1046532   ;;  %vm5017_vm8 = vcmask 257024   ;;  %s269_s19 = sand.u32 1, %s12834_s25   ;;  %s11551_s22 = sshll.u32 %s12909_s28, 4 }
  0x18   : > { %s12595_s29 = smul.u32 216, %s272_s21  ;;  %17824 = vst [vmem:[#allocation6_spill] sm:$0xff] %v17823_v36  ;;  %vm13263_vm7 = vmor %vm1345_vm5, %vm1346_vm6  ;;  %vm5020_vm9 = vcmask 253952   ;;  %vm6095_vm10 = vcmask 261120   ;;  %vm5478_vm11 = vsmask.f32 7938  ;;  %s17753_s13 = scalar_lea.hbm %s17795_s7, %s11551_s22 }
  0x19   : > { %11922 = vmatpush3.bf16.msra.mxu0 %v12640_v1  ;;  %11958 = vmatpush3.bf16.msra.mxu1 %v12641_v4  ;;  %vm5153_vm12 = vsmask.f32 256  ;;  %vm5154_vm13 = vsmask.f32 4368  ;;  %vm15256_vm14 = vmand %vm5017_vm8, %vm5478_vm11  ;;  %vm12846_vm1 = vmmov 0   ;;  %vm10324_vm2 = vcmask 523264  }
  0x1a   : > { %12588 = vmatprep.subr.msk.bf16.mxu0 %vm829_vm0, %v12643_v6  ;;  %s12964_s15 = scalar_lea.vmem %s17788_s0, %s12595_s29  ;;  %12589 = vmatprep.subr.msk.bf16.mxu1 %vm829_vm0, %v12660_v7  ;;  %vm15268_vm15 = vmand %vm5020_vm9, %vm5153_vm12  ;;  %s270_s23 = scalar_lea.vmem [#allocation3], %s269_s19 }
  0x1b   : > { %v277_v10 = vld [vmem:[%s12964_s15] sm:$0xf]  ;;  %v12973_v11 = vld [vmem:[%s12964_s15 + $0x4] sm:$0xf]  ;;  %v12976_v12 = vld [vmem:[%s12964_s15 + $0x8] sm:$0x1] }
  0x1c   : > { %v333_v13 = vshrl.u32 %v277_v10, 16  ;;  %v336_v14 = vshll.u32 %v277_v10, 16  ;;  %v342_v15 = vshll.u32 %v12973_v11, 16  ;;  %v346_v16 = vshrl.u32 %v12973_v11, 16  ;;  %v279_v17 = vld [vmem:[%s12964_s15 + $0xc] sm:$0xf] }
  0x1d   : > { %v352_v18 = vshll.u32 %v12976_v12, 16  ;;  %v1353_v19 = vrot.slane %v12976_v12, 5  ;;  %v10590_v20 = vcombine.low %v277_v10, %v12973_v11  ;;  %v12985_v21 = vld [vmem:[%s12964_s15 + $0x10] sm:$0xf]  ;;  %v12988_v22 = vld [vmem:[%s12964_s15 + $0x14] sm:$0x1] }
  0x1e   : > { %v335_v23 = vrot.slane %v333_v13, 4  ;;  %v338_v24 = vrot.slane %v336_v14, 5  ;;  %v344_v25 = vrot.slane %v342_v15, 5  ;;  %v348_v26 = vrot.slane %v346_v16, 4  ;;  %v281_v35 = vld [vmem:[%s12964_s15 + $0x18] sm:$0xf] }
  0x1f   : > { %v354_v27 = vrot.slane %v352_v18, 5  ;;  %11959 = vmatprep.mubr.msk.bf16.mxu1 %vm780_vm3, %v10590_v20  ;;  %v357_v28 = vshrl.u32 %v279_v17, 16  ;;  %v360_v29 = vshll.u32 %v279_v17, 16  ;;  %v366_v30 = vshll.u32 %v12985_v21, 16  ;;  %v13003_v45 = vld [vmem:[%s12964_s15 + $0x1c] sm:$0xf] }
  0x20   : > { %v339_v31 = vor.u32 %v338_v24, %v335_v23  ;;  %v349_v32 = vor.u32 %v348_v26, %v344_v25  ;;  %v370_v33 = vshrl.u32 %v12985_v21, 16  ;;  %v376_v34 = vshll.u32 %v12988_v22, 16  ;;  %v13008_v49 = vld [vmem:[%s12964_s15 + $0x20] sm:$0x1]  ;;  %v283_v56 = vld [vmem:[%s12964_s15 + $0x24] sm:$0xf] }
  0x21   : > { %v359_v37 = vrot.slane %v357_v28, 4  ;;  %v362_v38 = vrot.slane %v360_v29, 5  ;;  %v368_v39 = vrot.slane %v366_v30, 5  ;;  %v1357_v40 = vrot.slane %v12985_v21, 5  ;;  %v13023_v1 = vld [vmem:[%s12964_s15 + $0x28] sm:$0xf] }
  0x22   : > { %v340_v41 = vrot.slane %v339_v31, 4  ;;  %v350_v42 = vrot.slane %v349_v32, 4  ;;  %v372_v43 = vrot.slane %v370_v33, 4  ;;  %v378_v44 = vrot.slane %v376_v34, 5  ;;  %v13030_v5 = vld [vmem:[%s12964_s15 + $0x2c] sm:$0x1] }
  0x23   : > { %v363_v46 = vor.u32 %v362_v38, %v359_v37  ;;  %v1360_v47 = vrot.slane %v12988_v22, 5  ;;  %v10591_v48 = vcombine.low %v279_v17, %v12985_v21  ;;  %v381_v50 = vshrl.u32 %v281_v35, 16  ;;  %v12652_v20 = vld [vmem:[%s17789_s1 + $0x20] sm:$0xff]   ;;  %v13048_v31 = vld [vmem:[%s12964_s15 + $0x38] sm:$0x1]  ;;  %s10492_s29 = sshll.u32 %s270_s23, 4  ;;  %s10493_s29 = int_to_ptr.vmem [resolvable:$true] %s10492_s29 }
  0x24   : > { %v345_v52 = vsel %vm12997_vm4, %v340_v41, %v344_v25  ;;  %v355_v53 = vsel %vm12997_vm4, %v350_v42, %v354_v27  ;;  %v373_v54 = vor.u32 %v372_v43, %v368_v39  ;;  %v384_v55 = vshll.u32 %v281_v35, 16  ;;  %v13043_v27 = vld [vmem:[%s12964_s15 + $0x34] sm:$0xf]  ;;  %v12664_v22 = vld [vmem:[%s12964_s15 + $0x18] sm:$0xff]   ;;  %s10480_s14 = scalar_lea.sflag [#allocation4], %s269_s19  ;;  %s12847_s28 = smov [#allocation3]  }
  0x25   : > { %v10556_v57 = vcombine.low %v345_v52, %v355_v53  ;;  %v364_v58 = vrot.slane %v363_v46, 4  ;;  %11960 = vmatmul.mubr.msk.bf16.vlgmr.msra.gmra.mxu1 %vm780_vm3, %v10591_v48  ;;  %v383_v59 = vrot.slane %v381_v50, 4  ;;  %v390_v60 = vshll.u32 %v13003_v45, 16  ;;  %v287_v50 = vld [vmem:[%s12964_s15 + $0x3c] sm:$0xf]  ;;  %s12786_s16 = sshll.u32 %s12847_s28, 4  ;;  %s12787_s16 = int_to_ptr.vmem [resolvable:$false] %s12786_s16 }
  0x26   : > { %v374_v61 = vrot.slane %v373_v54, 4  ;;  %v386_v62 = vrot.slane %v384_v55, 5  ;;  %v394_v63 = vshrl.u32 %v13003_v45, 16  ;;  %v400_v0 = vshll.u32 %v13008_v49, 16  ;;  %12028 = vmatpush3.bf16.msra.mxu1 %v1946_v9  ;;  %v285_v9 = vld [vmem:[%s12964_s15 + $0x30] sm:$0xf]  ;;  %p12789_p0 = scmp.lt.s32.totalorder %s10493_s29, %s12787_s16 }
  0x27   : > { %11923 = vmatprep.mubr.msk.bf16.mxu0 %vm780_vm3, %v10556_v57  ;;  %v369_v2 = vsel %vm12997_vm4, %v364_v58, %v368_v39  ;;  %v392_v3 = vrot.slane %v390_v60, 5  ;;  %v10592_v4 = vcombine.low %v281_v35, %v13003_v45  ;;  %v405_v6 = vshrl.u32 %v283_v56, 16  ;;  %12029 = vmatprep.subr.bf16.mxu1 %v12661_v51  ;;  %v13066_v55 = vld [vmem:[%s12964_s15 + $0x40] sm:$0xf]  ;;  %s12788_s17 = scalar_lea.vmem %s12787_s16, 32 }
  0x28   : > { %v379_v7 = vsel %vm12997_vm4, %v374_v61, %v378_v44  ;;  %v387_v10 = vor.u32 %v386_v62, %v383_v59  ;;  %v396_v13 = vrot.slane %v394_v63, 4  ;;  %v402_v14 = vrot.slane %v400_v0, 5  ;;  %v13073_v62 = vld [vmem:[%s12964_s15 + $0x44] sm:$0x1] }
  0x29   : > { %v10557_v15 = vcombine.low %v369_v2, %v379_v7  ;;  %11963 = vmatprep.mubr.msk.bf16.mxu1 %vm780_vm3, %v10592_v4  ;;  %v407_v16 = vrot.slane %v405_v6, 4  ;;  %v408_v17 = vshll.u32 %v283_v56, 16  ;;  %v414_v18 = vshll.u32 %v13023_v1, 16  ;;  %v289_v7 = vld [vmem:[%s12964_s15 + $0x48] sm:$0xf] }
  0x2a   : > { %v388_v23 = vrot.slane %v387_v10, 4  ;;  %v397_v24 = vor.u32 %v396_v13, %v392_v3  ;;  %v418_v25 = vshrl.u32 %v13023_v1, 16  ;;  %v424_v26 = vshll.u32 %v13030_v5, 16  ;;  %12030 = vmatpush3.bf16.msra.mxu1 %v12661_v51 }
  0x2b   : > { %11924 = vmatmul.mubr.msk.bf16.vlgmr.msra.gmra.mxu0 %vm780_vm3, %v10557_v15  ;;  %v410_v28 = vrot.slane %v408_v17, 5  ;;  %v416_v29 = vrot.slane %v414_v18, 5  ;;  %v10593_v30 = vcombine.low %v283_v56, %v13023_v1  ;;  %v429_v32 = vshrl.u32 %v285_v9, 16 }
  0x2c   : > { %11992 = vmatpush3.bf16.msra.mxu0 %v12967_v8  ;;  %v393_v33 = vsel %vm12997_vm4, %v388_v23, %v392_v3  ;;  %v398_v34 = vrot.slane %v397_v24, 4  ;;  %v420_v35 = vrot.slane %v418_v25, 4  ;;  %v426_v37 = vrot.slane %v424_v26, 5  ;;  %v13058_v8 = vld [vmem:[%s17789_s1 + $0x48] sm:$0x7f]  }
  0x2d   : > { %v411_v38 = vor.u32 %v410_v28, %v407_v16  ;;  %11964 = vmatmul.mubr.msk.bf16.gmra.mxu1 %vm780_vm3, %v10593_v30  ;;  %v431_v39 = vrot.slane %v429_v32, 4  ;;  %v432_v41 = vshll.u32 %v285_v9, 16  ;;  %v438_v42 = vshll.u32 %v13043_v27, 16  ;;  %11993 = vmatprep.subr.bf16.mxu0 %v12652_v20  ;;  %v13092_v26 = vld [vmem:[%s12964_s15 + $0x50] sm:$0x1] }
  0x2e   : > { %v403_v43 = vsel %vm12997_vm4, %v398_v34, %v402_v14  ;;  %v421_v44 = vor.u32 %v420_v35, %v416_v29  ;;  %v442_v46 = vshrl.u32 %v13043_v27, 16  ;;  %v448_v48 = vshll.u32 %v13048_v31, 16  ;;  %v291_v34 = vld [vmem:[%s12964_s15 + $0x54] sm:$0xf] }
  0x2f   : > { %v10558_v51 = vcombine.low %v393_v33, %v403_v43  ;;  %v412_v52 = vrot.slane %v411_v38, 4  ;;  %v434_v53 = vrot.slane %v432_v41, 5  ;;  %v440_v54 = vrot.slane %v438_v42, 5 }
  0x30   : > { %v422_v56 = vrot.slane %v421_v44, 4  ;;  %v444_v57 = vrot.slane %v442_v46, 4  ;;  %v450_v58 = vrot.slane %v448_v48, 5  ;;  %v10594_v59 = vcombine.low %v285_v9, %v13043_v27  ;;  %11994 = vmatpush3.bf16.msra.mxu0 %v12652_v20  ;;  %v13085_v20 = vld [vmem:[%s12964_s15 + $0x4c] sm:$0xf] }
  0x31   : > { %11927 = vmatprep.mubr.msk.bf16.mxu0 %vm780_vm3, %v10558_v51  ;;  %v417_v60 = vsel %vm12997_vm4, %v412_v52, %v416_v29  ;;  %v435_v61 = vor.u32 %v434_v53, %v431_v39  ;;  %v453_v63 = vshrl.u32 %v287_v50, 16  ;;  %v456_v0 = vshll.u32 %v287_v50, 16  ;;  %12590 = vmatprep.subr.msk.bf16.mxu0 %vm829_vm0, %v13058_v8  ;;  %v13102_v46 = vld [vmem:[%s12964_s15 + $0x58] sm:$0xf]  ;;  %v13109_v52 = vld [vmem:[%s12964_s15 + $0x5c] sm:$0x1] }
  0x32   : > { %v427_v2 = vsel %vm12997_vm4, %v422_v56, %v426_v37  ;;  %v445_v3 = vor.u32 %v444_v57, %v440_v54  ;;  %11967 = vmatprep.mubr.msk.bf16.mxu1 %vm780_vm3, %v10594_v59  ;;  %v462_v4 = vshll.u32 %v13066_v55, 16  ;;  %v466_v6 = vshrl.u32 %v13066_v55, 16  ;;  %v293_v59 = vld [vmem:[%s12964_s15 + $0x60] sm:$0xf] }
  0x33   : > { %v10559_v10 = vcombine.low %v417_v60, %v427_v2  ;;  %v436_v13 = vrot.slane %v435_v61, 4  ;;  %v455_v14 = vrot.slane %v453_v63, 4  ;;  %v458_v9 = vrot.slane %v456_v0, 5 }
  0x34   : > { %v446_v15 = vrot.slane %v445_v3, 4  ;;  %v464_v16 = vrot.slane %v462_v4, 5  ;;  %v468_v17 = vrot.slane %v466_v6, 4  ;;  %v472_v18 = vshll.u32 %v13073_v62, 16 }
  0x35   : > { %11928 = vmatmul.mubr.msk.bf16.gmra.mxu0 %vm780_vm3, %v10559_v10  ;;  %v441_v23 = vsel %vm12997_vm4, %v436_v13, %v440_v54  ;;  %v459_v24 = vor.u32 %v458_v9, %v455_v14  ;;  %v10595_v25 = vcombine.low %v287_v50, %v13066_v55  ;;  %v477_v28 = vshrl.u32 %v289_v7, 16  ;;  %v13124_v9 = vld [vmem:[%s12964_s15 + $0x68] sm:$0x1] }
  0x36   : > { %v451_v29 = vsel %vm12997_vm4, %v446_v15, %v450_v58  ;;  %v469_v30 = vor.u32 %v468_v17, %v464_v16  ;;  %v474_v32 = vrot.slane %v472_v18, 5  ;;  %v480_v33 = vshll.u32 %v289_v7, 16 }
  0x37   : > { %v10560_v35 = vcombine.low %v441_v23, %v451_v29  ;;  %v460_v37 = vrot.slane %v459_v24, 4  ;;  %11968 = vmatmul.mubr.msk.bf16.gmra.mxu1 %vm780_vm3, %v10595_v25  ;;  %v479_v38 = vrot.slane %v477_v28, 4  ;;  %v486_v39 = vshll.u32 %v13085_v20, 16  ;;  %v295_v24 = vld [vmem:[%s12964_s15 + $0x6c] sm:$0xf] }
  0x38   : > { %v470_v41 = vrot.slane %v469_v30, 4  ;;  %v482_v42 = vrot.slane %v480_v33, 5  ;;  %v490_v43 = vshrl.u32 %v13085_v20, 16  ;;  %v496_v44 = vshll.u32 %v13092_v26, 16 }
  0x39   : > { %11931 = vmatprep.mubr.msk.bf16.mxu0 %vm780_vm3, %v10560_v35  ;;  %v465_v48 = vsel %vm12997_vm4, %v460_v37, %v464_v16  ;;  %v488_v50 = vrot.slane %v486_v39, 5  ;;  %v10596_v51 = vcombine.low %v289_v7, %v13085_v20  ;;  %v501_v53 = vshrl.u32 %v291_v34, 16  ;;  %v13119_v7 = vld [vmem:[%s12964_s15 + $0x64] sm:$0xf] }
  0x3a   : > { %v475_v54 = vsel %vm12997_vm4, %v470_v41, %v474_v32  ;;  %v483_v56 = vor.u32 %v482_v42, %v479_v38  ;;  %v492_v57 = vrot.slane %v490_v43, 4  ;;  %v498_v58 = vrot.slane %v496_v44, 5  ;;  %v13132_v32 = vld [vmem:[%s12964_s15 + $0x70] sm:$0xf]  ;;  %v13139_v43 = vld [vmem:[%s12964_s15 + $0x74] sm:$0x1] }
  0x3b   : > { %v10561_v60 = vcombine.low %v465_v48, %v475_v54  ;;  %11971 = vmatprep.mubr.msk.bf16.mxu1 %vm780_vm3, %v10596_v51  ;;  %v503_v61 = vrot.slane %v501_v53, 4  ;;  %v504_v63 = vshll.u32 %v291_v34, 16  ;;  %v510_v0 = vshll.u32 %v13102_v46, 16  ;;  %v297_v53 = vld [vmem:[%s12964_s15 + $0x78] sm:$0xf] }
  0x3c   : > { %v484_v2 = vrot.slane %v483_v56, 4  ;;  %v493_v3 = vor.u32 %v492_v57, %v488_v50  ;;  %v514_v4 = vshrl.u32 %v13102_v46, 16  ;;  %v520_v6 = vshll.u32 %v13109_v52, 16 }
  0x3d   : > { %11932 = vmatmul.mubr.msk.bf16.gmra.mxu0 %vm780_vm3, %v10561_v60  ;;  %v506_v10 = vrot.slane %v504_v63, 5  ;;  %v512_v13 = vrot.slane %v510_v0, 5  ;;  %v10597_v14 = vcombine.low %v291_v34, %v13102_v46  ;;  %v525_v15 = vshrl.u32 %v293_v59, 16  ;;  %v13152_v0 = vld [vmem:[%s12964_s15 + $0x7c] sm:$0xf] }
  0x3e   : > { %v489_v16 = vsel %vm12997_vm4, %v484_v2, %v488_v50  ;;  %v494_v17 = vrot.slane %v493_v3, 4  ;;  %v516_v18 = vrot.slane %v514_v4, 4  ;;  %v522_v23 = vrot.slane %v520_v6, 5 }
  0x3f   : > { %v507_v25 = vor.u32 %v506_v10, %v503_v61  ;;  %11972 = vmatmul.mubr.msk.bf16.gmra.mxu1 %vm780_vm3, %v10597_v14  ;;  %v527_v28 = vrot.slane %v525_v15, 4  ;;  %v528_v29 = vshll.u32 %v293_v59, 16  ;;  %v534_v30 = vshll.u32 %v13119_v7, 16  ;;  %v13155_v10 = vld [vmem:[%s12964_s15 + $0x80] sm:$0x1] }
  0x40   : > { %v499_v33 = vsel %vm12997_vm4, %v494_v17, %v498_v58  ;;  %v517_v34 = vor.u32 %v516_v18, %v512_v13  ;;  %v538_v35 = vshrl.u32 %v13119_v7, 16  ;;  %v544_v37 = vshll.u32 %v13124_v9, 16  ;;  %v299_v17 = vld [vmem:[%s12964_s15 + $0x84] sm:$0xf] }
  0x41   : > { %v10562_v38 = vcombine.low %v489_v16, %v499_v33  ;;  %v508_v39 = vrot.slane %v507_v25, 4  ;;  %v530_v41 = vrot.slane %v528_v29, 5  ;;  %v536_v42 = vrot.slane %v534_v30, 5 }
  0x42   : > { %v518_v44 = vrot.slane %v517_v34, 4  ;;  %v540_v48 = vrot.slane %v538_v35, 4  ;;  %v546_v50 = vrot.slane %v544_v37, 5  ;;  %v10598_v51 = vcombine.low %v293_v59, %v13119_v7  ;;  %v13166_v35 = vld [vmem:[%s12964_s15 + $0x88] sm:$0xf] }
  0x43   : > { %11935 = vmatprep.mubr.msk.bf16.mxu0 %vm780_vm3, %v10562_v38  ;;  %v513_v54 = vsel %vm12997_vm4, %v508_v39, %v512_v13  ;;  %v531_v56 = vor.u32 %v530_v41, %v527_v28  ;;  %v549_v57 = vshrl.u32 %v295_v24, 16  ;;  %v552_v58 = vshll.u32 %v295_v24, 16 }
  0x44   : > { %v523_v60 = vsel %vm12997_vm4, %v518_v44, %v522_v23  ;;  %v541_v61 = vor.u32 %v540_v48, %v536_v42  ;;  %11975 = vmatprep.mubr.msk.bf16.mxu1 %vm780_vm3, %v10598_v51  ;;  %v558_v63 = vshll.u32 %v13132_v32, 16  ;;  %v562_v59 = vshrl.u32 %v13132_v32, 16  ;;  %v301_v51 = vld [vmem:[%s12964_s15 + $0x90] sm:$0xf] }
  0x45   : > { %v10563_v2 = vcombine.low %v513_v54, %v523_v60  ;;  %v532_v3 = vrot.slane %v531_v56, 4  ;;  %v551_v4 = vrot.slane %v549_v57, 4  ;;  %v554_v6 = vrot.slane %v552_v58, 5 }
  0x46   : > { %v542_v13 = vrot.slane %v541_v61, 4  ;;  %v560_v14 = vrot.slane %v558_v63, 5  ;;  %v564_v15 = vrot.slane %v562_v59, 4  ;;  %v568_v16 = vshll.u32 %v13139_v43, 16 }
  0x47   : > { %11936 = vmatmul.mubr.msk.bf16.gmra.mxu0 %vm780_vm3, %v10563_v2  ;;  %v537_v18 = vsel %vm12997_vm4, %v532_v3, %v536_v42  ;;  %v555_v23 = vor.u32 %v554_v6, %v551_v4  ;;  %v10599_v25 = vcombine.low %v295_v24, %v13132_v32  ;;  %v573_v28 = vshrl.u32 %v297_v53, 16  ;;  %v13171_v42 = vld [vmem:[%s12964_s15 + $0x8c] sm:$0x1]  ;;  %v13183_v2 = vld [vmem:[%s12964_s15 + $0x94] sm:$0xf] }
  0x48   : > { %v547_v29 = vsel %vm12997_vm4, %v542_v13, %v546_v50  ;;  %v565_v30 = vor.u32 %v564_v15, %v560_v14  ;;  %v570_v33 = vrot.slane %v568_v16, 5  ;;  %v576_v34 = vshll.u32 %v297_v53, 16 }
  0x49   : > { %v10564_v37 = vcombine.low %v537_v18, %v547_v29  ;;  %v556_v38 = vrot.slane %v555_v23, 4  ;;  %11976 = vmatmul.mubr.msk.bf16.gmra.mxu1 %vm780_vm3, %v10599_v25  ;;  %v575_v39 = vrot.slane %v573_v28, 4  ;;  %v582_v41 = vshll.u32 %v13152_v0, 16 }
  0x4a   : > { %v566_v24 = vrot.slane %v565_v30, 4  ;;  %v578_v44 = vrot.slane %v576_v34, 5  ;;  %v586_v48 = vshrl.u32 %v13152_v0, 16  ;;  %v592_v50 = vshll.u32 %v13155_v10, 16 }
  0x4b   : > { %11939 = vmatprep.mubr.msk.bf16.mxu0 %vm780_vm3, %v10564_v37  ;;  %v561_v54 = vsel %vm12997_vm4, %v556_v38, %v560_v14  ;;  %v584_v56 = vrot.slane %v582_v41, 5  ;;  %v10600_v57 = vcombine.low %v297_v53, %v13152_v0  ;;  %v597_v58 = vshrl.u32 %v299_v17, 16  ;;  %v13188_v14 = vld [vmem:[%s12964_s15 + $0x98] sm:$0x1]  ;;  %v303_v38 = vld [vmem:[%s12964_s15 + $0x9c] sm:$0xf] }
  0x4c   : > { %v571_v60 = vsel %vm12997_vm4, %v566_v24, %v570_v33  ;;  %v579_v61 = vor.u32 %v578_v44, %v575_v39  ;;  %v588_v63 = vrot.slane %v586_v48, 4  ;;  %v594_v59 = vrot.slane %v592_v50, 5  ;;  %v13200_v48 = vld [vmem:[%s12964_s15 + $0xa0] sm:$0xf] }
  0x4d   : > { %v10565_v3 = vcombine.low %v561_v54, %v571_v60  ;;  %11979 = vmatprep.mubr.msk.bf16.mxu1 %vm780_vm3, %v10600_v57  ;;  %v599_v4 = vrot.slane %v597_v58, 4  ;;  %v600_v6 = vshll.u32 %v299_v17, 16  ;;  %v606_v13 = vshll.u32 %v13166_v35, 16 }
  0x4e   : > { %v580_v53 = vrot.slane %v579_v61, 4  ;;  %v589_v15 = vor.u32 %v588_v63, %v584_v56  ;;  %v610_v16 = vshrl.u32 %v13166_v35, 16  ;;  %v616_v18 = vshll.u32 %v13171_v42, 16 }
  0x4f   : > { %11940 = vmatmul.mubr.msk.bf16.gmra.mxu0 %vm780_vm3, %v10565_v3  ;;  %v602_v23 = vrot.slane %v600_v6, 5  ;;  %v608_v25 = vrot.slane %v606_v13, 5  ;;  %v10601_v28 = vcombine.low %v299_v17, %v13166_v35  ;;  %v621_v29 = vshrl.u32 %v301_v51, 16  ;;  %v13208_v13 = vld [vmem:[%s12964_s15 + $0xa4] sm:$0x1] }
  0x50   : > { %v585_v30 = vsel %vm12997_vm4, %v580_v53, %v584_v56  ;;  %v590_v33 = vrot.slane %v589_v15, 4  ;;  %v612_v34 = vrot.slane %v610_v16, 4  ;;  %v618_v37 = vrot.slane %v616_v18, 5  ;;  %v305_v18 = vld [vmem:[%s12964_s15 + $0xa8] sm:$0xf] }
  0x51   : > { %v603_v39 = vor.u32 %v602_v23, %v599_v4  ;;  %11980 = vmatmul.mubr.msk.bf16.gmra.mxu1 %vm780_vm3, %v10601_v28  ;;  %v623_v41 = vrot.slane %v621_v29, 4  ;;  %v624_v24 = vshll.u32 %v301_v51, 16  ;;  %v630_v44 = vshll.u32 %v13183_v2, 16 }
  0x52   : > { %v595_v17 = vsel %vm12997_vm4, %v590_v33, %v594_v59  ;;  %v613_v50 = vor.u32 %v612_v34, %v608_v25  ;;  %v634_v54 = vshrl.u32 %v13183_v2, 16  ;;  %v640_v56 = vshll.u32 %v13188_v14, 16 }
  0x53   : > { %v10566_v57 = vcombine.low %v585_v30, %v595_v17  ;;  %v604_v58 = vrot.slane %v603_v39, 4  ;;  %v626_v60 = vrot.slane %v624_v24, 5  ;;  %v632_v61 = vrot.slane %v630_v44, 5  ;;  %v13220_v30 = vld [vmem:[%s12964_s15 + $0xac] sm:$0xf] }
  0x54   : > { %v614_v63 = vrot.slane %v613_v50, 4  ;;  %v636_v3 = vrot.slane %v634_v54, 4  ;;  %v642_v4 = vrot.slane %v640_v56, 5  ;;  %v10602_v6 = vcombine.low %v301_v51, %v13183_v2  ;;  %v13224_v17 = vld [vmem:[%s12964_s15 + $0xb0] sm:$0x1] }
  0x55   : > { %11943 = vmatprep.mubr.msk.bf16.mxu0 %vm780_vm3, %v10566_v57  ;;  %v609_v59 = vsel %vm12997_vm4, %v604_v58, %v608_v25  ;;  %v627_v53 = vor.u32 %v626_v60, %v623_v41  ;;  %v645_v15 = vshrl.u32 %v303_v38, 16  ;;  %v648_v16 = vshll.u32 %v303_v38, 16  ;;  %v307_v58 = vld [vmem:[%s12964_s15 + $0xb4] sm:$0xf] }
  0x56   : > { %v619_v23 = vsel %vm12997_vm4, %v614_v63, %v618_v37  ;;  %v637_v28 = vor.u32 %v636_v3, %v632_v61  ;;  %11983 = vmatprep.mubr.msk.bf16.mxu1 %vm780_vm3, %v10602_v6  ;;  %v654_v51 = vshll.u32 %v13200_v48, 16  ;;  %v658_v29 = vshrl.u32 %v13200_v48, 16 }
  0x57   : > { %v10567_v33 = vcombine.low %v609_v59, %v619_v23  ;;  %v628_v25 = vrot.slane %v627_v53, 4  ;;  %v647_v34 = vrot.slane %v645_v15, 4  ;;  %v650_v39 = vrot.slane %v648_v16, 5  ;;  %v13234_v59 = vld [vmem:[%s12964_s15 + $0xb8] sm:$0xf] }
  0x58   : > { %v638_v41 = vrot.slane %v637_v28, 4  ;;  %v656_v37 = vrot.slane %v654_v51, 5  ;;  %v660_v24 = vrot.slane %v658_v29, 4  ;;  %v664_v44 = vshll.u32 %v13208_v13, 16  ;;  %v13241_v51 = vld [vmem:[%s12964_s15 + $0xbc] sm:$0x1] }
  0x59   : > { %11944 = vmatmul.mubr.msk.bf16.gmra.mxu0 %vm780_vm3, %v10567_v33  ;;  %v633_v50 = vsel %vm12997_vm4, %v628_v25, %v632_v61  ;;  %v651_v54 = vor.u32 %v650_v39, %v647_v34  ;;  %v10603_v56 = vcombine.low %v303_v38, %v13200_v48  ;;  %v669_v57 = vshrl.u32 %v305_v18, 16  ;;  %v1297_v39 = vld [vmem:[%s12964_s15] sm:$0xe] }
  0x5a   : > { %v643_v60 = vsel %vm12997_vm4, %v638_v41, %v642_v4  ;;  %v661_v63 = vor.u32 %v660_v24, %v656_v37  ;;  %v666_v3 = vrot.slane %v664_v44, 5  ;;  %v672_v6 = vshll.u32 %v305_v18, 16 }
  0x5b   : > { %v10568_v53 = vcombine.low %v633_v50, %v643_v60  ;;  %v652_v15 = vrot.slane %v651_v54, 4  ;;  %11984 = vmatmul.mubr.msk.bf16.gmra.mxu1 %vm780_vm3, %v10603_v56  ;;  %v671_v61 = vrot.slane %v669_v57, 4  ;;  %v678_v16 = vshll.u32 %v13220_v30, 16  ;;  %v1298_v54 = vld [vmem:[%s12964_s15 + $0xc] sm:$0xe] }
  0x5c   : > { %v662_v38 = vrot.slane %v661_v63, 4  ;;  %v674_v23 = vrot.slane %v672_v6, 5  ;;  %v682_v28 = vshrl.u32 %v13220_v30, 16  ;;  %v688_v4 = vshll.u32 %v13224_v17, 16  ;;  %v1299_v63 = vld [vmem:[%s12964_s15 + $0x18] sm:$0xe] }
  0x5d   : > { %11947 = vmatprep.mubr.msk.bf16.mxu0 %vm780_vm3, %v10568_v53  ;;  %v657_v29 = vsel %vm12997_vm4, %v652_v15, %v656_v37  ;;  %v680_v33 = vrot.slane %v678_v16, 5  ;;  %v10604_v25 = vcombine.low %v305_v18, %v13220_v30  ;;  %v693_v34 = vshrl.u32 %v307_v58, 16  ;;  %v12663_v16 = vld [vmem:[%s12964_s15 + $0xc] sm:$0xff]  }
  0x5e   : > { %v667_v41 = vsel %vm12997_vm4, %v662_v38, %v666_v3  ;;  %v675_v24 = vor.u32 %v674_v23, %v671_v61  ;;  %v684_v44 = vrot.slane %v682_v28, 4  ;;  %v690_v50 = vrot.slane %v688_v4, 5 }
  0x5f   : > { %v10569_v56 = vcombine.low %v657_v29, %v667_v41  ;;  %11987 = vmatprep.mubr.msk.bf16.mxu1 %vm780_vm3, %v10604_v25  ;;  %v695_v57 = vrot.slane %v693_v34, 4  ;;  %v696_v60 = vshll.u32 %v307_v58, 16  ;;  %v702_v37 = vshll.u32 %v13234_v59, 16  ;;  %v13270_v41 = vld [vmem:[%s17789_s1 + $0x58] sm:$0x7f]  }
  0x60   : > { %v676_v6 = vrot.slane %v675_v24, 4  ;;  %v685_v18 = vor.u32 %v684_v44, %v680_v33  ;;  %v706_v53 = vshrl.u32 %v13234_v59, 16  ;;  %v712_v15 = vshll.u32 %v13241_v51, 16  ;;  %12591 = vmatprep.subr.msk.bf16.mxu1 %vm829_vm0, %v13270_v41 }
  0x61   : > { %11948 = vmatmul.mubr.msk.bf16.gmra.mxu0 %vm780_vm3, %v10569_v56  ;;  %v698_v3 = vrot.slane %v696_v60, 5  ;;  %v704_v61 = vrot.slane %v702_v37, 5  ;;  %v10605_v38 = vcombine.low %v307_v58, %v13234_v59  ;;  %v10624_v23 = vrot.slane %v1297_v39, 9 }
  0x62   : > { %v681_v28 = vsel %vm12997_vm4, %v676_v6, %v680_v33  ;;  %v686_v4 = vrot.slane %v685_v18, 4  ;;  %v708_v29 = vrot.slane %v706_v53, 4  ;;  %v714_v25 = vrot.slane %v712_v15, 5 }
  0x63   : > { %v17825_v34 = vmov 0  ;;  %v699_v58 = vor.u32 %v698_v3, %v695_v57  ;;  %11988 = vmatmul.mubr.msk.bf16.gmra.mxu1 %vm780_vm3, %v10605_v38  ;;  %v1350_v33 = vrot.slane %v12973_v11, 5  ;;  %v10625_v39 = vrot.slane %v1298_v54, 9  ;;  %v12665_v38 = vld [vmem:[%s12964_s15 + $0x24] sm:$0xff]  }
  0x64   : > { %v17826_v34 = vsel %vm13263_vm7, 4294967295, %v17825_v34  ;;  %v1359_v24 = vrot.slane %v1357_v40, 4  ;;  %v691_v44 = vsel %vm12997_vm4, %v686_v4, %v690_v50  ;;  %v709_v56 = vor.u32 %v708_v29, %v704_v61  ;;  %12031 = vmatprep.mubr.msk.bf16.mxu1 %vm780_vm3, %v12663_v16  ;;  %v1300_v50 = vld [vmem:[%s12964_s15 + $0x24] sm:$0xe] }
  0x65   : > { %17827 = vst [vmem:[#allocation7_spill] sm:$0xff] %v17826_v34  ;;  %v13280_v60 = vsel %vm829_vm0, %v13058_v8, 0  ;;  %v10626_v57 = vrot.slane %v1299_v63, 9  ;;  %v10570_v11 = vcombine.low %v681_v28, %v691_v44  ;;  %v700_v54 = vrot.slane %v699_v58, 4 }
  0x66   : > { %v1351_v37 = vsel %vm13263_vm7, %v10624_v23, %v1350_v33  ;;  %v1352_v6 = vrot.slane %v1350_v33, 4  ;;  %v710_v18 = vrot.slane %v709_v56, 4  ;;  %v13292_v8 = vsel %vm13263_vm7, %v10625_v39, %v1357_v40  ;;  %v1302_v23 = vld [vmem:[%s12964_s15 + $0x3c] sm:$0xe]  ;;  %v1303_v39 = vld [vmem:[%s12964_s15 + $0x48] sm:$0xe] }
  0x67   : > { %v13298_v63 = vsel %vm13263_vm7, %v1359_v24, %v1360_v47  ;;  %v1364_v53 = vrot.slane %v13003_v45, 5  ;;  %11951 = vmatprep.mubr.msk.bf16.mxu0 %vm780_vm3, %v10570_v11  ;;  %v705_v15 = vsel %vm12997_vm4, %v700_v54, %v704_v61  ;;  %v1367_v16 = vrot.slane %v13008_v49, 5  ;;  %v1301_v47 = vld [vmem:[%s12964_s15 + $0x30] sm:$0xe]  ;;  %v1304_v11 = vld [vmem:[%s12964_s15 + $0x54] sm:$0xe] }
  0x68   : > { %v1354_v21 = vsel %vm13263_vm7, %v1352_v6, %v1353_v19  ;;  %v10645_v40 = vcombine.low %v13292_v8, %v13298_v63  ;;  %v715_v45 = vsel %vm12997_vm4, %v710_v18, %v714_v25  ;;  %v10627_v28 = vrot.slane %v1300_v50, 9  ;;  %v1305_v18 = vld [vmem:[%s12964_s15 + $0x60] sm:$0xe] }
  0x69   : > { %v10644_v3 = vcombine.low %v1351_v37, %v1354_v21  ;;  %v13317_v61 = vsel %vm13263_vm7, %v10626_v57, %v1364_v53  ;;  %v1366_v12 = vrot.slane %v1364_v53, 4  ;;  %v10571_v19 = vcombine.low %v705_v15, %v715_v45  ;;  %v12666_v53 = vld [vmem:[%s12964_s15 + $0x30] sm:$0xff]  }
  0x6a   : > { %v1371_v4 = vrot.slane %v13023_v1, 5  ;;  %v1374_v29 = vrot.slane %v13030_v5, 5  ;;  %v10628_v58 = vrot.slane %v1301_v47, 9  ;;  %v1378_v25 = vrot.slane %v13043_v27, 5 }
  0x6b   : > { %v1368_v49 = vsel %vm13263_vm7, %v1366_v12, %v1367_v16  ;;  %v1381_v33 = vrot.slane %v13048_v31, 5  ;;  %11952 = vmatmul.mubr.msk.bf16.gmra.mxu0 %vm780_vm3, %v10571_v19  ;;  %12032 = vmatmul.mubr.msk.bf16.vlgmr.msra.gmra.mxu1 %vm780_vm3, %v12664_v22  ;;  %v10629_v44 = vrot.slane %v1302_v23, 9  ;;  %v1385_v56 = vrot.slane %v13066_v55, 5  ;;  %v1306_v22 = vld [vmem:[%s12964_s15 + $0x6c] sm:$0xe]  ;;  %v12667_v12 = vld [vmem:[%s12964_s15 + $0x3c] sm:$0xff]  }
  0x6c   : > { %v10646_v24 = vcombine.low %v13317_v61, %v1368_v49  ;;  %v13333_v1 = vsel %vm13263_vm7, %v10627_v28, %v1371_v4  ;;  %v1373_v5 = vrot.slane %v1371_v4, 4  ;;  %11995 = vmatprep.mubr.msk.bf16.mxu0 %vm780_vm3, %v10644_v3  ;;  %12035 = vmatprep.mubr.msk.bf16.mxu1 %vm780_vm3, %v12665_v38  ;;  %v13339_v27 = vsel %vm13263_vm7, %v10628_v58, %v1378_v25  ;;  %v1307_v28 = vld [vmem:[%s12964_s15 + $0x78] sm:$0xe] }
  0x6d   : > { %v1380_v31 = vrot.slane %v1378_v25, 4  ;;  %v1388_v57 = vrot.slane %v13073_v62, 5  ;;  %v10630_v37 = vrot.slane %v1303_v39, 9  ;;  %v1392_v6 = vrot.slane %v13085_v20, 5 }
  0x6e   : > { %v13346_v54 = vsel %vm13263_vm7, %v1373_v5, %v1374_v29  ;;  %v1395_v50 = vrot.slane %v13092_v26, 5  ;;  %v13359_v62 = vsel %vm13263_vm7, %v10629_v44, %v1385_v56  ;;  %v1387_v63 = vrot.slane %v1385_v56, 4 }
  0x6f   : > { %v10647_v8 = vcombine.low %v13333_v1, %v13346_v54  ;;  %v13355_v55 = vsel %vm13263_vm7, %v1380_v31, %v1381_v33  ;;  %v13366_v26 = vsel %vm13263_vm7, %v10630_v37, %v1392_v6  ;;  %v1394_v15 = vrot.slane %v1392_v6, 4  ;;  %v1308_v33 = vld [vmem:[%s12964_s15 + $0x84] sm:$0xe]  ;;  %v1309_v31 = vld [vmem:[%s12964_s15 + $0x90] sm:$0xe]  ;;  %v12668_v6 = vld [vmem:[%s12964_s15 + $0x48] sm:$0xff]  }
  0x70   : > { %v10648_v20 = vcombine.low %v13339_v27, %v13355_v55  ;;  %v10631_v21 = vrot.slane %v1304_v11, 9  ;;  %v13371_v16 = vsel %vm13263_vm7, %v1387_v63, %v1388_v57  ;;  %v1399_v47 = vrot.slane %v13102_v46, 5  ;;  %v12671_v46 = vld [vmem:[%s17789_s1 + $0x40] sm:$0xff]   ;;  %v1310_v37 = vld [vmem:[%s12964_s15 + $0x9c] sm:$0xe]  ;;  %v12681_v27 = vld [vmem:[%s17789_s1 + $0x50] sm:$0xff]  }
  0x71   : > { %v1402_v45 = vrot.slane %v13109_v52, 5  ;;  %v10632_v3 = vrot.slane %v1305_v18, 9  ;;  %v10649_v61 = vcombine.low %v13359_v62, %v13371_v16  ;;  %v13380_v38 = vsel %vm13263_vm7, %v1394_v15, %v1395_v50  ;;  %v12669_v15 = vld [vmem:[%s12964_s15 + $0x54] sm:$0xff]   ;;  %v10748_v54 = vld [vmem:[%s12964_s15 + $0xc] sm:$0xf] }
  0x72   : > { %v1406_v23 = vrot.slane %v13119_v7, 5  ;;  %v1409_v19 = vrot.slane %v13124_v9, 5  ;;  %v10650_v52 = vcombine.low %v13366_v26, %v13380_v38  ;;  %v13392_v4 = vsel %vm13263_vm7, %v10631_v21, %v1399_v47 }
  0x73   : > { %v1401_v29 = vrot.slane %v1399_v47, 4  ;;  %v10633_v49 = vrot.slane %v1306_v22, 9  ;;  %11996 = vmatmul.mubr.msk.bf16.vlgmr.msra.gmra.mxu0 %vm780_vm3, %v10645_v40  ;;  %12036 = vmatmul.mubr.msk.bf16.gmra.mxu1 %vm780_vm3, %v12666_v53  ;;  %v1413_v58 = vrot.slane %v13132_v32, 5  ;;  %v1416_v25 = vrot.slane %v13139_v43, 5 }
  0x74   : > { %v13398_v7 = vsel %vm13263_vm7, %v10632_v3, %v1406_v23  ;;  %v1408_v9 = vrot.slane %v1406_v23, 4  ;;  %12064 = vmatpush3.bf16.msra.mxu0 %v13280_v60  ;;  %11999 = vmatprep.mubr.msk.bf16.mxu0 %vm780_vm3, %v10646_v24  ;;  %v10634_v40 = vrot.slane %v1307_v28, 9  ;;  %v1420_v5 = vrot.slane %v13152_v0, 5  ;;  %v13426_v0 = vld [vmem:[%s17789_s1 + $0x68] sm:$0x7f]  }
  0x75   : > { %v13407_v39 = vsel %vm13263_vm7, %v1401_v29, %v1402_v45  ;;  %v1423_v44 = vrot.slane %v13155_v10, 5  ;;  %12039 = vmatprep.mubr.msk.bf16.mxu1 %vm780_vm3, %v12667_v12  ;;  %12065 = vmatprep.subr.bf16.mxu0 %v12671_v46  ;;  %v13421_v60 = vsel %vm13263_vm7, %v10633_v49, %v1413_v58  ;;  %v1415_v24 = vrot.slane %v1413_v58, 4  ;;  %v1311_v3 = vld [vmem:[%s12964_s15 + $0xa8] sm:$0xe]  ;;  %v1312_v28 = vld [vmem:[%s12964_s15 + $0xb4] sm:$0xe] }
  0x76   : > { %v10651_v32 = vcombine.low %v13392_v4, %v13407_v39  ;;  %v13417_v43 = vsel %vm13263_vm7, %v1408_v9, %v1409_v19  ;;  %v13432_v56 = vsel %vm13263_vm7, %v10634_v40, %v1420_v5  ;;  %v1422_v57 = vrot.slane %v1420_v5, 4  ;;  %v13500_v58 = vld [vmem:[%s12964_s15 + $0x10] sm:$0xf] }
  0x77   : > { %v10652_v10 = vcombine.low %v13398_v7, %v13417_v43  ;;  %v10635_v11 = vrot.slane %v1308_v33, 9  ;;  %v13438_v50 = vsel %vm13263_vm7, %v1415_v24, %v1416_v25  ;;  %v1427_v18 = vrot.slane %v13166_v35, 5 }
  0x78   : > { %v1430_v63 = vrot.slane %v13171_v42, 5  ;;  %v10636_v53 = vrot.slane %v1309_v31, 9  ;;  %v10653_v21 = vcombine.low %v13421_v60, %v13438_v50  ;;  %12066 = vmatpush3.bf16.msra.mxu0 %v12671_v46  ;;  %v13447_v22 = vsel %vm13263_vm7, %v1422_v57, %v1423_v44  ;;  %v13511_v44 = vld [vmem:[%s12964_s15 + $0x14] sm:$0x1]  ;;  %v12670_v31 = vld [vmem:[%s12964_s15 + $0x60] sm:$0xff]  }
  0x79   : > { %v1434_v47 = vrot.slane %v13183_v2, 5  ;;  %v1437_v45 = vrot.slane %v13188_v14, 5  ;;  %v10654_v35 = vcombine.low %v13432_v56, %v13447_v22  ;;  %v13456_v42 = vsel %vm13263_vm7, %v10635_v11, %v1427_v18  ;;  %12592 = vmatprep.subr.msk.bf16.mxu0 %vm829_vm0, %v13426_v0 }
  0x7a   : > { %v1429_v12 = vrot.slane %v1427_v18, 4  ;;  %v10637_v23 = vrot.slane %v1310_v37, 9  ;;  %v1441_v14 = vrot.slane %v13200_v48, 5  ;;  %v1444_v46 = vrot.slane %v13208_v13, 5  ;;  %v10751_v37 = vld [vmem:[%s12964_s15 + $0x18] sm:$0xf] }
  0x7b   : > { %v13462_v19 = vsel %vm13263_vm7, %v10636_v53, %v1434_v47  ;;  %v1436_v2 = vrot.slane %v1434_v47, 4  ;;  %12000 = vmatmul.mubr.msk.bf16.gmra.mxu0 %vm780_vm3, %v10647_v8  ;;  %12040 = vmatmul.mubr.msk.bf16.gmra.mxu1 %vm780_vm3, %v12668_v6  ;;  %v10638_v49 = vrot.slane %v1311_v3, 9  ;;  %v1448_v9 = vrot.slane %v13220_v30, 5  ;;  %v12672_v6 = vld [vmem:[%s12964_s15 + $0x6c] sm:$0xff]  }
  0x7c   : > { %v13474_v29 = vsel %vm13263_vm7, %v1429_v12, %v1430_v63  ;;  %12003 = vmatprep.mubr.msk.bf16.mxu0 %vm780_vm3, %v10648_v20  ;;  %12043 = vmatprep.mubr.msk.bf16.mxu1 %vm780_vm3, %v12669_v15  ;;  %v13490_v1 = vsel %vm13263_vm7, %v10637_v23, %v1441_v14  ;;  %v1443_v30 = vrot.slane %v1441_v14, 4  ;;  %v1451_v55 = vrot.slane %v13224_v17, 5  ;;  %v13535_v23 = vld [vmem:[%s12964_s15 + $0x20] sm:$0x1] }
  0x7d   : > { %v10655_v48 = vcombine.low %v13456_v42, %v13474_v29  ;;  %v13486_v13 = vsel %vm13263_vm7, %v1436_v2, %v1437_v45  ;;  %v10639_v20 = vrot.slane %v1312_v28, 9  ;;  %v1455_v33 = vrot.slane %v13234_v59, 5  ;;  %v10752_v45 = vld [vmem:[%s12964_s15 + $0x1c] sm:$0xf] }
  0x7e   : > { %v10656_v8 = vcombine.low %v13462_v19, %v13486_v13  ;;  %v13504_v25 = vsel %vm13263_vm7, %v1443_v30, %v1444_v46  ;;  %v1458_v40 = vrot.slane %v13241_v51, 5  ;;  %v3170_v5 = vsel %vm829_vm0, %v13270_v41, 0  ;;  %v10834_v30 = vld [vmem:[%s12964_s15 + $0xc] sm:$0xe] }
  0x7f   : > { %v10657_v17 = vcombine.low %v13490_v1, %v13504_v25  ;;  %v1450_v24 = vrot.slane %v1448_v9, 4  ;;  %12100 = vmatpush3.bf16.msra.mxu1 %v3170_v5  ;;  %v2190_v57 = vshrl.u32 %v10748_v54, 16  ;;  %v2193_v11 = vshll.u32 %v10748_v54, 16  ;;  %v10835_v5 = vld [vmem:[%s12964_s15 + $0x18] sm:$0xe] }
  0x80   : > { %v13520_v59 = vsel %vm13263_vm7, %v10638_v49, %v1448_v9  ;;  %v13524_v51 = vsel %vm13263_vm7, %v10639_v20, %v1455_v33  ;;  %v1457_v41 = vrot.slane %v1455_v33, 4  ;;  %12101 = vmatprep.subr.bf16.mxu1 %v12681_v27  ;;  %v2199_v18 = vshll.u32 %v13500_v58, 16 }
  0x81   : > { %v2192_v63 = vrot.slane %v2190_v57, 4  ;;  %v2195_v53 = vrot.slane %v2193_v11, 5  ;;  %v2203_v15 = vshrl.u32 %v13500_v58, 16  ;;  %v2209_v47 = vshll.u32 %v13511_v44, 16 }
  0x82   : > { %v13532_v3 = vsel %vm13263_vm7, %v1457_v41, %v1458_v40  ;;  %v2201_v12 = vrot.slane %v2199_v18, 5  ;;  %v2214_v2 = vshrl.u32 %v10751_v37, 16  ;;  %v2217_v14 = vshll.u32 %v10751_v37, 16 }
  0x83   : > { %12004 = vmatmul.mubr.msk.bf16.gmra.mxu0 %vm780_vm3, %v10649_v61  ;;  %12044 = vmatmul.mubr.msk.bf16.gmra.mxu1 %vm780_vm3, %v12670_v31  ;;  %v13544_v46 = vsel %vm13263_vm7, %v1450_v24, %v1451_v55  ;;  %v10659_v28 = vcombine.low %v13524_v51, %v13532_v3  ;;  %v2196_v49 = vor.u32 %v2195_v53, %v2192_v63  ;;  %v2205_v9 = vrot.slane %v2203_v15, 4  ;;  %v12673_v24 = vld [vmem:[%s12964_s15 + $0x78] sm:$0xff]   ;;  %v10754_v15 = vld [vmem:[%s12964_s15 + $0x24] sm:$0xf] }
  0x84   : > { %12007 = vmatprep.mubr.msk.bf16.mxu0 %vm780_vm3, %v10650_v52  ;;  %12047 = vmatprep.mubr.msk.bf16.mxu1 %vm780_vm3, %v12672_v6  ;;  %v2216_v62 = vrot.slane %v2214_v2, 4  ;;  %v2219_v16 = vrot.slane %v2217_v14, 5  ;;  %v2223_v61 = vshll.u32 %v10752_v45, 16  ;;  %v2227_v54 = vshrl.u32 %v10752_v45, 16  ;;  %v12674_v6 = vld [vmem:[%s12964_s15 + $0x84] sm:$0xff]  }
  0x85   : > { %v2197_v55 = vrot.slane %v2196_v49, 4  ;;  %v2206_v20 = vor.u32 %v2205_v9, %v2201_v12  ;;  %v2211_v33 = vrot.slane %v2209_v47, 5  ;;  %12102 = vmatpush3.bf16.msra.mxu1 %v12681_v27  ;;  %v2233_v40 = vshll.u32 %v13535_v23, 16  ;;  %v13575_v49 = vld [vmem:[%s12964_s15 + $0x28] sm:$0xf] }
  0x86   : > { %v2220_v31 = vor.u32 %v2219_v16, %v2216_v62  ;;  %v13556_v26 = vrot.slane %v2223_v61, 5  ;;  %v2229_v38 = vrot.slane %v2227_v54, 4  ;;  %v10850_v52 = vrot.slane %v10834_v30, 9  ;;  %v13600_v16 = vld [vmem:[%s12964_s15 + $0x2c] sm:$0x1] }
  0x87   : > { %v10658_v57 = vcombine.low %v13520_v59, %v13544_v46  ;;  %v2202_v11 = vsel %vm12997_vm4, %v2197_v55, %v2201_v12  ;;  %v2207_v37 = vrot.slane %v2206_v20, 4  ;;  %v2947_v27 = vrot.slane %v13500_v58, 5  ;;  %v10757_v54 = vld [vmem:[%s12964_s15 + $0x30] sm:$0xf]  ;;  %v13618_v55 = vld [vmem:[%s12964_s15 + $0x34] sm:$0xf] }
  0x88   : > { %v13565_v41 = vrot.slane %v2220_v31, 4  ;;  %v2230_v18 = vor.u32 %v2229_v38, %v13556_v26  ;;  %v2950_v63 = vrot.slane %v13511_v44, 5  ;;  %v10851_v53 = vrot.slane %v10835_v5, 9 }
  0x89   : > { %v2212_v47 = vsel %vm12997_vm4, %v2207_v37, %v2211_v33  ;;  %v13572_v2 = vrot.slane %v2233_v40, 5  ;;  %v2949_v14 = vrot.slane %v2947_v27, 4  ;;  %v2954_v12 = vrot.slane %v10752_v45, 5  ;;  %v13628_v33 = vld [vmem:[%s12964_s15 + $0x38] sm:$0x1]  ;;  %v12675_v40 = vld [vmem:[%s12964_s15 + $0x90] sm:$0xff]  }
  0x8a   : > { %v13577_v58 = vrot.slane %v2230_v18, 4  ;;  %v13581_v9 = vsel %vm829_vm0, %v13426_v0, 0  ;;  %v13585_v44 = vsel %vm13263_vm7, %v10850_v52, %v2947_v27  ;;  %v2957_v30 = vrot.slane %v13535_v23, 5  ;;  %v10836_v27 = vld [vmem:[%s12964_s15 + $0x24] sm:$0xe] }
  0x8b   : > { %12008 = vmatmul.mubr.msk.bf16.gmra.mxu0 %vm780_vm3, %v10651_v32  ;;  %12048 = vmatmul.mubr.msk.bf16.gmra.mxu1 %vm780_vm3, %v12673_v24  ;;  %v13593_v45 = vcombine.low %v2202_v11, %v2212_v47  ;;  %v13597_v0 = vsel %vm13263_vm7, %v2949_v14, %v2950_v63  ;;  %v2956_v62 = vrot.slane %v2954_v12, 4  ;;  %v2238_v61 = vshrl.u32 %v10754_v15, 16 }
  0x8c   : > { %12011 = vmatprep.mubr.msk.bf16.mxu0 %vm780_vm3, %v10652_v10  ;;  %12051 = vmatprep.mubr.msk.bf16.mxu1 %vm780_vm3, %v12674_v6  ;;  %v2226_v4 = vsel %vm12997_vm4, %v13565_v41, %v13556_v26  ;;  %v13613_v39 = vsel %vm13263_vm7, %v10851_v53, %v2954_v12  ;;  %v2241_v32 = vshll.u32 %v10754_v15, 16  ;;  %v2247_v23 = vshll.u32 %v13575_v49, 16  ;;  %v12676_v6 = vld [vmem:[%s12964_s15 + $0x9c] sm:$0xff]   ;;  %v10837_v12 = vld [vmem:[%s12964_s15 + $0x30] sm:$0xe] }
  0x8d   : > { %v2236_v7 = vsel %vm12997_vm4, %v13577_v58, %v13572_v2  ;;  %v10870_v43 = vcombine.low %v13585_v44, %v13597_v0  ;;  %v2240_v10 = vrot.slane %v2238_v61, 4  ;;  %v2251_v20 = vshrl.u32 %v13575_v49, 16 }
  0x8e   : > { %v13633_v5 = vsel %vm13263_vm7, %v2956_v62, %v2957_v30  ;;  %v2243_v31 = vrot.slane %v2241_v32, 5  ;;  %v2249_v26 = vrot.slane %v2247_v23, 5  ;;  %v2257_v38 = vshll.u32 %v13600_v16, 16  ;;  %v10760_v32 = vld [vmem:[%s12964_s15 + $0x3c] sm:$0xf] }
  0x8f   : > { %v2253_v52 = vrot.slane %v2251_v20, 4  ;;  %v2262_v24 = vshrl.u32 %v10757_v54, 16  ;;  %v2265_v11 = vshll.u32 %v10757_v54, 16  ;;  %v2271_v37 = vshll.u32 %v13618_v55, 16 }
  0x90   : > { %v2244_v41 = vor.u32 %v2243_v31, %v2240_v10  ;;  %v2259_v18 = vrot.slane %v2257_v38, 5  ;;  %v2275_v63 = vshrl.u32 %v13618_v55, 16  ;;  %v2281_v53 = vshll.u32 %v13628_v33, 16  ;;  %v13651_v31 = vld [vmem:[%s12964_s15 + $0x40] sm:$0xf] }
  0x91   : > { %v2254_v15 = vor.u32 %v2253_v52, %v2249_v26  ;;  %v2264_v47 = vrot.slane %v2262_v24, 4  ;;  %v2267_v2 = vrot.slane %v2265_v11, 5  ;;  %v2273_v14 = vrot.slane %v2271_v37, 5  ;;  %v12678_v52 = vld [vmem:[%s12964_s15 + $0xb4] sm:$0xff]  }
  0x92   : > { %v2245_v58 = vrot.slane %v2244_v41, 4  ;;  %v2277_v30 = vrot.slane %v2275_v63, 4  ;;  %v2283_v62 = vrot.slane %v2281_v53, 5  ;;  %v10852_v61 = vrot.slane %v10836_v27, 9 }
  0x93   : > { %12012 = vmatmul.mubr.msk.bf16.gmra.mxu0 %vm780_vm3, %v10653_v21  ;;  %12052 = vmatmul.mubr.msk.bf16.gmra.mxu1 %vm780_vm3, %v12675_v40  ;;  %v2255_v23 = vrot.slane %v2254_v15, 4  ;;  %v2268_v54 = vor.u32 %v2267_v2, %v2264_v47  ;;  %v2961_v10 = vrot.slane %v13575_v49, 5  ;;  %v2964_v20 = vrot.slane %v13600_v16, 5  ;;  %v13664_v16 = vld [vmem:[%s17789_s1 + $0x78] sm:$0x7f]   ;;  %v12677_v40 = vld [vmem:[%s12964_s15 + $0xa8] sm:$0xff]  }
  0x94   : > { %12015 = vmatprep.mubr.msk.bf16.mxu0 %vm780_vm3, %v10654_v35  ;;  %12055 = vmatprep.mubr.msk.bf16.mxu1 %vm780_vm3, %v12676_v6  ;;  %v2250_v60 = vsel %vm12997_vm4, %v2245_v58, %v2249_v26  ;;  %v2278_v50 = vor.u32 %v2277_v30, %v2273_v14  ;;  %v10853_v21 = vrot.slane %v10837_v12, 9  ;;  %v2968_v49 = vrot.slane %v13618_v55, 5  ;;  %v13672_v26 = vld [vmem:[%s12964_s15 + $0x44] sm:$0x1]  ;;  %v13707_v30 = vld [vmem:[%s12964_s15 + $0x50] sm:$0x1] }
  0x95   : > { %v13667_v38 = vcombine.low %v2226_v4, %v2236_v7  ;;  %v2260_v56 = vsel %vm12997_vm4, %v2255_v23, %v2259_v18  ;;  %v2269_v22 = vrot.slane %v2268_v54, 4  ;;  %v2963_v35 = vrot.slane %v2961_v10, 4  ;;  %v10763_v4 = vld [vmem:[%s12964_s15 + $0x48] sm:$0xf]  ;;  %12593 = vmatprep.subr.msk.bf16.mxu1 %vm829_vm0, %v13664_v16  ;;  %v13693_v18 = vld [vmem:[%s12964_s15 + $0x4c] sm:$0xf] }
  0x96   : > { %v10871_v55 = vcombine.low %v13613_v39, %v13633_v5  ;;  %v13677_v24 = vcombine.low %v2250_v60, %v2260_v56  ;;  %v2279_v11 = vrot.slane %v2278_v50, 4  ;;  %v13681_v37 = vsel %vm13263_vm7, %v10852_v61, %v2961_v10  ;;  %v10838_v60 = vld [vmem:[%s12964_s15 + $0x3c] sm:$0xe] }
  0x97   : > { %v2274_v7 = vsel %vm12997_vm4, %v2269_v22, %v2273_v14  ;;  %v13690_v27 = vsel %vm13263_vm7, %v2963_v35, %v2964_v20  ;;  %v2970_v6 = vrot.slane %v2968_v49, 4  ;;  %v2286_v41 = vshrl.u32 %v10760_v32, 16  ;;  %v10839_v22 = vld [vmem:[%s12964_s15 + $0x48] sm:$0xe] }
  0x98   : > { %v2284_v63 = vsel %vm12997_vm4, %v2279_v11, %v2283_v62  ;;  %v13699_v53 = vsel %vm13263_vm7, %v10853_v21, %v2968_v49  ;;  %v2289_v15 = vshll.u32 %v10760_v32, 16  ;;  %v2295_v47 = vshll.u32 %v13651_v31, 16  ;;  %v12679_v11 = vld [vmem:[%s12964_s15 + $0xc0] sm:$0xff]  }
  0x99   : > { %v10872_v2 = vcombine.low %v13681_v37, %v13690_v27  ;;  %v2971_v14 = vrot.slane %v13628_v33, 5  ;;  %v2288_v12 = vrot.slane %v2286_v41, 4  ;;  %v2299_v58 = vshrl.u32 %v13651_v31, 16 }
  0x9a   : > { %v13709_v61 = vcombine.low %v2274_v7, %v2284_v63  ;;  %v2291_v62 = vrot.slane %v2289_v15, 5  ;;  %v2297_v23 = vrot.slane %v2295_v47, 5  ;;  %v2305_v54 = vshll.u32 %v13672_v26, 16 }
  0x9b   : > { %12016 = vmatmul.mubr.msk.bf16.gmra.mxu0 %vm780_vm3, %v10655_v48  ;;  %12056 = vmatmul.mubr.msk.bf16.gmra.mxu1 %vm780_vm3, %v12677_v40  ;;  %v2301_v33 = vrot.slane %v2299_v58, 4  ;;  %v2310_v32 = vshrl.u32 %v10763_v4, 16  ;;  %v2313_v10 = vshll.u32 %v10763_v4, 16  ;;  %v2319_v20 = vshll.u32 %v13693_v18, 16 }
  0x9c   : > { %12019 = vmatprep.mubr.msk.bf16.mxu0 %vm780_vm3, %v10656_v8  ;;  %12059 = vmatprep.mubr.msk.bf16.mxu1 %vm780_vm3, %v12678_v52  ;;  %v2292_v42 = vor.u32 %v2291_v62, %v2288_v12  ;;  %v2307_v29 = vrot.slane %v2305_v54, 5  ;;  %v2323_v48 = vshrl.u32 %v13693_v18, 16  ;;  %v2329_v50 = vshll.u32 %v13707_v30, 16  ;;  %v10766_v52 = vld [vmem:[%s12964_s15 + $0x54] sm:$0xf] }
  0x9d   : > { %v2302_v21 = vor.u32 %v2301_v33, %v2297_v23  ;;  %v2312_v49 = vrot.slane %v2310_v32, 4  ;;  %v2315_v40 = vrot.slane %v2313_v10, 5  ;;  %v13726_v56 = vrot.slane %v2319_v20, 5  ;;  %v13748_v54 = vld [vmem:[%s12964_s15 + $0x58] sm:$0xf] }
  0x9e   : > { %v13731_v19 = vsel %vm13263_vm7, %v2970_v6, %v2971_v14  ;;  %v2293_v13 = vrot.slane %v2292_v42, 4  ;;  %v2325_v8 = vrot.slane %v2323_v48, 4  ;;  %v10854_v35 = vrot.slane %v10838_v60, 9  ;;  %v13757_v32 = vld [vmem:[%s12964_s15 + $0x5c] sm:$0x1] }
  0x9f   : > { %v2303_v4 = vrot.slane %v2302_v21, 4  ;;  %v2316_v7 = vor.u32 %v2315_v40, %v2312_v49  ;;  %v2975_v41 = vrot.slane %v13651_v31, 5  ;;  %v2978_v63 = vrot.slane %v13672_v26, 5  ;;  %v10769_v10 = vld [vmem:[%s12964_s15 + $0x60] sm:$0xf] }
  0xa0   : > { %v2298_v15 = vsel %vm12997_vm4, %v2293_v13, %v2297_v23  ;;  %v2326_v6 = vor.u32 %v2325_v8, %v13726_v56  ;;  %v10855_v47 = vrot.slane %v10839_v22, 9  ;;  %v2982_v14 = vrot.slane %v13693_v18, 5  ;;  %v13773_v48 = vld [vmem:[%s12964_s15 + $0x64] sm:$0xf]  ;;  %v10840_v8 = vld [vmem:[%s12964_s15 + $0x54] sm:$0xe] }
  0xa1   : > { %v2308_v12 = vsel %vm12997_vm4, %v2303_v4, %v2307_v29  ;;  %v13743_v58 = vrot.slane %v2316_v7, 4  ;;  %v13745_v62 = vrot.slane %v2329_v50, 5  ;;  %v2977_v31 = vrot.slane %v2975_v41, 4  ;;  %v13776_v50 = vld [vmem:[%s12964_s15 + $0x68] sm:$0x1] }
  0xa2   : > { %v10873_v26 = vcombine.low %v13699_v53, %v13731_v19  ;;  %v2327_v23 = vrot.slane %v2326_v6, 4  ;;  %v13754_v33 = vsel %vm13263_vm7, %v10854_v35, %v2975_v41  ;;  %v2984_v18 = vrot.slane %v2982_v14, 4  ;;  %v10841_v6 = vld [vmem:[%s12964_s15 + $0x60] sm:$0xe] }
  0xa3   : > { %12020 = vmatmul.mubr.msk.bf16.gmra.mxu0 %vm780_vm3, %v10657_v17  ;;  %12060 = vmatmul.mubr.msk.bf16.gmra.mxu1 %vm780_vm3, %v12679_v11  ;;  %v13765_v20 = vcombine.low %v2298_v15, %v2308_v12  ;;  %v13769_v60 = vsel %vm13263_vm7, %v2977_v31, %v2978_v63  ;;  %v2985_v42 = vrot.slane %v13707_v30, 5  ;;  %v2334_v29 = vshrl.u32 %v10766_v52, 16 }
  0xa4   : > { %12023 = vmatprep.mubr.msk.bf16.mxu0 %vm780_vm3, %v10658_v57  ;;  %12103 = vmatprep.mubr.msk.bf16.mxu1 %vm780_vm3, %v10870_v43  ;;  %v2322_v1 = vsel %vm12997_vm4, %v13743_v58, %v13726_v56  ;;  %v13792_v25 = vsel %vm13263_vm7, %v10855_v47, %v2982_v14  ;;  %v2337_v17 = vshll.u32 %v10766_v52, 16  ;;  %v2343_v59 = vshll.u32 %v13748_v54, 16 }
  0xa5   : > { %v2332_v46 = vsel %vm12997_vm4, %v2327_v23, %v13745_v62  ;;  %v10874_v57 = vcombine.low %v13754_v33, %v13769_v60  ;;  %v2336_v44 = vrot.slane %v2334_v29, 4  ;;  %v2347_v0 = vshrl.u32 %v13748_v54, 16  ;;  %v10772_v62 = vld [vmem:[%s12964_s15 + $0x6c] sm:$0xf]  ;;  %v13847_v29 = vld [vmem:[%s12964_s15 + $0x74] sm:$0x1] }
  0xa6   : > { %v13803_v43 = vsel %vm13263_vm7, %v2984_v18, %v2985_v42  ;;  %v2339_v30 = vrot.slane %v2337_v17, 5  ;;  %v2345_v21 = vrot.slane %v2343_v59, 5  ;;  %v2353_v49 = vshll.u32 %v13757_v32, 16  ;;  %v13823_v42 = vld [vmem:[%s12964_s15 + $0x70] sm:$0xf] }
  0xa7   : > { %v2349_v40 = vrot.slane %v2347_v0, 4  ;;  %v2358_v56 = vshrl.u32 %v10769_v10, 16  ;;  %v2361_v22 = vshll.u32 %v10769_v10, 16  ;;  %v2367_v13 = vshll.u32 %v13773_v48, 16 }
  0xa8   : > { %v2340_v35 = vor.u32 %v2339_v30, %v2336_v44  ;;  %v2355_v52 = vrot.slane %v2353_v49, 5  ;;  %v2371_v11 = vshrl.u32 %v13773_v48, 16  ;;  %v2377_v4 = vshll.u32 %v13776_v50, 16  ;;  %v13857_v44 = vld [vmem:[%s12964_s15 + $0x7c] sm:$0xf] }
  0xa9   : > { %v2350_v7 = vor.u32 %v2349_v40, %v2345_v21  ;;  %v2360_v41 = vrot.slane %v2358_v56, 4  ;;  %v2363_v63 = vrot.slane %v2361_v22, 5  ;;  %v2369_v15 = vrot.slane %v2367_v13, 5  ;;  %v12683_v40 = vld [vmem:[%s17789_s1 + $0x60] sm:$0xff]  }
  0xaa   : > { %v2341_v47 = vrot.slane %v2340_v35, 4  ;;  %v2373_v14 = vrot.slane %v2371_v11, 4  ;;  %v2379_v12 = vrot.slane %v2377_v4, 5  ;;  %v10856_v58 = vrot.slane %v10840_v8, 9  ;;  %v13867_v56 = vld [vmem:[%s12964_s15 + $0x80] sm:$0x1] }
  0xab   : > { %12024 = vmatmul.mubr.msk.bf16.gmra.mxu0 %vm780_vm3, %v10659_v28  ;;  %12104 = vmatmul.mubr.msk.bf16.vlgmr.msra.gmra.mxu1 %vm780_vm3, %v10871_v55  ;;  %v2351_v31 = vrot.slane %v2350_v7, 4  ;;  %v2364_v23 = vor.u32 %v2363_v63, %v2360_v41  ;;  %v2989_v18 = vrot.slane %v13748_v54, 5  ;;  %v2992_v10 = vrot.slane %v13757_v32, 5 }
  0xac   : > { %12067 = vmatprep.mubr.msk.bf16.mxu0 %vm780_vm3, %v13593_v45  ;;  %12107 = vmatprep.mubr.msk.bf16.mxu1 %vm780_vm3, %v10872_v2  ;;  %v2346_v51 = vsel %vm12997_vm4, %v2341_v47, %v2345_v21  ;;  %v2374_v3 = vor.u32 %v2373_v14, %v2369_v15  ;;  %v10857_v28 = vrot.slane %v10841_v6, 9  ;;  %v2996_v39 = vrot.slane %v13773_v48, 5  ;;  %v13890_v47 = vld [vmem:[%s17789_s1 + $0x88] sm:$0x7f]  }
  0xad   : > { %v13834_v5 = vcombine.low %v2322_v1, %v2332_v46  ;;  %v2356_v55 = vsel %vm12997_vm4, %v2351_v31, %v2355_v52  ;;  %v2365_v45 = vrot.slane %v2364_v23, 4  ;;  %v2991_v54 = vrot.slane %v2989_v18, 4  ;;  %v10775_v46 = vld [vmem:[%s12964_s15 + $0x78] sm:$0xf] }
  0xae   : > { %v10875_v37 = vcombine.low %v13792_v25, %v13803_v43  ;;  %v13840_v27 = vcombine.low %v2346_v51, %v2356_v55  ;;  %v2375_v2 = vrot.slane %v2374_v3, 4  ;;  %v13844_v32 = vsel %vm13263_vm7, %v10856_v58, %v2989_v18  ;;  %v10843_v18 = vld [vmem:[%s12964_s15 + $0x78] sm:$0xe]  ;;  %v10778_v55 = vld [vmem:[%s12964_s15 + $0x84] sm:$0xf] }
  0xaf   : > { %v2370_v48 = vsel %vm12997_vm4, %v2365_v45, %v2369_v15  ;;  %v13853_v1 = vsel %vm13263_vm7, %v2991_v54, %v2992_v10  ;;  %v2998_v17 = vrot.slane %v2996_v39, 4  ;;  %v2382_v59 = vshrl.u32 %v10772_v62, 16  ;;  %v13913_v45 = vld [vmem:[%s12964_s15 + $0x88] sm:$0xf] }
  0xb0   : > { %v2380_v0 = vsel %vm12997_vm4, %v2375_v2, %v2379_v12  ;;  %v2999_v30 = vrot.slane %v13776_v50, 5  ;;  %v2385_v21 = vshll.u32 %v10772_v62, 16  ;;  %v2391_v49 = vshll.u32 %v13823_v42, 16  ;;  %v10842_v50 = vld [vmem:[%s12964_s15 + $0x6c] sm:$0xe] }
  0xb1   : > { %v10876_v22 = vcombine.low %v13844_v32, %v13853_v1  ;;  %v13873_v13 = vsel %vm13263_vm7, %v10857_v28, %v2996_v39  ;;  %v2384_v8 = vrot.slane %v2382_v59, 4  ;;  %v2395_v35 = vshrl.u32 %v13823_v42, 16 }
  0xb2   : > { %v13877_v52 = vcombine.low %v2370_v48, %v2380_v0  ;;  %v2387_v11 = vrot.slane %v2385_v21, 5  ;;  %v2393_v4 = vrot.slane %v2391_v49, 5  ;;  %v2401_v7 = vshll.u32 %v13847_v29, 16  ;;  %v13918_v48 = vld [vmem:[%s12964_s15 + $0x8c] sm:$0x1] }
  0xb3   : > { %12068 = vmatmul.mubr.msk.bf16.vlgmr.msra.gmra.mxu0 %vm780_vm3, %v13667_v38  ;;  %12108 = vmatmul.mubr.msk.bf16.gmra.mxu1 %vm780_vm3, %v10873_v26  ;;  %v2397_v41 = vrot.slane %v2395_v35, 4  ;;  %v2406_v63 = vshrl.u32 %v10775_v46, 16  ;;  %v2409_v15 = vshll.u32 %v10775_v46, 16  ;;  %v2415_v6 = vshll.u32 %v13857_v44, 16  ;;  %v10781_v46 = vld [vmem:[%s12964_s15 + $0x90] sm:$0xf] }
  0xb4   : > { %12136 = vmatpush3.bf16.msra.mxu0 %v13581_v9  ;;  %12071 = vmatprep.mubr.msk.bf16.mxu0 %vm780_vm3, %v13677_v24  ;;  %v2388_v38 = vor.u32 %v2387_v11, %v2384_v8  ;;  %v2403_v53 = vrot.slane %v2401_v7, 5  ;;  %v2419_v19 = vshrl.u32 %v13857_v44, 16  ;;  %v2425_v26 = vshll.u32 %v13867_v56, 16  ;;  %v10782_v49 = vld [vmem:[%s12964_s15 + $0x94] sm:$0xf] }
  0xb5   : > { %12111 = vmatprep.mubr.msk.bf16.mxu1 %vm780_vm3, %v10874_v57  ;;  %v2398_v14 = vor.u32 %v2397_v41, %v2393_v4  ;;  %12137 = vmatprep.subr.bf16.mxu0 %v12683_v40  ;;  %v2408_v12 = vrot.slane %v2406_v63, 4  ;;  %v2411_v58 = vrot.slane %v2409_v15, 5  ;;  %v2417_v9 = vrot.slane %v2415_v6, 5  ;;  %v10783_v11 = vld [vmem:[%s12964_s15 + $0x98] sm:$0x1] }
  0xb6   : > { %v13903_v24 = vsel %vm13263_vm7, %v2998_v17, %v2999_v30  ;;  %v2389_v62 = vrot.slane %v2388_v38, 4  ;;  %v2421_v31 = vrot.slane %v2419_v19, 4  ;;  %v10858_v23 = vrot.slane %v10842_v50, 9  ;;  %v10844_v15 = vld [vmem:[%s12964_s15 + $0x84] sm:$0xe] }
  0xb7   : > { %v2399_v10 = vrot.slane %v2398_v14, 4  ;;  %v2412_v33 = vor.u32 %v2411_v58, %v2408_v12  ;;  %v3003_v60 = vrot.slane %v13823_v42, 5  ;;  %v3006_v57 = vrot.slane %v13847_v29, 5 }
  0xb8   : > { %v2394_v51 = vsel %vm12997_vm4, %v2389_v62, %v2393_v4  ;;  %v2422_v3 = vor.u32 %v2421_v31, %v2417_v9  ;;  %v2427_v28 = vrot.slane %v2425_v26, 5  ;;  %12138 = vmatpush3.bf16.msra.mxu0 %v12683_v40  ;;  %v3010_v39 = vrot.slane %v13857_v44, 5  ;;  %v10845_v26 = vld [vmem:[%s12964_s15 + $0x90] sm:$0xe] }
  0xb9   : > { %v2404_v54 = vsel %vm12997_vm4, %v2399_v10, %v2403_v53  ;;  %v2413_v2 = vrot.slane %v2412_v33, 4  ;;  %v3005_v32 = vrot.slane %v3003_v60, 4  ;;  %v10859_v42 = vrot.slane %v10843_v18, 9  ;;  %12594 = vmatprep.subr.msk.bf16.mxu0 %vm829_vm0, %v13890_v47 }
  0xba   : > { %v10877_v29 = vcombine.low %v13873_v13, %v13903_v24  ;;  %v13924_v1 = vcombine.low %v2394_v51, %v2404_v54  ;;  %v2423_v17 = vrot.slane %v2422_v3, 4  ;;  %v3004_v59 = vsel %vm13263_vm7, %v10858_v23, %v3003_v60  ;;  %v10785_v54 = vld [vmem:[%s12964_s15 + $0xa0] sm:$0xf] }
  0xbb   : > { %12072 = vmatmul.mubr.msk.bf16.gmra.mxu0 %vm780_vm3, %v13709_v61  ;;  %12112 = vmatmul.mubr.msk.bf16.gmra.mxu1 %vm780_vm3, %v10875_v37  ;;  %v2418_v44 = vsel %vm12997_vm4, %v2413_v2, %v2417_v9  ;;  %v3007_v0 = vsel %vm13263_vm7, %v3005_v32, %v3006_v57  ;;  %v3012_v30 = vrot.slane %v3010_v39, 4  ;;  %v2430_v21 = vshrl.u32 %v10778_v55, 16  ;;  %v13982_v2 = vld [vmem:[%s12964_s15 + $0xa4] sm:$0x1] }
  0xbc   : > { %12075 = vmatprep.mubr.msk.bf16.mxu0 %vm780_vm3, %v13765_v20  ;;  %12115 = vmatprep.mubr.msk.bf16.mxu1 %vm780_vm3, %v10876_v22  ;;  %v2428_v61 = vsel %vm12997_vm4, %v2423_v17, %v2427_v28  ;;  %v3013_v25 = vrot.slane %v13867_v56, 5  ;;  %v2433_v43 = vshll.u32 %v10778_v55, 16  ;;  %v2439_v37 = vshll.u32 %v13913_v45, 16  ;;  %v10784_v28 = vld [vmem:[%s12964_s15 + $0x9c] sm:$0xf] }
  0xbd   : > { %v10878_v40 = vcombine.low %v3004_v59, %v3007_v0  ;;  %v13949_v13 = vsel %vm13263_vm7, %v10859_v42, %v3010_v39  ;;  %v2432_v8 = vrot.slane %v2430_v21, 4  ;;  %v2443_v20 = vshrl.u32 %v13913_v45, 16  ;;  %v10787_v17 = vld [vmem:[%s12964_s15 + $0xa8] sm:$0xf]  ;;  %v13987_v59 = vld [vmem:[%s12964_s15 + $0xac] sm:$0xf] }
  0xbe   : > { %v13952_v22 = vcombine.low %v2418_v44, %v2428_v61  ;;  %v2435_v35 = vrot.slane %v2433_v43, 5  ;;  %v2441_v50 = vrot.slane %v2439_v37, 5  ;;  %v2449_v56 = vshll.u32 %v13918_v48, 16 }
  0xbf   : > { %v2445_v4 = vrot.slane %v2443_v20, 4  ;;  %v2454_v7 = vshrl.u32 %v10781_v46, 16  ;;  %v2457_v41 = vshll.u32 %v10781_v46, 16  ;;  %v2463_v63 = vshll.u32 %v10782_v49, 16 }
  0xc0   : > { %v3014_v6 = vsel %vm13263_vm7, %v3012_v30, %v3013_v25  ;;  %v2436_v38 = vor.u32 %v2435_v35, %v2432_v8  ;;  %v2451_v53 = vrot.slane %v2449_v56, 5  ;;  %v2467_v19 = vshrl.u32 %v10782_v49, 16  ;;  %v10789_v56 = vld [vmem:[%s12964_s15 + $0xb0] sm:$0x1] }
  0xc1   : > { %v2446_v14 = vor.u32 %v2445_v4, %v2441_v50  ;;  %v2456_v12 = vrot.slane %v2454_v7, 4  ;;  %v2459_v58 = vrot.slane %v2457_v41, 5  ;;  %v13960_v9 = vrot.slane %v2463_v63, 5  ;;  %v10846_v63 = vld [vmem:[%s12964_s15 + $0x9c] sm:$0xe] }
  0xc2   : > { %v2437_v24 = vrot.slane %v2436_v38, 4  ;;  %v2469_v62 = vrot.slane %v2467_v19, 4  ;;  %v2473_v31 = vshll.u32 %v10783_v11, 16  ;;  %v10860_v23 = vrot.slane %v10844_v15, 9 }
  0xc3   : > { %12076 = vmatmul.mubr.msk.bf16.gmra.mxu0 %vm780_vm3, %v13834_v5  ;;  %12116 = vmatmul.mubr.msk.bf16.gmra.mxu1 %vm780_vm3, %v10877_v29  ;;  %v2447_v18 = vrot.slane %v2446_v14, 4  ;;  %v2460_v10 = vor.u32 %v2459_v58, %v2456_v12  ;;  %v3017_v33 = vrot.slane %v13913_v45, 5  ;;  %v3020_v60 = vrot.slane %v13918_v48, 5  ;;  %v10847_v12 = vld [vmem:[%s12964_s15 + $0xa8] sm:$0xe] }
  0xc4   : > { %12079 = vmatprep.mubr.msk.bf16.mxu0 %vm780_vm3, %v13840_v27  ;;  %12119 = vmatprep.mubr.msk.bf16.mxu1 %vm780_vm3, %v10878_v40  ;;  %v2442_v57 = vsel %vm12997_vm4, %v2437_v24, %v2441_v50  ;;  %v2470_v5 = vor.u32 %v2469_v62, %v13960_v9  ;;  %v10861_v51 = vrot.slane %v10845_v26, 9  ;;  %v3024_v3 = vrot.slane %v10782_v49, 5 }
  0xc5   : > { %v2452_v39 = vsel %vm12997_vm4, %v2447_v18, %v2451_v53  ;;  %v13976_v55 = vrot.slane %v2460_v10, 4  ;;  %v3018_v27 = vsel %vm13263_vm7, %v10860_v23, %v3017_v33  ;;  %v3019_v45 = vrot.slane %v3017_v33, 4 }
  0xc6   : > { %v10879_v32 = vcombine.low %v13949_v13, %v3014_v6  ;;  %v2471_v42 = vrot.slane %v2470_v5, 4  ;;  %v2475_v48 = vrot.slane %v2473_v31, 5  ;;  %v3026_v29 = vrot.slane %v3024_v3, 4  ;;  %v10790_v5 = vld [vmem:[%s12964_s15 + $0xb4] sm:$0xf] }
  0xc7   : > { %v13989_v46 = vcombine.low %v2442_v57, %v2452_v39  ;;  %v3021_v44 = vsel %vm13263_vm7, %v3019_v45, %v3020_v60  ;;  %v3027_v0 = vrot.slane %v10783_v11, 5  ;;  %v2478_v30 = vshrl.u32 %v10784_v28, 16 }
  0xc8   : > { %v10880_v21 = vcombine.low %v3018_v27, %v3021_v44  ;;  %v3025_v61 = vsel %vm13263_vm7, %v10861_v51, %v3024_v3  ;;  %v2481_v25 = vshll.u32 %v10784_v28, 16  ;;  %v2487_v43 = vshll.u32 %v10785_v54, 16  ;;  %v10794_v44 = vld [vmem:[%s12964_s15 + $0xc4] sm:$0xf] }
  0xc9   : > { %v2466_v37 = vsel %vm12997_vm4, %v13976_v55, %v13960_v9  ;;  %v3028_v49 = vsel %vm13263_vm7, %v3026_v29, %v3027_v0  ;;  %v2480_v40 = vrot.slane %v2478_v30, 4  ;;  %v2491_v13 = vshrl.u32 %v10785_v54, 16  ;;  %v14030_v55 = vld [vmem:[%s12964_s15 + $0xb8] sm:$0xf] }
  0xca   : > { %v2476_v8 = vsel %vm12997_vm4, %v2471_v42, %v2475_v48  ;;  %v2483_v20 = vrot.slane %v2481_v25, 5  ;;  %v2489_v35 = vrot.slane %v2487_v43, 5  ;;  %v2497_v50 = vshll.u32 %v13982_v2, 16  ;;  %v10793_v42 = vld [vmem:[%s12964_s15 + $0xc0] sm:$0xf] }
  0xcb   : > { %12080 = vmatmul.mubr.msk.bf16.gmra.mxu0 %vm780_vm3, %v13877_v52  ;;  %12120 = vmatmul.mubr.msk.bf16.gmra.mxu1 %vm780_vm3, %v10879_v32  ;;  %v2493_v11 = vrot.slane %v2491_v13, 4  ;;  %v2502_v4 = vshrl.u32 %v10787_v17, 16  ;;  %v2505_v7 = vshll.u32 %v10787_v17, 16  ;;  %v2511_v41 = vshll.u32 %v13987_v59, 16  ;;  %v14035_v32 = vld [vmem:[%s12964_s15 + $0xbc] sm:$0x1] }
  0xcc   : > { %12083 = vmatprep.mubr.msk.bf16.mxu0 %vm780_vm3, %v13924_v1  ;;  %12123 = vmatprep.mubr.msk.bf16.mxu1 %vm780_vm3, %v10880_v21  ;;  %v10881_v15 = vcombine.low %v3025_v61, %v3028_v49  ;;  %v2484_v6 = vor.u32 %v2483_v20, %v2480_v40  ;;  %v2499_v38 = vrot.slane %v2497_v50, 5  ;;  %v2515_v53 = vshrl.u32 %v13987_v59, 16  ;;  %v10795_v49 = vld [vmem:[%s12964_s15 + $0xc8] sm:$0x1]  ;;  %v10848_v40 = vld [vmem:[%s12964_s15 + $0xb4] sm:$0xe] }
  0xcd   : > { %v2494_v52 = vor.u32 %v2493_v11, %v2489_v35  ;;  %v2504_v19 = vrot.slane %v2502_v4, 4  ;;  %v2507_v26 = vrot.slane %v2505_v7, 5  ;;  %v14014_v14 = vrot.slane %v2511_v41, 5 }
  0xce   : > { %v2485_v58 = vrot.slane %v2484_v6, 4  ;;  %v2517_v9 = vrot.slane %v2515_v53, 4  ;;  %v2521_v24 = vshll.u32 %v10789_v56, 16  ;;  %v10862_v62 = vrot.slane %v10846_v63, 9 }
  0xcf   : > { %v2495_v1 = vrot.slane %v2494_v52, 4  ;;  %v2508_v31 = vor.u32 %v2507_v26, %v2504_v19  ;;  %v3031_v23 = vrot.slane %v10785_v54, 5  ;;  %v3034_v18 = vrot.slane %v13982_v2, 5 }
  0xd0   : > { %v2490_v10 = vsel %vm12997_vm4, %v2485_v58, %v2489_v35  ;;  %v2518_v33 = vor.u32 %v2517_v9, %v14014_v14  ;;  %v10863_v60 = vrot.slane %v10847_v12, 9  ;;  %v3038_v57 = vrot.slane %v13987_v59, 5 }
  0xd1   : > { %v2500_v51 = vsel %vm12997_vm4, %v2495_v1, %v2499_v38  ;;  %v14025_v3 = vrot.slane %v2508_v31, 4  ;;  %v3032_v28 = vsel %vm13263_vm7, %v10862_v62, %v3031_v23  ;;  %v3033_v39 = vrot.slane %v3031_v23, 4  ;;  %v12685_v1 = vld [vmem:[%s17789_s1 + $0x70] sm:$0xff]   ;;  %v10974_v31 = vld [vmem:[%s12964_s15 + $0x18] sm:$0xf] }
  0xd2   : > { %v10811_v27 = vcombine.low %v2466_v37, %v2476_v8  ;;  %v10812_v45 = vcombine.low %v2490_v10, %v2500_v51  ;;  %v14032_v54 = vrot.slane %v2521_v24, 5  ;;  %v3040_v2 = vrot.slane %v3038_v57, 4 }
  0xd3   : > { %12084 = vmatmul.mubr.msk.bf16.gmra.mxu0 %vm780_vm3, %v13952_v22  ;;  %12124 = vmatmul.mubr.msk.bf16.gmra.mxu1 %vm780_vm3, %v10881_v15  ;;  %v3035_v48 = vsel %vm13263_vm7, %v3033_v39, %v3034_v18  ;;  %v3039_v29 = vsel %vm13263_vm7, %v10863_v60, %v3038_v57  ;;  %v3041_v17 = vrot.slane %v10789_v56, 5  ;;  %v2526_v59 = vshrl.u32 %v10790_v5, 16  ;;  %v10849_v15 = vld [vmem:[%s12964_s15 + $0xc0] sm:$0xe]  ;;  %v14079_v60 = vld [vmem:[%s12964_s15 + $0x1c] sm:$0xf] }
  0xd4   : > { %12087 = vmatprep.mubr.msk.bf16.mxu0 %vm780_vm3, %v13989_v46  ;;  %v2519_v0 = vrot.slane %v2518_v33, 4  ;;  %v10882_v30 = vcombine.low %v3032_v28, %v3035_v48  ;;  %v2529_v21 = vshll.u32 %v10790_v5, 16  ;;  %v2535_v22 = vshll.u32 %v14030_v55, 16  ;;  %v14086_v28 = vld [vmem:[%s12964_s15 + $0x20] sm:$0x1] }
  0xd5   : > { %v2514_v61 = vsel %vm12997_vm4, %v14025_v3, %v14014_v14  ;;  %v3042_v25 = vsel %vm13263_vm7, %v3040_v2, %v3041_v17  ;;  %v2528_v43 = vrot.slane %v2526_v59, 4  ;;  %v2539_v37 = vshrl.u32 %v14030_v55, 16  ;;  %v14096_v48 = vld [vmem:[%s12964_s15 + $0x28] sm:$0xf] }
  0xd6   : > { %12127 = vmatprep.mubr.msk.bf16.mxu1 %vm780_vm3, %v10882_v30  ;;  %v10883_v46 = vcombine.low %v3039_v29, %v3042_v25  ;;  %v2531_v13 = vrot.slane %v2529_v21, 5  ;;  %v2537_v8 = vrot.slane %v2535_v22, 5  ;;  %v2545_v20 = vshll.u32 %v14035_v32, 16 }
  0xd7   : > { %v2541_v35 = vrot.slane %v2539_v37, 4  ;;  %v2550_v50 = vshrl.u32 %v10793_v42, 16  ;;  %v2553_v56 = vshll.u32 %v10793_v42, 16  ;;  %v2559_v11 = vshll.u32 %v10794_v44, 16  ;;  %v14108_v37 = vld [vmem:[%s12964_s15 + $0x2c] sm:$0x1] }
  0xd8   : > { %v2524_v4 = vsel %vm12997_vm4, %v2519_v0, %v14032_v54  ;;  %v2532_v7 = vor.u32 %v2531_v13, %v2528_v43  ;;  %v2547_v41 = vrot.slane %v2545_v20, 5  ;;  %v2563_v63 = vshrl.u32 %v10794_v44, 16 }
  0xd9   : > { %v2542_v6 = vor.u32 %v2541_v35, %v2537_v8  ;;  %v2552_v38 = vrot.slane %v2550_v50, 4  ;;  %v2555_v53 = vrot.slane %v2553_v56, 5  ;;  %v14064_v52 = vrot.slane %v2559_v11, 5  ;;  %v14119_v11 = vld [vmem:[%s12964_s15 + $0x34] sm:$0xf] }
  0xda   : > { %v2533_v19 = vrot.slane %v2532_v7, 4  ;;  %v2565_v26 = vrot.slane %v2563_v63, 4  ;;  %v2569_v14 = vshll.u32 %v10795_v49, 16  ;;  %v10864_v12 = vrot.slane %v10848_v40, 9 }
  0xdb   : > { %12088 = vmatmul.mubr.msk.bf16.gmra.mxu0 %vm780_vm3, %v10811_v27  ;;  %12128 = vmatmul.mubr.msk.bf16.gmra.mxu1 %vm780_vm3, %v10883_v46  ;;  %v2543_v58 = vrot.slane %v2542_v6, 4  ;;  %v2556_v9 = vor.u32 %v2555_v53, %v2552_v38  ;;  %v3045_v24 = vrot.slane %v14030_v55, 5  ;;  %v3048_v62 = vrot.slane %v14035_v32, 5 }
  0xdc   : > { %12091 = vmatprep.mubr.msk.bf16.mxu0 %vm780_vm3, %v10812_v45  ;;  %v2538_v23 = vsel %vm12997_vm4, %v2533_v19, %v2537_v8  ;;  %v2566_v18 = vor.u32 %v2565_v26, %v14064_v52  ;;  %v10865_v10 = vrot.slane %v10849_v15, 9  ;;  %v3052_v33 = vrot.slane %v10794_v44, 5  ;;  %v10977_v45 = vld [vmem:[%s12964_s15 + $0x24] sm:$0xf]  ;;  %v10980_v8 = vld [vmem:[%s12964_s15 + $0x30] sm:$0xf] }
  0xdd   : > { %v2548_v57 = vsel %vm12997_vm4, %v2543_v58, %v2547_v41  ;;  %v2557_v5 = vrot.slane %v2556_v9, 4  ;;  %v3046_v51 = vsel %vm13263_vm7, %v10864_v12, %v3045_v24  ;;  %v3047_v3 = vrot.slane %v3045_v24, 4  ;;  %v14123_v9 = vld [vmem:[%s12964_s15 + $0x38] sm:$0x1] }
  0xde   : > { %v10813_v39 = vcombine.low %v2514_v61, %v2524_v4  ;;  %v2571_v55 = vrot.slane %v2569_v14, 5  ;;  %v3054_v27 = vrot.slane %v3052_v33, 4  ;;  %v3053_v2 = vsel %vm13263_vm7, %v10865_v10, %v3052_v33  ;;  %v12686_v24 = vld [vmem:[%s12964_s15 + $0x18] sm:$0xff]  }
  0xdf   : > { %v3049_v54 = vsel %vm13263_vm7, %v3047_v3, %v3048_v62  ;;  %v3055_v32 = vrot.slane %v10795_v49, 5  ;;  %v4283_v42 = vsel %vm829_vm0, %v13664_v16, 0  ;;  %v10814_v29 = vcombine.low %v2538_v23, %v2548_v57 }
  0xe0   : > { %v2567_v17 = vrot.slane %v2566_v18, 4  ;;  %v10884_v59 = vcombine.low %v3046_v51, %v3049_v54  ;;  %12172 = vmatpush3.bf16.msra.mxu1 %v4283_v42  ;;  %v3787_v44 = vshrl.u32 %v10974_v31, 16  ;;  %v2562_v0 = vsel %vm12997_vm4, %v2557_v5, %v14064_v52  ;;  %v10983_v18 = vld [vmem:[%s12964_s15 + $0x3c] sm:$0xf] }
  0xe1   : > { %v3056_v30 = vsel %vm13263_vm7, %v3054_v27, %v3055_v32  ;;  %12173 = vmatprep.subr.bf16.mxu1 %v12685_v1  ;;  %v3790_v21 = vshll.u32 %v10974_v31, 16  ;;  %v3796_v16 = vshll.u32 %v14079_v60, 16  ;;  %v3800_v25 = vshrl.u32 %v14079_v60, 16 }
  0xe2   : > { %12131 = vmatprep.mubr.msk.bf16.mxu1 %vm780_vm3, %v10884_v59  ;;  %v10885_v22 = vcombine.low %v3053_v2, %v3056_v30  ;;  %v3789_v61 = vrot.slane %v3787_v44, 4  ;;  %v3806_v43 = vshll.u32 %v14086_v28, 16  ;;  %v3811_v46 = vshrl.u32 %v10977_v45, 16 }
  0xe3   : > { %12092 = vmatmul.mubr.msk.bf16.gmra.mxu0 %vm780_vm3, %v10813_v39  ;;  %v3792_v49 = vrot.slane %v3790_v21, 5  ;;  %v3798_v40 = vrot.slane %v3796_v16, 5  ;;  %v3814_v13 = vshll.u32 %v10977_v45, 16  ;;  %v2572_v20 = vsel %vm12997_vm4, %v2567_v17, %v2571_v55  ;;  %v14134_v45 = vld [vmem:[%s12964_s15 + $0x40] sm:$0xf]  ;;  %v12688_v16 = vld [vmem:[%s12964_s15 + $0x24] sm:$0xff]  }
  0xe4   : > { %12095 = vmatprep.mubr.msk.bf16.mxu0 %vm780_vm3, %v10814_v29  ;;  %12132 = vmatmul.mubr.msk.bf16.gmra.mxu1 %vm780_vm3, %v10885_v22  ;;  %v3802_v35 = vrot.slane %v3800_v25, 4  ;;  %v3820_v50 = vshll.u32 %v14096_v48, 16  ;;  %v3824_v56 = vshrl.u32 %v14096_v48, 16  ;;  %v3813_v41 = vrot.slane %v3811_v46, 4  ;;  %v14146_v21 = vld [vmem:[%s12964_s15 + $0x44] sm:$0x1] }
  0xe5   : > { %12174 = vmatpush3.bf16.msra.mxu1 %v12685_v1  ;;  %v11961_v4 = vpop.f32.mrf.mxu1  ;;  %v3793_v7 = vor.u32 %v3792_v49, %v3789_v61  ;;  %v3816_v63 = vrot.slane %v3814_v13, 5  ;;  %v3830_v15 = vshll.u32 %v14108_v37, 16  ;;  %v3808_v38 = vrot.slane %v3806_v43, 5  ;;  %v10986_v46 = vld [vmem:[%s12964_s15 + $0x48] sm:$0xf] }
  0xe6   : > { %v3803_v6 = vor.u32 %v3802_v35, %v3798_v40  ;;  %v3822_v53 = vrot.slane %v3820_v50, 5  ;;  %v3826_v52 = vrot.slane %v3824_v56, 4  ;;  %v10815_v19 = vcombine.low %v2562_v0, %v2572_v20  ;;  %v14156_v56 = vld [vmem:[%s12964_s15 + $0x4c] sm:$0xf] }
  0xe7   : > { %v3794_v26 = vrot.slane %v3793_v7, 4  ;;  %v1170_v14 = vpop.f32.mrf.mxu1  ;;  %v3817_v12 = vor.u32 %v3816_v63, %v3813_v41  ;;  %v3832_v58 = vrot.slane %v3830_v15, 5  ;;  %v3835_v31 = vshrl.u32 %v10980_v8, 16 }
  0xe8   : > { %v3804_v62 = vrot.slane %v3803_v6, 4  ;;  %v3827_v1 = vor.u32 %v3826_v52, %v3822_v53  ;;  %v3838_v23 = vshll.u32 %v10980_v8, 16  ;;  %v3844_v5 = vshll.u32 %v14119_v11, 16  ;;  %v12689_v8 = vld [vmem:[%s12964_s15 + $0x30] sm:$0xff]  }
  0xe9   : > { %v3799_v10 = vsel %vm12997_vm4, %v3794_v26, %v3798_v40  ;;  %v3818_v33 = vrot.slane %v3817_v12, 4  ;;  %v11962_v57 = vpop.f32.mrf.mxu1  ;;  %v3848_v51 = vshrl.u32 %v14119_v11, 16  ;;  %v3837_v55 = vrot.slane %v3835_v31, 4 }
  0xea   : > { %v3809_v3 = vsel %vm12997_vm4, %v3804_v62, %v3808_v38  ;;  %v3828_v39 = vrot.slane %v3827_v1, 4  ;;  %v3840_v27 = vrot.slane %v3838_v23, 5  ;;  %v3846_v29 = vrot.slane %v3844_v5, 5  ;;  %v14161_v38 = vld [vmem:[%s12964_s15 + $0x50] sm:$0x1] }
  0xeb   : > { %12096 = vmatmul.mubr.msk.bf16.gmra.mxu0 %vm780_vm3, %v10815_v19  ;;  %v11925_v54 = vpop.f32.mrf.mxu0  ;;  %v11026_v2 = vcombine.low %v3799_v10, %v3809_v3  ;;  %v3823_v32 = vsel %vm12997_vm4, %v3818_v33, %v3822_v53  ;;  %v1173_v42 = vpop.f32.mrf.mxu1  ;;  %v3850_v17 = vrot.slane %v3848_v51, 4  ;;  %v3854_v30 = vshll.u32 %v14123_v9, 16  ;;  %v12696_v53 = vld [vmem:[%s17789_s1 + $0x80] sm:$0xff]   ;;  %v10989_v23 = vld [vmem:[%s12964_s15 + $0x54] sm:$0xf] }
  0xec   : > { %12139 = vmatprep.mubr.msk.bf16.mxu0 %vm780_vm3, %v12686_v24  ;;  %v14140_v59 = vadd.f32 %v11961_v4, %v11925_v54  ;;  %v3833_v44 = vsel %vm12997_vm4, %v3828_v39, %v3832_v58  ;;  %v3841_v0 = vor.u32 %v3840_v27, %v3837_v55  ;;  %v3859_v49 = vshrl.u32 %v10983_v18, 16 }
  0xed   : > { %12175 = vmatprep.mubr.msk.bf16.mxu1 %vm780_vm3, %v11026_v2  ;;  %v867_v22 = vpop.f32.mrf.mxu0  ;;  %v11027_v61 = vcombine.low %v3823_v32, %v3833_v44  ;;  %v11965_v25 = vpop.f32.mrf.mxu1  ;;  %v3851_v43 = vor.u32 %v3850_v17, %v3846_v29  ;;  %v3862_v40 = vshll.u32 %v10983_v18, 16  ;;  %v3856_v35 = vrot.slane %v3854_v30, 5  ;;  %v14184_v2 = vld [vmem:[%s12964_s15 + $0x58] sm:$0xf] }
  0xee   : > { %v14151_v13 = vadd.f32 %v1170_v14, %v867_v22  ;;  %v3842_v20 = vrot.slane %v3841_v0, 4  ;;  %v3868_v50 = vshll.u32 %v14134_v45, 16  ;;  %v3861_v63 = vrot.slane %v3859_v49, 4  ;;  %v12690_v49 = vld [vmem:[%s12964_s15 + $0x3c] sm:$0xff]  }
  0xef   : > { %12176 = vmatmul.mubr.msk.bf16.vlgmr.msra.gmra.mxu1 %vm780_vm3, %v11027_v61  ;;  %v11926_v4 = vpop.f32.mrf.mxu0  ;;  %v3852_v7 = vrot.slane %v3851_v43, 4  ;;  %v1186_v41 = vpop.f32.mrf.mxu1  ;;  %v3864_v15 = vrot.slane %v3862_v40, 5  ;;  %v3872_v6 = vshrl.u32 %v14134_v45, 16  ;;  %v3878_v14 = vshll.u32 %v14146_v21, 16  ;;  %v14192_v61 = vld [vmem:[%s12964_s15 + $0x5c] sm:$0x1] }
  0xf0   : > { %v14166_v52 = vadd.f32 %v11962_v57, %v11926_v4  ;;  %v3847_v19 = vsel %vm12997_vm4, %v3842_v20, %v3846_v29  ;;  %v3870_v26 = vrot.slane %v3868_v50, 5  ;;  %v4767_v12 = vsel %vm829_vm0, %v13890_v47, 0  ;;  %vm15274_vm0 = vmor %vm5153_vm12, %vm5154_vm13 }
  0xf1   : > { %v870_v58 = vpop.f32.mrf.mxu0  ;;  %v3857_v24 = vsel %vm12997_vm4, %v3852_v7, %v3856_v35  ;;  %v3865_v62 = vor.u32 %v3864_v15, %v3861_v63  ;;  %v3874_v1 = vrot.slane %v3872_v6, 4  ;;  %v11966_v31 = vpop.f32.mrf.mxu1  ;;  %v3880_v33 = vrot.slane %v3878_v14, 5  ;;  %v12691_v7 = vld [vmem:[%s12964_s15 + $0x48] sm:$0xff]   ;;  %v10992_v6 = vld [vmem:[%s12964_s15 + $0x60] sm:$0xf] }
  0xf2   : > { %v14176_v18 = vadd.f32 %v1173_v42, %v870_v58  ;;  %v11028_v10 = vcombine.low %v3847_v19, %v3857_v24  ;;  %v3883_v57 = vshrl.u32 %v10986_v46, 16  ;;  %v3886_v47 = vshll.u32 %v10986_v46, 16 }
  0xf3   : > { %12140 = vmatmul.mubr.msk.bf16.vlgmr.msra.gmra.mxu0 %vm780_vm3, %v12688_v16  ;;  %v3866_v5 = vrot.slane %v3865_v62, 4  ;;  %v3875_v51 = vor.u32 %v3874_v1, %v3870_v26  ;;  %v1189_v3 = vpop.f32.mrf.mxu1  ;;  %v3892_v39 = vshll.u32 %v14156_v56, 16  ;;  %v3896_v27 = vshrl.u32 %v14156_v56, 16 }
  0xf4   : > { %12208 = vmatpush3.bf16.msra.mxu0 %v4767_v12  ;;  %12143 = vmatprep.mubr.msk.bf16.mxu0 %vm780_vm3, %v12689_v8  ;;  %v3885_v55 = vrot.slane %v3883_v57, 4  ;;  %v3902_v54 = vshll.u32 %v14161_v38, 16  ;;  %v3907_v32 = vshrl.u32 %v10989_v23, 16  ;;  %v3888_v44 = vrot.slane %v3886_v47, 5 }
  0xf5   : > { %v11929_v42 = vpop.f32.mrf.mxu0  ;;  %12179 = vmatprep.mubr.msk.bf16.mxu1 %vm780_vm3, %v11028_v10  ;;  %v3871_v29 = vsel %vm12997_vm4, %v3866_v5, %v3870_v26  ;;  %v3876_v17 = vrot.slane %v3875_v51, 4  ;;  %v3894_v0 = vrot.slane %v3892_v39, 5  ;;  %12209 = vmatprep.subr.bf16.mxu0 %v12696_v53  ;;  %v3898_v16 = vrot.slane %v3896_v27, 4 }
  0xf6   : > { %v14189_v30 = vadd.f32 %v11965_v25, %v11929_v42  ;;  %v3904_v22 = vrot.slane %v3902_v54, 5  ;;  %v3909_v43 = vrot.slane %v3907_v32, 4  ;;  %v3889_v20 = vor.u32 %v3888_v44, %v3885_v55  ;;  %v14219_v55 = vld [vmem:[%s12964_s15 + $0x68] sm:$0x1]  ;;  %v10995_v54 = vld [vmem:[%s12964_s15 + $0x6c] sm:$0xf] }
  0xf7   : > { %v883_v40 = vpop.f32.mrf.mxu0  ;;  %v3881_v46 = vsel %vm12997_vm4, %v3876_v17, %v3880_v33  ;;  %v11969_v8 = vpop.f32.mrf.mxu1  ;;  %v3910_v35 = vshll.u32 %v10989_v23, 16  ;;  %v3916_v50 = vshll.u32 %v14184_v2, 16  ;;  %v3899_v63 = vor.u32 %v3898_v16, %v3894_v0  ;;  %v14208_v23 = vld [vmem:[%s12964_s15 + $0x64] sm:$0xf] }
  0xf8   : > { %v14198_v4 = vadd.f32 %v1186_v41, %v883_v40  ;;  %v11029_v25 = vcombine.low %v3871_v29, %v3881_v46  ;;  %v3920_v15 = vshrl.u32 %v14184_v2, 16  ;;  %12210 = vmatpush3.bf16.msra.mxu0 %v12696_v53  ;;  %v3890_v26 = vrot.slane %v3889_v20, 4 }
  0xf9   : > { %v11930_v19 = vpop.f32.mrf.mxu0  ;;  %v1202_v14 = vpop.f32.mrf.mxu1  ;;  %v3912_v12 = vrot.slane %v3910_v35, 5  ;;  %v3918_v58 = vrot.slane %v3916_v50, 5  ;;  %v3926_v24 = vshll.u32 %v14192_v61, 16  ;;  %v3900_v62 = vrot.slane %v3899_v63, 4 }
  0xfa   : > { %12180 = vmatmul.mubr.msk.bf16.gmra.mxu1 %vm780_vm3, %v11029_v25  ;;  %v14205_v41 = vadd.f32 %v11966_v31, %v11930_v19  ;;  %v3922_v1 = vrot.slane %v3920_v15, 4  ;;  %v3895_v10 = vsel %vm12997_vm4, %v3890_v26, %v3894_v0  ;;  %v3931_v51 = vshrl.u32 %v10992_v6, 16  ;;  %v14232_v25 = vld [vmem:[%s12964_s15 + $0x70] sm:$0xf]  ;;  %v12693_v15 = vld [vmem:[%s12964_s15 + $0x60] sm:$0xff]  }
  0xfb   : > { %12144 = vmatmul.mubr.msk.bf16.gmra.mxu0 %vm780_vm3, %v12690_v49  ;;  %v886_v53 = vpop.f32.mrf.mxu0  ;;  %v3913_v33 = vor.u32 %v3912_v12, %v3909_v43  ;;  %v3928_v57 = vrot.slane %v3926_v24, 5  ;;  %v11970_v5 = vpop.f32.mrf.mxu1  ;;  %v3905_v31 = vsel %vm12997_vm4, %v3900_v62, %v3904_v22  ;;  %v3934_v27 = vshll.u32 %v10992_v6, 16  ;;  %v12692_v49 = vld [vmem:[%s12964_s15 + $0x54] sm:$0xff]  }
  0xfc   : > { %v14213_v47 = vadd.f32 %v1189_v3, %v886_v53  ;;  %12147 = vmatprep.mubr.msk.bf16.mxu0 %vm780_vm3, %v12691_v7  ;;  %v3923_v39 = vor.u32 %v3922_v1, %v3918_v58  ;;  %v11030_v42 = vcombine.low %v3895_v10, %v3905_v31  ;;  %v3933_v44 = vrot.slane %v3931_v51, 4  ;;  %v14240_v26 = vld [vmem:[%s12964_s15 + $0x74] sm:$0x1]  ;;  %v10998_v31 = vld [vmem:[%s12964_s15 + $0x78] sm:$0xf] }
  0xfd   : > { %v11933_v32 = vpop.f32.mrf.mxu0  ;;  %v3914_v29 = vrot.slane %v3913_v33, 4  ;;  %v1205_v17 = vpop.f32.mrf.mxu1  ;;  %v3940_v3 = vshll.u32 %v14208_v23, 16  ;;  %v3936_v43 = vrot.slane %v3934_v27, 5  ;;  %v3944_v22 = vshrl.u32 %v14208_v23, 16 }
  0xfe   : > { %v14223_v0 = vadd.f32 %v11969_v8, %v11933_v32  ;;  %v3924_v16 = vrot.slane %v3923_v39, 4  ;;  %12183 = vmatprep.mubr.msk.bf16.mxu1 %vm780_vm3, %v11030_v42  ;;  %v3950_v50 = vshll.u32 %v14219_v55, 16  ;;  %v3955_v8 = vshrl.u32 %v10995_v54, 16 }
  0xff   : > { %v899_v40 = vpop.f32.mrf.mxu0  ;;  %v3919_v46 = vsel %vm12997_vm4, %v3914_v29, %v3918_v58  ;;  %v11973_v20 = vpop.f32.mrf.mxu1  ;;  %v3942_v35 = vrot.slane %v3940_v3, 5  ;;  %v3937_v6 = vor.u32 %v3936_v43, %v3933_v44  ;;  %v3946_v19 = vrot.slane %v3944_v22, 4 }
 0x100   : > { %v14234_v7 = vadd.f32 %v1202_v14, %v899_v40  ;;  %v3929_v63 = vsel %vm12997_vm4, %v3924_v16, %v3928_v57  ;;  %v3952_v24 = vrot.slane %v3950_v50, 5  ;;  %v3957_v1 = vrot.slane %v3955_v8, 4  ;;  %v14259_v40 = vld [vmem:[%s12964_s15 + $0x80] sm:$0x1] }
 0x101   : > { %v11031_v12 = vcombine.low %v3919_v46, %v3929_v63  ;;  %v11934_v58 = vpop.f32.mrf.mxu0  ;;  %v1218_v62 = vpop.f32.mrf.mxu1  ;;  %v3958_v53 = vshll.u32 %v10995_v54, 16  ;;  %v3938_v14 = vrot.slane %v3937_v6, 4  ;;  %v3947_v33 = vor.u32 %v3946_v19, %v3942_v35  ;;  %v14251_v54 = vld [vmem:[%s12964_s15 + $0x7c] sm:$0xf]  ;;  %v12694_v6 = vld [vmem:[%s12964_s15 + $0x6c] sm:$0xff]  }
 0x102   : > { %v14242_v10 = vadd.f32 %v11970_v5, %v11934_v58  ;;  %v3964_v51 = vshll.u32 %v14232_v25, 16  ;;  %v3968_v27 = vshrl.u32 %v14232_v25, 16  ;;  %v3974_v32 = vshll.u32 %v14240_v26, 16 }
 0x103   : > { %12148 = vmatmul.mubr.msk.bf16.gmra.mxu0 %vm780_vm3, %v12692_v49  ;;  %12184 = vmatmul.mubr.msk.bf16.gmra.mxu1 %vm780_vm3, %v11031_v12  ;;  %v902_v57 = vpop.f32.mrf.mxu0  ;;  %v3960_v39 = vrot.slane %v3958_v53, 5  ;;  %v11974_v42 = vpop.f32.mrf.mxu1  ;;  %v3943_v29 = vsel %vm12997_vm4, %v3938_v14, %v3942_v35  ;;  %v3948_v44 = vrot.slane %v3947_v33, 4  ;;  %v3979_v46 = vshrl.u32 %v10998_v31, 16  ;;  %v11001_v35 = vld [vmem:[%s12964_s15 + $0x84] sm:$0xf]  ;;  %v12695_v14 = vld [vmem:[%s12964_s15 + $0x78] sm:$0xff]  }
 0x104   : > { %v14253_v5 = vadd.f32 %v1205_v17, %v902_v57  ;;  %12151 = vmatprep.mubr.msk.bf16.mxu0 %vm780_vm3, %v12693_v15  ;;  %v3966_v3 = vrot.slane %v3964_v51, 5  ;;  %v3970_v43 = vrot.slane %v3968_v27, 4  ;;  %v3976_v22 = vrot.slane %v3974_v32, 5  ;;  %v14271_v57 = vld [vmem:[%s12964_s15 + $0x88] sm:$0xf] }
 0x105   : > { %v3961_v16 = vor.u32 %v3960_v39, %v3957_v1  ;;  %v1221_v49 = vpop.f32.mrf.mxu1  ;;  %v3953_v17 = vsel %vm12997_vm4, %v3948_v44, %v3952_v24  ;;  %v3982_v50 = vshll.u32 %v10998_v31, 16  ;;  %v3988_v8 = vshll.u32 %v14251_v54, 16 }
 0x106   : > { %17828 = vst [vmem:[#allocation8_spill] sm:$0xff] %v14253_v5  ;;  %v3992_v63 = vshrl.u32 %v14251_v54, 16  ;;  %v11032_v19 = vcombine.low %v3943_v29, %v3953_v17  ;;  %v3971_v58 = vor.u32 %v3970_v43, %v3966_v3  ;;  %v3981_v1 = vrot.slane %v3979_v46, 4  ;;  %v14280_v46 = vld [vmem:[%s12964_s15 + $0x8c] sm:$0x1] }
 0x107   : > { %v11937_v15 = vpop.f32.mrf.mxu0  ;;  %v3962_v12 = vrot.slane %v3961_v16, 4  ;;  %v3984_v33 = vrot.slane %v3982_v50, 5  ;;  %v3990_v51 = vrot.slane %v3988_v8, 5  ;;  %v3998_v29 = vshll.u32 %v14259_v40, 16 }
 0x108   : > { %v14267_v53 = vadd.f32 %v11973_v20, %v11937_v15  ;;  %v3994_v24 = vrot.slane %v3992_v63, 4  ;;  %12187 = vmatprep.mubr.msk.bf16.mxu1 %vm780_vm3, %v11032_v19  ;;  %v3972_v27 = vrot.slane %v3971_v58, 4  ;;  %v4003_v20 = vshrl.u32 %v11001_v35, 16 }
 0x109   : > { %v915_v31 = vpop.f32.mrf.mxu0  ;;  %v3967_v39 = vsel %vm12997_vm4, %v3962_v12, %v3966_v3  ;;  %v11977_v32 = vpop.f32.mrf.mxu1  ;;  %v3985_v16 = vor.u32 %v3984_v33, %v3981_v1  ;;  %v4006_v17 = vshll.u32 %v11001_v35, 16  ;;  %v4000_v3 = vrot.slane %v3998_v29, 5  ;;  %v11004_v12 = vld [vmem:[%s12964_s15 + $0x90] sm:$0xf]  ;;  %v14293_v29 = vld [vmem:[%s12964_s15 + $0x94] sm:$0xf] }
 0x10a   : > { %17829 = vst [vmem:[#allocation9_spill] sm:$0xff] %v14267_v53  ;;  %v14277_v44 = vadd.f32 %v1218_v62, %v915_v31  ;;  %v3995_v43 = vor.u32 %v3994_v24, %v3990_v51  ;;  %v3977_v50 = vsel %vm12997_vm4, %v3972_v27, %v3976_v22  ;;  %v4005_v15 = vrot.slane %v4003_v20, 4  ;;  %v14303_v20 = vld [vmem:[%s12964_s15 + $0x98] sm:$0x1] }
 0x10b   : > { %12152 = vmatmul.mubr.msk.bf16.gmra.mxu0 %vm780_vm3, %v12694_v6  ;;  %v11938_v8 = vpop.f32.mrf.mxu0  ;;  %v1234_v63 = vpop.f32.mrf.mxu1  ;;  %v4012_v19 = vshll.u32 %v14271_v57, 16  ;;  %v11033_v62 = vcombine.low %v3967_v39, %v3977_v50  ;;  %v3986_v35 = vrot.slane %v3985_v16, 4  ;;  %v4008_v33 = vrot.slane %v4006_v17, 5  ;;  %17833 = vst [vmem:[#allocation13_spill] sm:$0xff] %v14303_v20  ;;  %v12697_v17 = vld [vmem:[%s12964_s15 + $0x84] sm:$0xff]  }
 0x10c   : > { %17830 = vst [vmem:[#allocation10_spill] sm:$0xff] %v14277_v44  ;;  %v14287_v58 = vadd.f32 %v11974_v42, %v11938_v8  ;;  %12155 = vmatprep.mubr.msk.bf16.mxu0 %vm780_vm3, %v12695_v14  ;;  %v3996_v6 = vrot.slane %v3995_v43, 4  ;;  %v4016_v24 = vshrl.u32 %v14271_v57, 16  ;;  %v4022_v31 = vshll.u32 %v14280_v46, 16 }
 0x10d   : > { %v918_v1 = vpop.f32.mrf.mxu0  ;;  %v4014_v22 = vrot.slane %v4012_v19, 5  ;;  %v11978_v27 = vpop.f32.mrf.mxu1  ;;  %12188 = vmatmul.mubr.msk.bf16.gmra.mxu1 %vm780_vm3, %v11033_v62  ;;  %v3991_v14 = vsel %vm12997_vm4, %v3986_v35, %v3990_v51  ;;  %v4027_v16 = vshrl.u32 %v11004_v12, 16  ;;  %v4009_v8 = vor.u32 %v4008_v33, %v4005_v15  ;;  %v11007_v62 = vld [vmem:[%s12964_s15 + $0x9c] sm:$0xf] }
 0x10e   : > { %17831 = vst [vmem:[#allocation11_spill] sm:$0xff] %v14287_v58  ;;  %v14296_v42 = vadd.f32 %v1221_v49, %v918_v1  ;;  %v4001_v39 = vsel %vm12997_vm4, %v3996_v6, %v4000_v3  ;;  %v4018_v19 = vrot.slane %v4016_v24, 4  ;;  %v4024_v58 = vrot.slane %v4022_v31, 5  ;;  %v12698_v1 = vld [vmem:[%s12964_s15 + $0x90] sm:$0xff]  }
 0x10f   : > { %v11941_v43 = vpop.f32.mrf.mxu0  ;;  %v11034_v50 = vcombine.low %v3991_v14, %v4001_v39  ;;  %v14306_v44 = vpop.f32.mrf.mxu1  ;;  %v4029_v51 = vrot.slane %v4027_v16, 4  ;;  %v4030_v35 = vshll.u32 %v11004_v12, 16  ;;  %v4036_v3 = vshll.u32 %v14293_v29, 16  ;;  %v14319_v39 = vld [vmem:[%s12964_s15 + $0xa0] sm:$0xf] }
 0x110   : > { %17832 = vst [vmem:[#allocation12_spill] sm:$0xff] %v14296_v42  ;;  %17834 = vst [vmem:[#allocation14_spill] sm:$0xff] %v14306_v44  ;;  %v14309_v49 = vadd.f32 %v11977_v32, %v11941_v43  ;;  %v4010_v42 = vrot.slane %v4009_v8, 4  ;;  %v4019_v53 = vor.u32 %v4018_v19, %v4014_v22  ;;  %v4040_v15 = vshrl.u32 %v14293_v29, 16 }
 0x111   : > { %12191 = vmatprep.mubr.msk.bf16.mxu1 %vm780_vm3, %v11034_v50  ;;  %v931_v6 = vpop.f32.mrf.mxu0  ;;  %v11981_v14 = vpop.f32.mrf.mxu1  ;;  %v4046_v33 = vshll.u32 %v14303_v20, 16  ;;  %v4032_v32 = vrot.slane %v4030_v35, 5  ;;  %v4038_v31 = vrot.slane %v4036_v3, 5  ;;  %17837 = vst [vmem:[#allocation17_spill] sm:$0xff] %v14319_v39  ;;  %v4051_v12 = vshrl.u32 %v11007_v62, 16 }
 0x112   : > { %17835 = vst [vmem:[#allocation15_spill] sm:$0xff] %v14309_v49  ;;  %v14316_v24 = vadd.f32 %v1234_v63, %v931_v6  ;;  %v4015_v16 = vsel %vm12997_vm4, %v4010_v42, %v4014_v22  ;;  %v4020_v43 = vrot.slane %v4019_v53, 4  ;;  %v4042_v8 = vrot.slane %v4040_v15, 4  ;;  %v14328_v35 = vld [vmem:[%s12964_s15 + $0xa4] sm:$0x1] }
 0x113   : > { %12156 = vmatmul.mubr.msk.bf16.gmra.mxu0 %vm780_vm3, %v12697_v17  ;;  %v11942_v50 = vpop.f32.mrf.mxu0  ;;  %v4048_v19 = vrot.slane %v4046_v33, 5  ;;  %v1250_v44 = vpop.f32.mrf.mxu1  ;;  %v4033_v63 = vor.u32 %v4032_v32, %v4029_v51  ;;  %17839 = vst [vmem:[#allocation19_spill] sm:$0xff] %v14328_v35  ;;  %v4053_v3 = vrot.slane %v4051_v12, 4  ;;  %v4054_v17 = vshll.u32 %v11007_v62, 16  ;;  %v14339_v12 = vld [vmem:[%s12964_s15 + $0xac] sm:$0xf] }
 0x114   : > { %17836 = vst [vmem:[#allocation16_spill] sm:$0xff] %v14316_v24  ;;  %v14324_v49 = vadd.f32 %v11978_v27, %v11942_v50  ;;  %12159 = vmatprep.mubr.msk.bf16.mxu0 %vm780_vm3, %v12698_v1  ;;  %v4025_v22 = vsel %vm12997_vm4, %v4020_v43, %v4024_v58  ;;  %v4043_v42 = vor.u32 %v4042_v8, %v4038_v31  ;;  %v4060_v6 = vshll.u32 %v14319_v39, 16  ;;  %v11010_v1 = vld [vmem:[%s12964_s15 + $0xa8] sm:$0xf]  ;;  %v12699_v62 = vld [vmem:[%s12964_s15 + $0x9c] sm:$0xff]  }
 0x115   : > { %v14332_v53 = vpop.f32.mrf.mxu0  ;;  %v4064_v27 = vshrl.u32 %v14319_v39, 16  ;;  %v11982_v15 = vpop.f32.mrf.mxu1  ;;  %v11035_v33 = vcombine.low %v4015_v16, %v4025_v22  ;;  %v4034_v32 = vrot.slane %v4033_v63, 4  ;;  %v4056_v50 = vrot.slane %v4054_v17, 5  ;;  %17841 = vst [vmem:[#allocation21_spill] sm:$0xff] %v14339_v12  ;;  %v12700_v63 = vld [vmem:[%s12964_s15 + $0xa8] sm:$0xff]  }
 0x116   : > { %17838 = vst [vmem:[#allocation18_spill] sm:$0xff] %v14324_v49  ;;  %17840 = vst [vmem:[#allocation20_spill] sm:$0xff] %v14332_v53  ;;  %v4044_v58 = vrot.slane %v4043_v42, 4  ;;  %v4062_v43 = vrot.slane %v4060_v6, 5  ;;  %v4070_v53 = vshll.u32 %v14328_v35, 16  ;;  %v4075_v17 = vshrl.u32 %v11010_v1, 16 }
 0x117   : > { %v4066_v8 = vrot.slane %v4064_v27, 4  ;;  %v14343_v49 = vpop.f32.mrf.mxu1  ;;  %12192 = vmatmul.mubr.msk.bf16.gmra.mxu1 %vm780_vm3, %v11035_v33  ;;  %v4039_v51 = vsel %vm12997_vm4, %v4034_v32, %v4038_v31  ;;  %v4057_v16 = vor.u32 %v4056_v50, %v4053_v3  ;;  %v4078_v22 = vshll.u32 %v11010_v1, 16  ;;  %v14352_v27 = vld [vmem:[%s12964_s15 + $0xb0] sm:$0x1] }
 0x118   : > { %17842 = vst [vmem:[#allocation22_spill] sm:$0xff] %v14343_v49  ;;  %v4049_v42 = vsel %vm12997_vm4, %v4044_v58, %v4048_v19  ;;  %v4072_v39 = vrot.slane %v4070_v53, 5  ;;  %17843 = vst [vmem:[#allocation23_spill] sm:$0xff] %v14352_v27  ;;  %v4084_v35 = vshll.u32 %v14339_v12, 16  ;;  %v11013_v49 = vld [vmem:[%s12964_s15 + $0xb4] sm:$0xf] }
 0x119   : > { %v11945_v24 = vpop.f32.mrf.mxu0  ;;  %v4067_v6 = vor.u32 %v4066_v8, %v4062_v43  ;;  %v11036_v33 = vcombine.low %v4039_v51, %v4049_v42  ;;  %v4058_v31 = vrot.slane %v4057_v16, 4  ;;  %v4077_v3 = vrot.slane %v4075_v17, 4  ;;  %v14368_v51 = vld [vmem:[%s12964_s15 + $0xb8] sm:$0xf]  ;;  %v14373_v42 = vld [vmem:[%s12964_s15 + $0xbc] sm:$0x1] }
 0x11a   : > { %v14356_v20 = vadd.f32 %v11981_v14, %v11945_v24  ;;  %v4080_v19 = vrot.slane %v4078_v22, 5  ;;  %v4086_v58 = vrot.slane %v4084_v35, 5  ;;  %v4088_v53 = vshrl.u32 %v14339_v12, 16  ;;  %17846 = vst [vmem:[#allocation26_spill] sm:$0xff] %v14368_v51  ;;  %17847 = vst [vmem:[#allocation27_spill] sm:$0xff] %v14373_v42 }
 0x11b   : > { %12160 = vmatmul.mubr.msk.bf16.gmra.mxu0 %vm780_vm3, %v12699_v62  ;;  %v947_v1 = vpop.f32.mrf.mxu0  ;;  %v4068_v32 = vrot.slane %v4067_v6, 4  ;;  %v11985_v50 = vpop.f32.mrf.mxu1  ;;  %12195 = vmatprep.mubr.msk.bf16.mxu1 %vm780_vm3, %v11036_v33  ;;  %v4063_v14 = vsel %vm12997_vm4, %v4058_v31, %v4062_v43  ;;  %v4094_v24 = vshll.u32 %v14352_v27, 16  ;;  %v4099_v62 = vshrl.u32 %v11013_v49, 16  ;;  %v11016_v43 = vld [vmem:[%s12964_s15 + $0xc0] sm:$0xf] }
 0x11c   : > { %17844 = vst [vmem:[#allocation24_spill] sm:$0xff] %v14356_v20  ;;  %v14361_v8 = vadd.f32 %v1250_v44, %v947_v1  ;;  %12163 = vmatprep.mubr.msk.bf16.mxu0 %vm780_vm3, %v12700_v63  ;;  %v4081_v17 = vor.u32 %v4080_v19, %v4077_v3  ;;  %v4090_v22 = vrot.slane %v4088_v53, 4  ;;  %v4102_v6 = vshll.u32 %v11013_v49, 16  ;;  %v12701_v20 = vld [vmem:[%s12964_s15 + $0xb4] sm:$0xff]   ;;  %v12702_v53 = vld [vmem:[%s12964_s15 + $0xc0] sm:$0xff]  }
 0x11d   : > { %v4073_v35 = vsel %vm12997_vm4, %v4068_v32, %v4072_v39  ;;  %v11946_v16 = vpop.f32.mrf.mxu0  ;;  %v1266_v44 = vpop.f32.mrf.mxu1  ;;  %v4096_v31 = vrot.slane %v4094_v24, 5  ;;  %v4101_v1 = vrot.slane %v4099_v62, 4  ;;  %v4108_v3 = vshll.u32 %v14368_v51, 16  ;;  %v14388_v24 = vld [vmem:[%s12964_s15 + $0xc4] sm:$0xf] }
 0x11e   : > { %17845 = vst [vmem:[#allocation25_spill] sm:$0xff] %v14361_v8  ;;  %v11037_v33 = vcombine.low %v4063_v14, %v4073_v35  ;;  %v14376_v63 = vadd.f32 %v11982_v15, %v11946_v16  ;;  %v4082_v27 = vrot.slane %v4081_v17, 4  ;;  %v4091_v39 = vor.u32 %v4090_v22, %v4086_v58  ;;  %17850 = vst [vmem:[#allocation30_spill] sm:$0xff] %v14388_v24 }
 0x11f   : > { %v14378_v8 = vpop.f32.mrf.mxu0  ;;  %v4104_v32 = vrot.slane %v4102_v6, 5  ;;  %v11986_v19 = vpop.f32.mrf.mxu1  ;;  %v4112_v15 = vshrl.u32 %v14368_v51, 16  ;;  %v4118_v14 = vshll.u32 %v14373_v42, 16  ;;  %v4123_v62 = vshrl.u32 %v11016_v43, 16  ;;  %v14397_v51 = vld [vmem:[%s12964_s15 + $0xc8] sm:$0x1] }
 0x120   : > { %17848 = vst [vmem:[#allocation28_spill] sm:$0xff] %v14376_v63  ;;  %17849 = vst [vmem:[#allocation29_spill] sm:$0xff] %v14378_v8  ;;  %12196 = vmatmul.mubr.msk.bf16.gmra.mxu1 %vm780_vm3, %v11037_v33  ;;  %v4087_v16 = vsel %vm12997_vm4, %v4082_v27, %v4086_v58  ;;  %v4092_v17 = vrot.slane %v4091_v39, 4  ;;  %v4110_v6 = vrot.slane %v4108_v3, 5  ;;  %v11019_v3 = vld [vmem:[%s12964_s15 + $0xcc] sm:$0xf] }
 0x121   : > { %v11949_v35 = vpop.f32.mrf.mxu0  ;;  %v4105_v22 = vor.u32 %v4104_v32, %v4101_v1  ;;  %v14392_v8 = vpop.f32.mrf.mxu1  ;;  %v4114_v33 = vrot.slane %v4112_v15, 4  ;;  %v4120_v63 = vrot.slane %v4118_v14, 5  ;;  %17853 = vst [vmem:[#allocation33_spill] sm:$0xff] %v14397_v51  ;;  %v4125_v42 = vrot.slane %v4123_v62, 4 }
 0x122   : > { %17851 = vst [vmem:[#allocation31_spill] sm:$0xff] %v14392_v8  ;;  %v14394_v49 = vadd.f32 %v11985_v50, %v11949_v35  ;;  %v4097_v12 = vsel %vm12997_vm4, %v4092_v17, %v4096_v31  ;;  %v4126_v1 = vshll.u32 %v11016_v43, 16  ;;  %v4132_v32 = vshll.u32 %v14388_v24, 16 }
 0x123   : > { %12164 = vmatmul.mubr.msk.bf16.gmra.mxu0 %vm780_vm3, %v12701_v20  ;;  %v963_v27 = vpop.f32.mrf.mxu0  ;;  %v4106_v58 = vrot.slane %v4105_v22, 4  ;;  %v11989_v39 = vpop.f32.mrf.mxu1  ;;  %v11038_v50 = vcombine.low %v4087_v16, %v4097_v12  ;;  %v4115_v14 = vor.u32 %v4114_v33, %v4110_v6  ;;  %v4136_v62 = vshrl.u32 %v14388_v24, 16  ;;  %v14409_v20 = vld [vmem:[%s12964_s15 + $0xd0] sm:$0xf]  ;;  %v14418_v33 = vld [vmem:[%s12964_s15 + $0xd4] sm:$0x1] }
 0x124   : > { %17852 = vst [vmem:[#allocation32_spill] sm:$0xff] %v14394_v49  ;;  %v14404_v15 = vadd.f32 %v1266_v44, %v963_v27  ;;  %12167 = vmatprep.mubr.msk.bf16.mxu0 %vm780_vm3, %v12702_v53  ;;  %v4128_v43 = vrot.slane %v4126_v1, 5  ;;  %v4134_v17 = vrot.slane %v4132_v32, 5  ;;  %v4142_v12 = vshll.u32 %v14397_v51, 16  ;;  %v11060_v51 = vld [vmem:[%s12964_s15 + $0x18] sm:$0xe] }
 0x125   : > { %v4111_v31 = vsel %vm12997_vm4, %v4106_v58, %v4110_v6  ;;  %v11950_v35 = vpop.f32.mrf.mxu0  ;;  %v1282_v16 = vpop.f32.mrf.mxu1  ;;  %12199 = vmatprep.mubr.msk.bf16.mxu1 %vm780_vm3, %v11038_v50  ;;  %v4116_v44 = vrot.slane %v4115_v14, 4  ;;  %v4138_v53 = vrot.slane %v4136_v62, 4  ;;  %v4147_v27 = vshrl.u32 %v11019_v3, 16  ;;  %v12703_v6 = vld [vmem:[%s12964_s15 + $0xcc] sm:$0xff]  }
 0x126   : > { %17854 = vst [vmem:[#allocation34_spill] sm:$0xff] %v14404_v15  ;;  %v14415_v22 = vadd.f32 %v11986_v19, %v11950_v35  ;;  %v4129_v58 = vor.u32 %v4128_v43, %v4125_v42  ;;  %v4150_v1 = vshll.u32 %v11019_v3, 16  ;;  %v4156_v32 = vshll.u32 %v14409_v20, 16 }
 0x127   : > { %v14421_v15 = vpop.f32.mrf.mxu0  ;;  %v11990_v49 = vpop.f32.mrf.mxu1  ;;  %v4121_v50 = vsel %vm12997_vm4, %v4116_v44, %v4120_v63  ;;  %v4139_v19 = vor.u32 %v4138_v53, %v4134_v17  ;;  %v4144_v14 = vrot.slane %v4142_v12, 5  ;;  %v4149_v62 = vrot.slane %v4147_v27, 4  ;;  %v11061_v27 = vld [vmem:[%s12964_s15 + $0x24] sm:$0xe] }
 0x128   : > { %17855 = vst [vmem:[#allocation35_spill] sm:$0xff] %v14415_v22  ;;  %17856 = vst [vmem:[#allocation36_spill] sm:$0xff] %v14421_v15  ;;  %v11039_v35 = vcombine.low %v4111_v31, %v4121_v50  ;;  %v4130_v22 = vrot.slane %v4129_v58, 4  ;;  %v4152_v24 = vrot.slane %v4150_v1, 5  ;;  %v4158_v8 = vrot.slane %v4156_v32, 5 }
 0x129   : > { %v14428_v5 = vpop.f32.mrf.mxu1  ;;  %v4140_v15 = vrot.slane %v4139_v19, 4  ;;  %v4160_v42 = vshrl.u32 %v14409_v20, 16  ;;  %v4166_v3 = vshll.u32 %v14418_v33, 16  ;;  %v11076_v43 = vrot.slane %v11060_v51, 9  ;;  %v11062_v19 = vld [vmem:[%s12964_s15 + $0x30] sm:$0xe] }
 0x12a   : > { %17857 = vst [vmem:[#allocation37_spill] sm:$0xff] %v14428_v5  ;;  %12200 = vmatmul.mubr.msk.bf16.gmra.mxu1 %vm780_vm3, %v11039_v35  ;;  %v4135_v31 = vsel %vm12997_vm4, %v4130_v22, %v4134_v17  ;;  %v4153_v12 = vor.u32 %v4152_v24, %v4149_v62  ;;  %v4544_v44 = vrot.slane %v14079_v60, 5  ;;  %v4547_v53 = vrot.slane %v14086_v28, 5 }
 0x12b   : > { %v11953_v63 = vpop.f32.mrf.mxu0  ;;  %12168 = vmatmul.mubr.msk.bf16.gmra.mxu0 %vm780_vm3, %v12703_v6  ;;  %v12033_v58 = vpop.f32.mrf.mxu1  ;;  %v4145_v51 = vsel %vm12997_vm4, %v4140_v15, %v4144_v14  ;;  %v4162_v32 = vrot.slane %v4160_v42, 4  ;;  %v4168_v50 = vrot.slane %v4166_v3, 5  ;;  %v11077_v22 = vrot.slane %v11061_v27, 9 }
 0x12c   : > { %v14439_v1 = vadd.f32 %v11989_v39, %v11953_v63  ;;  %v11040_v35 = vcombine.low %v4135_v31, %v4145_v51  ;;  %v4154_v5 = vrot.slane %v4153_v12, 4  ;;  %v4545_v24 = vsel %vm13263_vm7, %v11076_v43, %v4544_v44  ;;  %v11063_v31 = vld [vmem:[%s12964_s15 + $0x3c] sm:$0xe] }
 0x12d   : > { %v979_v6 = vpop.f32.mrf.mxu0  ;;  %v4546_v60 = vrot.slane %v4544_v44, 4  ;;  %v1982_v17 = vpop.f32.mrf.mxu1  ;;  %v4163_v39 = vor.u32 %v4162_v32, %v4158_v8  ;;  %v17858_v62 = vrot.slane %v14096_v48, 5  ;;  %v11078_v63 = vrot.slane %v11062_v19, 9 }
 0x12e   : > { %v14446_v28 = vadd.f32 %v1282_v16, %v979_v6  ;;  %12203 = vmatprep.mubr.msk.bf16.mxu1 %vm780_vm3, %v11040_v35  ;;  %v4159_v14 = vsel %vm12997_vm4, %v4154_v5, %v4158_v8  ;;  %v4558_v16 = vrot.slane %v14119_v11, 5  ;;  %v11064_v8 = vld [vmem:[%s12964_s15 + $0x48] sm:$0xe]  ;;  %v4582_v48 = vrot.slane %v14192_v61, 5 }
 0x12f   : > { %v4553_v15 = vrot.slane %v17858_v62, 4  ;;  %v11954_v42 = vpop.f32.mrf.mxu0  ;;  %v4548_v3 = vsel %vm13263_vm7, %v4546_v60, %v4547_v53  ;;  %v14455_v43 = vpop.f32.mrf.mxu1  ;;  %v4164_v12 = vrot.slane %v4163_v39, 4  ;;  %v17859_v51 = vmov %v17858_v62  ;;  %v11065_v39 = vld [vmem:[%s12964_s15 + $0x54] sm:$0xe] }
 0x130   : > { %v14459_v44 = vadd.f32 %v11990_v49, %v11954_v42  ;;  %v11096_v27 = vcombine.low %v4545_v24, %v4548_v3  ;;  %v4552_v5 = vsel %vm13263_vm7, %v11077_v22, %v17859_v51  ;;  %v17860_v53 = vrot.slane %v14108_v37, 5 }
 0x131   : > { %v14466_v32 = vpop.f32.mrf.mxu0  ;;  %v4559_v11 = vsel %vm13263_vm7, %v11078_v63, %v4558_v16  ;;  %v4560_v35 = vrot.slane %v4558_v16, 4  ;;  %v4561_v49 = vrot.slane %v14123_v9, 5  ;;  %v14475_v6 = vpop.f32.mrf.mxu1  ;;  %v4169_v24 = vsel %vm12997_vm4, %v4164_v12, %v4168_v50 }
 0x132   : > { %v4555_v19 = vsel %vm13263_vm7, %v4553_v15, %v17860_v53  ;;  %12211 = vmatprep.mubr.msk.bf16.mxu0 %vm780_vm3, %v11096_v27  ;;  %v11079_v60 = vrot.slane %v11063_v31, 9  ;;  %v11041_v22 = vcombine.low %v4159_v14, %v4169_v24  ;;  %v4565_v9 = vrot.slane %v14134_v45, 5  ;;  %v11066_v31 = vld [vmem:[%s12964_s15 + $0x60] sm:$0xe] }
 0x133   : > { %v11097_v37 = vcombine.low %v4552_v5, %v4555_v19  ;;  %v11997_v62 = vpop.f32.mrf.mxu0  ;;  %v4562_v15 = vsel %vm13263_vm7, %v4560_v35, %v4561_v49  ;;  %v12037_v42 = vpop.f32.mrf.mxu1  ;;  %v11080_v3 = vrot.slane %v11064_v8, 9  ;;  %v4572_v63 = vrot.slane %v14156_v56, 5 }
 0x134   : > { %v1738_v61 = vadd.f32 %v11997_v62, %v14140_v59  ;;  %v11098_v50 = vcombine.low %v4559_v11, %v4562_v15  ;;  %v4575_v16 = vrot.slane %v14161_v38, 5  ;;  %12204 = vmatmul.mubr.msk.bf16.gmra.mxu1 %vm780_vm3, %v11041_v22  ;;  %v4566_v12 = vsel %vm13263_vm7, %v11079_v60, %v4565_v9 }
 0x135   : > { %12212 = vmatmul.mubr.msk.bf16.vlgmr.msra.gmra.mxu0 %vm780_vm3, %v11097_v37  ;;  %v1609_v14 = vpop.f32.mrf.mxu0  ;;  %v4567_v45 = vrot.slane %v4565_v9, 4  ;;  %v1998_v27 = vpop.f32.mrf.mxu1  ;;  %v11081_v51 = vrot.slane %v11065_v39, 9  ;;  %v4579_v59 = vrot.slane %v14184_v2, 5  ;;  %v4573_v56 = vsel %vm13263_vm7, %v11080_v3, %v4572_v63 }
 0x136   : > { %v1736_v5 = vadd.f32 %v1609_v14, %v14151_v13  ;;  %v14495_v8 = vadd.f32 %v12033_v58, %v1738_v61  ;;  %12215 = vmatprep.mubr.msk.bf16.mxu0 %vm780_vm3, %v11098_v50  ;;  %v4574_v38 = vrot.slane %v4572_v63, 4  ;;  %v17861_v19 = vrot.slane %v14146_v21, 5  ;;  %v11067_v58 = vld [vmem:[%s12964_s15 + $0x6c] sm:$0xe] }
 0x137   : > { %v11998_v53 = vpop.f32.mrf.mxu0  ;;  %v12038_v35 = vpop.f32.mrf.mxu1  ;;  %v4580_v2 = vsel %vm13263_vm7, %v11081_v51, %v4579_v59  ;;  %v4581_v49 = vrot.slane %v4579_v59, 4  ;;  %v11082_v13 = vrot.slane %v11066_v31, 9  ;;  %v4586_v9 = vrot.slane %v14208_v23, 5 }
 0x138   : > { %v4569_v11 = vsel %vm13263_vm7, %v4567_v45, %v17861_v19  ;;  %v1739_v24 = vadd.f32 %v11998_v53, %v14166_v52  ;;  %v14508_v37 = vadd.f32 %v1982_v17, %v1736_v5  ;;  %v4576_v39 = vsel %vm13263_vm7, %v4574_v38, %v4575_v16 }
 0x139   : > { %v11099_v60 = vcombine.low %v4566_v12, %v4569_v11  ;;  %v1612_v22 = vpop.f32.mrf.mxu0  ;;  %v11100_v21 = vcombine.low %v4573_v56, %v4576_v39  ;;  %v14512_v62 = vpop.f32.mrf.mxu1  ;;  %v4583_v15 = vsel %vm13263_vm7, %v4581_v49, %v4582_v48  ;;  %v4589_v3 = vrot.slane %v14219_v55, 5 }
 0x13a   : > { %v14519_v61 = vadd.f32 %v1612_v22, %v14176_v18  ;;  %v14522_v52 = vadd.f32 %v14455_v43, %v1739_v24  ;;  %v11101_v17 = vcombine.low %v4580_v2, %v4583_v15  ;;  %v11083_v50 = vrot.slane %v11067_v58, 9 }
 0x13b   : > { %v4596_v63 = vrot.slane %v14240_v26, 5  ;;  %v12001_v16 = vpop.f32.mrf.mxu0  ;;  %v12041_v31 = vpop.f32.mrf.mxu1  ;;  %v4588_v14 = vrot.slane %v4586_v9, 4  ;;  %v4593_v48 = vrot.slane %v14232_v25, 5  ;;  %v4587_v43 = vsel %vm13263_vm7, %v11082_v13, %v4586_v9  ;;  %v11068_v25 = vld [vmem:[%s12964_s15 + $0x78] sm:$0xe] }
 0x13c   : > { %v1742_v23 = vadd.f32 %v12001_v16, %v14189_v30  ;;  %v4600_v59 = vrot.slane %v14251_v54, 5  ;;  %v11084_v49 = vrot.slane %v11068_v25, 9  ;;  %v4603_v24 = vrot.slane %v14259_v40, 5  ;;  %v17864_v25 = vld [vmem:[#allocation9_spill] sm:$0xff] }
 0x13d   : > { %12216 = vmatmul.mubr.msk.bf16.gmra.mxu0 %vm780_vm3, %v11099_v60  ;;  %v1625_v55 = vpop.f32.mrf.mxu0  ;;  %v2014_v18 = vpop.f32.mrf.mxu1  ;;  %v4594_v26 = vsel %vm13263_vm7, %v11083_v50, %v4593_v48  ;;  %v4595_v12 = vrot.slane %v4593_v48, 4  ;;  %v4590_v30 = vsel %vm13263_vm7, %v4588_v14, %v4589_v3  ;;  %v4614_v3 = vrot.slane %v14293_v29, 5 }
 0x13e   : > { %12219 = vmatprep.mubr.msk.bf16.mxu0 %vm780_vm3, %v11100_v21  ;;  %v1740_v45 = vadd.f32 %v1625_v55, %v14198_v4  ;;  %v14534_v51 = vadd.f32 %v12037_v42, %v1742_v23  ;;  %v11102_v4 = vcombine.low %v4587_v43, %v4590_v30  ;;  %v4602_v58 = vrot.slane %v4600_v59, 4  ;;  %v11069_v21 = vld [vmem:[%s12964_s15 + $0x84] sm:$0xe]  ;;  %v17862_v43 = vld [vmem:[#allocation8_spill] sm:$0xff] }
 0x13f   : > { %v12002_v5 = vpop.f32.mrf.mxu0  ;;  %v12042_v56 = vpop.f32.mrf.mxu1  ;;  %v4597_v38 = vsel %vm13263_vm7, %v4595_v12, %v4596_v63  ;;  %v11085_v14 = vrot.slane %v11069_v21, 9  ;;  %v4616_v12 = vrot.slane %v4614_v3, 4 }
 0x140   : > { %v1743_v53 = vadd.f32 %v12002_v5, %v14205_v41  ;;  %v14543_v19 = vadd.f32 %v1998_v27, %v1740_v45  ;;  %v11103_v11 = vcombine.low %v4594_v26, %v4597_v38  ;;  %v4604_v40 = vsel %vm13263_vm7, %v4602_v58, %v4603_v24  ;;  %v17863_v45 = vld [vmem:[#allocation13_spill] sm:$0xff]  ;;  %v17866_v58 = vld [vmem:[#allocation10_spill] sm:$0xff] }
 0x141   : > { %v1628_v2 = vpop.f32.mrf.mxu0  ;;  %v14545_v42 = vpop.f32.mrf.mxu1 }
 0x142   : > { %v14548_v13 = vadd.f32 %v1628_v2, %v14213_v47  ;;  %v14550_v54 = vadd.f32 %v12038_v35, %v1743_v53  ;;  %v4601_v47 = vsel %vm13263_vm7, %v11084_v49, %v4600_v59  ;;  %v4607_v35 = vrot.slane %v14271_v57, 5  ;;  %v11071_v2 = vld [vmem:[%s12964_s15 + $0x9c] sm:$0xe] }
 0x143   : > { %v12005_v60 = vpop.f32.mrf.mxu0  ;;  %v12045_v41 = vpop.f32.mrf.mxu1  ;;  %v11104_v23 = vcombine.low %v4601_v47, %v4604_v40 }
 0x144   : > { %v1746_v27 = vadd.f32 %v12005_v60, %v14223_v0  ;;  %v11070_v0 = vld [vmem:[%s12964_s15 + $0x90] sm:$0xe] }
 0x145   : > { %12220 = vmatmul.mubr.msk.bf16.gmra.mxu0 %vm780_vm3, %v11101_v17  ;;  %v1641_v39 = vpop.f32.mrf.mxu0  ;;  %v2030_v22 = vpop.f32.mrf.mxu1  ;;  %v11086_v55 = vrot.slane %v11070_v0, 9 }
 0x146   : > { %12223 = vmatprep.mubr.msk.bf16.mxu0 %vm780_vm3, %v11102_v4  ;;  %v1744_v15 = vadd.f32 %v1641_v39, %v14234_v7  ;;  %v14561_v9 = vadd.f32 %v12041_v31, %v1746_v27  ;;  %v4609_v7 = vrot.slane %v4607_v35, 4  ;;  %v4610_v31 = vrot.slane %v14280_v46, 5  ;;  %v17865_v4 = vld [vmem:[#allocation17_spill] sm:$0xff]  ;;  %v11072_v27 = vld [vmem:[%s12964_s15 + $0xa8] sm:$0xe] }
 0x147   : > { %v12006_v17 = vpop.f32.mrf.mxu0  ;;  %v12046_v50 = vpop.f32.mrf.mxu1  ;;  %v4608_v46 = vsel %vm13263_vm7, %v11085_v14, %v4607_v35  ;;  %v4615_v53 = vsel %vm13263_vm7, %v11086_v55, %v4614_v3  ;;  %v4621_v49 = vrot.slane %v17865_v4, 5  ;;  %v17867_v39 = vld [vmem:[#allocation21_spill] sm:$0xff]  ;;  %v17870_v55 = vld [vmem:[#allocation12_spill] sm:$0xff]  ;;  %v17873_v4 = vld [vmem:[#allocation26_spill] sm:$0xff] }
 0x148   : > { %v1747_v63 = vadd.f32 %v12006_v17, %v14242_v10  ;;  %v14568_v16 = vadd.f32 %v2014_v18, %v1744_v15  ;;  %v4617_v10 = vrot.slane %v17863_v45, 5  ;;  %v4628_v47 = vrot.slane %v17867_v39, 5  ;;  %v17868_v15 = vld [vmem:[#allocation11_spill] sm:$0xff] }
 0x149   : > { %v1644_v48 = vpop.f32.mrf.mxu0  ;;  %v14570_v57 = vpop.f32.mrf.mxu1  ;;  %v11087_v17 = vrot.slane %v11071_v2, 9 }
 0x14a   : > { %v14574_v26 = vadd.f32 %v1644_v48, %v17862_v43  ;;  %v14576_v29 = vadd.f32 %v12042_v56, %v1747_v63  ;;  %v4611_v56 = vsel %vm13263_vm7, %v4609_v7, %v4610_v31  ;;  %v11088_v31 = vrot.slane %v11072_v27, 9 }
 0x14b   : > { %v12009_v18 = vpop.f32.mrf.mxu0  ;;  %v12049_v30 = vpop.f32.mrf.mxu1  ;;  %v11105_v3 = vcombine.low %v4608_v46, %v4611_v56  ;;  %v4630_v45 = vrot.slane %v4628_v47, 4  ;;  %v4622_v56 = vsel %vm13263_vm7, %v11087_v17, %v4621_v49  ;;  %v11074_v17 = vld [vmem:[%s12964_s15 + $0xc0] sm:$0xe] }
 0x14c   : > { %v1750_v59 = vadd.f32 %v12009_v18, %v17864_v25  ;;  %v4629_v2 = vsel %vm13263_vm7, %v11088_v31, %v4628_v47 }
 0x14d   : > { %12224 = vmatmul.mubr.msk.bf16.gmra.mxu0 %vm780_vm3, %v11103_v11  ;;  %v1657_v5 = vpop.f32.mrf.mxu0  ;;  %v2046_v38 = vpop.f32.mrf.mxu1  ;;  %v4618_v11 = vsel %vm13263_vm7, %v4616_v12, %v4617_v10  ;;  %v17871_v10 = vld [vmem:[#allocation23_spill] sm:$0xff] }
 0x14e   : > { %12227 = vmatprep.mubr.msk.bf16.mxu0 %vm780_vm3, %v11104_v23  ;;  %v1748_v24 = vadd.f32 %v1657_v5, %v17866_v58  ;;  %v14591_v60 = vadd.f32 %v12045_v41, %v1750_v59  ;;  %v11106_v14 = vcombine.low %v4615_v53, %v4618_v11  ;;  %v4623_v41 = vrot.slane %v4621_v49, 4  ;;  %v17869_v23 = vld [vmem:[#allocation19_spill] sm:$0xff] }
 0x14f   : > { %v12010_v21 = vpop.f32.mrf.mxu0  ;;  %v12050_v35 = vpop.f32.mrf.mxu1  ;;  %v4624_v7 = vrot.slane %v17869_v23, 5  ;;  %v17872_v59 = vld [vmem:[#allocation15_spill] sm:$0xff]  ;;  %v4635_v58 = vrot.slane %v17873_v4, 5 }
 0x150   : > { %v1751_v40 = vadd.f32 %v12010_v21, %v17868_v15  ;;  %v14598_v0 = vadd.f32 %v2030_v22, %v1748_v24  ;;  %v4631_v22 = vrot.slane %v17871_v10, 5  ;;  %v17874_v24 = vld [vmem:[#allocation16_spill] sm:$0xff]  ;;  %v11073_v21 = vld [vmem:[%s12964_s15 + $0xb4] sm:$0xe]  ;;  %v17875_v15 = vld [vmem:[#allocation30_spill] sm:$0xff] }
 0x151   : > { %v1660_v63 = vpop.f32.mrf.mxu0  ;;  %v14600_v48 = vpop.f32.mrf.mxu1  ;;  %v17877_v10 = vld [vmem:[#allocation27_spill] sm:$0xff] }
 0x152   : > { %v14604_v43 = vadd.f32 %v1660_v63, %v17870_v55  ;;  %v14606_v12 = vadd.f32 %v12046_v50, %v1751_v40  ;;  %v4625_v50 = vsel %vm13263_vm7, %v4623_v41, %v4624_v7  ;;  %v4632_v39 = vsel %vm13263_vm7, %v4630_v45, %v4631_v22  ;;  %v17876_v63 = vld [vmem:[#allocation18_spill] sm:$0xff] }
 0x153   : > { %v12013_v18 = vpop.f32.mrf.mxu0  ;;  %v12053_v25 = vpop.f32.mrf.mxu1  ;;  %v4642_v40 = vrot.slane %v17875_v15, 5  ;;  %v11107_v47 = vcombine.low %v4622_v56, %v4625_v50  ;;  %v11108_v7 = vcombine.low %v4629_v2, %v4632_v39  ;;  %v4637_v55 = vrot.slane %v4635_v58, 4  ;;  %v17880_v15 = vld [vmem:[#allocation25_spill] sm:$0xff] }
 0x154   : > { %v1754_v5 = vadd.f32 %v12013_v18, %v17872_v59  ;;  %v4638_v45 = vrot.slane %v17877_v10, 5  ;;  %v11090_v18 = vrot.slane %v11074_v17, 9  ;;  %v4649_v39 = vrot.slane %v14409_v20, 5 }
 0x155   : > { %12228 = vmatmul.mubr.msk.bf16.gmra.mxu0 %vm780_vm3, %v11105_v3  ;;  %v1673_v46 = vpop.f32.mrf.mxu0  ;;  %v2062_v53 = vpop.f32.mrf.mxu1  ;;  %v4644_v59 = vrot.slane %v4642_v40, 4 }
 0x156   : > { %12231 = vmatprep.mubr.msk.bf16.mxu0 %vm780_vm3, %v11106_v14  ;;  %v1752_v11 = vadd.f32 %v1673_v46, %v17874_v24  ;;  %v14620_v27 = vadd.f32 %v12049_v30, %v1754_v5  ;;  %v11089_v30 = vrot.slane %v11073_v21, 9  ;;  %v17878_v5 = vld [vmem:[#allocation33_spill] sm:$0xff]  ;;  %v17879_v24 = vld [vmem:[#allocation24_spill] sm:$0xff] }
 0x157   : > { %v12014_v49 = vpop.f32.mrf.mxu0  ;;  %v12054_v3 = vpop.f32.mrf.mxu1  ;;  %v4645_v46 = vrot.slane %v17878_v5, 5  ;;  %v12704_v21 = vld [vmem:[%s17791_s3 + $0x18] sm:$0xff]  }
 0x158   : > { %v1755_v14 = vadd.f32 %v12014_v49, %v17876_v63  ;;  %v14628_v41 = vadd.f32 %v2046_v38, %v1752_v11  ;;  %v4636_v2 = vsel %vm13263_vm7, %v11089_v30, %v4635_v58  ;;  %v4643_v63 = vsel %vm13263_vm7, %v11090_v18, %v4642_v40  ;;  %12243 = vmatprep.subr.bf16.mxu1 %v12704_v21  ;;  %v17881_v30 = vld [vmem:[#allocation28_spill] sm:$0xff] }
 0x159   : > { %v14630_v23 = vpop.f32.mrf.mxu0  ;;  %v14632_v31 = vpop.f32.mrf.mxu1  ;;  %v4646_v58 = vsel %vm13263_vm7, %v4644_v59, %v4645_v46  ;;  %12244 = vmatpush3.bf16.msra.mxu1 %v12704_v21  ;;  %v4651_v40 = vrot.slane %v4649_v39, 4  ;;  %v4652_v18 = vrot.slane %v14418_v33, 5 }
 0x15a   : > { %v14635_v22 = vadd.f32 %v12050_v35, %v1755_v14  ;;  %v4639_v35 = vsel %vm13263_vm7, %v4637_v55, %v4638_v45  ;;  %v11075_v14 = vld [vmem:[%s12964_s15 + $0xcc] sm:$0xe]  ;;  %s12782_s15 = scalar_lea.vmem %s10493_s29, 16 }
 0x15b   : > { %v12017_v4 = vpop.f32.mrf.mxu0  ;;  %v12057_v38 = vpop.f32.mrf.mxu1  ;;  %v11109_v10 = vcombine.low %v4636_v2, %v4639_v35  ;;  %v4653_v35 = vsel %vm13263_vm7, %v4651_v40, %v4652_v18  ;;  %p12783_p11 = scmp.ne.s32.totalorder %s10493_s29, %s12782_s15  ;;  %p12790_p1 = scmp.lt.s32.totalorder %s12788_s17, %s12782_s15 }
 0x15c   : > { %v1758_v56 = vadd.f32 %v12017_v4, %v17879_v24  ;;  %v11091_v4 = vrot.slane %v11075_v14, 9 }
 0x15d   : > { %12232 = vmatmul.mubr.msk.bf16.gmra.mxu0 %vm780_vm3, %v11107_v47  ;;  %v1689_v50 = vpop.f32.mrf.mxu0  ;;  %v2078_v11 = vpop.f32.mrf.mxu1  ;;  %p12784_p12 = pnand %p12783_p11, %p12926_p5  ;;  %p12791_p2 = por %p12790_p1, %p12789_p0 }
 0x15e   : > { %12235 = vmatprep.mubr.msk.bf16.mxu0 %vm780_vm3, %v11108_v7  ;;  %v1756_v49 = vadd.f32 %v1689_v50, %v17880_v15  ;;  %v14650_v17 = vadd.f32 %v12053_v25, %v1758_v56  ;;  %v11110_v25 = vcombine.low %v4643_v63, %v4646_v58  ;;  %v17882_v56 = vld [vmem:[#allocation32_spill] sm:$0xff]  ;;  %v4650_v2 = vsel %vm13263_vm7, %v11091_v4, %v4649_v39  ;;  %v17883_v15 = vld [vmem:[#allocation34_spill] sm:$0xff]  ;;  %v17884_v58 = vld [vmem:[#allocation35_spill] sm:$0xff] }
 0x15f   : > { %v12018_v47 = vpop.f32.mrf.mxu0  ;;  %v12058_v7 = vpop.f32.mrf.mxu1  ;;  %p12785_p13 = pneg %p12784_p12 }
 0x160   : > { %v1759_v20 = vadd.f32 %v12018_v47, %v17881_v30  ;;  %v14658_v55 = vadd.f32 %v2062_v53, %v1756_v49  ;;  %v11111_v30 = vcombine.low %v4650_v2, %v4653_v35 }
 0x161   : > { %v14660_v45 = vpop.f32.mrf.mxu0  ;;  %v14662_v5 = vpop.f32.mrf.mxu1  ;;  %p12792_p3 = pnand %p12791_p2, %p12785_p13 }
 0x162   : > { %v14665_v59 = vadd.f32 %v12054_v3, %v1759_v20 }
 0x163   : > { %v12021_v46 = vpop.f32.mrf.mxu0  ;;  %v12061_v24 = vpop.f32.mrf.mxu1 }
 0x164   : > { %v1762_v50 = vadd.f32 %v12021_v46, %v17882_v56 }
 0x165   : > { %12236 = vmatmul.mubr.msk.bf16.gmra.mxu0 %vm780_vm3, %v11109_v10  ;;  %v1705_v53 = vpop.f32.mrf.mxu0  ;;  %v2094_v21 = vpop.f32.mrf.mxu1 }
 0x166   : > { %12239 = vmatprep.mubr.msk.bf16.mxu0 %vm780_vm3, %v11110_v25  ;;  %v1760_v33 = vadd.f32 %v1705_v53, %v17883_v15  ;;  %v14675_v3 = vadd.f32 %v12057_v38, %v1762_v50 }
 0x167   : > { %v12022_v49 = vpop.f32.mrf.mxu0  ;;  %v12062_v63 = vpop.f32.mrf.mxu1 }
 0x168   : > { %v1763_v14 = vadd.f32 %v12022_v49, %v17884_v58  ;;  %v14678_v47 = vadd.f32 %v2078_v11, %v1760_v33 }
 0x169   : > { %v14680_v20 = vpop.f32.mrf.mxu0  ;;  %v14682_v10 = vpop.f32.mrf.mxu1 }
 0x16a   : > { %v14684_v39 = vadd.f32 %v12058_v7, %v1763_v14 }
 0x16b   : > { %v12025_v25 = vpop.f32.mrf.mxu0  ;;  %v14686_v4 = vpop.f32.mrf.mxu1 }
 0x16c   : > { %v1766_v40 = vadd.f32 %v12025_v25, %v14439_v1 }
 0x16d   : > { %12240 = vmatmul.mubr.msk.bf16.gmra.mxu0 %vm780_vm3, %v11111_v30  ;;  %v1721_v38 = vpop.f32.mrf.mxu0  ;;  %v14690_v18 = vpop.f32.mrf.mxu1  ;;  %vm10477_vm3 = vcmask 40960  }
 0x16e   : > { %v1764_v11 = vadd.f32 %v1721_v38, %v14446_v28  ;;  %v14693_v46 = vadd.f32 %v12061_v24, %v1766_v40 }
 0x16f   : > { %v12026_v56 = vpop.f32.mrf.mxu0  ;;  %v14695_v50 = vpop.f32.mrf.mxu1 }
 0x170   : > { %17885 = vst [vmem:[#allocation8_spill] sm:$0xff] %v14695_v50  ;;  %v1767_v7 = vadd.f32 %v12026_v56, %v14459_v44  ;;  %v14698_v53 = vadd.f32 %v2094_v21, %v1764_v11  ;;  %v12844_v11 = vmov 0  }
 0x171   : > { %v14700_v2 = vpop.f32.mrf.mxu0  ;;  %v14702_v35 = vpop.f32.mrf.mxu1  ;;  %5025 = vst.msk [vmem:[#allocation2 + $0x18] sm:$0xf] %vm5017_vm8, %v12844_v11  ;;  %5018 = vst.msk [vmem:[#allocation2] sm:$0xf] %vm5017_vm8, %v12844_v11 }
 0x172   : > { %17886 = vst [vmem:[#allocation13_spill] sm:$0xff] %v14702_v35  ;;  %v14704_v1 = vadd.f32 %v12062_v63, %v1767_v7  ;;  %5019 = vst.msk [vmem:[#allocation2 + $0x4] sm:$0xf] %vm5017_vm8, %v12844_v11 }
 0x173   : > { %v12069_v15 = vpop.f32.mrf.mxu0  ;;  %v14706_v33 = vpop.f32.mrf.mxu1  ;;  %5022 = vst.msk [vmem:[#allocation2 + $0xc] sm:$0xf] %vm5017_vm8, %v12844_v11  ;;  %5023 = vst.msk [vmem:[#allocation2 + $0x10] sm:$0xf] %vm5017_vm8, %v12844_v11 }
 0x174   : > { %17887 = vst [vmem:[#allocation9_spill] sm:$0xff] %v14706_v33  ;;  %v14709_v28 = vadd.f32 %v12069_v15, %v14495_v8  ;;  %5026 = vst.msk [vmem:[#allocation2 + $0x1c] sm:$0xf] %vm5017_vm8, %v12844_v11 }
 0x175   : > { %v2722_v24 = vpop.f32.mrf.mxu0  ;;  %v14711_v49 = vpop.f32.mrf.mxu1  ;;  %5028 = vst.msk [vmem:[#allocation2 + $0x24] sm:$0xf] %vm5017_vm8, %v12844_v11  ;;  %5029 = vst.msk [vmem:[#allocation2 + $0x28] sm:$0xf] %vm5017_vm8, %v12844_v11 }
 0x176   : > { %17888 = vst [vmem:[#allocation17_spill] sm:$0xff] %v14711_v49  ;;  %v14714_v58 = vadd.f32 %v2722_v24, %v14508_v37  ;;  %5031 = vst.msk [vmem:[#allocation2 + $0x30] sm:$0xf] %vm5017_vm8, %v12844_v11 }
 0x177   : > { %v12070_v44 = vpop.f32.mrf.mxu0  ;;  %v14716_v21 = vpop.f32.mrf.mxu1  ;;  %5032 = vst.msk [vmem:[#allocation2 + $0x34] sm:$0xf] %vm5017_vm8, %v12844_v11  ;;  %5034 = vst.msk [vmem:[#allocation2 + $0x3c] sm:$0xf] %vm5017_vm8, %v12844_v11 }
 0x178   : > { %17889 = vst [vmem:[#allocation10_spill] sm:$0xff] %v14716_v21  ;;  %v14719_v14 = vadd.f32 %v12070_v44, %v14522_v52  ;;  %5035 = vst.msk [vmem:[#allocation2 + $0x40] sm:$0xf] %vm5017_vm8, %v12844_v11 }
 0x179   : > { %v14721_v63 = vpop.f32.mrf.mxu0  ;;  %v14723_v30 = vpop.f32.mrf.mxu1  ;;  %5037 = vst.msk [vmem:[#allocation2 + $0x48] sm:$0xf] %vm5017_vm8, %v12844_v11  ;;  %5038 = vst.msk [vmem:[#allocation2 + $0x4c] sm:$0xf] %vm5017_vm8, %v12844_v11 }
 0x17a   : > { %17890 = vst [vmem:[#allocation21_spill] sm:$0xff] %v14719_v14  ;;  %17891 = vst [vmem:[#allocation11_spill] sm:$0xff] %v14723_v30 }
 0x17b   : > { %v12073_v25 = vpop.f32.mrf.mxu0  ;;  %v14725_v40 = vpop.f32.mrf.mxu1  ;;  %5040 = vst.msk [vmem:[#allocation2 + $0x54] sm:$0xf] %vm5017_vm8, %v12844_v11  ;;  %5041 = vst.msk [vmem:[#allocation2 + $0x58] sm:$0xf] %vm5017_vm8, %v12844_v11 }
 0x17c   : > { %17892 = vst [vmem:[#allocation19_spill] sm:$0xff] %v14725_v40  ;;  %v14728_v8 = vadd.f32 %v12073_v25, %v14534_v51  ;;  %5043 = vst.msk [vmem:[#allocation2 + $0x60] sm:$0xf] %vm5017_vm8, %v12844_v11 }
 0x17d   : > { %v2738_v38 = vpop.f32.mrf.mxu0  ;;  %v14730_v37 = vpop.f32.mrf.mxu1  ;;  %5044 = vst.msk [vmem:[#allocation2 + $0x64] sm:$0xf] %vm5017_vm8, %v12844_v11  ;;  %5046 = vst.msk [vmem:[#allocation2 + $0x6c] sm:$0xf] %vm5017_vm8, %v12844_v11 }
 0x17e   : > { %17893 = vst [vmem:[#allocation12_spill] sm:$0xff] %v14728_v8  ;;  %17894 = vst [vmem:[#allocation23_spill] sm:$0xff] %v14730_v37  ;;  %v14805_v52 = vadd.f32 %v2738_v38, %v14543_v19  ;;  %v12705_v37 = vld [vmem:[%s17791_s3 + $0x10] sm:$0xff]  }
 0x17f   : > { %5047 = vst.msk [vmem:[#allocation2 + $0x70] sm:$0xf] %vm5017_vm8, %v12844_v11  ;;  %5049 = vst.msk [vmem:[#allocation2 + $0x78] sm:$0xf] %vm5017_vm8, %v12844_v11  ;;  %v12074_v51 = vpop.f32.mrf.mxu0  ;;  %v14807_v56 = vpop.f32.mrf.mxu1  ;;  %12245 = vmatprep.subr.bf16.mxu1 %v12705_v37 }
 0x180   : > { %5050 = vst.msk [vmem:[#allocation2 + $0x7c] sm:$0xf] %vm5017_vm8, %v12844_v11  ;;  %5052 = vst.msk [vmem:[#allocation2 + $0x84] sm:$0xf] %vm5017_vm8, %v12844_v11  ;;  %v14810_v7 = vadd.f32 %v12074_v51, %v14550_v54  ;;  %12246 = vmatpush3.bf16.msra.mxu1 %v12705_v37 }
 0x181   : > { %5053 = vst.msk [vmem:[#allocation2 + $0x88] sm:$0xf] %vm5017_vm8, %v12844_v11  ;;  %5055 = vst.msk [vmem:[#allocation2 + $0x90] sm:$0xf] %vm5017_vm8, %v12844_v11  ;;  %v14812_v15 = vpop.f32.mrf.mxu0  ;;  %v14814_v24 = vpop.f32.mrf.mxu1 }
 0x182   : > { %5056 = vst.msk [vmem:[#allocation2 + $0x94] sm:$0xf] %vm5017_vm8, %v12844_v11  ;;  %5058 = vst.msk [vmem:[#allocation2 + $0x9c] sm:$0xf] %vm5017_vm8, %v12844_v11 }
 0x183   : > { %5059 = vst.msk [vmem:[#allocation2 + $0xa0] sm:$0xf] %vm5017_vm8, %v12844_v11  ;;  %5061 = vst.msk [vmem:[#allocation2 + $0xa8] sm:$0xf] %vm5017_vm8, %v12844_v11  ;;  %v12077_v44 = vpop.f32.mrf.mxu0  ;;  %v12117_v25 = vpop.f32.mrf.mxu1 }
 0x184   : > { %5062 = vst.msk [vmem:[#allocation2 + $0xac] sm:$0xf] %vm5017_vm8, %v12844_v11  ;;  %5064 = vst.msk [vmem:[#allocation2 + $0xb4] sm:$0xf] %vm5017_vm8, %v12844_v11  ;;  %v14817_v34 = vadd.f32 %v12077_v44, %v14561_v9 }
 0x185   : > { %5065 = vst.msk [vmem:[#allocation2 + $0xb8] sm:$0xf] %vm5017_vm8, %v12844_v11  ;;  %5067 = vst.msk [vmem:[#allocation2 + $0xc0] sm:$0xf] %vm5017_vm8, %v12844_v11  ;;  %v2754_v19 = vpop.f32.mrf.mxu0  ;;  %v3254_v54 = vpop.f32.mrf.mxu1 }
 0x186   : > { %5068 = vst.msk [vmem:[#allocation2 + $0xc4] sm:$0xf] %vm5017_vm8, %v12844_v11  ;;  %5070 = vst.msk [vmem:[#allocation2 + $0xcc] sm:$0xf] %vm5017_vm8, %v12844_v11  ;;  %v14856_v9 = vadd.f32 %v2754_v19, %v14568_v16 }
 0x187   : > { %5071 = vst.msk [vmem:[#allocation2 + $0xd0] sm:$0xf] %vm5017_vm8, %v12844_v11  ;;  %17895 = vst [vmem:[#allocation15_spill] sm:$0xff] %v14805_v52  ;;  %v12078_v38 = vpop.f32.mrf.mxu0  ;;  %v14858_v51 = vpop.f32.mrf.mxu1 }
 0x188   : > { %17896 = vst [vmem:[#allocation26_spill] sm:$0xff] %v14807_v56  ;;  %17897 = vst [vmem:[#allocation16_spill] sm:$0xff] %v14810_v7  ;;  %v14861_v44 = vadd.f32 %v12078_v38, %v14576_v29 }
 0x189   : > { %17898 = vst [vmem:[#allocation30_spill] sm:$0xff] %v14814_v24  ;;  %17899 = vst [vmem:[#allocation18_spill] sm:$0xff] %v14817_v34  ;;  %v14863_v24 = vpop.f32.mrf.mxu0  ;;  %v14865_v56 = vpop.f32.mrf.mxu1 }
 0x18a   : > { %5027 = vst.msk [vmem:[#allocation2 + $0x20] sm:$0x1] %vm5020_vm9, %v12844_v11  ;;  %5021 = vst.msk [vmem:[#allocation2 + $0x8] sm:$0x1] %vm5020_vm9, %v12844_v11 }
 0x18b   : > { %5024 = vst.msk [vmem:[#allocation2 + $0x14] sm:$0x1] %vm5020_vm9, %v12844_v11  ;;  %5030 = vst.msk [vmem:[#allocation2 + $0x2c] sm:$0x1] %vm5020_vm9, %v12844_v11  ;;  %v12121_v40 = vpop.f32.mrf.mxu1 }
 0x18c   : > { %5033 = vst.msk [vmem:[#allocation2 + $0x38] sm:$0x1] %vm5020_vm9, %v12844_v11  ;;  %5036 = vst.msk [vmem:[#allocation2 + $0x44] sm:$0x1] %vm5020_vm9, %v12844_v11 }
 0x18d   : > { %5039 = vst.msk [vmem:[#allocation2 + $0x50] sm:$0x1] %vm5020_vm9, %v12844_v11  ;;  %5042 = vst.msk [vmem:[#allocation2 + $0x5c] sm:$0x1] %vm5020_vm9, %v12844_v11 }
 0x18e   : > { %5045 = vst.msk [vmem:[#allocation2 + $0x68] sm:$0x1] %vm5020_vm9, %v12844_v11  ;;  %5048 = vst.msk [vmem:[#allocation2 + $0x74] sm:$0x1] %vm5020_vm9, %v12844_v11 }
 0x18f   : > { %5051 = vst.msk [vmem:[#allocation2 + $0x80] sm:$0x1] %vm5020_vm9, %v12844_v11  ;;  %5054 = vst.msk [vmem:[#allocation2 + $0x8c] sm:$0x1] %vm5020_vm9, %v12844_v11 }
 0x190   : > { %5057 = vst.msk [vmem:[#allocation2 + $0x98] sm:$0x1] %vm5020_vm9, %v12844_v11  ;;  %5060 = vst.msk [vmem:[#allocation2 + $0xa4] sm:$0x1] %vm5020_vm9, %v12844_v11 }
 0x191   : > { %5063 = vst.msk [vmem:[#allocation2 + $0xb0] sm:$0x1] %vm5020_vm9, %v12844_v11  ;;  %5066 = vst.msk [vmem:[#allocation2 + $0xbc] sm:$0x1] %vm5020_vm9, %v12844_v11 }
 0x192   : > { %5069 = vst.msk [vmem:[#allocation2 + $0xc8] sm:$0x1] %vm5020_vm9, %v12844_v11  ;;  %5072 = vst.msk [vmem:[#allocation2 + $0xd4] sm:$0x1] %vm5020_vm9, %v12844_v11  ;;  %v12081_v11 = vpop.f32.mrf.mxu0 }
 0x193   : > { %17900 = vst [vmem:[#allocation27_spill] sm:$0xff] %v14856_v9  ;;  %17901 = vst [vmem:[#allocation33_spill] sm:$0xff] %v14858_v51  ;;  %v2863_v16 = vadd.f32 %v12081_v11, %v14591_v60  ;;  %v3270_v9 = vpop.f32.mrf.mxu1 }
 0x194   : > { %17902 = vst [vmem:[#allocation24_spill] sm:$0xff] %v14861_v44  ;;  %17903 = vst [vmem:[#allocation25_spill] sm:$0xff] %v14865_v56  ;;  %v2770_v19 = vpop.f32.mrf.mxu0  ;;  %v12706_v56 = vld [vmem:[%s17791_s3 + $0x8] sm:$0xff]  }
 0x195   : > { %v2861_v51 = vadd.f32 %v2770_v19, %v14598_v0  ;;  %v14872_v29 = vadd.f32 %v12117_v25, %v2863_v16  ;;  %v12122_v44 = vpop.f32.mrf.mxu1  ;;  %12279 = vmatprep.subr.bf16.mxu0 %v12706_v56  ;;  %v12707_v25 = vld [vmem:[%s17791_s3] sm:$0xff]  }
 0x196   : > { %v12082_v38 = vpop.f32.mrf.mxu0  ;;  %12280 = vmatpush3.bf16.msra.mxu0 %v12706_v56 }
 0x197   : > { %v14878_v34 = vadd.f32 %v12082_v38, %v14606_v12  ;;  %v14880_v30 = vadd.f32 %v3254_v54, %v2861_v51  ;;  %v14884_v60 = vpop.f32.mrf.mxu1  ;;  %12281 = vmatprep.subr.bf16.mxu0 %v12707_v25  ;;  %v5594_v12 = vld [vmem:[#allocation2] sm:$0xf]  ;;  %v5595_v54 = vld [vmem:[#allocation2 + $0x4] sm:$0xf] }
 0x198   : > { %v14882_v21 = vpop.f32.mrf.mxu0  ;;  %17905 = vst [vmem:[#allocation32_spill] sm:$0xff] %v14884_v60 }
 0x199   : > { %17904 = vst [vmem:[#allocation28_spill] sm:$0xff] %v14878_v34  ;;  %v12125_v37 = vpop.f32.mrf.mxu1  ;;  %v11201_v34 = vcombine.low %v5594_v12, %v5595_v54 }
 0x19a   : > { %v12085_v0 = vpop.f32.mrf.mxu0  ;;  %12282 = vmatpush3.bf16.msra.mxu0 %v12707_v25 }
 0x19b   : > { %v2867_v11 = vadd.f32 %v12085_v0, %v14620_v27  ;;  %v3286_v19 = vpop.f32.mrf.mxu1  ;;  %12283 = vmatprep.mubr.msk.bf16.mxu0 %vm6095_vm10, %v11201_v34 }
 0x19c   : > { %v2786_v16 = vpop.f32.mrf.mxu0 }
 0x19d   : > { %v2865_v51 = vadd.f32 %v2786_v16, %v14628_v41  ;;  %v14891_v38 = vadd.f32 %v12121_v40, %v2867_v11  ;;  %v12126_v56 = vpop.f32.mrf.mxu1 }
 0x19e   : > { %v12086_v60 = vpop.f32.mrf.mxu0 }
 0x19f   : > { %v2868_v7 = vadd.f32 %v12086_v60, %v14635_v22  ;;  %v14894_v49 = vadd.f32 %v3270_v9, %v2865_v51  ;;  %v14898_v27 = vpop.f32.mrf.mxu1 }
 0x1a0   : > { %v14896_v52 = vpop.f32.mrf.mxu0  ;;  %17907 = vst [vmem:[#allocation35_spill] sm:$0xff] %v14898_v27 }
 0x1a1   : > { %17906 = vst [vmem:[#allocation34_spill] sm:$0xff] %v14896_v52  ;;  %v14901_v0 = vadd.f32 %v12122_v44, %v2868_v7  ;;  %v12129_v40 = vpop.f32.mrf.mxu1  ;;  %v5647_v7 = vshrl.u32 %v5594_v12, 16 }
 0x1a2   : > { %v12089_v41 = vpop.f32.mrf.mxu0 }
 0x1a3   : > { %v2871_v25 = vadd.f32 %v12089_v41, %v14650_v17  ;;  %v3302_v16 = vpop.f32.mrf.mxu1  ;;  %v5650_v17 = vshll.u32 %v5594_v12, 16 }
 0x1a4   : > { %v2802_v11 = vpop.f32.mrf.mxu0 }
 0x1a5   : > { %v2869_v33 = vadd.f32 %v2802_v11, %v14658_v55  ;;  %v14905_v8 = vadd.f32 %v12125_v37, %v2871_v25  ;;  %v12130_v9 = vpop.f32.mrf.mxu1  ;;  %v5660_v37 = vshrl.u32 %v5595_v54, 16  ;;  %v5649_v11 = vrot.slane %v5647_v7, 4 }
 0x1a6   : > { %v12090_v22 = vpop.f32.mrf.mxu0 }
 0x1a7   : > { %v2872_v60 = vadd.f32 %v12090_v22, %v14665_v59  ;;  %v14908_v51 = vadd.f32 %v3286_v19, %v2869_v33  ;;  %v14912_v34 = vpop.f32.mrf.mxu1  ;;  %v5652_v19 = vrot.slane %v5650_v17, 5  ;;  %v5656_v22 = vshll.u32 %v5595_v54, 16 }
 0x1a8   : > { %v14910_v27 = vpop.f32.mrf.mxu0  ;;  %17909 = vst [vmem:[#allocation39_spill] sm:$0xff] %v14912_v34 }
 0x1a9   : > { %17908 = vst [vmem:[#allocation38_spill] sm:$0xff] %v14910_v27  ;;  %v14914_v44 = vadd.f32 %v12126_v56, %v2872_v60  ;;  %v12133_v55 = vpop.f32.mrf.mxu1  ;;  %v5658_v60 = vrot.slane %v5656_v22, 5  ;;  %v5662_v27 = vrot.slane %v5660_v37, 4  ;;  %v5653_v7 = vor.u32 %v5652_v19, %v5649_v11 }
 0x1aa   : > { %v12093_v41 = vpop.f32.mrf.mxu0 }
 0x1ab   : > { %v2875_v35 = vadd.f32 %v12093_v41, %v14675_v3  ;;  %v3318_v33 = vpop.f32.mrf.mxu1  ;;  %v5630_v41 = vld [vmem:[#allocation2 + $0x8] sm:$0x1] }
 0x1ac   : > { %v2818_v25 = vpop.f32.mrf.mxu0  ;;  %v5666_v17 = vshll.u32 %v5630_v41, 16 }
 0x1ad   : > { %v2873_v50 = vadd.f32 %v2818_v25, %v14678_v47  ;;  %v14918_v59 = vadd.f32 %v12129_v40, %v2875_v35  ;;  %v12134_v12 = vpop.f32.mrf.mxu1  ;;  %v5663_v47 = vor.u32 %v5662_v27, %v5658_v60  ;;  %v5654_v25 = vrot.slane %v5653_v7, 4 }
 0x1ae   : > { %v12094_v14 = vpop.f32.mrf.mxu0 }
 0x1af   : > { %v2876_v34 = vadd.f32 %v12094_v14, %v14684_v39  ;;  %v14921_v56 = vadd.f32 %v3302_v16, %v2873_v50  ;;  %v14927_v40 = vpop.f32.mrf.mxu1  ;;  %v5664_v39 = vrot.slane %v5663_v47, 4  ;;  %v5668_v14 = vrot.slane %v5666_v17, 5 }
 0x1b0   : > { %v14923_v3 = vpop.f32.mrf.mxu0  ;;  %17910 = vst [vmem:[#allocation40_spill] sm:$0xff] %v14927_v40 }
 0x1b1   : > { %v14925_v52 = vadd.f32 %v12130_v9, %v2876_v34  ;;  %v5659_v9 = vsel %vm12997_vm4, %v5654_v25, %v5658_v60  ;;  %v14935_v11 = vpop.f32.mrf.mxu1  ;;  %v5669_v27 = vsel %vm12997_vm4, %v5664_v39, %v5668_v14 }
 0x1b2   : > { %v12097_v35 = vpop.f32.mrf.mxu0  ;;  %17911 = vst [vmem:[#allocation41_spill] sm:$0xff] %v14935_v11  ;;  %v11167_v22 = vcombine.low %v5659_v9, %v5669_v27 }
 0x1b3   : > { %v2879_v54 = vadd.f32 %v12097_v35, %v14693_v46  ;;  %v14944_v7 = vpop.f32.mrf.mxu1 }
 0x1b4   : > { %v2834_v50 = vpop.f32.mrf.mxu0  ;;  %17912 = vst [vmem:[#allocation42_spill] sm:$0xff] %v14944_v7  ;;  %12247 = vmatprep.mubr.msk.bf16.mxu1 %vm6095_vm10, %v11167_v22 }
 0x1b5   : > { %v2877_v16 = vadd.f32 %v2834_v50, %v14698_v53  ;;  %v14931_v37 = vadd.f32 %v12133_v55, %v2879_v54  ;;  %v12712_v55 = vld [vmem:[%s17791_s3 + $0x28] sm:$0xff]   ;;  %v14954_v47 = vpop.f32.mrf.mxu1 }
 0x1b6   : > { %v12098_v34 = vpop.f32.mrf.mxu0  ;;  %17913 = vst [vmem:[#allocation43_spill] sm:$0xff] %v14954_v47  ;;  %12315 = vmatprep.subr.bf16.mxu1 %v12712_v55 }
 0x1b7   : > { %v2880_v19 = vadd.f32 %v12098_v34, %v14704_v1  ;;  %v14940_v46 = vadd.f32 %v3318_v33, %v2877_v16  ;;  %v14958_v33 = vpop.f32.mrf.mxu1 }
 0x1b8   : > { %v14942_v41 = vpop.f32.mrf.mxu0  ;;  %17914 = vst [vmem:[#allocation44_spill] sm:$0xff] %v14958_v33 }
 0x1b9   : > { %v14946_v53 = vadd.f32 %v12134_v12, %v2880_v19 }
 0x1ba   : > { %v14952_v60 = vpop.f32.mrf.mxu0  ;;  %v14964_v12 = vpop.f32.mrf.mxu1 }
 0x1bb   : > { %17915 = vst [vmem:[#allocation45_spill] sm:$0xff] %v14964_v12 }
 0x1bc   : > { %v14956_v1 = vpop.f32.mrf.mxu0  ;;  %v14968_v25 = vpop.f32.mrf.mxu1 }
 0x1bd   : > { %17916 = vst [vmem:[#allocation46_spill] sm:$0xff] %v14968_v25 }
 0x1be   : > { %v14960_v35 = vpop.f32.mrf.mxu0  ;;  %v14972_v50 = vpop.f32.mrf.mxu1 }
 0x1bf   : > { %17917 = vst [vmem:[#allocation47_spill] sm:$0xff] %v14972_v50 }
 0x1c0   : > { %v14962_v17 = vpop.f32.mrf.mxu0  ;;  %v14976_v16 = vpop.f32.mrf.mxu1 }
 0x1c1   : > { %17918 = vst [vmem:[#allocation48_spill] sm:$0xff] %v14976_v16 }
 0x1c2   : > { %v14966_v54 = vpop.f32.mrf.mxu0 }
 0x1c3   : > { %v14982_v27 = vpop.f32.mrf.mxu1 }
 0x1c4   : > { %v14970_v39 = vpop.f32.mrf.mxu0  ;;  %17919 = vst [vmem:[#allocation49_spill] sm:$0xff] %v14982_v27 }
 0x1c5   : > { %v14986_v22 = vpop.f32.mrf.mxu1 }
 0x1c6   : > { %v14974_v14 = vpop.f32.mrf.mxu0  ;;  %17920 = vst [vmem:[#allocation50_spill] sm:$0xff] %v14986_v22 }
 0x1c7   : > { %v14990_v36 = vpop.f32.mrf.mxu1 }
 0x1c8   : > { %v14978_v9 = vpop.f32.mrf.mxu0  ;;  %17921 = vst [vmem:[#allocation51_spill] sm:$0xff] %v14990_v36 }
 0x1c9   : > { %v14994_v50 = vpop.f32.mrf.mxu1 }
 0x1ca   : > { %v14980_v34 = vpop.f32.mrf.mxu0  ;;  %17922 = vst [vmem:[#allocation52_spill] sm:$0xff] %v14994_v50 }
 0x1cc   : > { %v14984_v19 = vpop.f32.mrf.mxu0 }
 0x1cd   : > { %v15002_v27 = vpop.f32.mrf.mxu1 }
 0x1ce   : > { %v14988_v55 = vpop.f32.mrf.mxu0  ;;  %17925 = vst [vmem:[#allocation55_spill] sm:$0xff] %v15002_v27 }
 0x1cf   : > { %v15006_v22 = vpop.f32.mrf.mxu1 }
 0x1d0   : > { %v14992_v25 = vpop.f32.mrf.mxu0  ;;  %17927 = vst [vmem:[#allocation57_spill] sm:$0xff] %v15006_v22 }
 0x1d1   : > { %v15010_v36 = vpop.f32.mrf.mxu1 }
 0x1d2   : > { %v12153_v12 = vpop.f32.mrf.mxu0  ;;  %17929 = vst [vmem:[#allocation59_spill] sm:$0xff] %v15010_v36 }
 0x1d3   : > { %v14997_v16 = vadd.f32 %v12153_v12, %v14872_v29  ;;  %v15015_v29 = vpop.f32.mrf.mxu1 }
 0x1d4   : > { %v3627_v33 = vpop.f32.mrf.mxu0  ;;  %17931 = vst [vmem:[#allocation61_spill] sm:$0xff] %v15015_v29 }
 0x1d5   : > { %17923 = vst [vmem:[#allocation53_spill] sm:$0xff] %v14997_v16  ;;  %v15000_v47 = vadd.f32 %v3627_v33, %v14880_v30 }
 0x1d6   : > { %v15004_v7 = vpop.f32.mrf.mxu0 }
 0x1d7   : > { %17924 = vst [vmem:[#allocation54_spill] sm:$0xff] %v15000_v47  ;;  %17926 = vst [vmem:[#allocation56_spill] sm:$0xff] %v15004_v7  ;;  %v15020_v47 = vpop.f32.mrf.mxu1 }
 0x1d8   : > { %v15008_v11 = vpop.f32.mrf.mxu0  ;;  %17933 = vst [vmem:[#allocation63_spill] sm:$0xff] %v15020_v47  ;;  %v17942_v47 = vld [vmem:[#allocation22_spill] sm:$0xff] }
 0x1d9   : > { %17928 = vst [vmem:[#allocation58_spill] sm:$0xff] %v15008_v11  ;;  %v15027_v16 = vpop.f32.mrf.mxu1 }
 0x1da   : > { %v12157_v40 = vpop.f32.mrf.mxu0  ;;  %17936 = vst [vmem:[#allocation66_spill] sm:$0xff] %v15027_v16  ;;  %v17943_v16 = vld [vmem:[#allocation36_spill] sm:$0xff] }
 0x1db   : > { %v15013_v50 = vadd.f32 %v12157_v40, %v14891_v38  ;;  %v15029_v11 = vpop.f32.mrf.mxu1 }
 0x1dc   : > { %v3643_v12 = vpop.f32.mrf.mxu0  ;;  %17937 = vst [vmem:[#allocation67_spill] sm:$0xff] %v15029_v11 }
 0x1dd   : > { %17930 = vst [vmem:[#allocation60_spill] sm:$0xff] %v15013_v50  ;;  %v15018_v30 = vadd.f32 %v3643_v12, %v14894_v49  ;;  %v15034_v50 = vpop.f32.mrf.mxu1  ;;  %v17939_v12 = vld [vmem:[#allocation20_spill] sm:$0xff] }
 0x1de   : > { %v12158_v33 = vpop.f32.mrf.mxu0 }
 0x1df   : > { %17932 = vst [vmem:[#allocation62_spill] sm:$0xff] %v15018_v30  ;;  %v15023_v27 = vadd.f32 %v12158_v33, %v14901_v0  ;;  %v17940_v30 = vld [vmem:[#allocation14_spill] sm:$0xff] }
 0x1e0   : > { %v15025_v22 = vpop.f32.mrf.mxu0  ;;  %v1238_v0 = vadd.f32 %v17940_v30, %v17939_v12  ;;  %v15045_v11 = vpop.f32.mrf.mxu1 }
 0x1e1   : > { %17934 = vst [vmem:[#allocation64_spill] sm:$0xff] %v15023_v27  ;;  %17935 = vst [vmem:[#allocation65_spill] sm:$0xff] %v15025_v22  ;;  %v17941_v27 = vld [vmem:[#allocation29_spill] sm:$0xff]  ;;  %v17944_v22 = vld [vmem:[#allocation31_spill] sm:$0xff] }
 0x1e2   : > { %v12161_v36 = vpop.f32.mrf.mxu0  ;;  %v1254_v29 = vadd.f32 %v17942_v47, %v17941_v27  ;;  %v1270_v7 = vadd.f32 %v17944_v22, %v17943_v16  ;;  %v15057_v47 = vpop.f32.mrf.mxu1  ;;  %v2110_v16 = vadd.f32 %v14475_v6, %v14519_v61  ;;  %v2114_v22 = vadd.f32 %v14512_v62, %v14548_v13 }
 0x1e3   : > { %v15032_v38 = vadd.f32 %v12161_v36, %v14905_v8  ;;  %v17945_v8 = vld [vmem:[#allocation37_spill] sm:$0xff] }
 0x1e4   : > { %v3659_v40 = vpop.f32.mrf.mxu0  ;;  %v1757_v30 = vadd.f32 %v14660_v45, %v1254_v29  ;;  %v1761_v12 = vadd.f32 %v14680_v20, %v1270_v7  ;;  %v2118_v45 = vadd.f32 %v14545_v42, %v14574_v26  ;;  %v2122_v20 = vadd.f32 %v14570_v57, %v14604_v43 }
 0x1e5   : > { %17938 = vst [vmem:[#allocation68_spill] sm:$0xff] %v15032_v38  ;;  %v15037_v49 = vadd.f32 %v3659_v40, %v14908_v51  ;;  %v1286_v38 = vadd.f32 %v17945_v8, %v14466_v32  ;;  %v1753_v51 = vadd.f32 %v14630_v23, %v1238_v0  ;;  %v15064_v32 = vpop.f32.mrf.mxu1  ;;  %v2850_v6 = vadd.f32 %v14721_v63, %v2110_v16  ;;  %v17949_v0 = vld [vmem:[#allocation8_spill] sm:$0xff]  ;;  %v17953_v8 = vld [vmem:[#allocation15_spill] sm:$0xff]  ;;  %v17956_v16 = vld [vmem:[#allocation10_spill] sm:$0xff] }
 0x1e6   : > { %v12162_v33 = vpop.f32.mrf.mxu0  ;;  %v2134_v62 = vadd.f32 %v14662_v5, %v1761_v12  ;;  %v2854_v13 = vadd.f32 %v14812_v15, %v2114_v22  ;;  %v3335_v42 = vadd.f32 %v14686_v4, %v14709_v28  ;;  %v3333_v57 = vadd.f32 %v14690_v18, %v14714_v58  ;;  %v17946_v5 = vld [vmem:[#allocation34_spill] sm:$0xff]  ;;  %v17950_v28 = vld [vmem:[#allocation13_spill] sm:$0xff]  ;;  %v17951_v18 = vld [vmem:[#allocation12_spill] sm:$0xff] }
 0x1e7   : > { %v15048_v36 = vadd.f32 %v12162_v33, %v14914_v44  ;;  %v1765_v27 = vadd.f32 %v14700_v2, %v1286_v38  ;;  %v2126_v7 = vadd.f32 %v14600_v48, %v1753_v51  ;;  %v2130_v2 = vadd.f32 %v14632_v31, %v1757_v30  ;;  %v15087_v48 = vpop.f32.mrf.mxu1  ;;  %v17947_v15 = vld [vmem:[#allocation38_spill] sm:$0xff]  ;;  %v17952_v58 = vld [vmem:[#allocation9_spill] sm:$0xff] }
 0x1e8   : > { %v15053_v40 = vpop.f32.mrf.mxu0  ;;  %v2858_v26 = vadd.f32 %v14863_v24, %v2118_v45  ;;  %v2862_v31 = vadd.f32 %v14882_v21, %v2122_v20  ;;  %v3334_v33 = vadd.f32 %v17950_v28, %v2850_v6  ;;  %v3339_v24 = vadd.f32 %v17952_v58, %v17951_v18  ;;  %v17954_v51 = vld [vmem:[#allocation17_spill] sm:$0xff]  ;;  %v17955_v21 = vld [vmem:[#allocation16_spill] sm:$0xff]  ;;  %v17959_v45 = vld [vmem:[#allocation19_spill] sm:$0xff] }
 0x1e9   : > { %v2138_v29 = vadd.f32 %v14682_v10, %v1765_v27  ;;  %v2866_v63 = vadd.f32 %v17946_v5, %v2126_v7  ;;  %v17948_v10 = vld [vmem:[#allocation21_spill] sm:$0xff]  ;;  %v3337_v30 = vadd.f32 %v17954_v51, %v17953_v8  ;;  %v3340_v27 = vadd.f32 %v17956_v16, %v17955_v21  ;;  %v17961_v6 = vld [vmem:[#allocation23_spill] sm:$0xff]  ;;  %v17963_v5 = vld [vmem:[#allocation26_spill] sm:$0xff] }
 0x1ea   : > { %v12165_v44 = vpop.f32.mrf.mxu0  ;;  %v3336_v4 = vadd.f32 %v17949_v0, %v17948_v10  ;;  %v2874_v7 = vadd.f32 %v14923_v3, %v2134_v62  ;;  %v17964_v10 = vld [vmem:[#allocation30_spill] sm:$0xff]  ;;  %v17965_v28 = vld [vmem:[#allocation28_spill] sm:$0xff]  ;;  %v17966_v18 = vld [vmem:[#allocation33_spill] sm:$0xff]  ;;  %v15117_v8 = vpop.f32.mrf.mxu1 }
 0x1eb   : > { %v15067_v23 = vadd.f32 %v12165_v44, %v14918_v59  ;;  %v17957_v44 = vld [vmem:[#allocation11_spill] sm:$0xff]  ;;  %v3342_v0 = vadd.f32 %v17964_v10, %v2858_v26  ;;  %v3348_v58 = vadd.f32 %v17966_v18, %v17965_v28  ;;  %v17968_v16 = vld [vmem:[#allocation32_spill] sm:$0xff]  ;;  %v3706_v26 = vadd.f32 %v14956_v1, %v3333_v57  ;;  %v17976_v28 = vld [vmem:[#allocation45_spill] sm:$0xff] }
 0x1ec   : > { %v3675_v61 = vpop.f32.mrf.mxu0  ;;  %v3338_v22 = vadd.f32 %v17957_v44, %v2854_v13  ;;  %v17967_v13 = vld [vmem:[#allocation25_spill] sm:$0xff]  ;;  %v3350_v44 = vadd.f32 %v17968_v16, %v2866_v63  ;;  %v17970_v10 = vld [vmem:[#allocation39_spill] sm:$0xff]  ;;  %v3707_v63 = vadd.f32 %v14962_v17, %v3334_v33 }
 0x1ed   : > { %v15079_v59 = vadd.f32 %v3675_v61, %v14921_v56  ;;  %v2870_v56 = vadd.f32 %v17947_v15, %v2130_v2  ;;  %v17960_v61 = vld [vmem:[#allocation27_spill] sm:$0xff]  ;;  %v3346_v21 = vadd.f32 %v17967_v13, %v2862_v31  ;;  %v3358_v31 = vadd.f32 %v17970_v10, %v2874_v7  ;;  %v17981_v13 = vld [vmem:[#allocation48_spill] sm:$0xff]  ;;  %v17986_v10 = vld [vmem:[#allocation65_spill] sm:$0xff] }
 0x1ee   : > { %v12166_v43 = vpop.f32.mrf.mxu0  ;;  %v3341_v2 = vadd.f32 %v17961_v6, %v17960_v61  ;;  %v3708_v61 = vadd.f32 %v14952_v60, %v3335_v42  ;;  %v3709_v6 = vadd.f32 %v14960_v35, %v3336_v4  ;;  %v3713_v60 = vadd.f32 %v14974_v14, %v3340_v27  ;;  %v17974_v27 = vld [vmem:[#allocation43_spill] sm:$0xff] }
 0x1ef   : > { %v15093_v38 = vadd.f32 %v12166_v43, %v14925_v52  ;;  %v17958_v52 = vld [vmem:[#allocation18_spill] sm:$0xff]  ;;  %v17962_v43 = vld [vmem:[#allocation24_spill] sm:$0xff]  ;;  %v3711_v1 = vadd.f32 %v14978_v9, %v3338_v22  ;;  %v3715_v17 = vadd.f32 %v14992_v25, %v3342_v0  ;;  %v17980_v18 = vld [vmem:[#allocation47_spill] sm:$0xff] }
 0x1f0   : > { %v15102_v12 = vpop.f32.mrf.mxu0  ;;  %v3343_v20 = vadd.f32 %v17959_v45, %v17958_v52  ;;  %v3344_v15 = vadd.f32 %v17963_v5, %v17962_v43  ;;  %v17969_v52 = vld [vmem:[#allocation35_spill] sm:$0xff]  ;;  %v2878_v45 = vadd.f32 %v14942_v41, %v2138_v29  ;;  %v15129_v43 = vpop.f32.mrf.mxu1  ;;  %v3710_v41 = vadd.f32 %v14970_v39, %v3337_v30  ;;  %v17973_v30 = vld [vmem:[#allocation42_spill] sm:$0xff] }
 0x1f1   : > { %v3354_v3 = vadd.f32 %v17969_v52, %v2870_v56  ;;  %v3712_v56 = vadd.f32 %v14966_v54, %v3339_v24  ;;  %v3714_v57 = vadd.f32 %v14984_v19, %v3341_v2  ;;  %v17972_v24 = vld [vmem:[#allocation41_spill] sm:$0xff]  ;;  %v4446_v14 = vadd.f32 %v17973_v30, %v3706_v26  ;;  %v17978_v25 = vld [vmem:[#allocation58_spill] sm:$0xff]  ;;  %v17991_v30 = vld [vmem:[#allocation59_spill] sm:$0xff] }
 0x1f2   : > { %v12169_v51 = vpop.f32.mrf.mxu0  ;;  %v3716_v35 = vadd.f32 %v14980_v34, %v3343_v20  ;;  %v12202_v29 = vpop.f32.mrf.mxu1  ;;  %v3717_v4 = vadd.f32 %v14988_v55, %v3344_v15  ;;  %v4448_v39 = vadd.f32 %v17972_v24, %v3708_v61  ;;  %v4449_v9 = vadd.f32 %v17974_v27, %v3709_v6  ;;  %v17975_v20 = vld [vmem:[#allocation44_spill] sm:$0xff]  ;;  %v17982_v52 = vld [vmem:[#allocation49_spill] sm:$0xff]  ;;  %v17983_v61 = vld [vmem:[#allocation50_spill] sm:$0xff] }
 0x1f3   : > { %v15123_v62 = vadd.f32 %v12169_v51, %v14931_v37  ;;  %v4447_v7 = vadd.f32 %v17975_v20, %v3707_v63  ;;  %v15151_v19 = vadd.f32 %v17976_v28, %v3712_v56  ;;  %v17977_v55 = vld [vmem:[#allocation56_spill] sm:$0xff]  ;;  %v3719_v15 = vadd.f32 %v17978_v25, %v3346_v21  ;;  %v17984_v6 = vld [vmem:[#allocation51_spill] sm:$0xff]  ;;  %v17992_v27 = vld [vmem:[#allocation61_spill] sm:$0xff] }
 0x1f4   : > { %v3691_v5 = vpop.f32.mrf.mxu0  ;;  %v4418_v22 = vpop.f32.mrf.mxu1  ;;  %v3721_v2 = vadd.f32 %v17977_v55, %v3348_v58  ;;  %v15159_v51 = vadd.f32 %v17980_v18, %v3713_v60  ;;  %v15162_v16 = vadd.f32 %v17981_v13, %v3711_v1  ;;  %v15168_v26 = vadd.f32 %v17983_v61, %v3714_v57  ;;  %v17985_v21 = vld [vmem:[#allocation52_spill] sm:$0xff]  ;;  %v17987_v60 = vld [vmem:[#allocation53_spill] sm:$0xff]  ;;  %v17988_v1 = vld [vmem:[#allocation55_spill] sm:$0xff] }
 0x1f5   : > { %v15135_v37 = vadd.f32 %v3691_v5, %v14940_v46  ;;  %v17971_v46 = vld [vmem:[#allocation40_spill] sm:$0xff]  ;;  %v15171_v58 = vadd.f32 %v17984_v6, %v3717_v4  ;;  %v15174_v5 = vadd.f32 %v17985_v21, %v3715_v17  ;;  %v3723_v63 = vadd.f32 %v17986_v10, %v3350_v44  ;;  %v17990_v57 = vld [vmem:[#allocation57_spill] sm:$0xff]  ;;  %v17994_v55 = vld [vmem:[#allocation63_spill] sm:$0xff] }
 0x1f6   : > { %v12170_v42 = vpop.f32.mrf.mxu0  ;;  %v3362_v33 = vadd.f32 %v17971_v46, %v2878_v45  ;;  %v15165_v45 = vadd.f32 %v17982_v52, %v3716_v35  ;;  %v15184_v35 = vadd.f32 %v17988_v1, %v17987_v60  ;;  %v3727_v4 = vadd.f32 %v15053_v40, %v3354_v3  ;;  %v12205_v17 = vpop.f32.mrf.mxu1  ;;  %v17993_v28 = vld [vmem:[#allocation60_spill] sm:$0xff]  ;;  %v17996_v18 = vld [vmem:[#allocation66_spill] sm:$0xff]  ;;  %v17998_v40 = vld [vmem:[#allocation67_spill] sm:$0xff] }
 0x1f7   : > { %v3737_v54 = vadd.f32 %v12170_v42, %v14946_v53  ;;  %v17979_v53 = vld [vmem:[#allocation46_spill] sm:$0xff]  ;;  %v15192_v44 = vadd.f32 %v17991_v30, %v3721_v2  ;;  %v15195_v20 = vadd.f32 %v17992_v27, %v3719_v15  ;;  %v15199_v25 = vadd.f32 %v17994_v55, %v17993_v28  ;;  %v17997_v61 = vld [vmem:[#allocation64_spill] sm:$0xff] }
 0x1f8   : > { %v3694_v34 = vpop.f32.mrf.mxu0  ;;  %v15156_v0 = vadd.f32 %v17979_v53, %v3710_v41  ;;  %v15180_v41 = vld [vmem:[%s17790_s2] ss:$0 sm:$0xff]  ;;  %v15207_v3 = vadd.f32 %v17998_v40, %v17997_v61  ;;  %v4431_v2 = vpop.f32.mrf.mxu1  ;;  %v15212_v21 = vadd.f32 %v15034_v50, %v3723_v63  ;;  %v17999_v10 = vld [vmem:[#allocation68_spill] sm:$0xff]  ;;  %v15220_v60 = vadd.f32 %v15057_v47, %v15037_v49 }
 0x1f9   : > { %v17989_v42 = vld [vmem:[#allocation54_spill] sm:$0xff]  ;;  %v15224_v1 = vadd.f32 %v15064_v32, %v15048_v36  ;;  %v15236_v49 = vadd.f32 %v15129_v43, %v15079_v59  ;;  %v15239_v36 = vadd.f32 %v12202_v29, %v15093_v38  ;;  %v3735_v47 = vadd.f32 %v3694_v34, %v3362_v33 }
 0x1fa   : > { %v12213_v56 = vpop.f32.mrf.mxu0  ;;  %v15188_v46 = vadd.f32 %v17990_v57, %v17989_v42  ;;  %v17995_v53 = vld [vmem:[#allocation62_spill] sm:$0xff]  ;;  %v15245_v30 = vadd.f32 %v12205_v17, %v15123_v62 }
 0x1fb   : > { %v4932_v24 = vadd.f32 %v12213_v56, %v4448_v39  ;;  %v15203_v13 = vadd.f32 %v17996_v18, %v17995_v53  ;;  %v3731_v39 = vadd.f32 %v15102_v12, %v3358_v31  ;;  %v15216_v56 = vadd.f32 %v15045_v11, %v17999_v10  ;;  %v5489_v62 = vld [vmem:[#allocation2 + $0x18] sm:$0xf] }
 0x1fc   : > { %v4803_v52 = vpop.f32.mrf.mxu0  ;;  %v15227_v31 = vadd.f32 %v15087_v48, %v3727_v4  ;;  %v15232_v11 = vadd.f32 %v15117_v8, %v15067_v23  ;;  %v15248_v23 = vadd.f32 %v4431_v2, %v15135_v37 }
 0x1fd   : > { %v4971_v15 = vadd.f32 %v15180_v41, %v4932_v24  ;;  %v4930_v6 = vadd.f32 %v4803_v52, %v4446_v14  ;;  %v12206_v14 = vpop.f32.mrf.mxu1  ;;  %v15241_v48 = vadd.f32 %v4418_v22, %v3731_v39  ;;  %v5480_v52 = vld [vmem:[#allocation2 + $0xc] sm:$0xf] }
 0x1fe   : > { %v12214_v12 = vpop.f32.mrf.mxu0  ;;  %v15250_v59 = vadd.f32 %v12206_v14, %v3737_v54 }
 0x1ff   : > { %v11556_v42 = vpack.c.bf16 %v4971_v15, %v4971_v15  ;;  %v4969_v50 = vadd.f32 %v15180_v41, %v4930_v6  ;;  %v4933_v63 = vadd.f32 %v12214_v12, %v4449_v9  ;;  %v4434_v57 = vpop.f32.mrf.mxu1 }
 0x200   : > { %v4806_v32 = vpop.f32.mrf.mxu0  ;;  %v15252_v34 = vadd.f32 %v4434_v57, %v3735_v47 }
 0x201   : > { %v5174_v4 = vshrl.u32 %v11556_v42, 16  ;;  %v11554_v24 = vpack.c.bf16 %v4969_v50, %v4969_v50  ;;  %v4972_v9 = vadd.f32 %v15180_v41, %v4933_v63  ;;  %v4931_v8 = vadd.f32 %v4806_v32, %v4447_v7 }
 0x202   : > { %v12217_v38 = vpop.f32.mrf.mxu0  ;;  %v5177_v29 = vshll.u32 %v11556_v42, 16 }
 0x203   : > { %v5176_v43 = vrot.slane %v5174_v4, 7  ;;  %v5157_v33 = vshrl.u32 %v11554_v24, 16  ;;  %v11557_v22 = vpack.c.bf16 %v4972_v9, %v4972_v9  ;;  %v5160_v17 = vshll.u32 %v11554_v24, 16 }
 0x204   : > { %v4970_v37 = vadd.f32 %v15180_v41, %v4931_v8  ;;  %v4936_v54 = vadd.f32 %v12217_v38, %v15151_v19  ;;  %v4819_v7 = vpop.f32.mrf.mxu0 }
 0x205   : > { %v5179_v28 = vor.u32 %v5177_v29, %v5176_v43  ;;  %v5180_v55 = vrot.slane %v5176_v43, 4  ;;  %v5159_v53 = vrot.slane %v5157_v33, 7  ;;  %v5182_v18 = vshrl.u32 %v11557_v22, 16 }
 0x206   : > { %v5185_v61 = vshll.u32 %v11557_v22, 16  ;;  %v11555_v40 = vpack.c.bf16 %v4970_v37, %v4970_v37  ;;  %v4975_v39 = vadd.f32 %v15180_v41, %v4936_v54  ;;  %v4934_v2 = vadd.f32 %v4819_v7, %v15156_v0  ;;  %v12218_v15 = vpop.f32.mrf.mxu0  ;;  %v5493_v0 = vld [vmem:[#allocation2 + $0x20] sm:$0x1]  ;;  %v5486_v37 = vld [vmem:[#allocation2 + $0x14] sm:$0x1] }
 0x207   : > { %v5490_v6 = vsel %vm15256_vm14, %v5179_v28, %v5489_v62  ;;  %v5162_v10 = vor.u32 %v5160_v17, %v5159_v53  ;;  %v5163_v12 = vrot.slane %v5159_v53, 4  ;;  %v5184_v14 = vrot.slane %v5182_v18, 7 }
 0x208   : > { %5491 = vst [vmem:[#allocation2 + $0x18] sm:$0xf] %v5490_v6  ;;  %v5165_v50 = vshrl.u32 %v11555_v40, 16  ;;  %v5168_v63 = vshll.u32 %v11555_v40, 16  ;;  %v11560_v47 = vpack.c.bf16 %v4975_v39, %v4975_v39  ;;  %v4973_v32 = vadd.f32 %v15180_v41, %v4934_v2  ;;  %v4822_v57 = vpop.f32.mrf.mxu0 }
 0x209   : > { %v5481_v4 = vsel %vm15256_vm14, %v5162_v10, %v5480_v52  ;;  %v5187_v24 = vor.u32 %v5185_v61, %v5184_v14  ;;  %v5189_v9 = vrot.slane %v5184_v14, 4  ;;  %v4937_v8 = vadd.f32 %v12218_v15, %v15159_v51  ;;  %v5503_v61 = vld [vmem:[#allocation2 + $0x30] sm:$0xf] }
 0x20a   : > { %5482 = vst [vmem:[#allocation2 + $0xc] sm:$0xf] %v5481_v4  ;;  %v5167_v38 = vrot.slane %v5165_v50, 7  ;;  %v5208_v43 = vshrl.u32 %v11560_v47, 16  ;;  %v5211_v29 = vshll.u32 %v11560_v47, 16  ;;  %v11558_v33 = vpack.c.bf16 %v4973_v32, %v4973_v32  ;;  %v12221_v22 = vpop.f32.mrf.mxu0 }
 0x20b   : > { %v5188_v62 = vsel %vm15274_vm0, %v5180_v55, %v5187_v24  ;;  %v5494_v17 = vsel %vm15268_vm15, %v5189_v9, %v5493_v0  ;;  %v4976_v54 = vadd.f32 %v15180_v41, %v4937_v8  ;;  %v4935_v7 = vadd.f32 %v4822_v57, %v15162_v16  ;;  %v15292_v55 = vld [vmem:[%s17791_s3 + $0x38] sm:$0xff]   ;;  %v5496_v57 = vld [vmem:[#allocation2 + $0x24] sm:$0xf] }
 0x20c   : > { %5492 = vst.msk [vmem:[#allocation2 + $0x1c] sm:$0xf] %vm5017_vm8, %v5188_v62  ;;  %5495 = vst [vmem:[#allocation2 + $0x20] sm:$0x1] %v5494_v17  ;;  %v5170_v51 = vor.u32 %v5168_v63, %v5167_v38  ;;  %v5172_v28 = vrot.slane %v5167_v38, 4  ;;  %v5210_v53 = vrot.slane %v5208_v43, 7  ;;  %v4835_v52 = vpop.f32.mrf.mxu0  ;;  %v4940_v16 = vadd.f32 %v12221_v22, %v15165_v45  ;;  %12351 = vmatprep.subr.bf16.mxu0 %v15292_v55 }
 0x20d   : > { %v5191_v18 = vshrl.u32 %v11558_v33, 16  ;;  %v5194_v40 = vshll.u32 %v11558_v33, 16  ;;  %v11561_v39 = vpack.c.bf16 %v4976_v54, %v4976_v54  ;;  %v4974_v2 = vadd.f32 %v15180_v41, %v4935_v7  ;;  %v5507_v33 = vld [vmem:[#allocation2 + $0x38] sm:$0x1] }
 0x20e   : > { %v5171_v15 = vsel %vm15274_vm0, %v5163_v12, %v5170_v51  ;;  %v5487_v6 = vsel %vm15268_vm15, %v5172_v28, %v5486_v37  ;;  %v5213_v10 = vor.u32 %v5211_v29, %v5210_v53  ;;  %v5214_v14 = vrot.slane %v5210_v53, 4  ;;  %v12222_v0 = vpop.f32.mrf.mxu0  ;;  %v5500_v28 = vld [vmem:[#allocation2 + $0x2c] sm:$0x1] }
 0x20f   : > { %5483 = vst.msk [vmem:[#allocation2 + $0x10] sm:$0xf] %vm5017_vm8, %v5171_v15  ;;  %5488 = vst [vmem:[#allocation2 + $0x14] sm:$0x1] %v5487_v6  ;;  %v5193_v50 = vrot.slane %v5191_v18, 7  ;;  %v5216_v63 = vshrl.u32 %v11561_v39, 16  ;;  %v11559_v32 = vpack.c.bf16 %v4974_v2, %v4974_v2  ;;  %v4979_v12 = vadd.f32 %v15180_v41, %v4940_v16 }
 0x210   : > { %v5219_v47 = vshll.u32 %v11561_v39, 16  ;;  %v5504_v45 = vsel %vm15256_vm14, %v5213_v10, %v5503_v61  ;;  %v4938_v4 = vadd.f32 %v4835_v52, %v15168_v26  ;;  %v4941_v24 = vadd.f32 %v12222_v0, %v15171_v58  ;;  %v4838_v9 = vpop.f32.mrf.mxu0 }
 0x211   : > { %5505 = vst [vmem:[#allocation2 + $0x30] sm:$0xf] %v5504_v45  ;;  %v5196_v8 = vor.u32 %v5194_v40, %v5193_v50  ;;  %v5197_v38 = vrot.slane %v5193_v50, 4  ;;  %v5218_v43 = vrot.slane %v5216_v63, 7  ;;  %v5199_v29 = vshrl.u32 %v11559_v32, 16 }
 0x212   : > { %v5202_v22 = vshll.u32 %v11559_v32, 16  ;;  %v11564_v62 = vpack.c.bf16 %v4979_v12, %v4979_v12  ;;  %v4977_v17 = vadd.f32 %v15180_v41, %v4938_v4  ;;  %v4980_v37 = vadd.f32 %v15180_v41, %v4941_v24  ;;  %v12225_v54 = vpop.f32.mrf.mxu0 }
 0x213   : > { %v5497_v7 = vsel %vm15256_vm14, %v5196_v8, %v5496_v57  ;;  %v5221_v26 = vor.u32 %v5219_v47, %v5218_v43  ;;  %v5223_v51 = vrot.slane %v5218_v43, 4  ;;  %v5201_v58 = vrot.slane %v5199_v29, 7  ;;  %v5510_v29 = vld [vmem:[#allocation2 + $0x3c] sm:$0xf] }
 0x214   : > { %5498 = vst [vmem:[#allocation2 + $0x24] sm:$0xf] %v5497_v7  ;;  %v5242_v53 = vshrl.u32 %v11564_v62, 16  ;;  %v5245_v18 = vshll.u32 %v11564_v62, 16  ;;  %v11562_v52 = vpack.c.bf16 %v4977_v17, %v4977_v17  ;;  %v11565_v61 = vpack.c.bf16 %v4980_v37, %v4980_v37  ;;  %v4851_v40 = vpop.f32.mrf.mxu0  ;;  %v5521_v7 = vld [vmem:[#allocation2 + $0x50] sm:$0x1] }
 0x215   : > { %v5222_v39 = vsel %vm15274_vm0, %v5214_v14, %v5221_v26  ;;  %v5508_v2 = vsel %vm15268_vm15, %v5223_v51, %v5507_v33  ;;  %v5204_v16 = vor.u32 %v5202_v22, %v5201_v58  ;;  %v5206_v15 = vrot.slane %v5201_v58, 4  ;;  %v5517_v14 = vld [vmem:[#allocation2 + $0x48] sm:$0xf] }
 0x216   : > { %5506 = vst.msk [vmem:[#allocation2 + $0x34] sm:$0xf] %vm5017_vm8, %v5222_v39  ;;  %5509 = vst [vmem:[#allocation2 + $0x38] sm:$0x1] %v5508_v2  ;;  %v5244_v6 = vrot.slane %v5242_v53, 7  ;;  %v5225_v10 = vshrl.u32 %v11562_v52, 16  ;;  %v12226_v63 = vpop.f32.mrf.mxu0  ;;  %v4939_v57 = vadd.f32 %v4838_v9, %v15174_v5  ;;  %v4942_v22 = vadd.f32 %v4851_v40, %v15188_v46 }
 0x217   : > { %v5228_v0 = vshll.u32 %v11562_v52, 16  ;;  %v5250_v50 = vshrl.u32 %v11565_v61, 16  ;;  %v5205_v47 = vsel %vm15274_vm0, %v5197_v38, %v5204_v16  ;;  %v5501_v32 = vsel %vm15268_vm15, %v5206_v15, %v5500_v28  ;;  %v15330_v53 = vld [vmem:[#allocation2 + $0xc] sm:$0xf] }
 0x218   : > { %v5253_v45 = vshll.u32 %v11565_v61, 16  ;;  %5499 = vst.msk [vmem:[#allocation2 + $0x28] sm:$0xf] %vm5017_vm8, %v5205_v47  ;;  %5502 = vst [vmem:[#allocation2 + $0x2c] sm:$0x1] %v5501_v32  ;;  %v5247_v12 = vor.u32 %v5245_v18, %v5244_v6  ;;  %v5248_v4 = vrot.slane %v5244_v6, 4  ;;  %v4854_v43 = vpop.f32.mrf.mxu0  ;;  %v4978_v33 = vadd.f32 %v15180_v41, %v4939_v57 }
 0x219   : > { %v5227_v24 = vrot.slane %v5225_v10, 7  ;;  %v5252_v8 = vrot.slane %v5250_v50, 7  ;;  %v4944_v38 = vadd.f32 %v12225_v54, %v15184_v35  ;;  %v4945_v62 = vadd.f32 %v12226_v63, %v15192_v44  ;;  %v5531_v32 = vld [vmem:[#allocation2 + $0x60] sm:$0xf] }
 0x21a   : > { %v5518_v5 = vsel %vm15256_vm14, %v5247_v12, %v5517_v14  ;;  %v11563_v51 = vpack.c.bf16 %v4978_v33, %v4978_v33  ;;  %v4981_v28 = vadd.f32 %v15180_v41, %v4942_v22  ;;  %v15332_v35 = vpop.f32.mrf.mxu0  ;;  %v4943_v18 = vadd.f32 %v4854_v43, %v15195_v20  ;;  %v5524_v43 = vld [vmem:[#allocation2 + $0x54] sm:$0xf]  ;;  %v15346_v22 = vld [vmem:[#allocation2 + $0x10] sm:$0xf] }
 0x21b   : > { %v5230_v9 = vor.u32 %v5228_v0, %v5227_v24  ;;  %v5231_v17 = vrot.slane %v5227_v24, 4  ;;  %v5255_v37 = vor.u32 %v5253_v45, %v5252_v8  ;;  %5519 = vst [vmem:[#allocation2 + $0x48] sm:$0xf] %v5518_v5  ;;  %v5257_v26 = vrot.slane %v5252_v8, 4  ;;  %v5514_v0 = vld [vmem:[#allocation2 + $0x44] sm:$0x1] }
 0x21c   : > { %v4983_v58 = vadd.f32 %v15180_v41, %v4944_v38  ;;  %v4984_v54 = vadd.f32 %v15180_v41, %v4945_v62  ;;  %v5233_v61 = vshrl.u32 %v11563_v51, 16  ;;  %v5236_v40 = vshll.u32 %v11563_v51, 16  ;;  %v4867_v47 = vpop.f32.mrf.mxu0  ;;  %v5535_v51 = vld [vmem:[#allocation2 + $0x68] sm:$0x1] }
 0x21d   : > { %v5511_v46 = vsel %vm15256_vm14, %v5230_v9, %v5510_v29  ;;  %v5256_v44 = vsel %vm15274_vm0, %v5248_v4, %v5255_v37  ;;  %v5522_v52 = vsel %vm15268_vm15, %v5257_v26, %v5521_v7  ;;  %v11566_v2 = vpack.c.bf16 %v4981_v28, %v4981_v28 }
 0x21e   : > { %5512 = vst [vmem:[#allocation2 + $0x3c] sm:$0xf] %v5511_v46  ;;  %5520 = vst.msk [vmem:[#allocation2 + $0x4c] sm:$0xf] %vm5017_vm8, %v5256_v44  ;;  %v11568_v39 = vpack.c.bf16 %v4983_v58, %v4983_v58  ;;  %v11569_v16 = vpack.c.bf16 %v4984_v54, %v4984_v54  ;;  %v4982_v15 = vadd.f32 %v15180_v41, %v4943_v18  ;;  %v5671_v6 = vshrl.u32 %v15330_v53, 16  ;;  %v12230_v58 = vpop.f32.mrf.mxu0 }
 0x21f   : > { %5523 = vst [vmem:[#allocation2 + $0x50] sm:$0x1] %v5522_v52  ;;  %v5235_v10 = vrot.slane %v5233_v61, 7  ;;  %v5674_v63 = vshll.u32 %v15330_v53, 16  ;;  %v5259_v14 = vshrl.u32 %v11566_v2, 16  ;;  %v5262_v45 = vshll.u32 %v11566_v2, 16 }
 0x220   : > { %v5276_v50 = vshrl.u32 %v11568_v39, 16  ;;  %v5279_v20 = vshll.u32 %v11568_v39, 16  ;;  %v5284_v57 = vshrl.u32 %v11569_v16, 16  ;;  %v5287_v12 = vshll.u32 %v11569_v16, 16  ;;  %v5598_v18 = vld [vmem:[#allocation2 + $0x18] sm:$0xf] }
 0x221   : > { %v5238_v4 = vor.u32 %v5236_v40, %v5235_v10  ;;  %v5240_v24 = vrot.slane %v5235_v10, 4  ;;  %v11567_v29 = vpack.c.bf16 %v4982_v15, %v4982_v15  ;;  %v5261_v33 = vrot.slane %v5259_v14, 7  ;;  %v15357_v52 = vld [vmem:[#allocation2 + $0x1c] sm:$0xf] }
 0x222   : > { %v5278_v8 = vrot.slane %v5276_v50, 7  ;;  %v5286_v38 = vrot.slane %v5284_v57, 7  ;;  %v15348_v62 = vrot.slane %v5671_v6, 4  ;;  %v15350_v5 = vrot.slane %v5674_v63, 5  ;;  %v4870_v63 = vpop.f32.mrf.mxu0  ;;  %v5528_v14 = vld [vmem:[#allocation2 + $0x5c] sm:$0x1] }
 0x223   : > { %v5239_v9 = vsel %vm15274_vm0, %v5231_v17, %v5238_v4  ;;  %v5515_v37 = vsel %vm15268_vm15, %v5240_v24, %v5514_v0  ;;  %v5264_v28 = vor.u32 %v5262_v45, %v5261_v33  ;;  %v5265_v46 = vrot.slane %v5261_v33, 4  ;;  %v5600_v4 = vld [vmem:[#allocation2 + $0x24] sm:$0xf] }
 0x224   : > { %v5281_v7 = vor.u32 %v5279_v20, %v5278_v8  ;;  %v5282_v26 = vrot.slane %v5278_v8, 4  ;;  %5513 = vst.msk [vmem:[#allocation2 + $0x40] sm:$0xf] %vm5017_vm8, %v5239_v9  ;;  %5516 = vst [vmem:[#allocation2 + $0x44] sm:$0x1] %v5515_v37  ;;  %v5289_v44 = vor.u32 %v5287_v12, %v5286_v38  ;;  %v5291_v54 = vrot.slane %v5286_v38, 4 }
 0x225   : > { %v5267_v61 = vshrl.u32 %v11567_v29, 16  ;;  %v5270_v40 = vshll.u32 %v11567_v29, 16  ;;  %v5684_v39 = vshrl.u32 %v15346_v22, 16  ;;  %v5525_v2 = vsel %vm15256_vm14, %v5264_v28, %v5524_v43 }
 0x226   : > { %v5532_v17 = vsel %vm15256_vm14, %v5281_v7, %v5531_v32  ;;  %v5290_v16 = vsel %vm15274_vm0, %v5282_v26, %v5289_v44  ;;  %v5536_v15 = vsel %vm15268_vm15, %v5291_v54, %v5535_v51  ;;  %v11202_v6 = vcombine.low %v15330_v53, %v15346_v22  ;;  %5526 = vst [vmem:[#allocation2 + $0x54] sm:$0xf] %v5525_v2  ;;  %v12728_v32 = vld [vmem:[%s17791_s3 + $0x30] sm:$0xff]   ;;  %v12233_v44 = vpop.f32.mrf.mxu0  ;;  %v5538_v2 = vld [vmem:[#allocation2 + $0x6c] sm:$0xf] }
 0x227   : > { %5533 = vst [vmem:[#allocation2 + $0x60] sm:$0xf] %v5532_v17  ;;  %5534 = vst.msk [vmem:[#allocation2 + $0x64] sm:$0xf] %vm5017_vm8, %v5290_v16  ;;  %v5269_v10 = vrot.slane %v5267_v61, 7  ;;  %v5695_v0 = vshrl.u32 %v5598_v18, 16  ;;  %v11203_v45 = vcombine.low %v5598_v18, %v15357_v52  ;;  %v4948_v53 = vadd.f32 %v15332_v35, %v15199_v25 }
 0x228   : > { %5537 = vst [vmem:[#allocation2 + $0x68] sm:$0x1] %v5536_v15  ;;  %v5698_v50 = vshll.u32 %v5598_v18, 16  ;;  %v5708_v20 = vshrl.u32 %v15357_v52, 16  ;;  %12284 = vmatmul.mubr.msk.bf16.vlgmr.msra.gmra.mxu0 %vm6095_vm10, %v11202_v6  ;;  %v4946_v57 = vadd.f32 %v4867_v47, %v15203_v13  ;;  %v4949_v12 = vadd.f32 %v12230_v58, %v15207_v3  ;;  %v15391_v3 = vld [vmem:[#allocation2 + $0x28] sm:$0xf] }
 0x229   : > { %v5272_v24 = vor.u32 %v5270_v40, %v5269_v10  ;;  %v5274_v8 = vrot.slane %v5269_v10, 4  ;;  %v15381_v43 = vrot.slane %v5695_v0, 4  ;;  %12352 = vmatpush3.bf16.msra.mxu0 %v15292_v55  ;;  %12287 = vmatprep.mubr.msk.bf16.mxu0 %vm6095_vm10, %v11203_v45  ;;  %v4987_v33 = vadd.f32 %v15180_v41, %v4948_v53  ;;  %v5545_v40 = vld [vmem:[#allocation2 + $0x78] sm:$0xf]  ;;  %v5631_v10 = vld [vmem:[#allocation2 + $0x14] sm:$0x1] }
 0x22a   : > { %v15383_v29 = vrot.slane %v5698_v50, 5  ;;  %v4985_v38 = vadd.f32 %v15180_v41, %v4946_v57  ;;  %v4988_v25 = vadd.f32 %v15180_v41, %v4949_v12  ;;  %v4947_v13 = vadd.f32 %v4870_v63, %v15212_v21  ;;  %12353 = vmatprep.subr.bf16.mxu0 %v12728_v32  ;;  %v5602_v50 = vld [vmem:[#allocation2 + $0x30] sm:$0xf] }
 0x22b   : > { %v5273_v35 = vsel %vm15274_vm0, %v5265_v46, %v5272_v24  ;;  %v5529_v47 = vsel %vm15268_vm15, %v5274_v8, %v5528_v14  ;;  %v5719_v9 = vshrl.u32 %v5600_v4, 16  ;;  %v5722_v55 = vshll.u32 %v5600_v4, 16  ;;  %v4883_v24 = vpop.f32.mrf.mxu0 }
 0x22c   : > { %5527 = vst.msk [vmem:[#allocation2 + $0x58] sm:$0xf] %vm5017_vm8, %v5273_v35  ;;  %5530 = vst [vmem:[#allocation2 + $0x5c] sm:$0x1] %v5529_v47  ;;  %v11572_v37 = vpack.c.bf16 %v4987_v33, %v4987_v33  ;;  %v11570_v7 = vpack.c.bf16 %v4985_v38, %v4985_v38  ;;  %v11573_v26 = vpack.c.bf16 %v4988_v25, %v4988_v25  ;;  %v5732_v28 = vshrl.u32 %v15391_v3, 16 }
 0x22d   : > { %v4986_v51 = vadd.f32 %v15180_v41, %v4947_v13  ;;  %v15399_v21 = vrot.slane %v5719_v9, 4  ;;  %v15401_v58 = vrot.slane %v5722_v55, 5  ;;  %v11204_v46 = vcombine.low %v5600_v4, %v15391_v3  ;;  %12354 = vmatpush3.bf16.msra.mxu0 %v12728_v32  ;;  %v5542_v47 = vld [vmem:[#allocation2 + $0x74] sm:$0x1] }
 0x22e   : > { %v5310_v54 = vshrl.u32 %v11572_v37, 16  ;;  %v5313_v18 = vshll.u32 %v11572_v37, 16  ;;  %v5293_v17 = vshrl.u32 %v11570_v7, 16  ;;  %v5296_v61 = vshll.u32 %v11570_v7, 16  ;;  %v15415_v37 = vld [vmem:[#allocation2 + $0x34] sm:$0xf] }
 0x22f   : > { %v5318_v16 = vshrl.u32 %v11573_v26, 16  ;;  %v5321_v15 = vshll.u32 %v11573_v26, 16  ;;  %v11571_v6 = vpack.c.bf16 %v4986_v51, %v4986_v51  ;;  %v5677_v0 = vor.u32 %v15350_v5, %v15348_v62  ;;  %v5549_v62 = vld [vmem:[#allocation2 + $0x80] sm:$0x1] }
 0x230   : > { %v5312_v63 = vrot.slane %v5310_v54, 7  ;;  %v5295_v14 = vrot.slane %v5293_v17, 7  ;;  %12288 = vmatmul.mubr.msk.bf16.gmra.mxu0 %vm6095_vm10, %v11204_v46  ;;  %v5680_v32 = vshll.u32 %v15346_v22, 16  ;;  %v5686_v45 = vrot.slane %v5684_v39, 4 }
 0x231   : > { %v5320_v53 = vrot.slane %v5318_v16, 7  ;;  %v5301_v57 = vshrl.u32 %v11571_v6, 16  ;;  %v5304_v12 = vshll.u32 %v11571_v6, 16  ;;  %v5678_v4 = vrot.slane %v5677_v0, 4 }
 0x232   : > { %v5315_v8 = vor.u32 %v5313_v18, %v5312_v63  ;;  %v5316_v33 = vrot.slane %v5312_v63, 4  ;;  %v5298_v38 = vor.u32 %v5296_v61, %v5295_v14  ;;  %v5299_v25 = vrot.slane %v5295_v14, 4  ;;  %v12234_v18 = vpop.f32.mrf.mxu0 }
 0x233   : > { %v5323_v5 = vor.u32 %v5321_v15, %v5320_v53  ;;  %v5325_v13 = vrot.slane %v5320_v53, 4  ;;  %v5303_v35 = vrot.slane %v5301_v57, 7  ;;  %v5682_v9 = vrot.slane %v5680_v32, 5  ;;  %v5632_v15 = vld [vmem:[#allocation2 + $0x20] sm:$0x1] }
 0x234   : > { %v5546_v55 = vsel %vm15256_vm14, %v5315_v8, %v5545_v40  ;;  %v5539_v22 = vsel %vm15256_vm14, %v5298_v38, %v5538_v2  ;;  %v5690_v39 = vshll.u32 %v5631_v10, 16  ;;  %v5743_v7 = vshrl.u32 %v5602_v50, 16  ;;  %v15436_v57 = vld [vmem:[#allocation2 + $0x3c] sm:$0xf]  ;;  %v4886_v38 = vpop.f32.mrf.mxu0 }
 0x235   : > { %5547 = vst [vmem:[#allocation2 + $0x78] sm:$0xf] %v5546_v55  ;;  %5540 = vst [vmem:[#allocation2 + $0x6c] sm:$0xf] %v5539_v22  ;;  %v5324_v26 = vsel %vm15274_vm0, %v5316_v33, %v5323_v5  ;;  %v5550_v51 = vsel %vm15268_vm15, %v5325_v13, %v5549_v62  ;;  %v5306_v46 = vor.u32 %v5304_v12, %v5303_v35  ;;  %v5308_v54 = vrot.slane %v5303_v35, 4 }
 0x236   : > { %5548 = vst.msk [vmem:[#allocation2 + $0x7c] sm:$0xf] %vm5017_vm8, %v5324_v26  ;;  %5551 = vst [vmem:[#allocation2 + $0x80] sm:$0x1] %v5550_v51  ;;  %v5683_v61 = vsel %vm12997_vm4, %v5678_v4, %v5682_v9  ;;  %v5687_v40 = vor.u32 %v5686_v45, %v5682_v9  ;;  %v5692_v2 = vrot.slane %v5690_v39, 5  ;;  %v15424_v16 = vrot.slane %v5743_v7, 4  ;;  %v15466_v51 = vpop.f32.mrf.mxu0 }
 0x237   : > { %v5307_v6 = vsel %vm15274_vm0, %v5299_v25, %v5306_v46  ;;  %v5543_v10 = vsel %vm15268_vm15, %v5308_v54, %v5542_v47  ;;  %v5746_v0 = vshll.u32 %v5602_v50, 16  ;;  %v5756_v63 = vshrl.u32 %v15415_v37, 16  ;;  %v15459_v55 = vld [vmem:[#allocation2 + $0x40] sm:$0xf] }
 0x238   : > { %5541 = vst.msk [vmem:[#allocation2 + $0x70] sm:$0xf] %vm5017_vm8, %v5307_v6  ;;  %5544 = vst [vmem:[#allocation2 + $0x74] sm:$0x1] %v5543_v10  ;;  %v5688_v14 = vrot.slane %v5687_v40, 4  ;;  %v11205_v32 = vcombine.low %v5602_v50, %v15415_v37  ;;  %v4952_v45 = vadd.f32 %v12233_v44, %v15216_v56  ;;  %v5701_v53 = vor.u32 %v15383_v29, %v15381_v43  ;;  %v12721_v29 = vld [vmem:[%s17791_s3 + $0x20] sm:$0xff]  }
 0x239   : > { %v15438_v12 = vrot.slane %v5746_v0, 5  ;;  %v5704_v4 = vshll.u32 %v15357_v52, 16  ;;  %v5710_v8 = vrot.slane %v5708_v20, 4  ;;  %v5714_v33 = vshll.u32 %v5632_v15, 16  ;;  %v12732_v40 = vld [vmem:[%s17791_s3 + $0x48] sm:$0xff]  }
 0x23a   : > { %v5693_v25 = vsel %vm12997_vm4, %v5688_v14, %v5692_v2  ;;  %12291 = vmatprep.mubr.msk.bf16.mxu0 %vm6095_vm10, %v11205_v32  ;;  %v4991_v56 = vadd.f32 %v15180_v41, %v4952_v45  ;;  %v5702_v44 = vrot.slane %v5701_v53, 4  ;;  %v4950_v43 = vadd.f32 %v4883_v24, %v15220_v60  ;;  %v5559_v15 = vld [vmem:[#allocation2 + $0x90] sm:$0xf] }
 0x23b   : > { %v11168_v50 = vcombine.low %v5683_v61, %v5693_v25  ;;  %v5706_v62 = vrot.slane %v5704_v4, 5  ;;  %v5716_v52 = vrot.slane %v5714_v33, 5  ;;  %v4953_v20 = vadd.f32 %v12234_v18, %v15224_v1  ;;  %v12770_v1 = vld [vmem:[%s17791_s3 + $0x28] sm:$0xff]   ;;  %v5552_v25 = vld [vmem:[#allocation2 + $0x84] sm:$0xf] }
 0x23c   : > { %v11576_v5 = vpack.c.bf16 %v4991_v56, %v4991_v56  ;;  %v4989_v13 = vadd.f32 %v15180_v41, %v4950_v43  ;;  %v4951_v35 = vadd.f32 %v4886_v38, %v15227_v31  ;;  %v5767_v47 = vshrl.u32 %v15436_v57, 16  ;;  %v4899_v56 = vpop.f32.mrf.mxu0 }
 0x23d   : > { %12248 = vmatmul.mubr.msk.bf16.vlgmr.msra.gmra.mxu1 %vm6095_vm10, %v11168_v50  ;;  %v5707_v60 = vsel %vm12997_vm4, %v5702_v44, %v5706_v62  ;;  %v5711_v24 = vor.u32 %v5710_v8, %v5706_v62  ;;  %v4992_v9 = vadd.f32 %v15180_v41, %v4953_v20  ;;  %v5770_v22 = vshll.u32 %v15436_v57, 16  ;;  %v15480_v20 = vld [vmem:[#allocation2 + $0x2c] sm:$0x1] }
 0x23e   : > { %12316 = vmatpush3.bf16.msra.mxu1 %v12770_v1  ;;  %v5344_v31 = vshrl.u32 %v11576_v5, 16  ;;  %v5347_v39 = vshll.u32 %v11576_v5, 16  ;;  %v11574_v7 = vpack.c.bf16 %v4989_v13, %v4989_v13  ;;  %v4990_v26 = vadd.f32 %v15180_v41, %v4951_v35  ;;  %v5563_v35 = vld [vmem:[#allocation2 + $0x98] sm:$0x1] }
 0x23f   : > { %v5712_v46 = vrot.slane %v5711_v24, 4  ;;  %v11577_v54 = vpack.c.bf16 %v4992_v9, %v4992_v9  ;;  %v15468_v18 = vrot.slane %v5767_v47, 4  ;;  %v15470_v61 = vrot.slane %v5770_v22, 5  ;;  %12317 = vmatprep.subr.bf16.mxu1 %v12721_v29  ;;  %v5556_v47 = vld [vmem:[#allocation2 + $0x8c] sm:$0x1] }
 0x240   : > { %v5346_v2 = vrot.slane %v5344_v31, 7  ;;  %v5327_v6 = vshrl.u32 %v11574_v7, 16  ;;  %v5330_v10 = vshll.u32 %v11574_v7, 16  ;;  %v11575_v0 = vpack.c.bf16 %v4990_v26, %v4990_v26  ;;  %v5606_v22 = vld [vmem:[#allocation2 + $0x48] sm:$0xf] }
 0x241   : > { %v5717_v14 = vsel %vm12997_vm4, %v5712_v46, %v5716_v52  ;;  %v5352_v32 = vshrl.u32 %v11577_v54, 16  ;;  %v5355_v45 = vshll.u32 %v11577_v54, 16  ;;  %v5780_v53 = vshrl.u32 %v15459_v55, 16  ;;  %v15494_v26 = vld [vmem:[#allocation2 + $0x4c] sm:$0xf] }
 0x242   : > { %v5349_v4 = vor.u32 %v5347_v39, %v5346_v2  ;;  %v5350_v8 = vrot.slane %v5346_v2, 4  ;;  %v11169_v33 = vcombine.low %v5707_v60, %v5717_v14  ;;  %v5329_v38 = vrot.slane %v5327_v6, 7  ;;  %12318 = vmatpush3.bf16.msra.mxu1 %v12721_v29 }
 0x243   : > { %v5354_v44 = vrot.slane %v5352_v32, 7  ;;  %v5335_v43 = vshrl.u32 %v11575_v0, 16  ;;  %v5338_v50 = vshll.u32 %v11575_v0, 16  ;;  %v11206_v62 = vcombine.low %v15436_v57, %v15459_v55  ;;  %12387 = vmatprep.subr.bf16.mxu1 %v12732_v40  ;;  %v15507_v32 = vld [vmem:[#allocation2 + $0x38] sm:$0x1] }
 0x244   : > { %v5560_v52 = vsel %vm15256_vm14, %v5349_v4, %v5559_v15  ;;  %12251 = vmatprep.mubr.msk.bf16.mxu1 %vm6095_vm10, %v11169_v33  ;;  %v5332_v5 = vor.u32 %v5330_v10, %v5329_v38  ;;  %v5333_v13 = vrot.slane %v5329_v38, 4  ;;  %v5725_v29 = vor.u32 %v15401_v58, %v15399_v21  ;;  %v12238_v21 = vpop.f32.mrf.mxu0 }
 0x245   : > { %5561 = vst [vmem:[#allocation2 + $0x90] sm:$0xf] %v5560_v52  ;;  %v5357_v60 = vor.u32 %v5355_v45, %v5354_v44  ;;  %v5359_v24 = vrot.slane %v5354_v44, 4  ;;  %v5337_v9 = vrot.slane %v5335_v43, 7  ;;  %12292 = vmatmul.mubr.msk.bf16.gmra.mxu0 %vm6095_vm10, %v11206_v62  ;;  %v5728_v57 = vshll.u32 %v15391_v3, 16 }
 0x246   : > { %v5553_v1 = vsel %vm15256_vm14, %v5332_v5, %v5552_v25  ;;  %v5726_v31 = vrot.slane %v5725_v29, 4  ;;  %v5734_v39 = vrot.slane %v5732_v28, 4  ;;  %v5738_v7 = vshll.u32 %v15480_v20, 16  ;;  %v4902_v38 = vpop.f32.mrf.mxu0  ;;  %v15519_v25 = vld [vmem:[%s17791_s3 + $0x58] sm:$0xff]  }
 0x247   : > { %5554 = vst [vmem:[#allocation2 + $0x84] sm:$0xf] %v5553_v1  ;;  %v5358_v58 = vsel %vm15274_vm0, %v5350_v8, %v5357_v60  ;;  %v5564_v46 = vsel %vm15268_vm15, %v5359_v24, %v5563_v35  ;;  %v5340_v54 = vor.u32 %v5338_v50, %v5337_v9  ;;  %v5342_v40 = vrot.slane %v5337_v9, 4  ;;  %12423 = vmatprep.subr.bf16.mxu0 %v15519_v25 }
 0x248   : > { %5562 = vst.msk [vmem:[#allocation2 + $0x94] sm:$0xf] %vm5017_vm8, %v5358_v58  ;;  %5565 = vst [vmem:[#allocation2 + $0x98] sm:$0x1] %v5564_v46  ;;  %v5730_v2 = vrot.slane %v5728_v57, 5  ;;  %v5740_v3 = vrot.slane %v5738_v7, 5  ;;  %v11207_v14 = vcombine.low %v5606_v22, %v15494_v26  ;;  %v4956_v44 = vadd.f32 %v15466_v51, %v15232_v11 }
 0x249   : > { %v5791_v28 = vshrl.u32 %v5606_v22, 16  ;;  %v5794_v15 = vshll.u32 %v5606_v22, 16  ;;  %v5341_v6 = vsel %vm15274_vm0, %v5333_v13, %v5340_v54  ;;  %v5557_v10 = vsel %vm15268_vm15, %v5342_v40, %v5556_v47  ;;  %v5573_v58 = vld [vmem:[#allocation2 + $0xa8] sm:$0xf] }
 0x24a   : > { %v5804_v0 = vshrl.u32 %v15494_v26, 16  ;;  %5555 = vst.msk [vmem:[#allocation2 + $0x88] sm:$0xf] %vm5017_vm8, %v5341_v6  ;;  %5558 = vst [vmem:[#allocation2 + $0x8c] sm:$0x1] %v5557_v10  ;;  %v5731_v45 = vsel %vm12997_vm4, %v5726_v31, %v5730_v2  ;;  %v5735_v4 = vor.u32 %v5734_v39, %v5730_v2  ;;  %12295 = vmatprep.mubr.msk.bf16.mxu0 %vm6095_vm10, %v11207_v14  ;;  %v5752_v50 = vshll.u32 %v15415_v37, 16 }
 0x24b   : > { %v15512_v8 = vrot.slane %v5791_v28, 4  ;;  %v15514_v33 = vrot.slane %v5794_v15, 5  ;;  %v5749_v43 = vor.u32 %v15438_v12, %v15424_v16  ;;  %v5758_v62 = vrot.slane %v5756_v63, 4  ;;  %v15535_v12 = vld [vmem:[#allocation2 + $0x54] sm:$0xf] }
 0x24c   : > { %v5736_v52 = vrot.slane %v5735_v4, 4  ;;  %v5762_v5 = vshll.u32 %v15507_v32, 16  ;;  %v4954_v13 = vadd.f32 %v4899_v56, %v15236_v49  ;;  %v4957_v35 = vadd.f32 %v12238_v21, %v15239_v36  ;;  %v15552_v21 = vpop.f32.mrf.mxu0  ;;  %v5566_v15 = vld [vmem:[#allocation2 + $0x9c] sm:$0xf] }
 0x24d   : > { %v4995_v47 = vadd.f32 %v15180_v41, %v4956_v44  ;;  %v5750_v11 = vrot.slane %v5749_v43, 4  ;;  %v5754_v51 = vrot.slane %v5752_v50, 5  ;;  %v4955_v16 = vadd.f32 %v4902_v38, %v15241_v48  ;;  %v15546_v48 = vld [vmem:[%s17790_s2] ss:$0 sm:$0xff]  ;;  %v15558_v38 = vld [vmem:[#allocation2 + $0x58] sm:$0xf] }
 0x24e   : > { %v5741_v37 = vsel %vm12997_vm4, %v5736_v52, %v5740_v3  ;;  %v5764_v63 = vrot.slane %v5762_v5, 5  ;;  %v4993_v29 = vadd.f32 %v15180_v41, %v4954_v13  ;;  %v4996_v49 = vadd.f32 %v15180_v41, %v4957_v35  ;;  %v4915_v13 = vpop.f32.mrf.mxu0 }
 0x24f   : > { %v11170_v56 = vcombine.low %v5731_v45, %v5741_v37  ;;  %v11580_v36 = vpack.c.bf16 %v4995_v47, %v4995_v47  ;;  %v5755_v60 = vsel %vm12997_vm4, %v5750_v11, %v5754_v51  ;;  %v5759_v24 = vor.u32 %v5758_v62, %v5754_v51  ;;  %v5577_v62 = vld [vmem:[#allocation2 + $0xb0] sm:$0x1] }
 0x250   : > { %v11578_v9 = vpack.c.bf16 %v4993_v29, %v4993_v29  ;;  %v11581_v57 = vpack.c.bf16 %v4996_v49, %v4996_v49  ;;  %v4994_v22 = vadd.f32 %v15546_v48, %v4955_v16  ;;  %v5815_v1 = vshrl.u32 %v15535_v12, 16  ;;  %v15568_v49 = vld [vmem:[#allocation2 + $0x44] sm:$0x1] }
 0x251   : > { %12252 = vmatmul.mubr.msk.bf16.gmra.mxu1 %vm6095_vm10, %v11170_v56  ;;  %v5378_v41 = vshrl.u32 %v11580_v36, 16  ;;  %v5381_v31 = vshll.u32 %v11580_v36, 16  ;;  %v5760_v39 = vrot.slane %v5759_v24, 4  ;;  %v5818_v7 = vshll.u32 %v15535_v12, 16  ;;  %v5610_v56 = vld [vmem:[#allocation2 + $0x60] sm:$0xf] }
 0x252   : > { %v5361_v46 = vshrl.u32 %v11578_v9, 16  ;;  %v5364_v54 = vshll.u32 %v11578_v9, 16  ;;  %v5386_v40 = vshrl.u32 %v11581_v57, 16  ;;  %v5389_v2 = vshll.u32 %v11581_v57, 16  ;;  %v5570_v9 = vld [vmem:[#allocation2 + $0xa4] sm:$0x1] }
 0x253   : > { %v5380_v3 = vrot.slane %v5378_v41, 7  ;;  %v5765_v28 = vsel %vm12997_vm4, %v5760_v39, %v5764_v63  ;;  %v11579_v6 = vpack.c.bf16 %v4994_v22, %v4994_v22  ;;  %v15556_v10 = vrot.slane %v5815_v1, 4  ;;  %v15578_v22 = vld [vmem:[#allocation2 + $0x64] sm:$0xf]  ;;  %v12242_v39 = vpop.f32.mrf.mxu0 }
 0x254   : > { %v11171_v14 = vcombine.low %v5755_v60, %v5765_v28  ;;  %v5363_v45 = vrot.slane %v5361_v46, 7  ;;  %v5388_v4 = vrot.slane %v5386_v40, 7  ;;  %v15560_v44 = vrot.slane %v5818_v7, 5  ;;  %v15586_v46 = vld [vmem:[#allocation2 + $0x50] sm:$0x1] }
 0x255   : > { %v5383_v43 = vor.u32 %v5381_v31, %v5380_v3  ;;  %v5384_v50 = vrot.slane %v5380_v3, 4  ;;  %v5369_v52 = vshrl.u32 %v11579_v6, 16  ;;  %v5372_v5 = vshll.u32 %v11579_v6, 16 }
 0x256   : > { %12255 = vmatprep.mubr.msk.bf16.mxu1 %vm6095_vm10, %v11171_v14  ;;  %v5366_v35 = vor.u32 %v5364_v54, %v5363_v45  ;;  %v5367_v47 = vrot.slane %v5363_v45, 4  ;;  %v5391_v11 = vor.u32 %v5389_v2, %v5388_v4  ;;  %v5393_v51 = vrot.slane %v5388_v4, 4 }
 0x257   : > { %v5574_v16 = vsel %vm15256_vm14, %v5383_v43, %v5573_v58  ;;  %v5371_v37 = vrot.slane %v5369_v52, 7  ;;  %v5828_v63 = vshrl.u32 %v15558_v38, 16  ;;  %v11208_v29 = vcombine.low %v15535_v12, %v15558_v38  ;;  %v4918_v43 = vpop.f32.mrf.mxu0 }
 0x258   : > { %5575 = vst [vmem:[#allocation2 + $0xa8] sm:$0xf] %v5574_v16  ;;  %v5567_v36 = vsel %vm15256_vm14, %v5366_v35, %v5566_v15  ;;  %v5392_v60 = vsel %vm15274_vm0, %v5384_v50, %v5391_v11  ;;  %v5578_v24 = vsel %vm15268_vm15, %v5393_v51, %v5577_v62  ;;  %v5773_v57 = vor.u32 %v15470_v61, %v15468_v18  ;;  %v15611_v35 = vld [vmem:[#allocation2 + $0x6c] sm:$0xf] }
 0x259   : > { %5568 = vst [vmem:[#allocation2 + $0x9c] sm:$0xf] %v5567_v36  ;;  %5576 = vst.msk [vmem:[#allocation2 + $0xac] sm:$0xf] %vm5017_vm8, %v5392_v60  ;;  %v5374_v12 = vor.u32 %v5372_v5, %v5371_v37  ;;  %v5376_v1 = vrot.slane %v5371_v37, 4  ;;  %12296 = vmatmul.mubr.msk.bf16.gmra.mxu0 %vm6095_vm10, %v11208_v29  ;;  %v5776_v41 = vshll.u32 %v15459_v55, 16  ;;  %v11209_v15 = vcombine.low %v5610_v56, %v15578_v22 }
 0x25a   : > { %5579 = vst [vmem:[#allocation2 + $0xb0] sm:$0x1] %v5578_v24  ;;  %v5782_v31 = vrot.slane %v5780_v53, 4  ;;  %v5774_v7 = vrot.slane %v5773_v57, 4  ;;  %v5786_v58 = vshll.u32 %v15568_v49, 16  ;;  %v5839_v18 = vshrl.u32 %v5610_v56, 16 }
 0x25b   : > { %v5842_v61 = vshll.u32 %v5610_v56, 16  ;;  %v5375_v54 = vsel %vm15274_vm0, %v5367_v47, %v5374_v12  ;;  %v5571_v40 = vsel %vm15268_vm15, %v5376_v1, %v5570_v9  ;;  %v5778_v2 = vrot.slane %v5776_v41, 5  ;;  %12299 = vmatprep.mubr.msk.bf16.mxu0 %vm6095_vm10, %v11209_v15 }
 0x25c   : > { %v5852_v3 = vshrl.u32 %v15578_v22, 16  ;;  %5569 = vst.msk [vmem:[#allocation2 + $0xa0] sm:$0xf] %vm5017_vm8, %v5375_v54  ;;  %5572 = vst [vmem:[#allocation2 + $0xa4] sm:$0x1] %v5571_v40  ;;  %v5788_v55 = vrot.slane %v5786_v58, 5  ;;  %v4960_v45 = vadd.f32 %v15552_v21, %v15245_v30  ;;  %v5797_v4 = vor.u32 %v15514_v33, %v15512_v8 }
 0x25d   : > { %v15594_v53 = vrot.slane %v5839_v18, 4  ;;  %v15596_v28 = vrot.slane %v5842_v61, 5  ;;  %v5779_v6 = vsel %vm12997_vm4, %v5774_v7, %v5778_v2  ;;  %v5783_v14 = vor.u32 %v5782_v31, %v5778_v2  ;;  %v5587_v61 = vld [vmem:[#allocation2 + $0xc0] sm:$0xf] }
 0x25e   : > { %v5800_v50 = vshll.u32 %v15494_v26, 16  ;;  %v5806_v62 = vrot.slane %v5804_v0, 4  ;;  %v5810_v52 = vshll.u32 %v15586_v46, 16  ;;  %v4958_v5 = vadd.f32 %v4915_v13, %v15248_v23 }
 0x25f   : > { %v5784_v47 = vrot.slane %v5783_v14, 4  ;;  %v4999_v30 = vadd.f32 %v15546_v48, %v4960_v45  ;;  %v5798_v21 = vrot.slane %v5797_v4, 4  ;;  %v4961_v8 = vadd.f32 %v12242_v39, %v15250_v59  ;;  %v5580_v14 = vld [vmem:[#allocation2 + $0xb4] sm:$0xf] }
 0x260   : > { %v5802_v33 = vrot.slane %v5800_v50, 5  ;;  %v5812_v11 = vrot.slane %v5810_v52, 5  ;;  %v4997_v51 = vadd.f32 %v15546_v48, %v4958_v5  ;;  %v4959_v16 = vadd.f32 %v4918_v43, %v15252_v34  ;;  %v15624_v34 = vld [vmem:[#allocation2 + $0x70] sm:$0xf]  ;;  %v5591_v50 = vld [vmem:[#allocation2 + $0xc8] sm:$0x1] }
 0x261   : > { %v5789_v0 = vsel %vm12997_vm4, %v5784_v47, %v5788_v55  ;;  %v11584_v37 = vpack.c.bf16 %v4999_v30, %v4999_v30  ;;  %v5000_v23 = vadd.f32 %v15546_v48, %v4961_v8  ;;  %v5863_v13 = vshrl.u32 %v15611_v35, 16 }
 0x262   : > { %v11172_v29 = vcombine.low %v5779_v6, %v5789_v0  ;;  %v5803_v56 = vsel %vm12997_vm4, %v5798_v21, %v5802_v33  ;;  %v5807_v36 = vor.u32 %v5806_v62, %v5802_v33  ;;  %v11582_v59 = vpack.c.bf16 %v4997_v51, %v4997_v51  ;;  %v5584_v21 = vld [vmem:[#allocation2 + $0xbc] sm:$0x1] }
 0x263   : > { %v5412_v60 = vshrl.u32 %v11584_v37, 16  ;;  %v5415_v24 = vshll.u32 %v11584_v37, 16  ;;  %v11585_v9 = vpack.c.bf16 %v5000_v23, %v5000_v23  ;;  %v4998_v57 = vadd.f32 %v15546_v48, %v4959_v16  ;;  %v15638_v33 = vld [vmem:[#allocation2 + $0x5c] sm:$0x1] }
 0x264   : > { %12256 = vmatmul.mubr.msk.bf16.gmra.mxu1 %vm6095_vm10, %v11172_v29  ;;  %v5808_v12 = vrot.slane %v5807_v36, 4  ;;  %v5395_v1 = vshrl.u32 %v11582_v59, 16  ;;  %v5398_v41 = vshll.u32 %v11582_v59, 16  ;;  %v15627_v31 = vrot.slane %v5863_v13, 4  ;;  %v15646_v23 = vld [vmem:[#allocation2 + $0x7c] sm:$0xf] }
 0x265   : > { %v5414_v39 = vrot.slane %v5412_v60, 7  ;;  %v5420_v7 = vshrl.u32 %v11585_v9, 16  ;;  %v5423_v58 = vshll.u32 %v11585_v9, 16  ;;  %v11583_v18 = vpack.c.bf16 %v4998_v57, %v4998_v57  ;;  %v15659_v57 = vld [vmem:[#allocation2 + $0x68] sm:$0x1] }
 0x266   : > { %v5813_v54 = vsel %vm12997_vm4, %v5808_v12, %v5812_v11  ;;  %v5397_v40 = vrot.slane %v5395_v1, 7  ;;  %v5866_v48 = vshll.u32 %v15611_v35, 16  ;;  %v5876_v2 = vshrl.u32 %v15624_v34, 16  ;;  %v5614_v11 = vld [vmem:[#allocation2 + $0x78] sm:$0xf] }
 0x267   : > { %v5417_v55 = vor.u32 %v5415_v24, %v5414_v39  ;;  %v5418_v15 = vrot.slane %v5414_v39, 4  ;;  %v11173_v6 = vcombine.low %v5803_v56, %v5813_v54  ;;  %v5422_v45 = vrot.slane %v5420_v7, 7  ;;  %v5616_v39 = vld [vmem:[#allocation2 + $0x84] sm:$0xf]  ;;  %v15666_v7 = vld [vmem:[#allocation2 + $0x88] sm:$0xf] }
 0x268   : > { %v5400_v4 = vor.u32 %v5398_v41, %v5397_v40  ;;  %v5401_v43 = vrot.slane %v5397_v40, 4  ;;  %v5403_v62 = vshrl.u32 %v11583_v18, 16  ;;  %v5406_v52 = vshll.u32 %v11583_v18, 16 }
 0x269   : > { %v5588_v5 = vsel %vm15256_vm14, %v5417_v55, %v5587_v61  ;;  %12259 = vmatprep.mubr.msk.bf16.mxu1 %vm6095_vm10, %v11173_v6  ;;  %v5425_v47 = vor.u32 %v5423_v58, %v5422_v45  ;;  %v5427_v30 = vrot.slane %v5422_v45, 4  ;;  %v15636_v8 = vrot.slane %v5866_v48, 5  ;;  %v15678_v55 = vld [vmem:[#allocation2 + $0x74] sm:$0x1] }
 0x26a   : > { %5589 = vst [vmem:[#allocation2 + $0xc0] sm:$0xf] %v5588_v5  ;;  %v5581_v51 = vsel %vm15256_vm14, %v5400_v4, %v5580_v14  ;;  %v5405_v16 = vrot.slane %v5403_v62, 7  ;;  %v11210_v0 = vcombine.low %v15611_v35, %v15624_v34  ;;  %v5821_v37 = vor.u32 %v15560_v44, %v15556_v10 }
 0x26b   : > { %5582 = vst [vmem:[#allocation2 + $0xb4] sm:$0xf] %v5581_v51  ;;  %v5426_v13 = vsel %vm15274_vm0, %v5418_v15, %v5425_v47  ;;  %v5592_v29 = vsel %vm15268_vm15, %v5427_v30, %v5591_v50  ;;  %v5824_v56 = vshll.u32 %v15558_v38, 16  ;;  %v5830_v27 = vrot.slane %v5828_v63, 4  ;;  %v5618_v15 = vld [vmem:[#allocation2 + $0x90] sm:$0xf] }
 0x26c   : > { %5590 = vst.msk [vmem:[#allocation2 + $0xc4] sm:$0xf] %vm5017_vm8, %v5426_v13  ;;  %5593 = vst [vmem:[#allocation2 + $0xc8] sm:$0x1] %v5592_v29  ;;  %v5408_v35 = vor.u32 %v5406_v52, %v5405_v16  ;;  %v5410_v36 = vrot.slane %v5405_v16, 4  ;;  %12300 = vmatmul.mubr.msk.bf16.gmra.mxu0 %vm6095_vm10, %v11210_v0  ;;  %v5822_v10 = vrot.slane %v5821_v37, 4  ;;  %v11211_v41 = vcombine.low %v5614_v11, %v15646_v23 }
 0x26d   : > { %v5834_v44 = vshll.u32 %v15638_v33, 16  ;;  %v5826_v59 = vrot.slane %v5824_v56, 5  ;;  %v5887_v60 = vshrl.u32 %v5614_v11, 16  ;;  %v5890_v24 = vshll.u32 %v5614_v11, 16 }
 0x26e   : > { %v5900_v9 = vshrl.u32 %v15646_v23, 16  ;;  %v5409_v63 = vsel %vm15274_vm0, %v5401_v43, %v5408_v35  ;;  %v5585_v12 = vsel %vm15268_vm15, %v5410_v36, %v5584_v21  ;;  %12303 = vmatprep.mubr.msk.bf16.mxu0 %vm6095_vm10, %v11211_v41  ;;  %v5845_v19 = vor.u32 %v15596_v28, %v15594_v53  ;;  %v15682_v28 = vld [vmem:[#allocation2 + $0x94] sm:$0xf] }
 0x26f   : > { %v5836_v1 = vrot.slane %v5834_v44, 5  ;;  %5583 = vst.msk [vmem:[#allocation2 + $0xb8] sm:$0xf] %vm5017_vm8, %v5409_v63  ;;  %5586 = vst [vmem:[#allocation2 + $0xbc] sm:$0x1] %v5585_v12  ;;  %v5827_v58 = vsel %vm12997_vm4, %v5822_v10, %v5826_v59  ;;  %v5831_v18 = vor.u32 %v5830_v27, %v5826_v59  ;;  %v5889_v61 = vrot.slane %v5887_v60, 4 }
 0x270   : > { %v5892_v54 = vrot.slane %v5890_v24, 5  ;;  %v5848_v42 = vshll.u32 %v15578_v22, 16  ;;  %v5854_v40 = vrot.slane %v5852_v3, 4  ;;  %v5858_v48 = vshll.u32 %v15659_v57, 16  ;;  %v15697_v27 = vld [vmem:[#allocation2 + $0x80] sm:$0x1] }
 0x271   : > { %v5832_v6 = vrot.slane %v5831_v18, 4  ;;  %v5911_v14 = vshrl.u32 %v5616_v39, 16  ;;  %v5914_v45 = vshll.u32 %v5616_v39, 16  ;;  %v5924_v4 = vshrl.u32 %v15666_v7, 16  ;;  %v5620_v59 = vld [vmem:[#allocation2 + $0x9c] sm:$0xf] }
 0x272   : > { %v5846_v43 = vrot.slane %v5845_v19, 4  ;;  %v5850_v50 = vrot.slane %v5848_v42, 5  ;;  %v5860_v62 = vrot.slane %v5858_v48, 5  ;;  %v11212_v53 = vcombine.low %v5616_v39, %v15666_v7  ;;  %v15704_v12 = vld [vmem:[#allocation2 + $0xa0] sm:$0xf] }
 0x273   : > { %v5837_v3 = vsel %vm12997_vm4, %v5832_v6, %v5836_v1  ;;  %v5913_v52 = vrot.slane %v5911_v14, 4  ;;  %v5916_v5 = vrot.slane %v5914_v45, 5  ;;  %v5869_v47 = vor.u32 %v15636_v8, %v15627_v31  ;;  %v5622_v14 = vld [vmem:[#allocation2 + $0xa8] sm:$0xf] }
 0x274   : > { %v11174_v30 = vcombine.low %v5827_v58, %v5837_v3  ;;  %v5851_v21 = vsel %vm12997_vm4, %v5846_v43, %v5850_v50  ;;  %v5855_v11 = vor.u32 %v5854_v40, %v5850_v50  ;;  %12304 = vmatmul.mubr.msk.bf16.gmra.mxu0 %vm6095_vm10, %v11212_v53  ;;  %v5872_v51 = vshll.u32 %v15624_v34, 16 }
 0x275   : > { %v5870_v16 = vrot.slane %v5869_v47, 4  ;;  %v5878_v0 = vrot.slane %v5876_v2, 4  ;;  %v5882_v37 = vshll.u32 %v15678_v55, 16  ;;  %v5935_v13 = vshrl.u32 %v5618_v15, 16 }
 0x276   : > { %12260 = vmatmul.mubr.msk.bf16.gmra.mxu1 %vm6095_vm10, %v11174_v30  ;;  %v5856_v29 = vrot.slane %v5855_v11, 4  ;;  %v5874_v31 = vrot.slane %v5872_v51, 5  ;;  %v5938_v8 = vshll.u32 %v5618_v15, 16  ;;  %v5948_v56 = vshrl.u32 %v15682_v28, 16  ;;  %v15723_v51 = vld [vmem:[#allocation2 + $0x98] sm:$0x1] }
 0x277   : > { %v5884_v35 = vrot.slane %v5882_v37, 5  ;;  %v5937_v36 = vrot.slane %v5935_v13, 4  ;;  %v11213_v10 = vcombine.low %v5618_v15, %v15682_v28  ;;  %v5893_v44 = vor.u32 %v5892_v54, %v5889_v61  ;;  %v15712_v15 = vld [vmem:[#allocation2 + $0x8c] sm:$0x1] }
 0x278   : > { %v5861_v2 = vsel %vm12997_vm4, %v5856_v29, %v5860_v62  ;;  %v5875_v60 = vsel %vm12997_vm4, %v5870_v16, %v5874_v31  ;;  %v5879_v24 = vor.u32 %v5878_v0, %v5874_v31  ;;  %v5940_v63 = vrot.slane %v5938_v8, 5  ;;  %v15716_v62 = vld [vmem:[#allocation2 + $0xac] sm:$0xf]  ;;  %v5624_v16 = vld [vmem:[#allocation2 + $0xb4] sm:$0xf] }
 0x279   : > { %v11175_v1 = vcombine.low %v5851_v21, %v5861_v2  ;;  %12307 = vmatprep.mubr.msk.bf16.mxu0 %vm6095_vm10, %v11213_v10  ;;  %v5894_v41 = vrot.slane %v5893_v44, 4  ;;  %v5896_v39 = vshll.u32 %v15646_v23, 16  ;;  %v5902_v58 = vrot.slane %v5900_v9, 4  ;;  %v15728_v44 = vld [vmem:[#allocation2 + $0xb8] sm:$0xf] }
 0x27a   : > { %v5880_v18 = vrot.slane %v5879_v24, 4  ;;  %v5906_v61 = vshll.u32 %v15697_v27, 16  ;;  %v5959_v54 = vshrl.u32 %v5620_v59, 16  ;;  %v5962_v19 = vshll.u32 %v5620_v59, 16 }
 0x27b   : > { %12263 = vmatprep.mubr.msk.bf16.mxu1 %vm6095_vm10, %v11175_v1  ;;  %v5898_v42 = vrot.slane %v5896_v39, 5  ;;  %v5972_v40 = vshrl.u32 %v15704_v12, 16  ;;  %v11214_v48 = vcombine.low %v5620_v59, %v15704_v12  ;;  %v5917_v6 = vor.u32 %v5916_v5, %v5913_v52 }
 0x27c   : > { %v5885_v45 = vsel %vm12997_vm4, %v5880_v18, %v5884_v35  ;;  %v5908_v9 = vrot.slane %v5906_v61, 5  ;;  %v5961_v43 = vrot.slane %v5959_v54, 4  ;;  %v5964_v50 = vrot.slane %v5962_v19, 5 }
 0x27d   : > { %v11176_v53 = vcombine.low %v5875_v60, %v5885_v45  ;;  %v5899_v3 = vsel %vm12997_vm4, %v5894_v41, %v5898_v42  ;;  %v5903_v47 = vor.u32 %v5902_v58, %v5898_v42  ;;  %12308 = vmatmul.mubr.msk.bf16.gmra.mxu0 %vm6095_vm10, %v11214_v48  ;;  %v5918_v30 = vrot.slane %v5917_v6, 4  ;;  %v15740_v42 = vld [vmem:[#allocation2 + $0xa4] sm:$0x1] }
 0x27e   : > { %v5920_v21 = vshll.u32 %v15666_v7, 16  ;;  %v5926_v52 = vrot.slane %v5924_v4, 4  ;;  %v5930_v5 = vshll.u32 %v15712_v15, 16  ;;  %v5983_v11 = vshrl.u32 %v5622_v14, 16 }
 0x27f   : > { %12264 = vmatmul.mubr.msk.bf16.gmra.mxu1 %vm6095_vm10, %v11176_v53  ;;  %v5904_v0 = vrot.slane %v5903_v47, 4  ;;  %v5986_v37 = vshll.u32 %v5622_v14, 16  ;;  %v5996_v13 = vshrl.u32 %v15716_v62, 16  ;;  %v11215_v29 = vcombine.low %v5622_v14, %v15716_v62 }
 0x280   : > { %v5922_v31 = vrot.slane %v5920_v21, 5  ;;  %v5932_v8 = vrot.slane %v5930_v5, 5  ;;  %v5985_v35 = vrot.slane %v5983_v11, 4  ;;  %v5941_v10 = vor.u32 %v5940_v63, %v5937_v36  ;;  %v15748_v21 = vld [vmem:[#allocation2 + $0xb0] sm:$0x1] }
 0x281   : > { %v5909_v4 = vsel %vm12997_vm4, %v5904_v0, %v5908_v9  ;;  %v5988_v59 = vrot.slane %v5986_v37, 5  ;;  %12311 = vmatprep.mubr.msk.bf16.mxu0 %vm6095_vm10, %v11215_v29  ;;  %v5944_v2 = vshll.u32 %v15682_v28, 16  ;;  %v5950_v60 = vrot.slane %v5948_v56, 4  ;;  %v12727_v9 = vld [vmem:[#allocation2 + $0xc] sm:$0xff]  }
 0x282   : > { %v11177_v24 = vcombine.low %v5899_v3, %v5909_v4  ;;  %v5923_v1 = vsel %vm12997_vm4, %v5918_v30, %v5922_v31  ;;  %v5927_v41 = vor.u32 %v5926_v52, %v5922_v31  ;;  %v5942_v39 = vrot.slane %v5941_v10, 4  ;;  %v15757_v10 = vld [vmem:[#allocation2 + $0xbc] sm:$0x1]  ;;  %v6606_v4 = vld [vmem:[#allocation2] sm:$0xe] }
 0x283   : > { %v5946_v58 = vrot.slane %v5944_v2, 5  ;;  %v5954_v36 = vshll.u32 %v15723_v51, 16  ;;  %v6007_v63 = vshrl.u32 %v5624_v16, 16  ;;  %v6010_v18 = vshll.u32 %v5624_v16, 16 }
 0x284   : > { %12267 = vmatprep.mubr.msk.bf16.mxu1 %vm6095_vm10, %v11177_v24  ;;  %v5928_v61 = vrot.slane %v5927_v41, 4  ;;  %v6020_v54 = vshrl.u32 %v15728_v44, 16  ;;  %v11216_v19 = vcombine.low %v5624_v16, %v15728_v44  ;;  %v5965_v56 = vor.u32 %v5964_v50, %v5961_v43 }
 0x285   : > { %v5947_v48 = vsel %vm12997_vm4, %v5942_v39, %v5946_v58  ;;  %v5951_v6 = vor.u32 %v5950_v60, %v5946_v58  ;;  %v5956_v14 = vrot.slane %v5954_v36, 5  ;;  %v6009_v45 = vrot.slane %v6007_v63, 4  ;;  %v6607_v39 = vld [vmem:[#allocation2 + $0xc] sm:$0xe]  ;;  %v12729_v36 = vld [vmem:[#allocation2 + $0x18] sm:$0xff]  }
 0x286   : > { %v5933_v53 = vsel %vm12997_vm4, %v5928_v61, %v5932_v8  ;;  %v6012_v3 = vrot.slane %v6010_v18, 5  ;;  %12312 = vmatmul.mubr.msk.bf16.gmra.mxu0 %vm6095_vm10, %v11216_v19  ;;  %v5966_v47 = vrot.slane %v5965_v56, 4  ;;  %v5968_v30 = vshll.u32 %v15704_v12, 16  ;;  %v12747_v19 = vld [vmem:[%s17791_s3 + $0x50] sm:$0xff]  }
 0x287   : > { %v11178_v52 = vcombine.low %v5923_v1, %v5933_v53  ;;  %v5952_v43 = vrot.slane %v5951_v6, 4  ;;  %v5974_v50 = vrot.slane %v5972_v40, 4  ;;  %v5978_v5 = vshll.u32 %v15740_v42, 16  ;;  %12355 = vmatprep.mubr.msk.bf16.mxu0 %vm6095_vm10, %v12727_v9 }
 0x288   : > { %v5970_v11 = vrot.slane %v5968_v30, 5  ;;  %v5989_v16 = vor.u32 %v5988_v59, %v5985_v35  ;;  %v5992_v0 = vshll.u32 %v15716_v62, 16  ;;  %v5998_v37 = vrot.slane %v5996_v13, 4 }
 0x289   : > { %12268 = vmatmul.mubr.msk.bf16.gmra.mxu1 %vm6095_vm10, %v11178_v52  ;;  %v5957_v29 = vsel %vm12997_vm4, %v5952_v43, %v5956_v14  ;;  %v5980_v31 = vrot.slane %v5978_v5, 5  ;;  %v6002_v8 = vshll.u32 %v15748_v21, 16  ;;  %v6013_v40 = vor.u32 %v6012_v3, %v6009_v45  ;;  %v12730_v14 = vld [vmem:[#allocation2 + $0x24] sm:$0xff]   ;;  %v6608_v52 = vld [vmem:[#allocation2 + $0x18] sm:$0xe] }
 0x28a   : > { %v11179_v2 = vcombine.low %v5947_v48, %v5957_v29  ;;  %v5971_v60 = vsel %vm12997_vm4, %v5966_v47, %v5970_v11  ;;  %v5975_v35 = vor.u32 %v5974_v50, %v5970_v11  ;;  %v5990_v59 = vrot.slane %v5989_v16, 4  ;;  %v12772_v45 = vld [vmem:[#allocation2 + $0x4] sm:$0xf]  ;;  %v12773_v3 = vld [vmem:[#allocation2 + $0x8] sm:$0x1] }
 0x28b   : > { %v5994_v24 = vrot.slane %v5992_v0, 5  ;;  %v6004_v13 = vrot.slane %v6002_v8, 5  ;;  %v6014_v1 = vrot.slane %v6013_v40, 4  ;;  %v6016_v41 = vshll.u32 %v15728_v44, 16  ;;  %v12774_v29 = vld [vmem:[#allocation2 + $0x10] sm:$0xf] }
 0x28c   : > { %12271 = vmatprep.mubr.msk.bf16.mxu1 %vm6095_vm10, %v11179_v2  ;;  %v5976_v58 = vrot.slane %v5975_v35, 4  ;;  %v6022_v63 = vrot.slane %v6020_v54, 4  ;;  %v6026_v18 = vshll.u32 %v15757_v10, 16  ;;  %v11235_v61 = vrot.slane %v6606_v4, 9  ;;  %v12775_v8 = vld [vmem:[#allocation2 + $0x14] sm:$0x1] }
 0x28d   : > { %v5995_v56 = vsel %vm12997_vm4, %v5990_v59, %v5994_v24  ;;  %v5999_v48 = vor.u32 %v5998_v37, %v5994_v24  ;;  %v6018_v6 = vrot.slane %v6016_v41, 5  ;;  %v6656_v9 = vrot.slane %v12772_v45, 5  ;;  %v15783_v4 = vld [vmem:[%s17791_s3 + $0x78] sm:$0xff]   ;;  %v6609_v24 = vld [vmem:[#allocation2 + $0x24] sm:$0xe] }
 0x28e   : > { %v5981_v53 = vsel %vm12997_vm4, %v5976_v58, %v5980_v31  ;;  %12356 = vmatmul.mubr.msk.bf16.vlgmr.msra.gmra.mxu0 %vm6095_vm10, %v12729_v36  ;;  %v6028_v54 = vrot.slane %v6026_v18, 5  ;;  %v6659_v47 = vrot.slane %v12773_v3, 5  ;;  %v11236_v30 = vrot.slane %v6607_v39, 9  ;;  %v12776_v35 = vld [vmem:[#allocation2 + $0x1c] sm:$0xf] }
 0x28f   : > { %v11180_v43 = vcombine.low %v5971_v60, %v5981_v53  ;;  %v6000_v50 = vrot.slane %v5999_v48, 4  ;;  %v6019_v5 = vsel %vm12997_vm4, %v6014_v1, %v6018_v6  ;;  %v6023_v11 = vor.u32 %v6022_v63, %v6018_v6  ;;  %12359 = vmatprep.mubr.msk.bf16.mxu0 %vm6095_vm10, %v12730_v14  ;;  %12424 = vmatpush3.bf16.msra.mxu0 %v15519_v25  ;;  %v6610_v36 = vld [vmem:[#allocation2 + $0x30] sm:$0xe]  ;;  %v12777_v45 = vld [vmem:[#allocation2 + $0x20] sm:$0x1] }
 0x290   : > { %v15778_v0 = vsel %vm13263_vm7, %v11235_v61, %v6656_v9  ;;  %v6658_v37 = vrot.slane %v6656_v9, 4  ;;  %v6663_v31 = vrot.slane %v12774_v29, 5  ;;  %v6666_v40 = vrot.slane %v12775_v8, 5  ;;  %12425 = vmatprep.subr.bf16.mxu0 %v12747_v19  ;;  %v12731_v6 = vld [vmem:[#allocation2 + $0x30] sm:$0xff]   ;;  %v12733_v3 = vld [vmem:[#allocation2 + $0x3c] sm:$0xff]  }
 0x291   : > { %12272 = vmatmul.mubr.msk.bf16.gmra.mxu1 %vm6095_vm10, %v11180_v43  ;;  %v6005_v25 = vsel %vm12997_vm4, %v6000_v50, %v6004_v13  ;;  %v6024_v2 = vrot.slane %v6023_v11, 4  ;;  %v11237_v60 = vrot.slane %v6608_v52, 9  ;;  %v6670_v59 = vrot.slane %v12776_v35, 5  ;;  %v6612_v43 = vld [vmem:[#allocation2 + $0x48] sm:$0xe] }
 0x292   : > { %v11181_v1 = vcombine.low %v5995_v56, %v6005_v25  ;;  %v6660_v41 = vsel %vm13263_vm7, %v6658_v37, %v6659_v47  ;;  %v15792_v39 = vsel %vm13263_vm7, %v11236_v30, %v6663_v31  ;;  %v6665_v58 = vrot.slane %v6663_v31, 4  ;;  %v6611_v56 = vld [vmem:[#allocation2 + $0x3c] sm:$0xe]  ;;  %v12778_v47 = vld [vmem:[#allocation2 + $0x28] sm:$0xf] }
 0x293   : > { %v6029_v63 = vsel %vm12997_vm4, %v6024_v2, %v6028_v54  ;;  %v11255_v13 = vcombine.low %v15778_v0, %v6660_v41  ;;  %v15799_v18 = vsel %vm13263_vm7, %v11237_v60, %v6670_v59  ;;  %v6672_v61 = vrot.slane %v6670_v59, 4  ;;  %12426 = vmatpush3.bf16.msra.mxu0 %v12747_v19  ;;  %v12780_v8 = vld [vmem:[#allocation2 + $0x40] sm:$0xf]  ;;  %v6613_v25 = vld [vmem:[#allocation2 + $0x54] sm:$0xe] }
 0x294   : > { %12275 = vmatprep.mubr.msk.bf16.mxu1 %vm6095_vm10, %v11181_v1  ;;  %v11182_v48 = vcombine.low %v6019_v5, %v6029_v63  ;;  %v15804_v14 = vsel %vm13263_vm7, %v6665_v58, %v6666_v40  ;;  %v6673_v9 = vrot.slane %v12777_v45, 5  ;;  %v11238_v53 = vrot.slane %v6609_v24, 9  ;;  %12495 = vmatprep.subr.bf16.mxu0 %v15783_v4  ;;  %v12779_v5 = vld [vmem:[#allocation2 + $0x34] sm:$0xf]  ;;  %v6614_v58 = vld [vmem:[#allocation2 + $0x60] sm:$0xe] }
 0x295   : > { %v11256_v54 = vcombine.low %v15792_v39, %v15804_v14  ;;  %v6677_v30 = vrot.slane %v12778_v47, 5  ;;  %v6680_v19 = vrot.slane %v15480_v20, 5  ;;  %v11239_v52 = vrot.slane %v6610_v36, 9  ;;  %v12735_v47 = vld [vmem:[#allocation2 + $0x54] sm:$0xff]  }
 0x296   : > { %12360 = vmatmul.mubr.msk.bf16.gmra.mxu0 %vm6095_vm10, %v12731_v6  ;;  %v15813_v50 = vsel %vm13263_vm7, %v6672_v61, %v6673_v9  ;;  %v6684_v11 = vrot.slane %v12779_v5, 5  ;;  %v6687_v0 = vrot.slane %v15507_v32, 5  ;;  %v11240_v37 = vrot.slane %v6611_v56, 9  ;;  %v6615_v61 = vld [vmem:[#allocation2 + $0x6c] sm:$0xe] }
 0x297   : > { %12363 = vmatprep.mubr.msk.bf16.mxu0 %vm6095_vm10, %v12733_v3  ;;  %v11257_v29 = vcombine.low %v15799_v18, %v15813_v50  ;;  %v15821_v20 = vsel %vm13263_vm7, %v11238_v53, %v6677_v30  ;;  %v6679_v31 = vrot.slane %v6677_v30, 4  ;;  %v6691_v40 = vrot.slane %v12780_v8, 5  ;;  %v12734_v6 = vld [vmem:[#allocation2 + $0x48] sm:$0xff]   ;;  %v6616_v3 = vld [vmem:[#allocation2 + $0x78] sm:$0xe] }
 0x298   : > { %v15825_v2 = vsel %vm13263_vm7, %v11239_v52, %v6684_v11  ;;  %v6686_v60 = vrot.slane %v6684_v11, 4  ;;  %v6694_v32 = vrot.slane %v15568_v49, 5  ;;  %v11241_v35 = vrot.slane %v6612_v43, 9  ;;  %v6617_v11 = vld [vmem:[#allocation2 + $0x84] sm:$0xe] }
 0x299   : > { %12276 = vmatmul.mubr.msk.bf16.gmra.mxu1 %vm6095_vm10, %v11182_v48  ;;  %v15831_v59 = vsel %vm13263_vm7, %v6679_v31, %v6680_v19  ;;  %v15835_v24 = vsel %vm13263_vm7, %v11240_v37, %v6691_v40  ;;  %v6693_v1 = vrot.slane %v6691_v40, 4  ;;  %v6698_v41 = vrot.slane %v15494_v26, 5 }
 0x29a   : > { %12319 = vmatprep.mubr.msk.bf16.mxu1 %vm6095_vm10, %v11255_v13  ;;  %v11258_v49 = vcombine.low %v15821_v20, %v15831_v59  ;;  %v15843_v36 = vsel %vm13263_vm7, %v6686_v60, %v6687_v0  ;;  %v6701_v63 = vrot.slane %v15586_v46, 5  ;;  %v11242_v18 = vrot.slane %v6613_v25, 9  ;;  %v12741_v0 = vld [vmem:[%s17791_s3 + $0x40] sm:$0xff]   ;;  %v6618_v60 = vld [vmem:[#allocation2 + $0x90] sm:$0xe] }
 0x29b   : > { %v11259_v56 = vcombine.low %v15825_v2, %v15843_v36  ;;  %v15850_v26 = vsel %vm13263_vm7, %v6693_v1, %v6694_v32  ;;  %v15854_v13 = vsel %vm13263_vm7, %v11241_v35, %v6698_v41  ;;  %v6700_v48 = vrot.slane %v6698_v41, 4  ;;  %v6619_v41 = vld [vmem:[#allocation2 + $0x9c] sm:$0xe] }
 0x29c   : > { %v11260_v45 = vcombine.low %v15835_v24, %v15850_v26  ;;  %v6705_v46 = vrot.slane %v15558_v38, 5  ;;  %v6708_v9 = vrot.slane %v15638_v33, 5  ;;  %v11243_v53 = vrot.slane %v6614_v58, 9  ;;  %v8180_v58 = vld [vmem:[#allocation2 + $0xc] sm:$0xe] }
 0x29d   : > { %v15862_v30 = vsel %vm13263_vm7, %v6700_v48, %v6701_v63  ;;  %v6712_v19 = vrot.slane %v15578_v22, 5  ;;  %v6715_v52 = vrot.slane %v15659_v57, 5  ;;  %v11244_v43 = vrot.slane %v6615_v61, 9  ;;  %v15921_v48 = vld [vmem:[#allocation2 + $0x10] sm:$0xf] }
 0x29e   : > { %12364 = vmatmul.mubr.msk.bf16.gmra.mxu0 %vm6095_vm10, %v12734_v6  ;;  %v11261_v50 = vcombine.low %v15854_v13, %v15862_v30  ;;  %v15871_v38 = vsel %vm13263_vm7, %v11242_v18, %v6705_v46  ;;  %v6707_v33 = vrot.slane %v6705_v46, 4  ;;  %v6719_v5 = vrot.slane %v15624_v34, 5  ;;  %v15926_v6 = vld [vmem:[%s17791_s3 + $0x68] sm:$0xff]   ;;  %v12736_v46 = vld [vmem:[#allocation2 + $0x60] sm:$0xff]   ;;  %v8184_v20 = vld [vmem:[#allocation2 + $0x3c] sm:$0xe] }
 0x29f   : > { %12367 = vmatprep.mubr.msk.bf16.mxu0 %vm6095_vm10, %v12735_v47  ;;  %v15877_v22 = vsel %vm13263_vm7, %v11243_v53, %v6712_v19  ;;  %v6714_v57 = vrot.slane %v6712_v19, 4  ;;  %v6722_v37 = vrot.slane %v15678_v55, 5  ;;  %v11245_v31 = vrot.slane %v6616_v3, 9  ;;  %v15934_v47 = vld [vmem:[#allocation2 + $0x14] sm:$0x1] }
 0x2a0   : > { %v15885_v8 = vsel %vm13263_vm7, %v6707_v33, %v6708_v9  ;;  %v15889_v34 = vsel %vm13263_vm7, %v11244_v43, %v6719_v5  ;;  %v6721_v40 = vrot.slane %v6719_v5, 4  ;;  %v6726_v25 = vrot.slane %v15646_v23, 5  ;;  %v12781_v23 = vld [vmem:[%s17791_s3 + $0x48] sm:$0xff]  }
 0x2a1   : > { %12320 = vmatmul.mubr.msk.bf16.vlgmr.msra.gmra.mxu1 %vm6095_vm10, %v11256_v54  ;;  %v11262_v55 = vcombine.low %v15871_v38, %v15885_v8  ;;  %v15900_v32 = vsel %vm13263_vm7, %v6714_v57, %v6715_v52  ;;  %v6729_v35 = vrot.slane %v15697_v27, 5  ;;  %v11246_v1 = vrot.slane %v6617_v11, 9  ;;  %v6620_v5 = vld [vmem:[#allocation2 + $0xa8] sm:$0xe] }
 0x2a2   : > { %12388 = vmatpush3.bf16.msra.mxu1 %v12781_v23  ;;  %12323 = vmatprep.mubr.msk.bf16.mxu1 %vm6095_vm10, %v11257_v29  ;;  %v11263_v39 = vcombine.low %v15877_v22, %v15900_v32  ;;  %v15911_v14 = vsel %vm13263_vm7, %v6721_v40, %v6722_v37  ;;  %v15915_v54 = vsel %vm13263_vm7, %v11245_v31, %v6726_v25  ;;  %v6728_v27 = vrot.slane %v6726_v25, 4  ;;  %v15959_v40 = vld [vmem:[#allocation2 + $0x1c] sm:$0xf]  ;;  %v8181_v25 = vld [vmem:[#allocation2 + $0x18] sm:$0xe] }
 0x2a3   : > { %12389 = vmatprep.subr.bf16.mxu1 %v12741_v0  ;;  %v11264_v63 = vcombine.low %v15889_v34, %v15911_v14  ;;  %v6733_v18 = vrot.slane %v15666_v7, 5  ;;  %v6736_v29 = vrot.slane %v15712_v15, 5  ;;  %v11247_v61 = vrot.slane %v6618_v60, 9  ;;  %v12737_v15 = vld [vmem:[#allocation2 + $0x6c] sm:$0xff]   ;;  %v6621_v23 = vld [vmem:[#allocation2 + $0xb4] sm:$0xe] }
 0x2a4   : > { %v15930_v9 = vsel %vm13263_vm7, %v6728_v27, %v6729_v35  ;;  %v6740_v53 = vrot.slane %v15682_v28, 5  ;;  %v6743_v3 = vrot.slane %v15723_v51, 5  ;;  %v11248_v7 = vrot.slane %v6619_v41, 9  ;;  %v15969_v41 = vld [vmem:[#allocation2 + $0x20] sm:$0x1] }
 0x2a5   : > { %v11265_v19 = vcombine.low %v15915_v54, %v15930_v9  ;;  %v15940_v52 = vsel %vm13263_vm7, %v11246_v1, %v6733_v18  ;;  %v6735_v43 = vrot.slane %v6733_v18, 4  ;;  %v6747_v33 = vrot.slane %v15704_v12, 5  ;;  %v8186_v14 = vld [vmem:[#allocation2 + $0x54] sm:$0xe]  ;;  %v16146_v54 = vld [vmem:[#allocation2 + $0x58] sm:$0xf] }
 0x2a6   : > { %12368 = vmatmul.mubr.msk.bf16.gmra.mxu0 %vm6095_vm10, %v12736_v46  ;;  %12390 = vmatpush3.bf16.msra.mxu1 %v12741_v0  ;;  %v15946_v28 = vsel %vm13263_vm7, %v11247_v61, %v6740_v53  ;;  %v6742_v51 = vrot.slane %v6740_v53, 4  ;;  %v6750_v11 = vrot.slane %v15740_v42, 5  ;;  %v11365_v57 = vrot.slane %v8180_v58, 9  ;;  %v8182_v46 = vld [vmem:[#allocation2 + $0x24] sm:$0xe] }
 0x2a7   : > { %12371 = vmatprep.mubr.msk.bf16.mxu0 %vm6095_vm10, %v12737_v15  ;;  %v15952_v37 = vsel %vm13263_vm7, %v6735_v43, %v6736_v29  ;;  %v15956_v12 = vsel %vm13263_vm7, %v11248_v7, %v6747_v33  ;;  %v6749_v31 = vrot.slane %v6747_v33, 4  ;;  %v8246_v0 = vrot.slane %v15921_v48, 5  ;;  %12459 = vmatprep.subr.bf16.mxu1 %v15926_v6  ;;  %v7442_v53 = vld [vmem:[#allocation2 + $0xc] sm:$0xf]  ;;  %v12738_v15 = vld [vmem:[#allocation2 + $0x78] sm:$0xff]   ;;  %v12745_v9 = vld [vmem:[#allocation2 + $0xc0] sm:$0xff]  }
 0x2a8   : > { %v11266_v42 = vcombine.low %v15940_v52, %v15952_v37  ;;  %v15966_v60 = vsel %vm13263_vm7, %v6742_v51, %v6743_v3  ;;  %v8249_v35 = vrot.slane %v15934_v47, 5  ;;  %v11249_v1 = vrot.slane %v6620_v5, 9  ;;  %v16008_v5 = vld [vmem:[#allocation2 + $0x2c] sm:$0x1]  ;;  %v12739_v51 = vld [vmem:[#allocation2 + $0x84] sm:$0xff]  }
 0x2a9   : > { %12324 = vmatmul.mubr.msk.bf16.gmra.mxu1 %vm6095_vm10, %v11258_v49  ;;  %v11267_v27 = vcombine.low %v15946_v28, %v15966_v60  ;;  %v15979_v58 = vsel %vm13263_vm7, %v6749_v31, %v6750_v11  ;;  %v15983_v18 = vsel %vm13263_vm7, %v11365_v57, %v8246_v0  ;;  %v8248_v29 = vrot.slane %v8246_v0, 4 }
 0x2aa   : > { %12327 = vmatprep.mubr.msk.bf16.mxu1 %vm6095_vm10, %v11259_v56  ;;  %v6754_v59 = vrot.slane %v15716_v62, 5  ;;  %v6757_v49 = vrot.slane %v15748_v21, 5  ;;  %v11366_v61 = vrot.slane %v8181_v25, 9  ;;  %v8253_v7 = vrot.slane %v15959_v40, 5  ;;  %v15999_v56 = vld [vmem:[#allocation2 + $0x28] sm:$0xf] }
 0x2ab   : > { %v15995_v3 = vsel %vm13263_vm7, %v8248_v29, %v8249_v35  ;;  %v8256_v2 = vrot.slane %v15969_v41, 5  ;;  %v11250_v36 = vrot.slane %v6621_v23, 9  ;;  %v6761_v33 = vrot.slane %v15728_v44, 5 }
 0x2ac   : > { %v11385_v62 = vcombine.low %v15983_v18, %v15995_v3  ;;  %v16005_v21 = vsel %vm13263_vm7, %v11249_v1, %v6754_v59  ;;  %v6756_v43 = vrot.slane %v6754_v59, 4  ;;  %v16012_v11 = vsel %vm13263_vm7, %v11366_v61, %v8253_v7  ;;  %v7448_v61 = vld [vmem:[#allocation2 + $0x24] sm:$0xf] }
 0x2ad   : > { %v8255_v57 = vrot.slane %v8253_v7, 4  ;;  %v6764_v31 = vrot.slane %v15757_v10, 5  ;;  %v11367_v0 = vrot.slane %v8182_v46, 9  ;;  %v16022_v44 = vsel %vm13263_vm7, %v11250_v36, %v6761_v33 }
 0x2ae   : > { %12372 = vmatmul.mubr.msk.bf16.gmra.mxu0 %vm6095_vm10, %v12738_v15  ;;  %v16018_v25 = vsel %vm13263_vm7, %v6756_v43, %v6757_v49  ;;  %v6763_v35 = vrot.slane %v6761_v33, 4  ;;  %v8260_v1 = vrot.slane %v15999_v56, 5  ;;  %v8263_v29 = vrot.slane %v16008_v5, 5  ;;  %v8183_v49 = vld [vmem:[#allocation2 + $0x30] sm:$0xe] }
 0x2af   : > { %12375 = vmatprep.mubr.msk.bf16.mxu0 %vm6095_vm10, %v12739_v51  ;;  %v16030_v10 = vsel %vm13263_vm7, %v8255_v57, %v8256_v2  ;;  %v7491_v59 = vshrl.u32 %v7442_v53, 16  ;;  %v16043_v15 = vld [vmem:[#allocation2 + $0x34] sm:$0xf]  ;;  %v7445_v2 = vld [vmem:[#allocation2 + $0x18] sm:$0xf]  ;;  %v7494_v51 = vshll.u32 %v7442_v53, 16 }
 0x2b0   : > { %v16037_v46 = vsel %vm13263_vm7, %v6763_v35, %v6764_v31  ;;  %v16041_v7 = vsel %vm13263_vm7, %v11367_v0, %v8260_v1  ;;  %v8262_v36 = vrot.slane %v8260_v1, 4  ;;  %v7500_v57 = vshll.u32 %v15921_v48, 16  ;;  %v16052_v31 = vld [vmem:[#allocation2 + $0x38] sm:$0x1]  ;;  %v12740_v43 = vld [vmem:[#allocation2 + $0x90] sm:$0xff]  }
 0x2b1   : > { %12328 = vmatmul.mubr.msk.bf16.gmra.mxu1 %vm6095_vm10, %v11260_v45  ;;  %v7493_v33 = vrot.slane %v7491_v59, 4  ;;  %v7504_v24 = vshrl.u32 %v15921_v48, 16  ;;  %v7510_v26 = vshll.u32 %v15934_v47, 16  ;;  %v11368_v45 = vrot.slane %v8183_v49, 9 }
 0x2b2   : > { %12331 = vmatprep.mubr.msk.bf16.mxu1 %vm6095_vm10, %v11261_v50  ;;  %v16060_v0 = vsel %vm13263_vm7, %v8262_v36, %v8263_v29  ;;  %v7496_v35 = vrot.slane %v7494_v51, 5  ;;  %v7502_v1 = vrot.slane %v7500_v57, 5  ;;  %v8267_v59 = vrot.slane %v16043_v15, 5  ;;  %v12742_v29 = vld [vmem:[#allocation2 + $0x9c] sm:$0xff]  }
 0x2b3   : > { %v7506_v13 = vrot.slane %v7504_v24, 4  ;;  %v7512_v30 = vrot.slane %v7510_v26, 5  ;;  %v8270_v50 = vrot.slane %v16052_v31, 5  ;;  %v7515_v23 = vshrl.u32 %v7445_v2, 16  ;;  %v16075_v26 = vld [vmem:[#allocation2 + $0x40] sm:$0xf] }
 0x2b4   : > { %v7497_v36 = vor.u32 %v7496_v35, %v7493_v33  ;;  %v16070_v48 = vsel %vm13263_vm7, %v11368_v45, %v8267_v59  ;;  %v8269_v47 = vrot.slane %v8267_v59, 4  ;;  %v7518_v49 = vshll.u32 %v7445_v2, 16  ;;  %v16083_v59 = vld [vmem:[#allocation2 + $0x44] sm:$0x1] }
 0x2b5   : > { %v7507_v51 = vor.u32 %v7506_v13, %v7502_v1  ;;  %v7517_v57 = vrot.slane %v7515_v23, 4  ;;  %v7524_v53 = vshll.u32 %v15959_v40, 16  ;;  %v7528_v24 = vshrl.u32 %v15959_v40, 16 }
 0x2b6   : > { %12376 = vmatmul.mubr.msk.bf16.gmra.mxu0 %vm6095_vm10, %v12740_v43  ;;  %v7498_v33 = vrot.slane %v7497_v36, 4  ;;  %v16080_v45 = vsel %vm13263_vm7, %v8269_v47, %v8270_v50  ;;  %v7520_v35 = vrot.slane %v7518_v49, 5  ;;  %v7534_v2 = vshll.u32 %v15969_v41, 16 }
 0x2b7   : > { %12379 = vmatprep.mubr.msk.bf16.mxu0 %vm6095_vm10, %v12742_v29  ;;  %v7508_v43 = vrot.slane %v7507_v51, 4  ;;  %v11388_v23 = vcombine.low %v16070_v48, %v16080_v45  ;;  %v7526_v13 = vrot.slane %v7524_v53, 5  ;;  %v7530_v40 = vrot.slane %v7528_v24, 4 }
 0x2b8   : > { %v7503_v50 = vsel %vm12997_vm4, %v7498_v33, %v7502_v1  ;;  %v7521_v29 = vor.u32 %v7520_v35, %v7517_v57  ;;  %v7536_v36 = vrot.slane %v7534_v2, 5  ;;  %v11369_v41 = vrot.slane %v8184_v20, 9  ;;  %v8185_v57 = vld [vmem:[#allocation2 + $0x48] sm:$0xe]  ;;  %v12744_v33 = vld [vmem:[#allocation2 + $0xb4] sm:$0xff]  }
 0x2b9   : > { %12332 = vmatmul.mubr.msk.bf16.gmra.mxu1 %vm6095_vm10, %v11262_v55  ;;  %v7513_v53 = vsel %vm12997_vm4, %v7508_v43, %v7512_v30  ;;  %v7531_v47 = vor.u32 %v7530_v40, %v7526_v13  ;;  %v8274_v49 = vrot.slane %v16075_v26, 5  ;;  %v8277_v38 = vrot.slane %v16083_v59, 5  ;;  %v12743_v20 = vld [vmem:[#allocation2 + $0xa8] sm:$0xff]   ;;  %v16113_v40 = vld [vmem:[#allocation2 + $0x50] sm:$0x1] }
 0x2ba   : > { %12335 = vmatprep.mubr.msk.bf16.mxu1 %vm6095_vm10, %v11263_v39  ;;  %v16101_v8 = vcombine.low %v7503_v50, %v7513_v53  ;;  %v7522_v55 = vrot.slane %v7521_v29, 4  ;;  %v7539_v1 = vshrl.u32 %v7448_v61, 16  ;;  %v7542_v51 = vshll.u32 %v7448_v61, 16  ;;  %v16108_v30 = vld [vmem:[#allocation2 + $0x4c] sm:$0xf] }
 0x2bb   : > { %v7532_v24 = vrot.slane %v7531_v47, 4  ;;  %v16105_v22 = vsel %vm13263_vm7, %v11369_v41, %v8274_v49  ;;  %v8276_v32 = vrot.slane %v8274_v49, 4  ;;  %v7548_v39 = vshll.u32 %v15999_v56, 16  ;;  %v7451_v47 = vld [vmem:[#allocation2 + $0x30] sm:$0xf] }
 0x2bc   : > { %v7527_v35 = vsel %vm12997_vm4, %v7522_v55, %v7526_v13  ;;  %v7541_v2 = vrot.slane %v7539_v1, 4  ;;  %v7544_v43 = vrot.slane %v7542_v51, 5  ;;  %v7552_v61 = vshrl.u32 %v15999_v56, 16 }
 0x2bd   : > { %v7537_v50 = vsel %vm12997_vm4, %v7532_v24, %v7536_v36  ;;  %v16120_v29 = vsel %vm13263_vm7, %v8276_v32, %v8277_v38  ;;  %v7550_v41 = vrot.slane %v7548_v39, 5  ;;  %v7558_v53 = vshll.u32 %v16008_v5, 16 }
 0x2be   : > { %12380 = vmatmul.mubr.msk.bf16.gmra.mxu0 %vm6095_vm10, %v12743_v20  ;;  %v16124_v13 = vcombine.low %v7527_v35, %v7537_v50  ;;  %v11389_v56 = vcombine.low %v16105_v22, %v16120_v29  ;;  %v7545_v49 = vor.u32 %v7544_v43, %v7541_v2  ;;  %v7554_v55 = vrot.slane %v7552_v61, 4 }
 0x2bf   : > { %12383 = vmatprep.mubr.msk.bf16.mxu0 %vm6095_vm10, %v12744_v33  ;;  %v7560_v1 = vrot.slane %v7558_v53, 5  ;;  %v11370_v51 = vrot.slane %v8185_v57, 9  ;;  %v8281_v36 = vrot.slane %v16108_v30, 5  ;;  %v8284_v38 = vrot.slane %v16113_v40, 5 }
 0x2c0   : > { %v7546_v5 = vrot.slane %v7545_v49, 4  ;;  %v7555_v20 = vor.u32 %v7554_v55, %v7550_v41  ;;  %v7563_v24 = vshrl.u32 %v7451_v47, 16  ;;  %v7566_v32 = vshll.u32 %v7451_v47, 16 }
 0x2c1   : > { %12336 = vmatmul.mubr.msk.bf16.gmra.mxu1 %vm6095_vm10, %v11264_v63  ;;  %v16140_v57 = vsel %vm13263_vm7, %v11370_v51, %v8281_v36  ;;  %v8283_v39 = vrot.slane %v8281_v36, 4  ;;  %v7572_v33 = vshll.u32 %v16043_v15, 16  ;;  %v7576_v34 = vshrl.u32 %v16043_v15, 16  ;;  %v7454_v63 = vld [vmem:[#allocation2 + $0x3c] sm:$0xf] }
 0x2c2   : > { %12339 = vmatprep.mubr.msk.bf16.mxu1 %vm6095_vm10, %v11265_v19  ;;  %v7551_v35 = vsel %vm12997_vm4, %v7546_v5, %v7550_v41  ;;  %v7556_v2 = vrot.slane %v7555_v20, 4  ;;  %v7565_v43 = vrot.slane %v7563_v24, 4  ;;  %v7568_v61 = vrot.slane %v7566_v32, 5  ;;  %v16153_v15 = vld [vmem:[#allocation2 + $0x5c] sm:$0x1] }
 0x2c3   : > { %v16150_v19 = vsel %vm13263_vm7, %v8283_v39, %v8284_v38  ;;  %v7574_v50 = vrot.slane %v7572_v33, 5  ;;  %v7578_v53 = vrot.slane %v7576_v34, 4  ;;  %v7582_v47 = vshll.u32 %v16052_v31, 16  ;;  %v8187_v39 = vld [vmem:[#allocation2 + $0x60] sm:$0xe] }
 0x2c4   : > { %v7561_v49 = vsel %vm12997_vm4, %v7556_v2, %v7560_v1  ;;  %v11390_v41 = vcombine.low %v16140_v57, %v16150_v19  ;;  %v7569_v55 = vor.u32 %v7568_v61, %v7565_v43  ;;  %v11371_v51 = vrot.slane %v8186_v14, 9  ;;  %v16173_v2 = vld [vmem:[#allocation2 + $0x64] sm:$0xf]  ;;  %v16182_v43 = vld [vmem:[#allocation2 + $0x68] sm:$0x1] }
 0x2c5   : > { %v16160_v36 = vcombine.low %v7551_v35, %v7561_v49  ;;  %v7579_v38 = vor.u32 %v7578_v53, %v7574_v50  ;;  %v7584_v5 = vrot.slane %v7582_v47, 5  ;;  %v8288_v20 = vrot.slane %v16146_v54, 5  ;;  %v12749_v57 = vld [vmem:[%s17791_s3 + $0x60] sm:$0xff]  }
 0x2c6   : > { %12384 = vmatmul.mubr.msk.bf16.gmra.mxu0 %vm6095_vm10, %v12745_v9  ;;  %v7570_v31 = vrot.slane %v7569_v55, 4  ;;  %v8291_v1 = vrot.slane %v16153_v15, 5  ;;  %v7587_v24 = vshrl.u32 %v7454_v63, 16  ;;  %v7590_v32 = vshll.u32 %v7454_v63, 16  ;;  %v7457_v9 = vld [vmem:[#allocation2 + $0x48] sm:$0xf] }
 0x2c7   : > { %12427 = vmatprep.mubr.msk.bf16.mxu0 %vm6095_vm10, %v11385_v62  ;;  %v7580_v33 = vrot.slane %v7579_v38, 4  ;;  %v16170_v34 = vsel %vm13263_vm7, %v11371_v51, %v8288_v20  ;;  %v8290_v14 = vrot.slane %v8288_v20, 4  ;;  %v7596_v35 = vshll.u32 %v16075_v26, 16  ;;  %v12751_v55 = vld [vmem:[%s17791_s3 + $0x70] sm:$0xff]  }
 0x2c8   : > { %v7575_v18 = vsel %vm12997_vm4, %v7570_v31, %v7574_v50  ;;  %v7589_v3 = vrot.slane %v7587_v24, 4  ;;  %v7592_v62 = vrot.slane %v7590_v32, 5  ;;  %v7600_v63 = vshrl.u32 %v16075_v26, 16 }
 0x2c9   : > { %12340 = vmatmul.mubr.msk.bf16.gmra.mxu1 %vm6095_vm10, %v11266_v42  ;;  %v7585_v61 = vsel %vm12997_vm4, %v7580_v33, %v7584_v5  ;;  %v16192_v52 = vsel %vm13263_vm7, %v8290_v14, %v8291_v1  ;;  %v7598_v37 = vrot.slane %v7596_v35, 5  ;;  %v7606_v42 = vshll.u32 %v16083_v59, 16  ;;  %v7460_v33 = vld [vmem:[#allocation2 + $0x54] sm:$0xf] }
 0x2ca   : > { %12343 = vmatprep.mubr.msk.bf16.mxu1 %vm6095_vm10, %v11267_v27  ;;  %v16195_v50 = vcombine.low %v7575_v18, %v7585_v61  ;;  %v11391_v26 = vcombine.low %v16170_v34, %v16192_v52  ;;  %v7593_v53 = vor.u32 %v7592_v62, %v7589_v3  ;;  %v7602_v28 = vrot.slane %v7600_v63, 4  ;;  %v16220_v3 = vld [vmem:[#allocation2 + $0x70] sm:$0xf]  ;;  %v16326_v52 = vld [vmem:[#allocation2 + $0x94] sm:$0xf] }
 0x2cb   : > { %v7608_v60 = vrot.slane %v7606_v42, 5  ;;  %v11372_v27 = vrot.slane %v8187_v39, 9  ;;  %v8295_v47 = vrot.slane %v16173_v2, 5  ;;  %v8298_v49 = vrot.slane %v16182_v43, 5  ;;  %v8188_v39 = vld [vmem:[#allocation2 + $0x6c] sm:$0xe] }
 0x2cc   : > { %v7594_v51 = vrot.slane %v7593_v53, 4  ;;  %v7603_v59 = vor.u32 %v7602_v28, %v7598_v37  ;;  %v7611_v38 = vshrl.u32 %v7457_v9, 16  ;;  %v7614_v5 = vshll.u32 %v7457_v9, 16 }
 0x2cd   : > { %v18008_v20 = vcombine.low %v16012_v11, %v16030_v10  ;;  %v16210_v31 = vsel %vm13263_vm7, %v11372_v27, %v8295_v47  ;;  %v8297_v1 = vrot.slane %v8295_v47, 4  ;;  %v7620_v24 = vshll.u32 %v16108_v30, 16 }
 0x2ce   : > { %v7624_v32 = vshrl.u32 %v16108_v30, 16  ;;  %v18009_v14 = vcombine.low %v16041_v7, %v16060_v0  ;;  %v7599_v11 = vsel %vm12997_vm4, %v7594_v51, %v7598_v37  ;;  %v7604_v10 = vrot.slane %v7603_v59, 4  ;;  %v16228_v0 = vld [vmem:[#allocation2 + $0x74] sm:$0x1]  ;;  %v8189_v51 = vld [vmem:[#allocation2 + $0x78] sm:$0xe] }
 0x2cf   : > { %12428 = vmatmul.mubr.msk.bf16.vlgmr.msra.gmra.mxu0 %vm6095_vm10, %v18008_v20  ;;  %v7613_v35 = vrot.slane %v7611_v38, 4  ;;  %v7616_v18 = vrot.slane %v7614_v5, 5  ;;  %v16225_v30 = vsel %vm13263_vm7, %v8297_v1, %v8298_v49  ;;  %v7622_v62 = vrot.slane %v7620_v24, 5  ;;  %v16251_v5 = vld [vmem:[#allocation2 + $0x7c] sm:$0xf] }
 0x2d0   : > { %12431 = vmatprep.mubr.msk.bf16.mxu0 %vm6095_vm10, %v18009_v14  ;;  %12496 = vmatpush3.bf16.msra.mxu0 %v15783_v4  ;;  %v7626_v63 = vrot.slane %v7624_v32, 4  ;;  %v7630_v7 = vshll.u32 %v16113_v40, 16  ;;  %v18010_v61 = vcombine.low %v15956_v12, %v15979_v58  ;;  %v7609_v37 = vsel %vm12997_vm4, %v7604_v10, %v7608_v60  ;;  %v7463_v10 = vld [vmem:[#allocation2 + $0x60] sm:$0xf] }
 0x2d1   : > { %12497 = vmatprep.subr.bf16.mxu0 %v12751_v55  ;;  %v11392_v4 = vcombine.low %v16210_v31, %v16225_v30  ;;  %v7617_v42 = vor.u32 %v7616_v18, %v7613_v35  ;;  %v11373_v9 = vrot.slane %v8188_v39, 9  ;;  %v18011_v53 = vcombine.low %v16005_v21, %v16018_v25  ;;  %v16256_v39 = vld [vmem:[#allocation2 + $0x80] sm:$0x1] }
 0x2d2   : > { %12344 = vmatmul.mubr.msk.bf16.gmra.mxu1 %vm6095_vm10, %v18010_v61  ;;  %v16242_v40 = vcombine.low %v7599_v11, %v7609_v37  ;;  %v7627_v28 = vor.u32 %v7626_v63, %v7622_v62  ;;  %v7632_v27 = vrot.slane %v7630_v7, 5  ;;  %v8302_v12 = vrot.slane %v16220_v3, 5 }
 0x2d3   : > { %12347 = vmatprep.mubr.msk.bf16.mxu1 %vm6095_vm10, %v18011_v53  ;;  %v7618_v58 = vrot.slane %v7617_v42, 4  ;;  %v8305_v47 = vrot.slane %v16228_v0, 5  ;;  %v7635_v60 = vshrl.u32 %v7460_v33, 16  ;;  %v7638_v49 = vshll.u32 %v7460_v33, 16  ;;  %v8190_v53 = vld [vmem:[#allocation2 + $0x84] sm:$0xe] }
 0x2d4   : > { %12498 = vmatpush3.bf16.msra.mxu0 %v12751_v55  ;;  %v7628_v59 = vrot.slane %v7627_v28, 4  ;;  %v16248_v38 = vsel %vm13263_vm7, %v11373_v9, %v8302_v12  ;;  %v8304_v21 = vrot.slane %v8302_v12, 4  ;;  %v7644_v25 = vshll.u32 %v16146_v54, 16 }
 0x2d5   : > { %v7623_v20 = vsel %vm12997_vm4, %v7618_v58, %v7622_v62  ;;  %v7637_v1 = vrot.slane %v7635_v60, 4  ;;  %v7640_v24 = vrot.slane %v7638_v49, 5  ;;  %v7648_v32 = vshrl.u32 %v16146_v54, 16  ;;  %v16293_v58 = vld [vmem:[#allocation2 + $0x88] sm:$0xf] }
 0x2d6   : > { %v7633_v55 = vsel %vm12997_vm4, %v7628_v59, %v7632_v27  ;;  %v16266_v33 = vsel %vm13263_vm7, %v8304_v21, %v8305_v47  ;;  %v7646_v14 = vrot.slane %v7644_v25, 5  ;;  %v7654_v11 = vshll.u32 %v16153_v15, 16 }
 0x2d7   : > { %12432 = vmatmul.mubr.msk.bf16.gmra.mxu0 %vm6095_vm10, %v11388_v23  ;;  %v16273_v54 = vcombine.low %v7623_v20, %v7633_v55  ;;  %v11393_v48 = vcombine.low %v16248_v38, %v16266_v33  ;;  %v7641_v45 = vor.u32 %v7640_v24, %v7637_v1  ;;  %v7650_v23 = vrot.slane %v7648_v32, 4  ;;  %v16380_v33 = vld [vmem:[#allocation2 + $0xa4] sm:$0x1] }
 0x2d8   : > { %12435 = vmatprep.mubr.msk.bf16.mxu0 %vm6095_vm10, %v11389_v56  ;;  %v7656_v35 = vrot.slane %v7654_v11, 5  ;;  %v11374_v18 = vrot.slane %v8189_v51, 9  ;;  %v8309_v62 = vrot.slane %v16251_v5, 5  ;;  %v8312_v63 = vrot.slane %v16256_v39, 5  ;;  %v16300_v51 = vld [vmem:[#allocation2 + $0x8c] sm:$0x1] }
 0x2d9   : > { %v18012_v15 = vcombine.low %v16022_v44, %v16037_v46  ;;  %v7642_v22 = vrot.slane %v7641_v45, 4  ;;  %v7651_v29 = vor.u32 %v7650_v23, %v7646_v14  ;;  %v7659_v56 = vshrl.u32 %v7463_v10, 16  ;;  %v7466_v44 = vld [vmem:[#allocation2 + $0x6c] sm:$0xf] }
 0x2da   : > { %v7662_v7 = vshll.u32 %v7463_v10, 16  ;;  %v16287_v61 = vsel %vm13263_vm7, %v11374_v18, %v8309_v62  ;;  %v8311_v37 = vrot.slane %v8309_v62, 4  ;;  %v7668_v42 = vshll.u32 %v16173_v2, 16  ;;  %v8191_v10 = vld [vmem:[#allocation2 + $0x90] sm:$0xe] }
 0x2db   : > { %12348 = vmatmul.mubr.msk.bf16.gmra.mxu1 %vm6095_vm10, %v18012_v15  ;;  %v7672_v9 = vshrl.u32 %v16173_v2, 16  ;;  %v7647_v46 = vsel %vm12997_vm4, %v7642_v22, %v7646_v14  ;;  %v7652_v28 = vrot.slane %v7651_v29, 4  ;;  %v7661_v27 = vrot.slane %v7659_v56, 4  ;;  %v16333_v62 = vld [vmem:[#allocation2 + $0x98] sm:$0x1] }
 0x2dc   : > { %12391 = vmatprep.mubr.msk.bf16.mxu1 %vm6095_vm10, %v16101_v8  ;;  %v7664_v12 = vrot.slane %v7662_v7, 5  ;;  %v16297_v8 = vsel %vm13263_vm7, %v8311_v37, %v8312_v63  ;;  %v7670_v47 = vrot.slane %v7668_v42, 5  ;;  %v7678_v49 = vshll.u32 %v16182_v43, 16  ;;  %v7469_v29 = vld [vmem:[#allocation2 + $0x78] sm:$0xf] }
 0x2dd   : > { %v7674_v60 = vrot.slane %v7672_v9, 4  ;;  %v7657_v2 = vsel %vm12997_vm4, %v7652_v28, %v7656_v35  ;;  %v11394_v59 = vcombine.low %v16287_v61, %v16297_v8  ;;  %v11375_v25 = vrot.slane %v8190_v53, 9 }
 0x2de   : > { %v7665_v21 = vor.u32 %v7664_v12, %v7661_v27  ;;  %v16310_v20 = vcombine.low %v7647_v46, %v7657_v2  ;;  %v7680_v24 = vrot.slane %v7678_v49, 5  ;;  %v8316_v43 = vrot.slane %v16293_v58, 5  ;;  %v8192_v49 = vld [vmem:[#allocation2 + $0x9c] sm:$0xe]  ;;  %v7472_v2 = vld [vmem:[#allocation2 + $0x84] sm:$0xf] }
 0x2df   : > { %12436 = vmatmul.mubr.msk.bf16.gmra.mxu0 %vm6095_vm10, %v11390_v41  ;;  %v7675_v1 = vor.u32 %v7674_v60, %v7670_v47  ;;  %v8319_v55 = vrot.slane %v16300_v51, 5  ;;  %v7683_v14 = vshrl.u32 %v7466_v44, 16  ;;  %v7686_v11 = vshll.u32 %v7466_v44, 16 }
 0x2e0   : > { %12439 = vmatprep.mubr.msk.bf16.mxu0 %vm6095_vm10, %v11391_v26  ;;  %v7666_v32 = vrot.slane %v7665_v21, 4  ;;  %v16323_v41 = vsel %vm13263_vm7, %v11375_v25, %v8316_v43  ;;  %v8318_v45 = vrot.slane %v8316_v43, 4  ;;  %v7692_v34 = vshll.u32 %v16220_v3, 16  ;;  %v16372_v25 = vld [vmem:[#allocation2 + $0xa0] sm:$0xf] }
 0x2e1   : > { %v7676_v19 = vrot.slane %v7675_v1, 4  ;;  %v7685_v23 = vrot.slane %v7683_v14, 4  ;;  %v7688_v35 = vrot.slane %v7686_v11, 5  ;;  %v7696_v18 = vshrl.u32 %v16220_v3, 16 }
 0x2e2   : > { %v7671_v26 = vsel %vm12997_vm4, %v7666_v32, %v7670_v47  ;;  %v7694_v15 = vrot.slane %v7692_v34, 5  ;;  %v7702_v22 = vshll.u32 %v16228_v0, 16  ;;  %v11376_v42 = vrot.slane %v8191_v10, 9  ;;  %v8193_v34 = vld [vmem:[#allocation2 + $0xa8] sm:$0xe] }
 0x2e3   : > { %12392 = vmatmul.mubr.msk.bf16.vlgmr.msra.gmra.mxu1 %vm6095_vm10, %v16124_v13  ;;  %v7681_v63 = vsel %vm12997_vm4, %v7676_v19, %v7680_v24  ;;  %v16342_v13 = vsel %vm13263_vm7, %v8318_v45, %v8319_v55  ;;  %v7698_v7 = vrot.slane %v7696_v18, 4  ;;  %v8323_v9 = vrot.slane %v16326_v52, 5 }
 0x2e4   : > { %12460 = vmatpush3.bf16.msra.mxu1 %v15926_v6  ;;  %12395 = vmatprep.mubr.msk.bf16.mxu1 %vm6095_vm10, %v16160_v36  ;;  %v16345_v56 = vcombine.low %v7671_v26, %v7681_v63  ;;  %v11395_v3 = vcombine.low %v16323_v41, %v16342_v13  ;;  %v7689_v6 = vor.u32 %v7688_v35, %v7685_v23  ;;  %v16352_v36 = vld [vmem:[%s17791_s3 + $0x88] sm:$0xff]   ;;  %v7704_v37 = vrot.slane %v7702_v22, 5 }
 0x2e5   : > { %12461 = vmatprep.subr.bf16.mxu1 %v12749_v57  ;;  %v8326_v0 = vrot.slane %v16333_v62, 5  ;;  %v7699_v44 = vor.u32 %v7698_v7, %v7694_v15  ;;  %v7707_v46 = vshrl.u32 %v7469_v29, 16  ;;  %v7710_v28 = vshll.u32 %v7469_v29, 16  ;;  %v16404_v7 = vld [vmem:[#allocation2 + $0xb0] sm:$0x1] }
 0x2e6   : > { %v7690_v53 = vrot.slane %v7689_v6, 4  ;;  %v16362_v27 = vsel %vm13263_vm7, %v11376_v42, %v8323_v9  ;;  %v8325_v12 = vrot.slane %v8323_v9, 4  ;;  %v7716_v47 = vshll.u32 %v16251_v5, 16 }
 0x2e7   : > { %12440 = vmatmul.mubr.msk.bf16.gmra.mxu0 %vm6095_vm10, %v11392_v4  ;;  %v7720_v60 = vshrl.u32 %v16251_v5, 16  ;;  %v7700_v30 = vrot.slane %v7699_v44, 4  ;;  %v7709_v4 = vrot.slane %v7707_v46, 4  ;;  %v7712_v21 = vrot.slane %v7710_v28, 5 }
 0x2e8   : > { %12462 = vmatpush3.bf16.msra.mxu1 %v12749_v57  ;;  %12443 = vmatprep.mubr.msk.bf16.mxu0 %vm6095_vm10, %v11393_v48  ;;  %v7695_v31 = vsel %vm12997_vm4, %v7690_v53, %v7694_v15  ;;  %v16377_v5 = vsel %vm13263_vm7, %v8325_v12, %v8326_v0  ;;  %v7718_v1 = vrot.slane %v7716_v47, 5  ;;  %v7726_v38 = vshll.u32 %v16256_v39, 16  ;;  %v16399_v63 = vpop.f32.mrf.mxu0  ;;  %v7475_v53 = vld [vmem:[#allocation2 + $0x90] sm:$0xf] }
 0x2e9   : > { %12531 = vmatprep.subr.bf16.mxu1 %v16352_v36  ;;  %v7722_v24 = vrot.slane %v7720_v60, 4  ;;  %v7705_v48 = vsel %vm12997_vm4, %v7700_v30, %v7704_v37  ;;  %v11396_v43 = vcombine.low %v16362_v27, %v16377_v5  ;;  %v7713_v32 = vor.u32 %v7712_v21, %v7709_v4  ;;  %v8194_v30 = vld [vmem:[#allocation2 + $0xb4] sm:$0xe]  ;;  %v7478_v4 = vld [vmem:[#allocation2 + $0x9c] sm:$0xf] }
 0x2ea   : > { %v11377_v55 = vrot.slane %v8192_v49, 9  ;;  %v16390_v14 = vcombine.low %v7695_v31, %v7705_v48  ;;  %v7728_v39 = vrot.slane %v7726_v38, 5  ;;  %v8330_v10 = vrot.slane %v16372_v25, 5  ;;  %v16423_v47 = vpop.f32.mrf.mxu0  ;;  %v16437_v38 = vld [vmem:[#allocation2 + $0xb8] sm:$0xf] }
 0x2eb   : > { %12396 = vmatmul.mubr.msk.bf16.gmra.mxu1 %vm6095_vm10, %v16195_v50  ;;  %v7723_v11 = vor.u32 %v7722_v24, %v7718_v1  ;;  %v7714_v57 = vrot.slane %v7713_v32, 4  ;;  %v8333_v50 = vrot.slane %v16380_v33, 5  ;;  %v7731_v19 = vshrl.u32 %v7472_v2, 16 }
 0x2ec   : > { %12399 = vmatprep.mubr.msk.bf16.mxu1 %vm6095_vm10, %v16242_v40  ;;  %v7734_v45 = vshll.u32 %v7472_v2, 16  ;;  %v8331_v23 = vsel %vm13263_vm7, %v11377_v55, %v8330_v10  ;;  %v8332_v35 = vrot.slane %v8330_v10, 4  ;;  %v7740_v18 = vshll.u32 %v16293_v58, 16  ;;  %v16397_v40 = vld [vmem:[#allocation2 + $0xac] sm:$0xf] }
 0x2ed   : > { %v7724_v26 = vrot.slane %v7723_v11, 4  ;;  %v7719_v15 = vsel %vm12997_vm4, %v7714_v57, %v7718_v1  ;;  %v7733_v22 = vrot.slane %v7731_v19, 4  ;;  %v7744_v6 = vshrl.u32 %v16293_v58, 16  ;;  %v16442_v11 = vld [vmem:[#allocation2 + $0xbc] sm:$0x1] }
 0x2ee   : > { %v7736_v29 = vrot.slane %v7734_v45, 5  ;;  %v8334_v42 = vsel %vm13263_vm7, %v8332_v35, %v8333_v50  ;;  %v7742_v9 = vrot.slane %v7740_v18, 5  ;;  %v7750_v0 = vshll.u32 %v16300_v51, 16 }
 0x2ef   : > { %12444 = vmatmul.mubr.msk.bf16.gmra.mxu0 %vm6095_vm10, %v11394_v59  ;;  %v7729_v37 = vsel %vm12997_vm4, %v7724_v26, %v7728_v39  ;;  %v11397_v61 = vcombine.low %v8331_v23, %v8334_v42  ;;  %v7746_v59 = vrot.slane %v7744_v6, 4  ;;  %v11378_v46 = vrot.slane %v8193_v34, 9 }
 0x2f0   : > { %12447 = vmatprep.mubr.msk.bf16.mxu0 %vm6095_vm10, %v11395_v3  ;;  %v16419_v58 = vcombine.low %v7719_v15, %v7729_v37  ;;  %v7737_v8 = vor.u32 %v7736_v29, %v7733_v22  ;;  %v7752_v44 = vrot.slane %v7750_v0, 5  ;;  %v8337_v28 = vrot.slane %v16397_v40, 5  ;;  %v8195_v15 = vld [vmem:[#allocation2 + $0xc0] sm:$0xe]  ;;  %v16461_v29 = vld [vmem:[#allocation2 + $0xc4] sm:$0xf] }
 0x2f1   : > { %v8340_v12 = vrot.slane %v16404_v7, 5  ;;  %v7747_v41 = vor.u32 %v7746_v59, %v7742_v9  ;;  %v7755_v13 = vshrl.u32 %v7475_v53, 16  ;;  %v7758_v3 = vshll.u32 %v7475_v53, 16  ;;  %v16470_v53 = vld [vmem:[#allocation2 + $0xc8] sm:$0x1] }
 0x2f2   : > { %v7738_v51 = vrot.slane %v7737_v8, 4  ;;  %v16431_v60 = vsel %vm13263_vm7, %v11378_v46, %v8337_v28  ;;  %v8339_v49 = vrot.slane %v8337_v28, 4  ;;  %v7764_v2 = vshll.u32 %v16326_v52, 16 }
 0x2f3   : > { %12400 = vmatmul.mubr.msk.bf16.gmra.mxu1 %vm6095_vm10, %v16273_v54  ;;  %v7768_v31 = vshrl.u32 %v16326_v52, 16  ;;  %v7748_v21 = vrot.slane %v7747_v41, 4  ;;  %v7757_v1 = vrot.slane %v7755_v13, 4  ;;  %v7760_v24 = vrot.slane %v7758_v3, 5  ;;  %v16444_v52 = vpop.f32.mrf.mxu0 }
 0x2f4   : > { %12403 = vmatprep.mubr.msk.bf16.mxu1 %vm6095_vm10, %v16310_v20  ;;  %v7743_v54 = vsel %vm12997_vm4, %v7738_v51, %v7742_v9  ;;  %v8341_v20 = vsel %vm13263_vm7, %v8339_v49, %v8340_v12  ;;  %v7766_v48 = vrot.slane %v7764_v2, 5  ;;  %v7774_v55 = vshll.u32 %v16333_v62, 16 }
 0x2f5   : > { %v7770_v32 = vrot.slane %v7768_v31, 4  ;;  %v7753_v39 = vsel %vm12997_vm4, %v7748_v21, %v7752_v44  ;;  %v11398_v10 = vcombine.low %v16431_v60, %v8341_v20  ;;  %v7761_v57 = vor.u32 %v7760_v24, %v7757_v1  ;;  %v16463_v6 = vpop.f32.mrf.mxu0  ;;  %v7481_v44 = vld [vmem:[#allocation2 + $0xa8] sm:$0xf]  ;;  %v9033_v21 = vld [vmem:[#allocation2 + $0x18] sm:$0xf] }
 0x2f6   : > { %v11379_v50 = vrot.slane %v8194_v30, 9  ;;  %v16453_v19 = vcombine.low %v7743_v54, %v7753_v39  ;;  %v7776_v62 = vrot.slane %v7774_v55, 5  ;;  %v8344_v34 = vrot.slane %v16437_v38, 5 }
 0x2f7   : > { %12448 = vmatmul.mubr.msk.bf16.gmra.mxu0 %vm6095_vm10, %v11396_v43  ;;  %v7771_v45 = vor.u32 %v7770_v32, %v7766_v48  ;;  %v7762_v26 = vrot.slane %v7761_v57, 4  ;;  %v8347_v23 = vrot.slane %v16442_v11, 5  ;;  %v7779_v35 = vshrl.u32 %v7478_v4, 16  ;;  %v16483_v3 = vpop.f32.mrf.mxu0  ;;  %v16496_v57 = vld [vmem:[#allocation2 + $0x1c] sm:$0xf] }
 0x2f8   : > { %12451 = vmatprep.mubr.msk.bf16.mxu0 %vm6095_vm10, %v11397_v61  ;;  %v7782_v18 = vshll.u32 %v7478_v4, 16  ;;  %v8345_v27 = vsel %vm13263_vm7, %v11379_v50, %v8344_v34  ;;  %v8346_v5 = vrot.slane %v8344_v34, 4  ;;  %v7788_v43 = vshll.u32 %v16372_v25, 16  ;;  %v16504_v34 = vld [vmem:[#allocation2 + $0x20] sm:$0x1] }
 0x2f9   : > { %v7772_v22 = vrot.slane %v7771_v45, 4  ;;  %v7767_v37 = vsel %vm12997_vm4, %v7762_v26, %v7766_v48  ;;  %v7781_v42 = vrot.slane %v7779_v35, 4  ;;  %v7792_v0 = vshrl.u32 %v16372_v25, 16  ;;  %v16498_v50 = vpop.f32.mrf.mxu0 }
 0x2fa   : > { %v7784_v9 = vrot.slane %v7782_v18, 5  ;;  %v8348_v8 = vsel %vm13263_vm7, %v8346_v5, %v8347_v23  ;;  %v7790_v59 = vrot.slane %v7788_v43, 5  ;;  %v11380_v41 = vrot.slane %v8195_v15, 9  ;;  %v7484_v23 = vld [vmem:[#allocation2 + $0xb4] sm:$0xf] }
 0x2fb   : > { %12404 = vmatmul.mubr.msk.bf16.gmra.mxu1 %vm6095_vm10, %v16345_v56  ;;  %v7777_v61 = vsel %vm12997_vm4, %v7772_v22, %v7776_v62  ;;  %v7798_v56 = vshll.u32 %v16380_v33, 16  ;;  %v11399_v28 = vcombine.low %v8345_v27, %v8348_v8  ;;  %v7794_v25 = vrot.slane %v7792_v0, 4 }
 0x2fc   : > { %12407 = vmatprep.mubr.msk.bf16.mxu1 %vm6095_vm10, %v16390_v14  ;;  %v16479_v46 = vcombine.low %v7767_v37, %v7777_v61  ;;  %v7785_v12 = vor.u32 %v7784_v9, %v7781_v42  ;;  %v8351_v13 = vrot.slane %v16461_v29, 5  ;;  %v8354_v14 = vrot.slane %v16470_v53, 5  ;;  %v16513_v61 = vpop.f32.mrf.mxu0 }
 0x2fd   : > { %v7800_v51 = vrot.slane %v7798_v56, 5  ;;  %v7795_v49 = vor.u32 %v7794_v25, %v7790_v59  ;;  %v7803_v2 = vshrl.u32 %v7481_v44, 16  ;;  %v7806_v31 = vshll.u32 %v7481_v44, 16  ;;  %v16511_v0 = vpop.f32.mrf.mxu1  ;;  %v9036_v44 = vld [vmem:[#allocation2 + $0x24] sm:$0xf] }
 0x2fe   : > { %v7786_v60 = vrot.slane %v7785_v12, 4  ;;  %v8352_v33 = vsel %vm13263_vm7, %v11380_v41, %v8351_v13  ;;  %v8353_v30 = vrot.slane %v8351_v13, 4  ;;  %v7812_v4 = vshll.u32 %v16397_v40, 16 }
 0x2ff   : > { %12452 = vmatmul.mubr.msk.bf16.gmra.mxu0 %vm6095_vm10, %v11398_v10  ;;  %v7816_v54 = vshrl.u32 %v16397_v40, 16  ;;  %v7796_v24 = vrot.slane %v7795_v49, 4  ;;  %v7805_v20 = vrot.slane %v7803_v2, 4  ;;  %v7808_v48 = vrot.slane %v7806_v31, 5 }
 0x300   : > { %12455 = vmatprep.mubr.msk.bf16.mxu0 %vm6095_vm10, %v11399_v28  ;;  %v7791_v1 = vsel %vm12997_vm4, %v7786_v60, %v7790_v59  ;;  %v8355_v32 = vsel %vm13263_vm7, %v8353_v30, %v8354_v14  ;;  %v7814_v55 = vrot.slane %v7812_v4, 5  ;;  %v7822_v10 = vshll.u32 %v16404_v7, 16  ;;  %v16525_v4 = vpop.f32.mrf.mxu1 }
 0x301   : > { %v7818_v39 = vrot.slane %v7816_v54, 4  ;;  %v7801_v40 = vsel %vm12997_vm4, %v7796_v24, %v7800_v51  ;;  %v11400_v45 = vcombine.low %v8352_v33, %v8355_v32  ;;  %v7809_v62 = vor.u32 %v7808_v48, %v7805_v20  ;;  %v16523_v33 = vld [vmem:[#allocation2 + $0x28] sm:$0xf]  ;;  %v16527_v54 = vpop.f32.mrf.mxu0  ;;  %v16531_v20 = vld [vmem:[#allocation2 + $0x2c] sm:$0x1] }
 0x302   : > { %v9082_v26 = vshrl.u32 %v9033_v21, 16  ;;  %v11343_v7 = vcombine.low %v7791_v1, %v7801_v40  ;;  %v7824_v18 = vrot.slane %v7822_v10, 5  ;;  %v9085_v15 = vshll.u32 %v9033_v21, 16  ;;  %18013 = vst [vmem:[#allocation20_spill] sm:$0xff] %v16527_v54 }
 0x303   : > { %12408 = vmatmul.mubr.msk.bf16.gmra.mxu1 %vm6095_vm10, %v16419_v58  ;;  %v7819_v35 = vor.u32 %v7818_v39, %v7814_v55  ;;  %v7810_v22 = vrot.slane %v7809_v62, 4  ;;  %v9091_v58 = vshll.u32 %v16496_v57, 16  ;;  %v9095_v5 = vshrl.u32 %v16496_v57, 16  ;;  %v7487_v39 = vld [vmem:[#allocation2 + $0xc0] sm:$0xf] }
 0x304   : > { %12411 = vmatprep.mubr.msk.bf16.mxu1 %vm6095_vm10, %v16453_v19  ;;  %v9084_v27 = vrot.slane %v9082_v26, 4  ;;  %v9087_v37 = vrot.slane %v9085_v15, 5  ;;  %v9101_v42 = vshll.u32 %v16504_v34, 16  ;;  %v7827_v9 = vshrl.u32 %v7484_v23, 16 }
 0x305   : > { %v7820_v43 = vrot.slane %v7819_v35, 4  ;;  %v7815_v19 = vsel %vm12997_vm4, %v7810_v22, %v7814_v55  ;;  %v9093_v8 = vrot.slane %v9091_v58, 5  ;;  %v9097_v59 = vrot.slane %v9095_v5, 4  ;;  %v16541_v35 = vpop.f32.mrf.mxu1 }
 0x306   : > { %v7830_v56 = vshll.u32 %v7484_v23, 16  ;;  %v9088_v12 = vor.u32 %v9087_v37, %v9084_v27  ;;  %v9103_v25 = vrot.slane %v9101_v42, 5  ;;  %v7829_v51 = vrot.slane %v7827_v9, 4 }
 0x307   : > { %12456 = vmatmul.mubr.msk.bf16.gmra.mxu0 %vm6095_vm10, %v11400_v45  ;;  %v7825_v28 = vsel %vm12997_vm4, %v7820_v43, %v7824_v18  ;;  %v9098_v13 = vor.u32 %v9097_v59, %v9093_v8  ;;  %v7836_v60 = vshll.u32 %v16437_v38, 16  ;;  %v7840_v2 = vshrl.u32 %v16437_v38, 16  ;;  %v16543_v18 = vpop.f32.mrf.mxu0 }
 0x308   : > { %v11344_v41 = vcombine.low %v7815_v19, %v7825_v28  ;;  %v7832_v14 = vrot.slane %v7830_v56, 5  ;;  %v9089_v49 = vrot.slane %v9088_v12, 4  ;;  %v7846_v31 = vshll.u32 %v16442_v11, 16  ;;  %v9039_v56 = vld [vmem:[#allocation2 + $0x30] sm:$0xf] }
 0x309   : > { %v9106_v30 = vshrl.u32 %v9036_v44, 16  ;;  %v9099_v21 = vrot.slane %v9098_v13, 4  ;;  %v7838_v24 = vrot.slane %v7836_v60, 5  ;;  %v9109_v48 = vshll.u32 %v9036_v44, 16  ;;  %v16555_v13 = vpop.f32.mrf.mxu1 }
 0x30a   : > { %v7833_v1 = vor.u32 %v7832_v14, %v7829_v51  ;;  %v9094_v38 = vsel %vm12997_vm4, %v9089_v49, %v9093_v8  ;;  %v7842_v11 = vrot.slane %v7840_v2, 4  ;;  %v7848_v32 = vrot.slane %v7846_v31, 5  ;;  %v16553_v51 = vld [vmem:[#allocation2 + $0x34] sm:$0xf]  ;;  %v16557_v14 = vpop.f32.mrf.mxu0  ;;  %v16562_v31 = vld [vmem:[#allocation2 + $0x38] sm:$0x1] }
 0x30b   : > { %12412 = vmatmul.mubr.msk.bf16.gmra.mxu1 %vm6095_vm10, %v16479_v46  ;;  %v9108_v55 = vrot.slane %v9106_v30, 4  ;;  %v9104_v10 = vsel %vm12997_vm4, %v9099_v21, %v9103_v25  ;;  %v9111_v46 = vrot.slane %v9109_v48, 5  ;;  %v9115_v45 = vshll.u32 %v16523_v33, 16 }
 0x30c   : > { %12415 = vmatprep.mubr.msk.bf16.mxu1 %vm6095_vm10, %v11343_v7  ;;  %v7834_v40 = vrot.slane %v7833_v1, 4  ;;  %v11461_v62 = vcombine.low %v9094_v38, %v9104_v10  ;;  %v7843_v26 = vor.u32 %v7842_v11, %v7838_v24  ;;  %v9119_v23 = vshrl.u32 %v16523_v33, 16  ;;  %v9042_v11 = vld [vmem:[#allocation2 + $0x3c] sm:$0xf] }
 0x30d   : > { %v9125_v7 = vshll.u32 %v16531_v20, 16  ;;  %v9112_v22 = vor.u32 %v9111_v46, %v9108_v55  ;;  %v9117_v27 = vrot.slane %v9115_v45, 5  ;;  %v7851_v58 = vshrl.u32 %v7487_v39, 16  ;;  %v16574_v45 = vpop.f32.mrf.mxu0 }
 0x30e   : > { %v7839_v15 = vsel %vm12997_vm4, %v7834_v40, %v7838_v24  ;;  %12499 = vmatprep.mubr.msk.bf16.mxu0 %vm6095_vm10, %v11461_v62  ;;  %v7844_v5 = vrot.slane %v7843_v26, 4  ;;  %v9121_v43 = vrot.slane %v9119_v23, 4  ;;  %v7854_v42 = vshll.u32 %v7487_v39, 16  ;;  %v16570_v40 = vld [vmem:[#allocation2 + $0x40] sm:$0xf] }
 0x30f   : > { %v9127_v37 = vrot.slane %v9125_v7, 5  ;;  %v9113_v9 = vrot.slane %v9112_v22, 4  ;;  %v7853_v19 = vrot.slane %v7851_v58, 4  ;;  %v7860_v8 = vshll.u32 %v16461_v29, 16  ;;  %v16578_v58 = vld [vmem:[#allocation2 + $0x44] sm:$0x1] }
 0x310   : > { %v7864_v59 = vshrl.u32 %v16461_v29, 16  ;;  %v7849_v44 = vsel %vm12997_vm4, %v7844_v5, %v7848_v32  ;;  %v9122_v28 = vor.u32 %v9121_v43, %v9117_v27  ;;  %v7856_v12 = vrot.slane %v7854_v42, 5 }
 0x311   : > { %v7870_v25 = vshll.u32 %v16470_v53, 16  ;;  %v11345_v60 = vcombine.low %v7839_v15, %v7849_v44  ;;  %v9118_v29 = vsel %vm12997_vm4, %v9113_v9, %v9117_v27  ;;  %v7862_v49 = vrot.slane %v7860_v8, 5  ;;  %v16572_v46 = vpop.f32.mrf.mxu1 }
 0x312   : > { %v7866_v2 = vrot.slane %v7864_v59, 4  ;;  %v9123_v30 = vrot.slane %v9122_v28, 4  ;;  %v7857_v21 = vor.u32 %v7856_v12, %v7853_v19  ;;  %v9130_v53 = vshrl.u32 %v9039_v56, 16  ;;  %v9045_v19 = vld [vmem:[#allocation2 + $0x48] sm:$0xf] }
 0x313   : > { %12416 = vmatmul.mubr.msk.bf16.gmra.mxu1 %vm6095_vm10, %v11344_v41  ;;  %v7872_v1 = vrot.slane %v7870_v25, 5  ;;  %v9133_v48 = vshll.u32 %v9039_v56, 16  ;;  %v9139_v38 = vshll.u32 %v16553_v51, 16  ;;  %v9143_v41 = vshrl.u32 %v16553_v51, 16  ;;  %v12752_v56 = vld [vmem:[#allocation2 + $0x18] sm:$0xff]   ;;  %v16585_v12 = vpop.f32.mrf.mxu1  ;;  %v16587_v25 = vpop.f32.mrf.mxu0 }
 0x314   : > { %12419 = vmatprep.mubr.msk.bf16.mxu1 %vm6095_vm10, %v11345_v60  ;;  %v7867_v24 = vor.u32 %v7866_v2, %v7862_v49  ;;  %v9128_v32 = vsel %vm12997_vm4, %v9123_v30, %v9127_v37  ;;  %v7858_v55 = vrot.slane %v7857_v21, 4  ;;  %v9132_v39 = vrot.slane %v9130_v53, 4  ;;  %v16590_v30 = vld [vmem:[#allocation2 + $0x4c] sm:$0xf] }
 0x315   : > { %v9149_v10 = vshll.u32 %v16562_v31, 16  ;;  %v11462_v62 = vcombine.low %v9118_v29, %v9128_v32  ;;  %v9135_v23 = vrot.slane %v9133_v48, 5  ;;  %v9141_v7 = vrot.slane %v9139_v38, 5 }
 0x316   : > { %v7868_v26 = vrot.slane %v7867_v24, 4  ;;  %v7863_v15 = vsel %vm12997_vm4, %v7858_v55, %v7862_v49  ;;  %v9145_v22 = vrot.slane %v9143_v41, 4  ;;  %v9154_v5 = vshrl.u32 %v9042_v11, 16 }
 0x317   : > { %v9151_v27 = vrot.slane %v9149_v10, 5  ;;  %12500 = vmatmul.mubr.msk.bf16.vlgmr.msra.gmra.mxu0 %vm6095_vm10, %v11462_v62  ;;  %v9136_v37 = vor.u32 %v9135_v23, %v9132_v39  ;;  %v9157_v42 = vshll.u32 %v9042_v11, 16  ;;  %v9163_v9 = vshll.u32 %v16570_v40, 16  ;;  %v16600_v11 = vld [vmem:[#allocation2 + $0x50] sm:$0x1] }
 0x318   : > { %v7873_v43 = vsel %vm12997_vm4, %v7868_v26, %v7872_v1  ;;  %v9146_v59 = vor.u32 %v9145_v22, %v9141_v7  ;;  %v9156_v44 = vrot.slane %v9154_v5, 4  ;;  %v9167_v28 = vshrl.u32 %v16570_v40, 16  ;;  %v9048_v22 = vld [vmem:[#allocation2 + $0x54] sm:$0xf] }
 0x319   : > { %v11346_v8 = vcombine.low %v7863_v15, %v7873_v43  ;;  %v9137_v60 = vrot.slane %v9136_v37, 4  ;;  %v9159_v29 = vrot.slane %v9157_v42, 5  ;;  %v9165_v49 = vrot.slane %v9163_v9, 5 }
 0x31a   : > { %v9173_v2 = vshll.u32 %v16578_v58, 16  ;;  %v9147_v21 = vrot.slane %v9146_v59, 4  ;;  %v9169_v1 = vrot.slane %v9167_v28, 4  ;;  %v16595_v53 = vadd.f32 %v16399_v63, %v16511_v0  ;;  %v16605_v63 = vpop.f32.mrf.mxu1  ;;  %v16607_v0 = vpop.f32.mrf.mxu0  ;;  %v16622_v59 = vld [vmem:[#allocation2 + $0x5c] sm:$0x1] }
 0x31b   : > { %12420 = vmatmul.mubr.msk.bf16.gmra.mxu1 %vm6095_vm10, %v11346_v8  ;;  %v9178_v24 = vshrl.u32 %v9045_v19, 16  ;;  %v9142_v48 = vsel %vm12997_vm4, %v9137_v60, %v9141_v7  ;;  %v9160_v38 = vor.u32 %v9159_v29, %v9156_v44  ;;  %v9181_v32 = vshll.u32 %v9045_v19, 16  ;;  %v16620_v8 = vld [vmem:[#allocation2 + $0x58] sm:$0xf] }
 0x31c   : > { %12463 = vmatprep.mubr.msk.bf16.mxu1 %vm6095_vm10, %v12752_v56  ;;  %v9175_v41 = vrot.slane %v9173_v2, 5  ;;  %v9152_v55 = vsel %vm12997_vm4, %v9147_v21, %v9151_v27  ;;  %v9170_v39 = vor.u32 %v9169_v1, %v9165_v49  ;;  %v9187_v62 = vshll.u32 %v16590_v30, 16  ;;  %v16628_v60 = vpop.f32.mrf.mxu1  ;;  %v16630_v29 = vpop.f32.mrf.mxu0  ;;  %v12755_v1 = vld [vmem:[#allocation2 + $0x30] sm:$0xff]  }
 0x31d   : > { %v9180_v10 = vrot.slane %v9178_v24, 4  ;;  %v11463_v26 = vcombine.low %v9142_v48, %v9152_v55  ;;  %v9161_v23 = vrot.slane %v9160_v38, 4  ;;  %v9183_v7 = vrot.slane %v9181_v32, 5  ;;  %18014 = vst [vmem:[#allocation14_spill] sm:$0xff] %v16628_v60  ;;  %v16639_v55 = vld [vmem:[#allocation2 + $0x64] sm:$0xf] }
 0x31e   : > { %v9191_v15 = vshrl.u32 %v16590_v30, 16  ;;  %v9171_v5 = vrot.slane %v9170_v39, 4  ;;  %v9189_v43 = vrot.slane %v9187_v62, 5  ;;  %v9197_v37 = vshll.u32 %v16600_v11, 16 }
 0x31f   : > { %v16613_v27 = vadd.f32 %v16423_v47, %v16525_v4  ;;  %12503 = vmatprep.mubr.msk.bf16.mxu0 %vm6095_vm10, %v11463_v26  ;;  %v9184_v42 = vor.u32 %v9183_v7, %v9180_v10  ;;  %v16618_v19 = vadd.f32 %v16444_v52, %v16541_v35  ;;  %v9166_v56 = vsel %vm12997_vm4, %v9161_v23, %v9165_v49  ;;  %v12754_v47 = vld [vmem:[#allocation2 + $0x24] sm:$0xff]   ;;  %v9051_v49 = vld [vmem:[#allocation2 + $0x60] sm:$0xf] }
 0x320   : > { %v9193_v9 = vrot.slane %v9191_v15, 4  ;;  %v9176_v44 = vsel %vm12997_vm4, %v9171_v5, %v9175_v41  ;;  %v9199_v4 = vrot.slane %v9197_v37, 5  ;;  %v9202_v28 = vshrl.u32 %v9048_v22, 16  ;;  %v12762_v52 = vld [vmem:[%s17791_s3 + $0x80] sm:$0xff]  }
 0x321   : > { %v11464_v35 = vcombine.low %v9166_v56, %v9176_v44  ;;  %v9185_v2 = vrot.slane %v9184_v42, 4  ;;  %v9205_v24 = vshll.u32 %v9048_v22, 16  ;;  %v9211_v38 = vshll.u32 %v16620_v8, 16  ;;  %v16650_v22 = vld [vmem:[#allocation2 + $0x68] sm:$0x1]  ;;  %v16652_v42 = vpop.f32.mrf.mxu0 }
 0x322   : > { %v9194_v21 = vor.u32 %v9193_v9, %v9189_v43  ;;  %v9204_v48 = vrot.slane %v9202_v28, 4  ;;  %v9215_v41 = vshrl.u32 %v16620_v8, 16  ;;  %v9221_v32 = vshll.u32 %v16622_v59, 16 }
 0x323   : > { %12464 = vmatmul.mubr.msk.bf16.vlgmr.msra.gmra.mxu1 %vm6095_vm10, %v12754_v47  ;;  %12504 = vmatmul.mubr.msk.bf16.gmra.mxu0 %vm6095_vm10, %v11464_v35  ;;  %v9190_v39 = vsel %vm12997_vm4, %v9185_v2, %v9189_v43  ;;  %v9207_v62 = vrot.slane %v9205_v24, 5  ;;  %v16647_v26 = vadd.f32 %v16483_v3, %v16572_v46  ;;  %v9213_v23 = vrot.slane %v9211_v38, 5 }
 0x324   : > { %v9195_v10 = vrot.slane %v9194_v21, 4  ;;  %12532 = vmatpush3.bf16.msra.mxu1 %v16352_v36  ;;  %12467 = vmatprep.mubr.msk.bf16.mxu1 %vm6095_vm10, %v12755_v1  ;;  %v9217_v7 = vrot.slane %v9215_v41, 4  ;;  %v9223_v15 = vrot.slane %v9221_v32, 5  ;;  %v9226_v5 = vshrl.u32 %v9051_v49, 16  ;;  %v12257_v37 = vpop.f32.mrf.mxu1  ;;  %v9054_v1 = vld [vmem:[#allocation2 + $0x6c] sm:$0xf] }
 0x325   : > { %12533 = vmatprep.subr.bf16.mxu1 %v12762_v52  ;;  %v9208_v43 = vor.u32 %v9207_v62, %v9204_v48  ;;  %v9229_v9 = vshll.u32 %v9051_v49, 16  ;;  %v9235_v3 = vshll.u32 %v16639_v55, 16  ;;  %v9239_v47 = vshrl.u32 %v16639_v55, 16  ;;  %v16668_v41 = vld [vmem:[#allocation2 + $0x70] sm:$0xf] }
 0x326   : > { %v9200_v36 = vsel %vm12997_vm4, %v9195_v10, %v9199_v4  ;;  %v9218_v56 = vor.u32 %v9217_v7, %v9213_v23  ;;  %v9228_v44 = vrot.slane %v9226_v5, 4  ;;  %v9245_v21 = vshll.u32 %v16650_v22, 16  ;;  %v12756_v4 = vld [vmem:[#allocation2 + $0x3c] sm:$0xff]   ;;  %v6210_v32 = vpop.f32.mrf.mxu1  ;;  %v12757_v7 = vld [vmem:[#allocation2 + $0x48] sm:$0xff]   ;;  %v16674_v5 = vld [vmem:[#allocation2 + $0x74] sm:$0x1] }
 0x327   : > { %v11465_v46 = vcombine.low %v9190_v39, %v9200_v36  ;;  %v9209_v28 = vrot.slane %v9208_v43, 4  ;;  %v9231_v35 = vrot.slane %v9229_v9, 5  ;;  %v9237_v2 = vrot.slane %v9235_v3, 5  ;;  %v16670_v39 = vpop.f32.mrf.mxu0  ;;  %v9057_v3 = vld [vmem:[#allocation2 + $0x78] sm:$0xf] }
 0x328   : > { %12534 = vmatpush3.bf16.msra.mxu1 %v12762_v52  ;;  %v9219_v24 = vrot.slane %v9218_v56, 4  ;;  %v9241_v48 = vrot.slane %v9239_v47, 4  ;;  %v16662_v49 = vadd.f32 %v16498_v50, %v16585_v12  ;;  %v16666_v38 = vadd.f32 %v16513_v61, %v16605_v63 }
 0x329   : > { %12507 = vmatprep.mubr.msk.bf16.mxu0 %vm6095_vm10, %v11465_v46  ;;  %v9214_v52 = vsel %vm12997_vm4, %v9209_v28, %v9213_v23  ;;  %v9232_v10 = vor.u32 %v9231_v35, %v9228_v44  ;;  %v9247_v62 = vrot.slane %v9245_v21, 5  ;;  %v9250_v12 = vshrl.u32 %v9054_v1, 16  ;;  %v12258_v28 = vpop.f32.mrf.mxu1 }
 0x32a   : > { %18015 = vst [vmem:[#allocation29_spill] sm:$0xff] %v16662_v49  ;;  %18016 = vst [vmem:[#allocation22_spill] sm:$0xff] %v16666_v38  ;;  %v9224_v50 = vsel %vm12997_vm4, %v9219_v24, %v9223_v15  ;;  %v9242_v61 = vor.u32 %v9241_v48, %v9237_v2  ;;  %v9253_v63 = vshll.u32 %v9054_v1, 16  ;;  %v9259_v9 = vshll.u32 %v16668_v41, 16  ;;  %v16683_v15 = vld [vmem:[#allocation2 + $0x7c] sm:$0xf] }
 0x32b   : > { %12468 = vmatmul.mubr.msk.bf16.gmra.mxu1 %vm6095_vm10, %v12756_v4  ;;  %v11466_v36 = vcombine.low %v9214_v52, %v9224_v50  ;;  %v9233_v43 = vrot.slane %v9232_v10, 4  ;;  %v9263_v23 = vshrl.u32 %v16668_v41, 16  ;;  %v9252_v56 = vrot.slane %v9250_v12, 4  ;;  %v16693_v48 = vld [vmem:[#allocation2 + $0x80] sm:$0x1] }
 0x32c   : > { %12471 = vmatprep.mubr.msk.bf16.mxu1 %vm6095_vm10, %v12757_v7  ;;  %v9243_v46 = vrot.slane %v9242_v61, 4  ;;  %v9255_v44 = vrot.slane %v9253_v63, 5  ;;  %v9269_v47 = vshll.u32 %v16674_v5, 16  ;;  %v16685_v35 = vpop.f32.mrf.mxu0  ;;  %v9261_v1 = vrot.slane %v9259_v9, 5 }
 0x32d   : > { %12508 = vmatmul.mubr.msk.bf16.gmra.mxu0 %vm6095_vm10, %v11466_v36  ;;  %v9238_v21 = vsel %vm12997_vm4, %v9233_v43, %v9237_v2  ;;  %v9265_v24 = vrot.slane %v9263_v23, 4  ;;  %v16691_v4 = vadd.f32 %v16543_v18, %v12257_v37  ;;  %v9274_v50 = vshrl.u32 %v9057_v3, 16  ;;  %v12758_v36 = vld [vmem:[#allocation2 + $0x54] sm:$0xff]   ;;  %v6213_v23 = vpop.f32.mrf.mxu1 }
 0x32e   : > { %v9248_v52 = vsel %vm12997_vm4, %v9243_v46, %v9247_v62  ;;  %v9256_v10 = vor.u32 %v9255_v44, %v9252_v56  ;;  %v9271_v7 = vrot.slane %v9269_v47, 5  ;;  %v16697_v61 = vpop.f32.mrf.mxu0  ;;  %v9277_v38 = vshll.u32 %v9057_v3, 16  ;;  %v12759_v47 = vld [vmem:[#allocation2 + $0x60] sm:$0xff]  }
 0x32f   : > { %18017 = vst [vmem:[#allocation36_spill] sm:$0xff] %v16691_v4  ;;  %18018 = vst [vmem:[#allocation31_spill] sm:$0xff] %v16697_v61  ;;  %v11467_v12 = vcombine.low %v9238_v21, %v9248_v52  ;;  %v9266_v63 = vor.u32 %v9265_v24, %v9261_v1  ;;  %v9283_v2 = vshll.u32 %v16683_v15, 16  ;;  %v9276_v9 = vrot.slane %v9274_v50, 4  ;;  %v9060_v4 = vld [vmem:[#allocation2 + $0x84] sm:$0xf] }
 0x330   : > { %v9257_v43 = vrot.slane %v9256_v10, 4  ;;  %v9287_v18 = vshrl.u32 %v16683_v15, 16  ;;  %v9293_v37 = vshll.u32 %v16693_v48, 16  ;;  %v16702_v62 = vpop.f32.mrf.mxu0  ;;  %v9279_v56 = vrot.slane %v9277_v38, 5  ;;  %v16708_v21 = vld [vmem:[#allocation2 + $0x88] sm:$0xf] }
 0x331   : > { %12511 = vmatprep.mubr.msk.bf16.mxu0 %vm6095_vm10, %v11467_v12  ;;  %v9267_v46 = vrot.slane %v9266_v63, 4  ;;  %v9285_v44 = vrot.slane %v9283_v2, 5  ;;  %v16706_v3 = vadd.f32 %v16557_v14, %v6210_v32  ;;  %v16714_v50 = vadd.f32 %v16574_v45, %v12258_v28  ;;  %v16716_v12 = vld [vmem:[#allocation2 + $0x8c] sm:$0x1] }
 0x332   : > { %v9262_v24 = vsel %vm12997_vm4, %v9257_v43, %v9261_v1  ;;  %v9289_v52 = vrot.slane %v9287_v18, 4  ;;  %v9295_v10 = vrot.slane %v9293_v37, 5  ;;  %v16718_v38 = vpop.f32.mrf.mxu0  ;;  %v9280_v32 = vor.u32 %v9279_v56, %v9276_v9  ;;  %v16732_v56 = vld [vmem:[#allocation2 + $0x94] sm:$0xf] }
 0x333   : > { %18019 = vst [vmem:[#allocation37_spill] sm:$0xff] %v16706_v3  ;;  %12472 = vmatmul.mubr.msk.bf16.gmra.mxu1 %vm6095_vm10, %v12758_v36  ;;  %18020 = vst [vmem:[#allocation34_spill] sm:$0xff] %v16714_v50  ;;  %v9272_v14 = vsel %vm12997_vm4, %v9267_v46, %v9271_v7  ;;  %v16724_v63 = vadd.f32 %v16587_v25, %v6213_v23  ;;  %v9298_v1 = vshrl.u32 %v9060_v4, 16  ;;  %v9063_v36 = vld [vmem:[#allocation2 + $0x90] sm:$0xf]  ;;  %v9301_v18 = vshll.u32 %v9060_v4, 16 }
 0x334   : > { %12475 = vmatprep.mubr.msk.bf16.mxu1 %vm6095_vm10, %v12759_v47  ;;  %v11468_v2 = vcombine.low %v9262_v24, %v9272_v14  ;;  %v9290_v43 = vor.u32 %v9289_v52, %v9285_v44  ;;  %v9307_v45 = vshll.u32 %v16708_v21, 16  ;;  %v16727_v28 = vpop.f32.mrf.mxu0  ;;  %v9281_v37 = vrot.slane %v9280_v32, 4  ;;  %18022 = vst [vmem:[#allocation21_spill] sm:$0xff] %v16732_v56 }
 0x335   : > { %18021 = vst [vmem:[#allocation38_spill] sm:$0xff] %v16724_v63  ;;  %v9300_v61 = vrot.slane %v9298_v1, 4  ;;  %v9311_v50 = vshrl.u32 %v16708_v21, 16  ;;  %v9317_v7 = vshll.u32 %v16716_v12, 16  ;;  %v9303_v25 = vrot.slane %v9301_v18, 5  ;;  %v12760_v18 = vld [vmem:[#allocation2 + $0x6c] sm:$0xff]  }
 0x336   : > { %12512 = vmatmul.mubr.msk.bf16.gmra.mxu0 %vm6095_vm10, %v11468_v2  ;;  %v9291_v9 = vrot.slane %v9290_v43, 4  ;;  %v9309_v23 = vrot.slane %v9307_v45, 5  ;;  %v12261_v46 = vpop.f32.mrf.mxu1  ;;  %v9322_v47 = vshrl.u32 %v9063_v36, 16  ;;  %v16734_v4 = vpop.f32.mrf.mxu0  ;;  %v9286_v24 = vsel %vm12997_vm4, %v9281_v37, %v9285_v44  ;;  %v16741_v1 = vld [vmem:[#allocation2 + $0x98] sm:$0x1] }
 0x337   : > { %v9313_v52 = vrot.slane %v9311_v50, 4  ;;  %v9319_v14 = vrot.slane %v9317_v7, 5  ;;  %v16739_v32 = vadd.f32 %v16607_v0, %v12261_v46  ;;  %18024 = vst [vmem:[#allocation13_spill] sm:$0xff] %v16741_v1  ;;  %v9304_v43 = vor.u32 %v9303_v25, %v9300_v61  ;;  %v12761_v0 = vld [vmem:[#allocation2 + $0x78] sm:$0xff]  }
 0x338   : > { %v9296_v2 = vsel %vm12997_vm4, %v9291_v9, %v9295_v10  ;;  %v9324_v45 = vrot.slane %v9322_v47, 4  ;;  %v9325_v63 = vshll.u32 %v9063_v36, 16  ;;  %v6226_v3 = vpop.f32.mrf.mxu1  ;;  %v16745_v54 = vpop.f32.mrf.mxu0  ;;  %v9331_v44 = vshll.u32 %v16732_v56, 16  ;;  %v9066_v37 = vld [vmem:[#allocation2 + $0x9c] sm:$0xf] }
 0x339   : > { %18023 = vst [vmem:[#allocation8_spill] sm:$0xff] %v16739_v32  ;;  %v11469_v60 = vcombine.low %v9286_v24, %v9296_v2  ;;  %v9314_v49 = vor.u32 %v9313_v52, %v9309_v23  ;;  %v9335_v50 = vshrl.u32 %v16732_v56, 16  ;;  %v9305_v7 = vrot.slane %v9304_v43, 4  ;;  %v16761_v2 = vld [vmem:[#allocation2 + $0xa0] sm:$0xf]  ;;  %v12764_v32 = vld [vmem:[#allocation2 + $0x90] sm:$0xff]  }
 0x33a   : > { %v9327_v46 = vrot.slane %v9325_v63, 5  ;;  %v9341_v61 = vshll.u32 %v16741_v1, 16  ;;  %v16752_v10 = vadd.f32 %v16630_v29, %v6226_v3  ;;  %v12262_v36 = vpop.f32.mrf.mxu1  ;;  %v16754_v9 = vpop.f32.mrf.mxu0  ;;  %v9333_v47 = vrot.slane %v9331_v44, 5  ;;  %18027 = vst [vmem:[#allocation15_spill] sm:$0xff] %v16761_v2  ;;  %v16770_v44 = vld [vmem:[#allocation2 + $0xa4] sm:$0x1] }
 0x33b   : > { %12476 = vmatmul.mubr.msk.bf16.gmra.mxu1 %vm6095_vm10, %v12760_v18  ;;  %12515 = vmatprep.mubr.msk.bf16.mxu0 %vm6095_vm10, %v11469_v60  ;;  %v9315_v25 = vrot.slane %v9314_v49, 4  ;;  %v9337_v24 = vrot.slane %v9335_v50, 4  ;;  %v16759_v52 = vadd.f32 %v16652_v42, %v12262_v36  ;;  %v9310_v63 = vsel %vm12997_vm4, %v9305_v7, %v9309_v23  ;;  %18029 = vst [vmem:[#allocation16_spill] sm:$0xff] %v16770_v44  ;;  %v9069_v42 = vld [vmem:[#allocation2 + $0xa8] sm:$0xf] }
 0x33c   : > { %18025 = vst [vmem:[#allocation12_spill] sm:$0xff] %v16752_v10  ;;  %12479 = vmatprep.mubr.msk.bf16.mxu1 %vm6095_vm10, %v12761_v0  ;;  %v9328_v29 = vor.u32 %v9327_v46, %v9324_v45  ;;  %v6229_v3 = vpop.f32.mrf.mxu1  ;;  %v9346_v43 = vshrl.u32 %v9066_v37, 16  ;;  %v9349_v50 = vshll.u32 %v9066_v37, 16  ;;  %v9355_v23 = vshll.u32 %v16761_v2, 16 }
 0x33d   : > { %18026 = vst [vmem:[#allocation9_spill] sm:$0xff] %v16759_v52  ;;  %v9320_v18 = vsel %vm12997_vm4, %v9315_v25, %v9319_v14  ;;  %v9338_v60 = vor.u32 %v9337_v24, %v9333_v47  ;;  %v16768_v49 = vadd.f32 %v16670_v39, %v6229_v3  ;;  %v16772_v0 = vpop.f32.mrf.mxu0  ;;  %v9343_v7 = vrot.slane %v9341_v61, 5  ;;  %v16776_v24 = vld [vmem:[#allocation2 + $0xac] sm:$0xf] }
 0x33e   : > { %v11470_v36 = vcombine.low %v9310_v63, %v9320_v18  ;;  %v9329_v52 = vrot.slane %v9328_v29, 4  ;;  %v9348_v10 = vrot.slane %v9346_v43, 4  ;;  %v9351_v46 = vrot.slane %v9349_v50, 5  ;;  %18030 = vst [vmem:[#allocation10_spill] sm:$0xff] %v16776_v24  ;;  %v12763_v29 = vld [vmem:[#allocation2 + $0x84] sm:$0xff]  }
 0x33f   : > { %18028 = vst [vmem:[#allocation17_spill] sm:$0xff] %v16768_v49  ;;  %v9339_v45 = vrot.slane %v9338_v60, 4  ;;  %v9359_v14 = vshrl.u32 %v16761_v2, 16  ;;  %v12265_v25 = vpop.f32.mrf.mxu1  ;;  %v16778_v39 = vpop.f32.mrf.mxu0  ;;  %v9357_v37 = vrot.slane %v9355_v23, 5  ;;  %v9365_v3 = vshll.u32 %v16770_v44, 16 }
 0x340   : > { %12516 = vmatmul.mubr.msk.bf16.gmra.mxu0 %vm6095_vm10, %v11470_v36  ;;  %v16783_v63 = vadd.f32 %v16685_v35, %v12265_v25  ;;  %v16785_v43 = vld [vmem:[#allocation2 + $0xb0] sm:$0x1]  ;;  %v9370_v61 = vshrl.u32 %v9069_v42, 16  ;;  %v9334_v18 = vsel %vm12997_vm4, %v9329_v52, %v9333_v47  ;;  %v9352_v50 = vor.u32 %v9351_v46, %v9348_v10 }
 0x341   : > { %18032 = vst [vmem:[#allocation18_spill] sm:$0xff] %v16785_v43  ;;  %v9344_v60 = vsel %vm12997_vm4, %v9339_v45, %v9343_v7  ;;  %v9361_v49 = vrot.slane %v9359_v14, 4  ;;  %v16791_v36 = vpop.f32.mrf.mxu1  ;;  %v16793_v23 = vpop.f32.mrf.mxu0  ;;  %v9373_v25 = vshll.u32 %v9069_v42, 16  ;;  %v9383_v47 = vshrl.u32 %v16776_v24, 16  ;;  %v9072_v45 = vld [vmem:[#allocation2 + $0xb4] sm:$0xf] }
 0x342   : > { %18031 = vst [vmem:[#allocation11_spill] sm:$0xff] %v16783_v63  ;;  %18033 = vst [vmem:[#allocation19_spill] sm:$0xff] %v16791_v36  ;;  %v11471_v44 = vcombine.low %v9334_v18, %v9344_v60  ;;  %v9372_v35 = vrot.slane %v9370_v61, 4  ;;  %v9379_v63 = vshll.u32 %v16776_v24, 16  ;;  %v9353_v1 = vrot.slane %v9352_v50, 4 }
 0x343   : > { %12480 = vmatmul.mubr.msk.bf16.gmra.mxu1 %vm6095_vm10, %v12763_v29  ;;  %v9362_v2 = vor.u32 %v9361_v49, %v9357_v37  ;;  %v9389_v52 = vshll.u32 %v16785_v43, 16  ;;  %v12266_v10 = vpop.f32.mrf.mxu1  ;;  %v16800_v7 = vpop.f32.mrf.mxu0  ;;  %v9367_v46 = vrot.slane %v9365_v3, 5  ;;  %v9375_v14 = vrot.slane %v9373_v25, 5  ;;  %v16806_v61 = vld [vmem:[#allocation2 + $0xb8] sm:$0xf] }
 0x344   : > { %12483 = vmatprep.mubr.msk.bf16.mxu1 %vm6095_vm10, %v12764_v32  ;;  %12519 = vmatprep.mubr.msk.bf16.mxu0 %vm6095_vm10, %v11471_v44  ;;  %v9381_v29 = vrot.slane %v9379_v63, 5  ;;  %v16804_v42 = vadd.f32 %v16702_v62, %v12266_v10  ;;  %18035 = vst [vmem:[#allocation23_spill] sm:$0xff] %v16806_v61  ;;  %v9358_v49 = vsel %vm12997_vm4, %v9353_v1, %v9357_v37  ;;  %v9385_v60 = vrot.slane %v9383_v47, 4  ;;  %v16813_v44 = vld [vmem:[#allocation2 + $0xbc] sm:$0x1] }
 0x345   : > { %v9363_v18 = vrot.slane %v9362_v2, 4  ;;  %v9391_v32 = vrot.slane %v9389_v52, 5  ;;  %v6245_v50 = vpop.f32.mrf.mxu1  ;;  %v9376_v43 = vor.u32 %v9375_v14, %v9372_v35  ;;  %18037 = vst [vmem:[#allocation26_spill] sm:$0xff] %v16813_v44  ;;  %v9394_v3 = vshrl.u32 %v9072_v45, 16  ;;  %v9075_v37 = vld [vmem:[#allocation2 + $0xc0] sm:$0xf] }
 0x346   : > { %18034 = vst [vmem:[#allocation27_spill] sm:$0xff] %v16804_v42  ;;  %v16811_v36 = vadd.f32 %v16718_v38, %v6245_v50  ;;  %v9397_v63 = vshll.u32 %v9072_v45, 16  ;;  %v16815_v25 = vpop.f32.mrf.mxu0  ;;  %v9386_v10 = vor.u32 %v9385_v60, %v9381_v29  ;;  %v9403_v1 = vshll.u32 %v16806_v61, 16  ;;  %v12765_v14 = vld [vmem:[#allocation2 + $0x9c] sm:$0xff]   ;;  %v12766_v50 = vld [vmem:[#allocation2 + $0xa8] sm:$0xff]  }
 0x347   : > { %v9368_v62 = vsel %vm12997_vm4, %v9363_v18, %v9367_v46  ;;  %v9407_v2 = vshrl.u32 %v16806_v61, 16  ;;  %v9377_v35 = vrot.slane %v9376_v43, 4  ;;  %v9396_v52 = vrot.slane %v9394_v3, 4  ;;  %v16824_v18 = vld [vmem:[#allocation2 + $0xc4] sm:$0xf] }
 0x348   : > { %18036 = vst [vmem:[#allocation24_spill] sm:$0xff] %v16811_v36  ;;  %v11472_v47 = vcombine.low %v9358_v49, %v9368_v62  ;;  %v9399_v38 = vrot.slane %v9397_v63, 5  ;;  %v16821_v36 = vpop.f32.mrf.mxu0  ;;  %v9387_v45 = vrot.slane %v9386_v10, 4  ;;  %v9405_v42 = vrot.slane %v9403_v1, 5  ;;  %v16833_v3 = vld [vmem:[#allocation2 + $0xc8] sm:$0x1] }
 0x349   : > { %v9409_v24 = vrot.slane %v9407_v2, 4  ;;  %v9413_v56 = vshll.u32 %v16813_v44, 16  ;;  %v12269_v46 = vpop.f32.mrf.mxu1  ;;  %v9382_v49 = vsel %vm12997_vm4, %v9377_v35, %v9381_v29  ;;  %18039 = vst [vmem:[#allocation28_spill] sm:$0xff] %v16833_v3  ;;  %v9418_v63 = vshrl.u32 %v9075_v37, 16 }
 0x34a   : > { %12520 = vmatmul.mubr.msk.bf16.gmra.mxu0 %vm6095_vm10, %v11472_v47  ;;  %v9400_v43 = vor.u32 %v9399_v38, %v9396_v52  ;;  %v16830_v60 = vadd.f32 %v16727_v28, %v12269_v46  ;;  %v16835_v62 = vpop.f32.mrf.mxu0  ;;  %v9392_v10 = vsel %vm12997_vm4, %v9387_v45, %v9391_v32  ;;  %v9421_v47 = vshll.u32 %v9075_v37, 16  ;;  %v9771_v45 = vld [vmem:[#allocation2 + $0x18] sm:$0xe] }
 0x34b   : > { %12484 = vmatmul.mubr.msk.bf16.gmra.mxu1 %vm6095_vm10, %v12765_v14  ;;  %v9410_v1 = vor.u32 %v9409_v24, %v9405_v42  ;;  %v9415_v2 = vrot.slane %v9413_v56, 5  ;;  %v6258_v29 = vpop.f32.mrf.mxu1  ;;  %v11473_v35 = vcombine.low %v9382_v49, %v9392_v10  ;;  %v9420_v28 = vrot.slane %v9418_v63, 4  ;;  %v9078_v49 = vld [vmem:[#allocation2 + $0xcc] sm:$0xf] }
 0x34c   : > { %18038 = vst [vmem:[#allocation30_spill] sm:$0xff] %v16830_v60  ;;  %12487 = vmatprep.mubr.msk.bf16.mxu1 %vm6095_vm10, %v12766_v50  ;;  %v9401_v52 = vrot.slane %v9400_v43, 4  ;;  %v9427_v38 = vshll.u32 %v16824_v18, 16  ;;  %v16841_v14 = vpop.f32.mrf.mxu0  ;;  %v9423_v60 = vrot.slane %v9421_v47, 5  ;;  %v9431_v44 = vshrl.u32 %v16824_v18, 16 }
 0x34d   : > { %v9411_v46 = vrot.slane %v9410_v1, 4  ;;  %v9437_v61 = vshll.u32 %v16833_v3, 16  ;;  %v12270_v32 = vpop.f32.mrf.mxu1  ;;  %12523 = vmatprep.mubr.msk.bf16.mxu0 %vm6095_vm10, %v11473_v35  ;;  %v16847_v24 = vadd.f32 %v16734_v4, %v6258_v29 }
 0x34e   : > { %v9429_v56 = vrot.slane %v9427_v38, 5  ;;  %v16850_v37 = vadd.f32 %v16745_v54, %v12270_v32  ;;  %v16852_v50 = vpop.f32.mrf.mxu0  ;;  %v9406_v43 = vsel %vm12997_vm4, %v9401_v52, %v9405_v42  ;;  %v9424_v10 = vor.u32 %v9423_v60, %v9420_v28  ;;  %v12767_v54 = vld [vmem:[#allocation2 + $0xb4] sm:$0xff]  }
 0x34f   : > { %18040 = vst [vmem:[#allocation33_spill] sm:$0xff] %v16847_v24  ;;  %v9416_v63 = vsel %vm12997_vm4, %v9411_v46, %v9415_v2  ;;  %v9433_v1 = vrot.slane %v9431_v44, 4  ;;  %v6261_v47 = vpop.f32.mrf.mxu1  ;;  %v9439_v38 = vrot.slane %v9437_v61, 5  ;;  %v9837_v32 = vrot.slane %v16496_v57, 5  ;;  %v12768_v24 = vld [vmem:[#allocation2 + $0xc0] sm:$0xff]  }
 0x350   : > { %18041 = vst [vmem:[#allocation25_spill] sm:$0xff] %v16850_v37  ;;  %v11474_v35 = vcombine.low %v9406_v43, %v9416_v63  ;;  %v16859_v4 = vadd.f32 %v16754_v9, %v6261_v47  ;;  %v16861_v29 = vpop.f32.mrf.mxu0  ;;  %v16864_v37 = vld [vmem:[#allocation2 + $0xd0] sm:$0xf]  ;;  %v9425_v3 = vrot.slane %v9424_v10, 4  ;;  %v11495_v2 = vrot.slane %v9771_v45, 9 }
 0x351   : > { %v9434_v42 = vor.u32 %v9433_v1, %v9429_v56  ;;  %v12273_v52 = vpop.f32.mrf.mxu1  ;;  %v9442_v60 = vshrl.u32 %v9078_v49, 16  ;;  %v9839_v9 = vrot.slane %v9837_v32, 4  ;;  %v9840_v44 = vrot.slane %v16504_v34, 5  ;;  %v16872_v28 = vld [vmem:[#allocation2 + $0xd4] sm:$0x1] }
 0x352   : > { %12524 = vmatmul.mubr.msk.bf16.gmra.mxu0 %vm6095_vm10, %v11474_v35  ;;  %v16868_v61 = vadd.f32 %v16772_v0, %v12273_v52  ;;  %v9445_v57 = vshll.u32 %v9078_v49, 16  ;;  %v16874_v46 = vpop.f32.mrf.mxu0  ;;  %v9838_v63 = vsel %vm13263_vm7, %v11495_v2, %v9837_v32  ;;  %v9451_v0 = vshll.u32 %v16864_v37, 16 }
 0x353   : > { %12488 = vmatmul.mubr.msk.bf16.gmra.mxu1 %vm6095_vm10, %v12767_v54  ;;  %v9435_v43 = vrot.slane %v9434_v42, 4  ;;  %v6274_v45 = vpop.f32.mrf.mxu1  ;;  %v9444_v10 = vrot.slane %v9442_v60, 4  ;;  %v9841_v34 = vsel %vm13263_vm7, %v9839_v9, %v9840_v44  ;;  %v9455_v49 = vshrl.u32 %v16864_v37, 16  ;;  %v12769_v9 = vld [vmem:[#allocation2 + $0xcc] sm:$0xff]  }
 0x354   : > { %12491 = vmatprep.mubr.msk.bf16.mxu1 %vm6095_vm10, %v12768_v24  ;;  %v16881_v1 = vadd.f32 %v16778_v39, %v6274_v45  ;;  %v9447_v47 = vrot.slane %v9445_v57, 5  ;;  %v16886_v35 = vpop.f32.mrf.mxu0  ;;  %v9430_v24 = vsel %vm12997_vm4, %v9425_v3, %v9429_v56  ;;  %v9453_v42 = vrot.slane %v9451_v0, 5  ;;  %v9772_v39 = vld [vmem:[#allocation2 + $0x24] sm:$0xe] }
 0x355   : > { %v9440_v54 = vsel %vm12997_vm4, %v9435_v43, %v9439_v38  ;;  %v12274_v32 = vpop.f32.mrf.mxu1  ;;  %v9461_v52 = vshll.u32 %v16872_v28, 16  ;;  %v9457_v57 = vrot.slane %v9455_v49, 4  ;;  %v16900_v3 = vadd.f32 %v16463_v6, %v16555_v13 }
 0x356   : > { %18042 = vst [vmem:[#allocation32_spill] sm:$0xff] %v16881_v1  ;;  %v11475_v2 = vcombine.low %v9430_v24, %v9440_v54  ;;  %v16894_v60 = vadd.f32 %v16793_v23, %v12274_v32  ;;  %v9448_v44 = vor.u32 %v9447_v47, %v9444_v10  ;;  %v16896_v45 = vpop.f32.mrf.mxu0  ;;  %v9773_v1 = vld [vmem:[#allocation2 + $0x30] sm:$0xe]  ;;  %v11515_v38 = vcombine.low %v9838_v63, %v9841_v34  ;;  %v9774_v34 = vld [vmem:[#allocation2 + $0x3c] sm:$0xe] }
 0x357   : > { %v6277_v56 = vpop.f32.mrf.mxu1  ;;  %v9463_v43 = vrot.slane %v9461_v52, 5  ;;  %v9844_v0 = vrot.slane %v16523_v33, 5  ;;  %v9458_v10 = vor.u32 %v9457_v57, %v9453_v42  ;;  %v11496_v47 = vrot.slane %v9772_v39, 9 }
 0x358   : > { %12527 = vmatprep.mubr.msk.bf16.mxu0 %vm6095_vm10, %v11475_v2  ;;  %v16905_v23 = vadd.f32 %v16800_v7, %v6277_v56  ;;  %v9449_v24 = vrot.slane %v9448_v44, 4  ;;  %v16907_v49 = vpop.f32.mrf.mxu0  ;;  %v9847_v6 = vrot.slane %v16531_v20, 5  ;;  %v11497_v13 = vrot.slane %v9773_v1, 9 }
 0x359   : > { %v12277_v54 = vpop.f32.mrf.mxu1  ;;  %v9846_v32 = vrot.slane %v9844_v0, 4  ;;  %v9851_v63 = vrot.slane %v16553_v51, 5  ;;  %v9459_v52 = vrot.slane %v9458_v10, 4  ;;  %v9845_v39 = vsel %vm13263_vm7, %v11496_v47, %v9844_v0  ;;  %v9775_v0 = vld [vmem:[#allocation2 + $0x48] sm:$0xe] }
 0x35a   : > { %v16912_v33 = vadd.f32 %v16815_v25, %v12277_v54  ;;  %v9454_v7 = vsel %vm12997_vm4, %v9449_v24, %v9453_v42  ;;  %v16919_v2 = vpop.f32.mrf.mxu0  ;;  %v9854_v25 = vrot.slane %v16562_v31, 5 }
 0x35b   : > { %12492 = vmatmul.mubr.msk.bf16.gmra.mxu1 %vm6095_vm10, %v12769_v9  ;;  %v6290_v20 = vpop.f32.mrf.mxu1  ;;  %v9848_v51 = vsel %vm13263_vm7, %v9846_v32, %v9847_v6  ;;  %v9853_v1 = vrot.slane %v9851_v63, 4  ;;  %v9858_v9 = vrot.slane %v16570_v40, 5  ;;  %v9464_v42 = vsel %vm12997_vm4, %v9459_v52, %v9463_v43 }
 0x35c   : > { %12535 = vmatprep.mubr.msk.bf16.mxu1 %vm6095_vm10, %v11515_v38  ;;  %v16927_v44 = vadd.f32 %v16821_v36, %v6290_v20  ;;  %v9852_v57 = vsel %vm13263_vm7, %v11497_v13, %v9851_v63  ;;  %v16933_v56 = vpop.f32.mrf.mxu0  ;;  %v11498_v38 = vrot.slane %v9774_v34, 9  ;;  %v11476_v24 = vcombine.low %v9454_v7, %v9464_v42  ;;  %v9776_v36 = vld [vmem:[#allocation2 + $0x54] sm:$0xe]  ;;  %v9777_v7 = vld [vmem:[#allocation2 + $0x60] sm:$0xe] }
 0x35d   : > { %v12278_v10 = vpop.f32.mrf.mxu1  ;;  %v9855_v31 = vsel %vm13263_vm7, %v9853_v1, %v9854_v25  ;;  %v9860_v47 = vrot.slane %v9858_v9, 4  ;;  %v9861_v40 = vrot.slane %v16578_v58, 5  ;;  %v11516_v17 = vcombine.low %v9845_v39, %v9848_v51  ;;  %v9778_v1 = vld [vmem:[#allocation2 + $0x6c] sm:$0xe] }
 0x35e   : > { %18043 = vst [vmem:[#allocation35_spill] sm:$0xff] %v16927_v44  ;;  %v16939_v54 = vadd.f32 %v16835_v62, %v12278_v10  ;;  %v16941_v43 = vpop.f32.mrf.mxu0  ;;  %v16945_v32 = vsel %vm13263_vm7, %v11498_v38, %v9858_v9  ;;  %v9865_v6 = vrot.slane %v16590_v30, 5  ;;  %12528 = vmatmul.mubr.msk.bf16.gmra.mxu0 %vm6095_vm10, %v11476_v24  ;;  %v11517_v63 = vcombine.low %v9852_v57, %v9855_v31  ;;  %v18056_v44 = vld [vmem:[#allocation36_spill] sm:$0xff] }
 0x35f   : > { %v6293_v13 = vpop.f32.mrf.mxu1  ;;  %v9862_v58 = vsel %vm13263_vm7, %v9860_v47, %v9861_v40  ;;  %v11499_v34 = vrot.slane %v9775_v0, 9  ;;  %v9872_v62 = vrot.slane %v16620_v8, 5  ;;  %v9868_v51 = vrot.slane %v16600_v11, 5  ;;  %v9779_v40 = vld [vmem:[#allocation2 + $0x78] sm:$0xe] }
 0x360   : > { %18044 = vst [vmem:[#allocation39_spill] sm:$0xff] %v16939_v54  ;;  %v16953_v52 = vadd.f32 %v16841_v14, %v6293_v13  ;;  %v16955_v39 = vpop.f32.mrf.mxu0  ;;  %v9867_v20 = vrot.slane %v9865_v6, 4  ;;  %v11500_v30 = vrot.slane %v9776_v36, 9  ;;  %v11518_v9 = vcombine.low %v16945_v32, %v9862_v58 }
 0x361   : > { %v12321_v25 = vpop.f32.mrf.mxu1  ;;  %v9866_v42 = vsel %vm13263_vm7, %v11499_v34, %v9865_v6  ;;  %v9874_v57 = vrot.slane %v9872_v62, 4  ;;  %v9875_v8 = vrot.slane %v16622_v59, 5  ;;  %v11501_v0 = vrot.slane %v9777_v7, 9  ;;  %v9780_v34 = vld [vmem:[#allocation2 + $0x84] sm:$0xe] }
 0x362   : > { %18045 = vst [vmem:[#allocation40_spill] sm:$0xff] %v16953_v52  ;;  %v16963_v38 = vadd.f32 %v12321_v25, %v16595_v53  ;;  %v16966_v14 = vpop.f32.mrf.mxu0  ;;  %v16970_v11 = vsel %vm13263_vm7, %v11500_v30, %v9872_v62  ;;  %v9879_v24 = vrot.slane %v16639_v55, 5  ;;  %v9869_v59 = vsel %vm13263_vm7, %v9867_v20, %v9868_v51 }
 0x363   : > { %12536 = vmatmul.mubr.msk.bf16.vlgmr.msra.gmra.mxu1 %vm6095_vm10, %v11516_v17  ;;  %v6913_v10 = vpop.f32.mrf.mxu1  ;;  %v16978_v53 = vsel %vm13263_vm7, %v9874_v57, %v9875_v8  ;;  %v11502_v31 = vrot.slane %v9778_v1, 9  ;;  %v9886_v47 = vrot.slane %v16668_v41, 5  ;;  %v9882_v6 = vrot.slane %v16650_v22, 5 }
 0x364   : > { %12539 = vmatprep.mubr.msk.bf16.mxu1 %vm6095_vm10, %v11517_v63  ;;  %v16982_v36 = vadd.f32 %v6913_v10, %v16613_v27  ;;  %v16984_v17 = vpop.f32.mrf.mxu0  ;;  %v9881_v32 = vrot.slane %v9879_v24, 4  ;;  %v16991_v63 = vsel %vm13263_vm7, %v11501_v0, %v9879_v24  ;;  %v9889_v27 = vrot.slane %v16674_v5, 5  ;;  %v9781_v10 = vld [vmem:[#allocation2 + $0x90] sm:$0xe] }
 0x365   : > { %v12322_v13 = vpop.f32.mrf.mxu1  ;;  %v16995_v41 = vsel %vm13263_vm7, %v11502_v31, %v9886_v47  ;;  %v9888_v58 = vrot.slane %v9886_v47, 4  ;;  %v11503_v20 = vrot.slane %v9779_v40, 9  ;;  %v9893_v51 = vrot.slane %v16683_v15, 5  ;;  %v18053_v15 = vld [vmem:[#allocation22_spill] sm:$0xff] }
 0x366   : > { %v16999_v62 = vadd.f32 %v12322_v13, %v16618_v19  ;;  %v17001_v7 = vpop.f32.mrf.mxu0  ;;  %v17005_v22 = vsel %vm13263_vm7, %v9881_v32, %v9882_v6  ;;  %v9896_v19 = vrot.slane %v16693_v48, 5  ;;  %v9900_v25 = vrot.slane %v16708_v21, 5 }
 0x367   : > { %v6916_v30 = vpop.f32.mrf.mxu1  ;;  %v11521_v1 = vcombine.low %v16991_v63, %v17005_v22  ;;  %v17012_v5 = vsel %vm13263_vm7, %v9888_v58, %v9889_v27  ;;  %v9895_v0 = vrot.slane %v9893_v51, 4  ;;  %v11504_v24 = vrot.slane %v9780_v34, 9  ;;  %v9782_v63 = vld [vmem:[#allocation2 + $0x9c] sm:$0xe]  ;;  %v18047_v27 = vld [vmem:[#allocation15_spill] sm:$0xff]  ;;  %v18048_v22 = vld [vmem:[#allocation29_spill] sm:$0xff] }
 0x368   : > { %v17017_v57 = vadd.f32 %v6916_v30, %v16900_v3  ;;  %v17019_v8 = vpop.f32.mrf.mxu0  ;;  %v11519_v47 = vcombine.low %v9866_v42, %v9869_v59  ;;  %v17025_v40 = vsel %vm13263_vm7, %v11503_v20, %v9893_v51  ;;  %v9902_v48 = vrot.slane %v9900_v25, 4  ;;  %v18046_v59 = vld [vmem:[#allocation21_spill] sm:$0xff] }
 0x369   : > { %v12325_v31 = vpop.f32.mrf.mxu1  ;;  %v9903_v21 = vrot.slane %v16716_v12, 5  ;;  %v17034_v6 = vsel %vm13263_vm7, %v9895_v0, %v9896_v19  ;;  %v17038_v42 = vsel %vm13263_vm7, %v11504_v24, %v9900_v25  ;;  %v9907_v13 = vrot.slane %v18046_v59, 5  ;;  %v18049_v25 = vld [vmem:[#allocation13_spill] sm:$0xff]  ;;  %v18050_v59 = vld [vmem:[#allocation16_spill] sm:$0xff] }
 0x36a   : > { %v7046_v3 = vadd.f32 %v12325_v31, %v16647_v26  ;;  %v17030_v32 = vpop.f32.mrf.mxu0  ;;  %v11505_v58 = vrot.slane %v9781_v10, 9  ;;  %v9914_v34 = vrot.slane %v18047_v27, 5  ;;  %v9910_v0 = vrot.slane %v18049_v25, 5  ;;  %v9784_v25 = vld [vmem:[#allocation2 + $0xb4] sm:$0xe] }
 0x36b   : > { %12540 = vmatmul.mubr.msk.bf16.gmra.mxu1 %vm6095_vm10, %v11518_v9  ;;  %v6929_v12 = vpop.f32.mrf.mxu1  ;;  %v17046_v9 = vsel %vm13263_vm7, %v9902_v48, %v9903_v21  ;;  %v9909_v19 = vrot.slane %v9907_v13, 4  ;;  %v11506_v31 = vrot.slane %v9782_v63, 9  ;;  %v9917_v26 = vrot.slane %v18050_v59, 5  ;;  %v18051_v48 = vld [vmem:[#allocation14_spill] sm:$0xff]  ;;  %v18052_v21 = vld [vmem:[#allocation20_spill] sm:$0xff] }
 0x36c   : > { %12543 = vmatprep.mubr.msk.bf16.mxu1 %vm6095_vm10, %v11519_v47  ;;  %v7044_v20 = vadd.f32 %v6929_v12, %v18048_v22  ;;  %v17050_v51 = vpop.f32.mrf.mxu0  ;;  %v9916_v47 = vrot.slane %v9914_v34, 4  ;;  %v6499_v10 = vadd.f32 %v18052_v21, %v18051_v48  ;;  %v17063_v12 = vsel %vm13263_vm7, %v11505_v58, %v9907_v13  ;;  %v18055_v59 = vld [vmem:[#allocation26_spill] sm:$0xff] }
 0x36d   : > { %v12326_v24 = vpop.f32.mrf.mxu1  ;;  %v17067_v22 = vsel %vm13263_vm7, %v9909_v19, %v9910_v0  ;;  %v17073_v48 = vsel %vm13263_vm7, %v11506_v31, %v9914_v34  ;;  %v11508_v30 = vrot.slane %v9784_v25, 9  ;;  %v9931_v54 = vrot.slane %v18055_v59, 5 }
 0x36e   : > { %v7047_v27 = vadd.f32 %v12326_v24, %v18053_v15  ;;  %v17059_v55 = vpop.f32.mrf.mxu0  ;;  %v17077_v15 = vsel %vm13263_vm7, %v9916_v47, %v9917_v26  ;;  %v18054_v24 = vld [vmem:[#allocation23_spill] sm:$0xff]  ;;  %v18057_v31 = vcombine.low %v16970_v11, %v16978_v53 }
 0x36f   : > { %v6932_v63 = vpop.f32.mrf.mxu1  ;;  %v9928_v13 = vrot.slane %v18054_v24, 5  ;;  %v11526_v19 = vcombine.low %v17073_v48, %v17077_v15  ;;  %v18059_v24 = vld [vmem:[#allocation34_spill] sm:$0xff]  ;;  %v9786_v48 = vld [vmem:[#allocation2 + $0xcc] sm:$0xe] }
 0x370   : > { %v7045_v58 = vadd.f32 %v6932_v63, %v6499_v10  ;;  %v17080_v21 = vpop.f32.mrf.mxu0  ;;  %v18058_v63 = vld [vmem:[#allocation37_spill] sm:$0xff] }
 0x371   : > { %v12329_v0 = vpop.f32.mrf.mxu1  ;;  %v9930_v52 = vrot.slane %v9928_v13, 4  ;;  %v17095_v10 = vsel %vm13263_vm7, %v11508_v30, %v9928_v13 }
 0x372   : > { %v7050_v34 = vadd.f32 %v12329_v0, %v18056_v44  ;;  %v17090_v26 = vpop.f32.mrf.mxu0 }
 0x373   : > { %12544 = vmatmul.mubr.msk.bf16.gmra.mxu1 %vm6095_vm10, %v18057_v31  ;;  %v6945_v47 = vpop.f32.mrf.mxu1  ;;  %v17099_v25 = vsel %vm13263_vm7, %v9930_v52, %v9931_v54  ;;  %v17115_v54 = vadd.f32 %v16861_v29, %v16982_v36  ;;  %v17119_v52 = vadd.f32 %v16874_v46, %v16999_v62  ;;  %v17123_v31 = vadd.f32 %v16886_v35, %v17017_v57  ;;  %v18061_v57 = vld [vmem:[#allocation8_spill] sm:$0xff] }
 0x374   : > { %12547 = vmatprep.mubr.msk.bf16.mxu1 %vm6095_vm10, %v11521_v1  ;;  %v7048_v44 = vadd.f32 %v6945_v47, %v18058_v63  ;;  %v17102_v59 = vpop.f32.mrf.mxu0  ;;  %v11528_v11 = vcombine.low %v17095_v10, %v17099_v25  ;;  %v17108_v1 = vadd.f32 %v16852_v50, %v16963_v38  ;;  %v17126_v50 = vadd.f32 %v16896_v45, %v7046_v3  ;;  %v18060_v38 = vld [vmem:[#allocation38_spill] sm:$0xff] }
 0x375   : > { %v12330_v53 = vpop.f32.mrf.mxu1  ;;  %v17135_v29 = vadd.f32 %v16919_v2, %v7047_v27  ;;  %v17138_v36 = vadd.f32 %v16933_v56, %v7045_v58  ;;  %v17141_v35 = vadd.f32 %v16941_v43, %v7050_v34  ;;  %v18063_v43 = vcombine.low %v17025_v40, %v17034_v6  ;;  %v18067_v6 = vld [vmem:[#allocation17_spill] sm:$0xff] }
 0x376   : > { %v7051_v0 = vadd.f32 %v12330_v53, %v18059_v24  ;;  %v17111_v30 = vpop.f32.mrf.mxu0  ;;  %v17132_v53 = vadd.f32 %v16907_v49, %v7044_v20  ;;  %v17144_v45 = vadd.f32 %v16955_v39, %v7048_v44  ;;  %v18062_v49 = vcombine.low %v16995_v41, %v17012_v5  ;;  %v18065_v5 = vld [vmem:[#allocation9_spill] sm:$0xff] }
 0x377   : > { %v6948_v13 = vpop.f32.mrf.mxu1 }
 0x378   : > { %v7049_v47 = vadd.f32 %v6948_v13, %v18060_v38  ;;  %v17129_v63 = vpop.f32.mrf.mxu0  ;;  %v17147_v62 = vadd.f32 %v16966_v14, %v7051_v0  ;;  %v18064_v14 = vld [vmem:[#allocation12_spill] sm:$0xff] }
 0x379   : > { %v12333_v46 = vpop.f32.mrf.mxu1 }
 0x37a   : > { %v7054_v3 = vadd.f32 %v12333_v46, %v18061_v57  ;;  %v17154_v2 = vpop.f32.mrf.mxu0  ;;  %v17157_v56 = vadd.f32 %v16984_v17, %v7049_v47  ;;  %v18066_v17 = vld [vmem:[#allocation10_spill] sm:$0xff]  ;;  %v18068_v46 = vld [vmem:[#allocation19_spill] sm:$0xff] }
 0x37b   : > { %12548 = vmatmul.mubr.msk.bf16.gmra.mxu1 %vm6095_vm10, %v18062_v49  ;;  %v6961_v39 = vpop.f32.mrf.mxu1  ;;  %v9921_v24 = vrot.slane %v18066_v17, 5  ;;  %v18069_v57 = vld [vmem:[#allocation31_spill] sm:$0xff]  ;;  %v18073_v17 = vld [vmem:[#allocation18_spill] sm:$0xff] }
 0x37c   : > { %12551 = vmatprep.mubr.msk.bf16.mxu1 %vm6095_vm10, %v18063_v43  ;;  %v7052_v20 = vadd.f32 %v6961_v39, %v18064_v14  ;;  %v17164_v27 = vpop.f32.mrf.mxu0  ;;  %v17167_v58 = vadd.f32 %v17001_v7, %v7054_v3  ;;  %v6544_v3 = vadd.f32 %v18069_v57, %v18068_v46  ;;  %v18070_v49 = vld [vmem:[#allocation11_spill] sm:$0xff]  ;;  %v18071_v39 = vcombine.low %v17038_v42, %v17046_v9 }
 0x37d   : > { %v12334_v41 = vpop.f32.mrf.mxu1  ;;  %v9923_v14 = vrot.slane %v9921_v24, 4  ;;  %v18074_v46 = vld [vmem:[#allocation27_spill] sm:$0xff] }
 0x37e   : > { %v7055_v34 = vadd.f32 %v12334_v41, %v18065_v5  ;;  %v17170_v44 = vpop.f32.mrf.mxu0  ;;  %v17174_v0 = vadd.f32 %v17019_v8, %v7052_v20  ;;  %v9783_v8 = vld [vmem:[#allocation2 + $0xa8] sm:$0xe] }
 0x37f   : > { %v6964_v40 = vpop.f32.mrf.mxu1 }
 0x380   : > { %v7053_v13 = vadd.f32 %v6964_v40, %v18067_v6  ;;  %v17177_v38 = vpop.f32.mrf.mxu0  ;;  %v17180_v47 = vadd.f32 %v17030_v32, %v7055_v34  ;;  %v18072_v32 = vcombine.low %v17063_v12, %v17067_v22  ;;  %v9924_v40 = vrot.slane %v18073_v17, 5 }
 0x381   : > { %v12337_v7 = vpop.f32.mrf.mxu1  ;;  %v9935_v12 = vrot.slane %v16824_v18, 5 }
 0x382   : > { %v7058_v43 = vadd.f32 %v12337_v7, %v18070_v49  ;;  %v17189_v20 = vpop.f32.mrf.mxu0  ;;  %v17192_v41 = vadd.f32 %v17050_v51, %v7053_v13  ;;  %v11507_v7 = vrot.slane %v9783_v8, 9  ;;  %v9925_v51 = vsel %vm13263_vm7, %v9923_v14, %v9924_v40  ;;  %v18075_v49 = vld [vmem:[#allocation24_spill] sm:$0xff] }
 0x383   : > { %12552 = vmatmul.mubr.msk.bf16.gmra.mxu1 %vm6095_vm10, %v18071_v39  ;;  %v6977_v5 = vpop.f32.mrf.mxu1  ;;  %v9937_v18 = vrot.slane %v9935_v12, 4  ;;  %v9942_v40 = vrot.slane %v16864_v37, 5 }
 0x384   : > { %12555 = vmatprep.mubr.msk.bf16.mxu1 %vm6095_vm10, %v18072_v32  ;;  %v7056_v34 = vadd.f32 %v6977_v5, %v6544_v3  ;;  %v17199_v6 = vpop.f32.mrf.mxu0  ;;  %v17202_v42 = vadd.f32 %v17059_v55, %v7058_v43  ;;  %v9922_v55 = vsel %vm13263_vm7, %v11507_v7, %v9921_v24  ;;  %v18076_v5 = vld [vmem:[#allocation30_spill] sm:$0xff] }
 0x385   : > { %v12338_v9 = vpop.f32.mrf.mxu1  ;;  %v11527_v14 = vcombine.low %v9922_v55, %v9925_v51 }
 0x386   : > { %v7059_v57 = vadd.f32 %v12338_v9, %v18074_v46  ;;  %v17207_v13 = vpop.f32.mrf.mxu0  ;;  %v17211_v22 = vadd.f32 %v17080_v21, %v7056_v34  ;;  %v18077_v9 = vld [vmem:[#allocation33_spill] sm:$0xff]  ;;  %v18078_v46 = vld [vmem:[#allocation28_spill] sm:$0xff] }
 0x387   : > { %v6980_v3 = vpop.f32.mrf.mxu1 }
 0x388   : > { %v7057_v39 = vadd.f32 %v6980_v3, %v18075_v49  ;;  %v17216_v43 = vpop.f32.mrf.mxu0  ;;  %v17219_v8 = vadd.f32 %v17090_v26, %v7059_v57  ;;  %v9785_v26 = vld [vmem:[#allocation2 + $0xc0] sm:$0xe]  ;;  %v9938_v57 = vrot.slane %v18078_v46, 5  ;;  %v18079_v3 = vld [vmem:[#allocation25_spill] sm:$0xff] }
 0x389   : > { %v12341_v32 = vpop.f32.mrf.mxu1 }
 0x38a   : > { %v7062_v17 = vadd.f32 %v12341_v32, %v18076_v5  ;;  %v17226_v21 = vpop.f32.mrf.mxu0  ;;  %v17229_v34 = vadd.f32 %v17102_v59, %v7057_v39  ;;  %v11509_v59 = vrot.slane %v9785_v26, 9  ;;  %v9939_v39 = vsel %vm13263_vm7, %v9937_v18, %v9938_v57 }
 0x38b   : > { %12556 = vmatmul.mubr.msk.bf16.gmra.mxu1 %vm6095_vm10, %v11526_v19  ;;  %v6993_v24 = vpop.f32.mrf.mxu1  ;;  %v9944_v5 = vrot.slane %v9942_v40, 4 }
 0x38c   : > { %12559 = vmatprep.mubr.msk.bf16.mxu1 %vm6095_vm10, %v11527_v14  ;;  %v7060_v7 = vadd.f32 %v6993_v24, %v18077_v9  ;;  %v7398_v51 = vpop.f32.mrf.mxu0  ;;  %v17236_v15 = vadd.f32 %v17111_v30, %v7062_v17  ;;  %v11510_v14 = vrot.slane %v9786_v48, 9  ;;  %v9945_v24 = vrot.slane %v16872_v28, 5 }
 0x38d   : > { %v12342_v19 = vpop.f32.mrf.mxu1  ;;  %v9936_v30 = vsel %vm13263_vm7, %v11509_v59, %v9935_v12 }
 0x38e   : > { %v7063_v49 = vadd.f32 %v12342_v19, %v18079_v3  ;;  %v17242_v32 = vadd.f32 %v17129_v63, %v7060_v7  ;;  %v11529_v18 = vcombine.low %v9936_v30, %v9939_v39  ;;  %v9946_v12 = vsel %vm13263_vm7, %v9944_v5, %v9945_v24  ;;  %v18080_v7 = vld [vmem:[#allocation32_spill] sm:$0xff] }
 0x38f   : > { %v12429_v55 = vpop.f32.mrf.mxu0  ;;  %v6996_v37 = vpop.f32.mrf.mxu1 }
 0x390   : > { %v7061_v9 = vadd.f32 %v6996_v37, %v16859_v4  ;;  %v17249_v26 = vadd.f32 %v17154_v2, %v7063_v49  ;;  %v9943_v2 = vsel %vm13263_vm7, %v11510_v14, %v9942_v40 }
 0x391   : > { %v8503_v17 = vpop.f32.mrf.mxu0 }
 0x392   : > { %v12345_v46 = vpop.f32.mrf.mxu1  ;;  %v17257_v28 = vadd.f32 %v17164_v27, %v7061_v9  ;;  %v11530_v27 = vcombine.low %v9943_v2, %v9946_v12 }
 0x393   : > { %v7066_v57 = vadd.f32 %v12345_v46, %v16868_v61  ;;  %12560 = vmatmul.mubr.msk.bf16.gmra.mxu1 %vm6095_vm10, %v11528_v11  ;;  %v12430_v63 = vpop.f32.mrf.mxu0 }
 0x394   : > { %12563 = vmatprep.mubr.msk.bf16.mxu1 %vm6095_vm10, %v11529_v18  ;;  %v7009_v4 = vpop.f32.mrf.mxu1 }
 0x395   : > { %v7064_v61 = vadd.f32 %v7009_v4, %v18080_v7  ;;  %v17265_v48 = vpop.f32.mrf.mxu0  ;;  %v17268_v10 = vadd.f32 %v17170_v44, %v7066_v57  ;;  %v18083_v57 = vld [vmem:[#allocation40_spill] sm:$0xff] }
 0x396   : > { %v12346_v25 = vpop.f32.mrf.mxu1 }
 0x397   : > { %v7067_v11 = vadd.f32 %v12346_v25, %v16894_v60  ;;  %v12433_v19 = vpop.f32.mrf.mxu0  ;;  %v17272_v3 = vadd.f32 %v17177_v38, %v7064_v61  ;;  %v18081_v38 = vld [vmem:[#allocation35_spill] sm:$0xff] }
 0x398   : > { %v7012_v49 = vpop.f32.mrf.mxu1 }
 0x399   : > { %v7065_v40 = vadd.f32 %v7012_v49, %v16905_v23  ;;  %v17275_v16 = vpop.f32.mrf.mxu0  ;;  %v17278_v59 = vadd.f32 %v17189_v20, %v7067_v11  ;;  %v18082_v20 = vld [vmem:[#allocation39_spill] sm:$0xff] }
 0x39b   : > { %v12349_v39 = vpop.f32.mrf.mxu1  ;;  %12564 = vmatmul.mubr.msk.bf16.gmra.mxu1 %vm6095_vm10, %v11530_v27  ;;  %v12434_v37 = vpop.f32.mrf.mxu0  ;;  %v17283_v60 = vadd.f32 %v17199_v6, %v7065_v40 }
 0x39c   : > { %v7070_v44 = vadd.f32 %v12349_v39, %v16912_v33 }
 0x39d   : > { %v7025_v14 = vpop.f32.mrf.mxu1  ;;  %v17286_v24 = vpop.f32.mrf.mxu0 }
 0x39e   : > { %v7068_v5 = vadd.f32 %v7025_v14, %v18081_v38  ;;  %v17289_v23 = vadd.f32 %v17207_v13, %v7070_v44 }
 0x39f   : > { %v12350_v9 = vpop.f32.mrf.mxu1  ;;  %v12437_v46 = vpop.f32.mrf.mxu0 }
 0x3a0   : > { %v7071_v30 = vadd.f32 %v12350_v9, %v18082_v20  ;;  %v17293_v33 = vadd.f32 %v17216_v43, %v7068_v5 }
 0x3a1   : > { %v7028_v18 = vpop.f32.mrf.mxu1  ;;  %v17296_v6 = vpop.f32.mrf.mxu0 }
 0x3a2   : > { %v7069_v4 = vadd.f32 %v7028_v18, %v18083_v57  ;;  %v17299_v2 = vadd.f32 %v17226_v21, %v7071_v30 }
 0x3a3   : > { %v12393_v12 = vpop.f32.mrf.mxu1  ;;  %v12438_v13 = vpop.f32.mrf.mxu0 }
 0x3a4   : > { %v8150_v7 = vadd.f32 %v12393_v12, %v17108_v1  ;;  %v17302_v61 = vadd.f32 %v7398_v51, %v7069_v4 }
 0x3a5   : > { %v8021_v25 = vpop.f32.mrf.mxu1  ;;  %v17305_v27 = vpop.f32.mrf.mxu0 }
 0x3a6   : > { %v8148_v11 = vadd.f32 %v8021_v25, %v17115_v54  ;;  %v17307_v43 = vadd.f32 %v12429_v55, %v8150_v7 }
 0x3a7   : > { %v12394_v49 = vpop.f32.mrf.mxu1  ;;  %v12441_v39 = vpop.f32.mrf.mxu0 }
 0x3a8   : > { %v8151_v40 = vadd.f32 %v12394_v49, %v17119_v52  ;;  %v17310_v44 = vadd.f32 %v8503_v17, %v8148_v11 }
 0x3a9   : > { %v8024_v21 = vpop.f32.mrf.mxu1  ;;  %v17315_v1 = vpop.f32.mrf.mxu0 }
 0x3aa   : > { %v17313_v14 = vadd.f32 %v8024_v21, %v17123_v31  ;;  %v17317_v51 = vadd.f32 %v12430_v63, %v8151_v40 }
 0x3ab   : > { %v12397_v38 = vpop.f32.mrf.mxu1  ;;  %v12442_v5 = vpop.f32.mrf.mxu0 }
 0x3ac   : > { %v8154_v54 = vadd.f32 %v12397_v38, %v17126_v50 }
 0x3ad   : > { %v8037_v55 = vpop.f32.mrf.mxu1  ;;  %v17323_v52 = vpop.f32.mrf.mxu0 }
 0x3ae   : > { %v17321_v9 = vadd.f32 %v8037_v55, %v17132_v53  ;;  %v17325_v17 = vadd.f32 %v12433_v19, %v8154_v54 }
 0x3af   : > { %v12398_v20 = vpop.f32.mrf.mxu1  ;;  %v12445_v30 = vpop.f32.mrf.mxu0 }
 0x3b0   : > { %v8155_v31 = vadd.f32 %v12398_v20, %v17135_v29 }
 0x3b1   : > { %v8040_v18 = vpop.f32.mrf.mxu1  ;;  %v17331_v57 = vpop.f32.mrf.mxu0 }
 0x3b2   : > { %v17329_v63 = vadd.f32 %v8040_v18, %v17138_v36  ;;  %v17333_v50 = vadd.f32 %v12434_v37, %v8155_v31 }
 0x3b3   : > { %v12401_v4 = vpop.f32.mrf.mxu1  ;;  %v12446_v12 = vpop.f32.mrf.mxu0 }
 0x3b4   : > { %v8158_v53 = vadd.f32 %v12401_v4, %v17141_v35 }
 0x3b5   : > { %v8053_v7 = vpop.f32.mrf.mxu1  ;;  %v17339_v25 = vpop.f32.mrf.mxu0 }
 0x3b6   : > { %v17337_v19 = vadd.f32 %v8053_v7, %v17144_v45  ;;  %v17341_v29 = vadd.f32 %v12437_v46, %v8158_v53 }
 0x3b7   : > { %v12402_v11 = vpop.f32.mrf.mxu1  ;;  %v12449_v49 = vpop.f32.mrf.mxu0 }
 0x3b8   : > { %v8159_v36 = vadd.f32 %v12402_v11, %v17147_v62 }
 0x3b9   : > { %v8056_v40 = vpop.f32.mrf.mxu1  ;;  %v17347_v21 = vpop.f32.mrf.mxu0 }
 0x3ba   : > { %v17345_v37 = vadd.f32 %v8056_v40, %v17157_v56  ;;  %18084 = vst [vmem:[#allocation41_spill] sm:$0xff] %v17347_v21  ;;  %v17349_v35 = vadd.f32 %v12438_v13, %v8159_v36 }
 0x3bb   : > { %v12405_v38 = vpop.f32.mrf.mxu1  ;;  %v12450_v54 = vpop.f32.mrf.mxu0 }
 0x3bc   : > { %v8162_v45 = vadd.f32 %v12405_v38, %v17167_v58 }
 0x3bd   : > { %v8069_v55 = vpop.f32.mrf.mxu1  ;;  %v17357_v31 = vpop.f32.mrf.mxu0 }
 0x3be   : > { %v17353_v46 = vadd.f32 %v8069_v55, %v17174_v0  ;;  %v17355_v20 = vadd.f32 %v12441_v39, %v8162_v45  ;;  %18085 = vst [vmem:[#allocation42_spill] sm:$0xff] %v17357_v31  ;;  %v17818_v0 = vmov 0.0  }
 0x3bf   : > { %v12406_v62 = vpop.f32.mrf.mxu1  ;;  %v12453_v58 = vpop.f32.mrf.mxu0  ;;  %12567 = vmatprep.subr.mxu0 %v17818_v0 }
 0x3c0   : > { %v8163_v56 = vadd.f32 %v12406_v62, %v17180_v47 }
 0x3c1   : > { %v8072_v18 = vpop.f32.mrf.mxu1  ;;  %v17372_v40 = vpop.f32.mrf.mxu0 }
 0x3c2   : > { %v17361_v4 = vadd.f32 %v8072_v18, %v17192_v41  ;;  %v17363_v13 = vadd.f32 %v12442_v5, %v8163_v56  ;;  %18086 = vst [vmem:[#allocation43_spill] sm:$0xff] %v17372_v40  ;;  %v10402_v5 = vld [vmem:[%s17793_s5 + $0x38] sm:$0xff] }
 0x3c3   : > { %v12409_v53 = vpop.f32.mrf.mxu1  ;;  %12568 = vmatpush3.msra.mxu0 %v10402_v5 }
 0x3c4   : > { %v8166_v7 = vadd.f32 %v12409_v53, %v17202_v42  ;;  %12569 = vmatprep.subr.mxu0 %v17818_v0 }
 0x3c5   : > { %v8085_v11 = vpop.f32.mrf.mxu1 }
 0x3c6   : > { %v17368_v39 = vadd.f32 %v8085_v11, %v17211_v22  ;;  %v17370_v36 = vadd.f32 %v12445_v30, %v8166_v7  ;;  %v12454_v30 = vpop.f32.mrf.mxu0 }
 0x3c7   : > { %v12410_v47 = vpop.f32.mrf.mxu1 }
 0x3c8   : > { %v8167_v41 = vadd.f32 %v12410_v47, %v17219_v8  ;;  %v17390_v53 = vpop.f32.mrf.mxu0 }
 0x3c9   : > { %v8088_v38 = vpop.f32.mrf.mxu1  ;;  %18088 = vst [vmem:[#allocation45_spill] sm:$0xff] %v17390_v53 }
 0x3ca   : > { %v17379_v42 = vadd.f32 %v8088_v38, %v17229_v34  ;;  %v17381_v45 = vadd.f32 %v12446_v12, %v8167_v41  ;;  %v10401_v12 = vld [vmem:[%s17793_s5 + $0x30] sm:$0xff] }
 0x3cb   : > { %v12413_v22 = vpop.f32.mrf.mxu1  ;;  %12570 = vmatpush3.msra.mxu0 %v10401_v12 }
 0x3cc   : > { %v8170_v55 = vadd.f32 %v12413_v22, %v17236_v15  ;;  %12571 = vmatprep.subr.mxu0 %v17818_v0 }
 0x3cd   : > { %v8101_v62 = vpop.f32.mrf.mxu1 }
 0x3ce   : > { %v17386_v8 = vadd.f32 %v8101_v62, %v17242_v32  ;;  %v17388_v56 = vadd.f32 %v12449_v49, %v8170_v55  ;;  %v12457_v32 = vpop.f32.mrf.mxu0 }
 0x3cf   : > { %v12414_v18 = vpop.f32.mrf.mxu1 }
 0x3d0   : > { %18087 = vst [vmem:[#allocation44_spill] sm:$0xff] %v17386_v8  ;;  %v8171_v34 = vadd.f32 %v12414_v18, %v17249_v26  ;;  %v17408_v38 = vpop.f32.mrf.mxu0 }
 0x3d1   : > { %v8104_v7 = vpop.f32.mrf.mxu1  ;;  %18091 = vst [vmem:[#allocation46_spill] sm:$0xff] %v17408_v38 }
 0x3d2   : > { %v17397_v11 = vadd.f32 %v8104_v7, %v17257_v28  ;;  %v17399_v15 = vadd.f32 %v12450_v54, %v8171_v34  ;;  %v10400_v54 = vld [vmem:[%s17793_s5 + $0x28] sm:$0xff] }
 0x3d3   : > { %v12417_v49 = vpop.f32.mrf.mxu1  ;;  %12572 = vmatpush3.msra.mxu0 %v10400_v54 }
 0x3d4   : > { %18089 = vst [vmem:[#allocation56_spill] sm:$0xff] %v17397_v11  ;;  %v8174_v47 = vadd.f32 %v12417_v49, %v17268_v10  ;;  %12573 = vmatprep.subr.mxu0 %v17818_v0 }
 0x3d5   : > { %v8117_v41 = vpop.f32.mrf.mxu1 }
 0x3d6   : > { %v17404_v26 = vadd.f32 %v8117_v41, %v17272_v3  ;;  %v17406_v5 = vadd.f32 %v12453_v58, %v8174_v47  ;;  %v12458_v3 = vpop.f32.mrf.mxu0 }
 0x3d7   : > { %v12418_v22 = vpop.f32.mrf.mxu1 }
 0x3d8   : > { %18090 = vst [vmem:[#allocation58_spill] sm:$0xff] %v17404_v26  ;;  %v8175_v28 = vadd.f32 %v12418_v22, %v17278_v59  ;;  %v17421_v12 = vpop.f32.mrf.mxu0 }
 0x3d9   : > { %v8120_v55 = vpop.f32.mrf.mxu1  ;;  %18093 = vst [vmem:[#allocation48_spill] sm:$0xff] %v17421_v12  ;;  %v10397_v12 = vld [vmem:[%s17793_s5 + $0x10] sm:$0xff] }
 0x3da   : > { %v17415_v62 = vadd.f32 %v8120_v55, %v17283_v60  ;;  %v17417_v10 = vadd.f32 %v12454_v30, %v8175_v28  ;;  %v10399_v60 = vld [vmem:[%s17793_s5 + $0x20] sm:$0xff] }
 0x3db   : > { %v12421_v58 = vpop.f32.mrf.mxu1  ;;  %12574 = vmatpush3.msra.mxu0 %v10399_v60 }
 0x3dc   : > { %18092 = vst [vmem:[#allocation47_spill] sm:$0xff] %v17415_v62  ;;  %v8178_v18 = vadd.f32 %v12421_v58, %v17289_v23  ;;  %12575 = vmatprep.subr.mxu0 %v17818_v0  ;;  %v17433_v23 = vpop.f32.mrf.mxu0  ;;  %v10398_v58 = vld [vmem:[%s17793_s5 + $0x18] sm:$0xff] }
 0x3dd   : > { %v8133_v34 = vpop.f32.mrf.mxu1  ;;  %12576 = vmatpush3.msra.mxu0 %v10398_v58 }
 0x3de   : > { %v17424_v59 = vadd.f32 %v8133_v34, %v17293_v33  ;;  %v17426_v7 = vadd.f32 %v12457_v32, %v8178_v18  ;;  %v17443_v54 = vpop.f32.mrf.mxu0  ;;  %12577 = vmatprep.subr.mxu0 %v17818_v0 }
 0x3df   : > { %v12422_v49 = vpop.f32.mrf.mxu1  ;;  %12578 = vmatpush3.msra.mxu0 %v10397_v12 }
 0x3e0   : > { %18094 = vst [vmem:[#allocation49_spill] sm:$0xff] %v17424_v59  ;;  %v8179_v30 = vadd.f32 %v12422_v49, %v17299_v2 }
 0x3e1   : > { %v8136_v47 = vpop.f32.mrf.mxu1 }
 0x3e2   : > { %v17436_v41 = vadd.f32 %v8136_v47, %v17302_v61  ;;  %v17438_v33 = vadd.f32 %v12458_v3, %v8179_v30 }
 0x3e3   : > { %v12465_v32 = vpop.f32.mrf.mxu1 }
 0x3e4   : > { %18095 = vst [vmem:[#allocation50_spill] sm:$0xff] %v17436_v41  ;;  %v17441_v22 = vadd.f32 %v12465_v32, %v17307_v43  ;;  %v17457_v43 = vpop.f32.mrf.mxu0  ;;  %v10395_v41 = vld [vmem:[%s17793_s5] sm:$0xff] }
 0x3e5   : > { %v8874_v28 = vpop.f32.mrf.mxu1 }
 0x3e6   : > { %v17446_v2 = vadd.f32 %v8874_v28, %v17310_v44  ;;  %v17464_v49 = vpop.f32.mrf.mxu0 }
 0x3e7   : > { %v12466_v55 = vpop.f32.mrf.mxu1 }
 0x3e8   : > { %v17452_v61 = vadd.f32 %v12466_v55, %v17317_v51  ;;  %v17471_v47 = vpop.f32.mrf.mxu0 }
 0x3e9   : > { %v17454_v3 = vpop.f32.mrf.mxu1 }
 0x3eb   : > { %v12469_v18 = vpop.f32.mrf.mxu1 }
 0x3ec   : > { %v17460_v34 = vadd.f32 %v12469_v18, %v17325_v17  ;;  %v17478_v17 = vpop.f32.mrf.mxu0 }
 0x3ed   : > { %v17462_v44 = vpop.f32.mrf.mxu1 }
 0x3ef   : > { %v12470_v60 = vpop.f32.mrf.mxu1 }
 0x3f0   : > { %v17467_v30 = vadd.f32 %v12470_v60, %v17333_v50  ;;  %v17485_v50 = vpop.f32.mrf.mxu0 }
 0x3f1   : > { %v17469_v51 = vpop.f32.mrf.mxu1 }
 0x3f2   : > { %v17503_v38 = vpop.f32.mrf.mxu0 }
 0x3f3   : > { %v12473_v32 = vpop.f32.mrf.mxu1 }
 0x3f4   : > { %v17474_v28 = vadd.f32 %v12473_v32, %v17341_v29  ;;  %v10396_v29 = vld [vmem:[%s17793_s5 + $0x8] sm:$0xff] }
 0x3f5   : > { %v17476_v55 = vpop.f32.mrf.mxu1 }
 0x3f7   : > { %v12474_v58 = vpop.f32.mrf.mxu1 }
 0x3f8   : > { %v17481_v18 = vadd.f32 %v12474_v58, %v17349_v35  ;;  %v18096_v35 = vmov 0.0  }
 0x3f9   : > { %v17483_v0 = vpop.f32.mrf.mxu1  ;;  %12583 = vmatprep.mubr.msk.f32.mxu0 %vm12846_vm1, %v18096_v35  ;;  %12579 = vmatprep.subr.mxu0 %v18096_v35 }
 0x3fa   : > { %12580 = vmatpush3.msra.mxu0 %v10396_v29 }
 0x3fb   : > { %v12477_v60 = vpop.f32.mrf.mxu1  ;;  %12581 = vmatprep.subr.mxu0 %v18096_v35 }
 0x3fc   : > { %v17494_v32 = vadd.f32 %v12477_v60, %v17355_v20  ;;  %12582 = vmatpush3.msra.mxu0 %v10395_v41  ;;  %v17511_v60 = vpop.f32.mrf.mxu0 }
 0x3fd   : > { %v17497_v58 = vpop.f32.mrf.mxu1 }
 0x3fe   : > { %v17518_v26 = vpop.f32.mrf.mxu0 }
 0x3ff   : > { %v12478_v59 = vpop.f32.mrf.mxu1 }
 0x400   : > { %v17507_v20 = vadd.f32 %v12478_v59, %v17363_v13  ;;  %v17525_v13 = vpop.f32.mrf.mxu0 }
 0x401   : > { %v17509_v12 = vpop.f32.mrf.mxu1 }
 0x403   : > { %v12481_v53 = vpop.f32.mrf.mxu1 }
 0x404   : > { %v17514_v62 = vadd.f32 %v12481_v53, %v17370_v36  ;;  %v17532_v36 = vpop.f32.mrf.mxu0 }
 0x405   : > { %v17516_v40 = vpop.f32.mrf.mxu1 }
 0x406   : > { %18097 = vst [vmem:[#allocation51_spill] sm:$0xff] %v17514_v62 }
 0x407   : > { %v12482_v29 = vpop.f32.mrf.mxu1 }
 0x408   : > { %v17521_v31 = vadd.f32 %v12482_v29, %v17381_v45  ;;  %v17539_v45 = vpop.f32.mrf.mxu0 }
 0x409   : > { %v17523_v35 = vpop.f32.mrf.mxu1 }
 0x40a   : > { %18098 = vst [vmem:[#allocation52_spill] sm:$0xff] %v17521_v31 }
 0x40b   : > { %v12485_v59 = vpop.f32.mrf.mxu1 }
 0x40c   : > { %v17528_v41 = vadd.f32 %v12485_v59, %v17388_v56  ;;  %v17546_v56 = vpop.f32.mrf.mxu0 }
 0x40d   : > { %v17530_v11 = vpop.f32.mrf.mxu1 }
 0x40e   : > { %18099 = vst [vmem:[#allocation65_spill] sm:$0xff] %v17528_v41  ;;  %18100 = vst [vmem:[#allocation53_spill] sm:$0xff] %v17530_v11 }
 0x40f   : > { %v12486_v53 = vpop.f32.mrf.mxu1 }
 0x410   : > { %v17535_v21 = vadd.f32 %v12486_v53, %v17399_v15  ;;  %v17553_v15 = vpop.f32.mrf.mxu0 }
 0x411   : > { %v17537_v8 = vpop.f32.mrf.mxu1 }
 0x412   : > { %18101 = vst [vmem:[#allocation55_spill] sm:$0xff] %v17535_v21  ;;  %18102 = vst [vmem:[#allocation54_spill] sm:$0xff] %v17537_v8 }
 0x413   : > { %v12489_v29 = vpop.f32.mrf.mxu1 }
 0x414   : > { %v17542_v31 = vadd.f32 %v12489_v29, %v17406_v5  ;;  %v17560_v5 = vpop.f32.mrf.mxu0 }
 0x415   : > { %v17544_v62 = vpop.f32.mrf.mxu1 }
 0x416   : > { %18103 = vst [vmem:[#allocation57_spill] sm:$0xff] %v17542_v31  ;;  %18104 = vst [vmem:[#allocation59_spill] sm:$0xff] %v17544_v62 }
 0x417   : > { %v12490_v59 = vpop.f32.mrf.mxu1 }
 0x418   : > { %v17549_v41 = vadd.f32 %v12490_v59, %v17417_v10  ;;  %v8631_v10 = vadd.f32 %v17265_v48, %v17313_v14  ;;  %v17569_v59 = vpop.f32.mrf.mxu0  ;;  %v9742_v48 = vadd.f32 %v17457_v43, %v17452_v61  ;;  %v17585_v14 = vld [vmem:[%s17792_s4] ss:$0 sm:$0xff] }
 0x419   : > { %v17551_v11 = vpop.f32.mrf.mxu1 }
 0x41a   : > { %18105 = vst [vmem:[#allocation61_spill] sm:$0xff] %v17549_v41  ;;  %18106 = vst [vmem:[#allocation60_spill] sm:$0xff] %v17551_v11  ;;  %v9002_v11 = vadd.f32 %v17454_v3, %v8631_v10 }
 0x41b   : > { %v12493_v53 = vpop.f32.mrf.mxu1 }
 0x41c   : > { %v17556_v21 = vadd.f32 %v12493_v53, %v17426_v7  ;;  %v9741_v7 = vadd.f32 %v17433_v23, %v17441_v22  ;;  %v9739_v53 = vadd.f32 %v17443_v54, %v17446_v2 }
 0x41d   : > { %v17558_v8 = vpop.f32.mrf.mxu1 }
 0x41e   : > { %18107 = vst [vmem:[#allocation63_spill] sm:$0xff] %v17556_v21 }
 0x41f   : > { %v12494_v29 = vpop.f32.mrf.mxu1 }
 0x420   : > { %v17563_v31 = vadd.f32 %v12494_v29, %v17438_v33  ;;  %v8634_v33 = vadd.f32 %v17275_v16, %v17321_v9  ;;  %v17578_v29 = vpop.f32.mrf.mxu0  ;;  %v9740_v16 = vadd.f32 %v17464_v49, %v9002_v11  ;;  %v8635_v9 = vadd.f32 %v17286_v24, %v17329_v63 }
 0x421   : > { %v17565_v62 = vpop.f32.mrf.mxu1  ;;  %v9745_v11 = vadd.f32 %v17471_v47, %v17460_v34  ;;  %v8638_v24 = vadd.f32 %v17296_v6, %v17337_v19 }
 0x422   : > { %18108 = vst [vmem:[#allocation62_spill] sm:$0xff] %v17563_v31  ;;  %18109 = vst [vmem:[#allocation66_spill] sm:$0xff] %v17565_v62  ;;  %v9005_v22 = vadd.f32 %v17462_v44, %v8634_v33  ;;  %v17592_v3 = vpop.f32.mrf.mxu0 }
 0x423   : > { %v12537_v41 = vpop.f32.mrf.mxu1 }
 0x424   : > { %v10223_v31 = vadd.f32 %v12537_v41, %v9741_v7  ;;  %v9006_v41 = vadd.f32 %v17469_v51, %v8635_v9  ;;  %v9743_v49 = vadd.f32 %v17478_v17, %v9005_v22  ;;  %v17605_v51 = vpop.f32.mrf.mxu0 }
 0x425   : > { %v10094_v21 = vpop.f32.mrf.mxu1 }
 0x426   : > { %v10221_v62 = vadd.f32 %v10094_v21, %v9739_v53  ;;  %v10262_v61 = vadd.f32 %v17585_v14, %v10223_v31  ;;  %v9746_v31 = vadd.f32 %v17485_v50, %v17467_v30  ;;  %v9744_v17 = vadd.f32 %v17503_v38, %v9006_v41  ;;  %v17614_v9 = vpop.f32.mrf.mxu0 }
 0x427   : > { %v12538_v23 = vpop.f32.mrf.mxu1  ;;  %v8639_v30 = vadd.f32 %v17305_v27, %v17345_v37 }
 0x428   : > { %v10260_v54 = vadd.f32 %v17585_v14, %v10221_v62  ;;  %v10224_v2 = vadd.f32 %v12538_v23, %v9742_v48  ;;  %v10294_v53 = vmax.f32 %v10262_v61, 0.0 }
 0x429   : > { %v10097_v21 = vpop.f32.mrf.mxu1  ;;  %v9010_v38 = vadd.f32 %v17483_v0, %v8639_v30  ;;  %v9750_v0 = vadd.f32 %v17525_v13, %v17481_v18  ;;  %v8643_v18 = vadd.f32 %v17323_v52, %v17361_v4 }
 0x42a   : > { %v10222_v43 = vadd.f32 %v10097_v21, %v9740_v16  ;;  %v10292_v10 = vmax.f32 %v10260_v54, 0.0  ;;  %v10263_v44 = vadd.f32 %v17585_v14, %v10224_v2  ;;  %v9009_v54 = vadd.f32 %v17476_v55, %v8638_v24 }
 0x42b   : > { %v12541_v7 = vpop.f32.mrf.mxu1  ;;  %v10328_v55 = vsel %vm10324_vm2, %v10294_v53, 0.0 }
 0x42c   : > { %v10261_v62 = vadd.f32 %v17585_v14, %v10222_v43  ;;  %v10227_v48 = vadd.f32 %v12541_v7, %v9745_v11  ;;  %v10325_v34 = vsel %vm10324_vm2, %v10292_v10, 0.0  ;;  %v10295_v22 = vmax.f32 %v10263_v44, 0.0 }
 0x42d   : > { %v10110_v63 = vpop.f32.mrf.mxu1  ;;  %v9749_v10 = vadd.f32 %v17511_v60, %v17474_v28  ;;  %v8642_v11 = vadd.f32 %v17315_v1, %v17353_v46 }
 0x42e   : > { %v10293_v33 = vmax.f32 %v10261_v62, 0.0  ;;  %v10225_v23 = vadd.f32 %v10110_v63, %v9743_v49  ;;  %v10266_v21 = vadd.f32 %v17585_v14, %v10227_v48  ;;  %v10330_v44 = vsel %vm10324_vm2, %v10295_v22, 0.0 }
 0x42f   : > { %v12542_v47 = vpop.f32.mrf.mxu1  ;;  %v9747_v62 = vadd.f32 %v17518_v26, %v9009_v54  ;;  %v9013_v48 = vadd.f32 %v17497_v58, %v8642_v11  ;;  %v9748_v54 = vadd.f32 %v17532_v36, %v9010_v38  ;;  %v9014_v36 = vadd.f32 %v17509_v12, %v8643_v18 }
 0x430   : > { %v10326_v6 = vsel %vm10324_vm2, %v10293_v33, 0.0  ;;  %v10264_v19 = vadd.f32 %v17585_v14, %v10225_v23  ;;  %v10228_v2 = vadd.f32 %v12542_v47, %v9746_v31  ;;  %v17629_v31 = vpop.f32.mrf.mxu0  ;;  %v10298_v28 = vmax.f32 %v10266_v21, 0.0 }
 0x431   : > { %v10327_v50 = vadd.f32 %v10326_v6, %v10325_v34  ;;  %v10113_v16 = vpop.f32.mrf.mxu1  ;;  %v9751_v21 = vadd.f32 %v17546_v56, %v9013_v48  ;;  %v9754_v12 = vadd.f32 %v17553_v15, %v17507_v20  ;;  %v8647_v20 = vadd.f32 %v17339_v25, %v17379_v42 }
 0x432   : > { %v10296_v61 = vmax.f32 %v10264_v19, 0.0  ;;  %v10226_v43 = vadd.f32 %v10113_v16, %v9744_v17  ;;  %v10267_v27 = vadd.f32 %v17585_v14, %v10228_v2  ;;  %v17639_v6 = vpop.f32.mrf.mxu0  ;;  %v10336_v58 = vsel %vm10324_vm2, %v10298_v28, 0.0 }
 0x433   : > { %v10329_v41 = vadd.f32 %v10328_v55, %v10327_v50  ;;  %v12545_v7 = vpop.f32.mrf.mxu1  ;;  %v9753_v50 = vadd.f32 %v17539_v45, %v17494_v32 }
 0x434   : > { %v10265_v37 = vadd.f32 %v17585_v14, %v10226_v43  ;;  %v10231_v24 = vadd.f32 %v12545_v7, %v9749_v10  ;;  %v10332_v60 = vsel %vm10324_vm2, %v10296_v61, 0.0  ;;  %v10299_v1 = vmax.f32 %v10267_v27, 0.0  ;;  %v17653_v10 = vpop.f32.mrf.mxu0 }
 0x435   : > { %v10331_v49 = vadd.f32 %v10330_v44, %v10329_v41  ;;  %v10126_v63 = vpop.f32.mrf.mxu1  ;;  %v8646_v61 = vadd.f32 %v17331_v57, %v17368_v39 }
 0x436   : > { %v10297_v53 = vmax.f32 %v10265_v37, 0.0  ;;  %v10229_v33 = vadd.f32 %v10126_v63, %v9747_v62  ;;  %v10270_v17 = vadd.f32 %v17585_v14, %v10231_v24  ;;  %v10338_v55 = vsel %vm10324_vm2, %v10299_v1, 0.0  ;;  %v17662_v63 = vpop.f32.mrf.mxu0  ;;  %v18111_v1 = vld [vmem:[#allocation44_spill] sm:$0xff] }
 0x437   : > { %v10333_v23 = vadd.f32 %v10332_v60, %v10331_v49  ;;  %v12546_v26 = vpop.f32.mrf.mxu1  ;;  %v9017_v27 = vadd.f32 %v17516_v40, %v8646_v61  ;;  %v9752_v62 = vadd.f32 %v17560_v5, %v9014_v36  ;;  %v9018_v5 = vadd.f32 %v17523_v35, %v8647_v20  ;;  %v18113_v35 = vld [vmem:[#allocation52_spill] sm:$0xff]  ;;  %v18114_v36 = vld [vmem:[#allocation53_spill] sm:$0xff]  ;;  %v18116_v61 = vld [vmem:[#allocation42_spill] sm:$0xff] }
 0x438   : > { %v10334_v46 = vsel %vm10324_vm2, %v10297_v53, 0.0  ;;  %v10268_v34 = vadd.f32 %v17585_v14, %v10229_v33  ;;  %v10232_v47 = vadd.f32 %v12546_v26, %v9750_v0  ;;  %v10302_v43 = vmax.f32 %v10270_v17, 0.0  ;;  %v18110_v33 = vld [vmem:[#allocation51_spill] sm:$0xff] }
 0x439   : > { %v10335_v13 = vadd.f32 %v10334_v46, %v10333_v23  ;;  %v10129_v22 = vpop.f32.mrf.mxu1  ;;  %v9757_v48 = vadd.f32 %v17569_v59, %v18110_v33  ;;  %v18112_v46 = vld [vmem:[#allocation41_spill] sm:$0xff]  ;;  %v9758_v17 = vadd.f32 %v17592_v3, %v18113_v35  ;;  %v18115_v3 = vld [vmem:[#allocation56_spill] sm:$0xff] }
 0x43a   : > { %v10300_v19 = vmax.f32 %v10268_v34, 0.0  ;;  %v10230_v2 = vadd.f32 %v10129_v22, %v9748_v54  ;;  %v10271_v52 = vadd.f32 %v17585_v14, %v10232_v47  ;;  %v10344_v0 = vsel %vm10324_vm2, %v10302_v43, 0.0  ;;  %v17677_v22 = vpop.f32.mrf.mxu0  ;;  %v18124_v35 = vld [vmem:[#allocation45_spill] sm:$0xff] }
 0x43b   : > { %v10337_v30 = vadd.f32 %v10336_v58, %v10335_v13  ;;  %v12549_v16 = vpop.f32.mrf.mxu1  ;;  %v9755_v54 = vadd.f32 %v17578_v29, %v9017_v27  ;;  %v8650_v34 = vadd.f32 %v18112_v46, %v18111_v1  ;;  %v8651_v43 = vadd.f32 %v18116_v61, %v18115_v3  ;;  %v18117_v27 = vld [vmem:[#allocation54_spill] sm:$0xff] }
 0x43c   : > { %v10269_v4 = vadd.f32 %v17585_v14, %v10230_v2  ;;  %v10340_v32 = vsel %vm10324_vm2, %v10300_v19, 0.0  ;;  %v10235_v7 = vadd.f32 %v12549_v16, %v9753_v50  ;;  %v10303_v57 = vmax.f32 %v10271_v52, 0.0 }
 0x43d   : > { %v10339_v38 = vadd.f32 %v10338_v55, %v10337_v30  ;;  %v10142_v41 = vpop.f32.mrf.mxu1  ;;  %v9021_v30 = vadd.f32 %v18114_v36, %v8650_v34  ;;  %v9756_v16 = vadd.f32 %v17605_v51, %v9018_v5  ;;  %v9022_v51 = vadd.f32 %v18117_v27, %v8651_v43  ;;  %v18121_v5 = vld [vmem:[#allocation55_spill] sm:$0xff]  ;;  %v18129_v27 = vld [vmem:[#allocation61_spill] sm:$0xff] }
 0x43e   : > { %v10301_v45 = vmax.f32 %v10269_v4, 0.0  ;;  %v10233_v44 = vadd.f32 %v10142_v41, %v9751_v21  ;;  %v10274_v40 = vadd.f32 %v17585_v14, %v10235_v7  ;;  %v10346_v26 = vsel %vm10324_vm2, %v10303_v57, 0.0 }
 0x43f   : > { %v10341_v37 = vadd.f32 %v10340_v32, %v10339_v38  ;;  %v12550_v56 = vpop.f32.mrf.mxu1  ;;  %v12526_v32 = vpop.f32.mrf.mxu0  ;;  %v9759_v20 = vadd.f32 %v17629_v31, %v9021_v30  ;;  %v9760_v31 = vadd.f32 %v17653_v10, %v9022_v51 }
 0x440   : > { %v10342_v39 = vsel %vm10324_vm2, %v10301_v45, 0.0  ;;  %v10272_v11 = vadd.f32 %v17585_v14, %v10233_v44  ;;  %v10236_v49 = vadd.f32 %v12550_v56, %v9754_v12  ;;  %v10306_v59 = vmax.f32 %v10274_v40, 0.0  ;;  %v18118_v56 = vld [vmem:[#allocation65_spill] sm:$0xff] }
 0x441   : > { %v10343_v15 = vadd.f32 %v10342_v39, %v10341_v37  ;;  %v10145_v24 = vpop.f32.mrf.mxu1  ;;  %v9711_v33 = vpop.f32.mrf.mxu0  ;;  %v9766_v51 = vadd.f32 %v12526_v32, %v18129_v27 }
 0x442   : > { %v10304_v28 = vmax.f32 %v10272_v11, 0.0  ;;  %v10234_v60 = vadd.f32 %v10145_v24, %v9752_v62  ;;  %v10275_v25 = vadd.f32 %v17585_v14, %v10236_v49  ;;  %v10352_v45 = vsel %vm10324_vm2, %v10306_v59, 0.0  ;;  %v18120_v24 = vld [vmem:[#allocation43_spill] sm:$0xff] }
 0x443   : > { %v10345_v53 = vadd.f32 %v10344_v0, %v10343_v15  ;;  %v12553_v23 = vpop.f32.mrf.mxu1  ;;  %v9761_v62 = vadd.f32 %v17614_v9, %v18118_v56  ;;  %v18119_v15 = vld [vmem:[#allocation58_spill] sm:$0xff]  ;;  %v12529_v46 = vpop.f32.mrf.mxu0 }
 0x444   : > { %v10273_v42 = vadd.f32 %v17585_v14, %v10234_v60  ;;  %v10239_v18 = vadd.f32 %v12553_v23, %v9757_v48  ;;  %v10348_v58 = vsel %vm10324_vm2, %v10304_v28, 0.0  ;;  %v10307_v55 = vmax.f32 %v10275_v25, 0.0  ;;  %v18122_v25 = vld [vmem:[#allocation59_spill] sm:$0xff] }
 0x445   : > { %v10347_v47 = vadd.f32 %v10346_v26, %v10345_v53  ;;  %v10158_v13 = vpop.f32.mrf.mxu1  ;;  %v8654_v0 = vadd.f32 %v18120_v24, %v18119_v15  ;;  %v9762_v53 = vadd.f32 %v17639_v6, %v18121_v5  ;;  %v18123_v6 = vld [vmem:[#allocation47_spill] sm:$0xff] }
 0x446   : > { %v10305_v19 = vmax.f32 %v10273_v42, 0.0  ;;  %v10237_v2 = vadd.f32 %v10158_v13, %v9755_v54  ;;  %v10278_v41 = vadd.f32 %v17585_v14, %v10239_v18  ;;  %v10354_v39 = vsel %vm10324_vm2, %v10307_v55, 0.0 }
 0x447   : > { %v10349_v50 = vadd.f32 %v10348_v58, %v10347_v47  ;;  %v12554_v29 = vpop.f32.mrf.mxu1  ;;  %v9025_v42 = vadd.f32 %v18122_v25, %v8654_v0 }
 0x448   : > { %v10350_v52 = vsel %vm10324_vm2, %v10305_v19, 0.0  ;;  %v10276_v4 = vadd.f32 %v17585_v14, %v10237_v2  ;;  %v10240_v21 = vadd.f32 %v12554_v29, %v9758_v17  ;;  %v10310_v40 = vmax.f32 %v10278_v41, 0.0  ;;  %v18128_v41 = vld [vmem:[#allocation46_spill] sm:$0xff] }
 0x449   : > { %v10351_v38 = vadd.f32 %v10350_v52, %v10349_v50  ;;  %v10161_v12 = vpop.f32.mrf.mxu1  ;;  %v8655_v17 = vadd.f32 %v18124_v35, %v18123_v6  ;;  %v18125_v50 = vld [vmem:[#allocation60_spill] sm:$0xff]  ;;  %v9763_v43 = vadd.f32 %v17677_v22, %v9025_v42 }
 0x44a   : > { %v10308_v7 = vmax.f32 %v10276_v4, 0.0  ;;  %v10238_v44 = vadd.f32 %v10161_v12, %v9756_v16  ;;  %v10279_v11 = vadd.f32 %v17585_v14, %v10240_v21  ;;  %v10360_v19 = vsel %vm10324_vm2, %v10310_v40, 0.0  ;;  %v18126_v16 = vld [vmem:[#allocation57_spill] sm:$0xff]  ;;  %v9724_v4 = vpop.f32.mrf.mxu0  ;;  %v18130_v40 = vld [vmem:[#allocation50_spill] sm:$0xff] }
 0x44b   : > { %v10353_v37 = vadd.f32 %v10352_v45, %v10351_v38  ;;  %v12557_v57 = vpop.f32.mrf.mxu1  ;;  %v9026_v10 = vadd.f32 %v18125_v50, %v8655_v17  ;;  %v9765_v55 = vadd.f32 %v17662_v63, %v18126_v16  ;;  %v18127_v38 = vld [vmem:[#allocation49_spill] sm:$0xff] }
 0x44c   : > { %v10277_v49 = vadd.f32 %v17585_v14, %v10238_v44  ;;  %v10356_v9 = vsel %vm10324_vm2, %v10308_v7, 0.0  ;;  %v10243_v23 = vadd.f32 %v12557_v57, %v9761_v62  ;;  %v10311_v34 = vmax.f32 %v10279_v11, 0.0 }
 0x44d   : > { %v10355_v28 = vadd.f32 %v10354_v39, %v10353_v37  ;;  %v10174_v60 = vpop.f32.mrf.mxu1  ;;  %v8658_v12 = vadd.f32 %v18128_v41, %v18127_v38 }
 0x44e   : > { %v10309_v48 = vmax.f32 %v10277_v49, 0.0  ;;  %v10241_v26 = vadd.f32 %v10174_v60, %v9759_v20  ;;  %v10282_v2 = vadd.f32 %v17585_v14, %v10243_v23  ;;  %v10362_v21 = vsel %vm10324_vm2, %v10311_v34, 0.0  ;;  %v12530_v20 = vpop.f32.mrf.mxu0  ;;  %v18132_v23 = vld [vmem:[#allocation63_spill] sm:$0xff] }
 0x44f   : > { %v10357_v54 = vadd.f32 %v10356_v9, %v10355_v28  ;;  %v12558_v1 = vpop.f32.mrf.mxu1  ;;  %v9029_v57 = vadd.f32 %v17558_v8, %v8658_v12  ;;  %v9764_v49 = vadd.f32 %v9711_v33, %v9026_v10  ;;  %v18131_v28 = vld [vmem:[#allocation48_spill] sm:$0xff]  ;;  %v9769_v33 = vadd.f32 %v12529_v46, %v18132_v23 }
 0x450   : > { %v10358_v47 = vsel %vm10324_vm2, %v10309_v48, 0.0  ;;  %v10280_v18 = vadd.f32 %v17585_v14, %v10241_v26  ;;  %v10244_v13 = vadd.f32 %v12558_v1, %v9762_v53  ;;  %v10314_v37 = vmax.f32 %v10282_v2, 0.0  ;;  %v18133_v26 = vld [vmem:[#allocation66_spill] sm:$0xff] }
 0x451   : > { %v10359_v59 = vadd.f32 %v10358_v47, %v10357_v54  ;;  %v10177_v58 = vpop.f32.mrf.mxu1  ;;  %v8659_v32 = vadd.f32 %v18131_v28, %v18130_v40  ;;  %v9767_v1 = vadd.f32 %v9724_v4, %v9029_v57  ;;  %v10403_v28 = vld [vmem:[%s17794_s6] sm:$0x1] }
 0x452   : > { %v10312_v36 = vmax.f32 %v10280_v18, 0.0  ;;  %v10242_v30 = vadd.f32 %v10177_v58, %v9760_v31  ;;  %v10283_v3 = vadd.f32 %v17585_v14, %v10244_v13  ;;  %v10368_v9 = vsel %vm10324_vm2, %v10314_v37, 0.0  ;;  %v9727_v31 = vpop.f32.mrf.mxu0  ;;  %v18134_v13 = vld [vmem:[#allocation62_spill] sm:$0xff] }
 0x453   : > { %v10361_v29 = vadd.f32 %v10360_v19, %v10359_v59  ;;  %v12561_v52 = vpop.f32.mrf.mxu1  ;;  %v9030_v25 = vadd.f32 %v18133_v26, %v8659_v32  ;;  %v9770_v6 = vadd.f32 %v12530_v20, %v18134_v13 }
 0x454   : > { %v10281_v61 = vadd.f32 %v17585_v14, %v10242_v30  ;;  %v10247_v7 = vadd.f32 %v12561_v52, %v9765_v55  ;;  %v10364_v63 = vsel %vm10324_vm2, %v10312_v36, 0.0  ;;  %v10315_v22 = vmax.f32 %v10283_v3, 0.0 }
 0x455   : > { %v10363_v45 = vadd.f32 %v10362_v21, %v10361_v29  ;;  %v10190_v44 = vpop.f32.mrf.mxu1  ;;  %v9768_v36 = vadd.f32 %v9727_v31, %v9030_v25 }
 0x456   : > { %v10313_v56 = vmax.f32 %v10281_v61, 0.0  ;;  %v10245_v62 = vadd.f32 %v10190_v44, %v9763_v43  ;;  %v10286_v5 = vadd.f32 %v17585_v14, %v10247_v7  ;;  %v10370_v34 = vsel %vm10324_vm2, %v10315_v22, 0.0 }
 0x457   : > { %v10365_v39 = vadd.f32 %v10364_v63, %v10363_v45  ;;  %v12562_v11 = vpop.f32.mrf.mxu1 }
 0x458   : > { %v10366_v15 = vsel %vm10324_vm2, %v10313_v56, 0.0  ;;  %v10284_v24 = vadd.f32 %v17585_v14, %v10245_v62  ;;  %v10248_v0 = vadd.f32 %v12562_v11, %v9766_v51  ;;  %v10318_v35 = vmax.f32 %v10286_v5, 0.0 }
 0x459   : > { %v10367_v60 = vadd.f32 %v10366_v15, %v10365_v39  ;;  %v10193_v53 = vpop.f32.mrf.mxu1 }
 0x45a   : > { %v10316_v8 = vmax.f32 %v10284_v24, 0.0  ;;  %v10246_v48 = vadd.f32 %v10193_v53, %v9764_v49  ;;  %v10287_v47 = vadd.f32 %v17585_v14, %v10248_v0  ;;  %v10376_v21 = vsel %vm10324_vm2, %v10318_v35, 0.0 }
 0x45b   : > { %v10369_v42 = vadd.f32 %v10368_v9, %v10367_v60  ;;  %v12565_v54 = vpop.f32.mrf.mxu1 }
 0x45c   : > { %v10285_v18 = vadd.f32 %v17585_v14, %v10246_v48  ;;  %v10372_v58 = vsel %vm10324_vm2, %v10316_v8, 0.0  ;;  %v10251_v19 = vadd.f32 %v12565_v54, %v9769_v33  ;;  %v10319_v10 = vmax.f32 %v10287_v47, 0.0 }
 0x45d   : > { %v10371_v17 = vadd.f32 %v10370_v34, %v10369_v42  ;;  %v10206_v59 = vpop.f32.mrf.mxu1 }
 0x45e   : > { %v10317_v46 = vmax.f32 %v10285_v18, 0.0  ;;  %v10249_v2 = vadd.f32 %v10206_v59, %v9767_v1  ;;  %v10290_v3 = vadd.f32 %v17585_v14, %v10251_v19  ;;  %v10378_v41 = vsel %vm10324_vm2, %v10319_v10, 0.0 }
 0x45f   : > { %v10373_v30 = vadd.f32 %v10372_v58, %v10371_v17  ;;  %v12566_v50 = vpop.f32.mrf.mxu1 }
 0x460   : > { %v10374_v29 = vsel %vm10324_vm2, %v10317_v46, 0.0  ;;  %v10288_v16 = vadd.f32 %v17585_v14, %v10249_v2  ;;  %v10252_v55 = vadd.f32 %v12566_v50, %v9770_v6  ;;  %v10322_v44 = vmax.f32 %v10290_v3, 0.0 }
 0x461   : > { %v10375_v52 = vadd.f32 %v10374_v29, %v10373_v30  ;;  %v10209_v4 = vpop.f32.mrf.mxu1 }
 0x462   : > { %v10320_v61 = vmax.f32 %v10288_v16, 0.0  ;;  %v10250_v43 = vadd.f32 %v10209_v4, %v9768_v36  ;;  %v10291_v12 = vadd.f32 %v17585_v14, %v10252_v55  ;;  %v10384_v57 = vsel %vm10324_vm2, %v10322_v44, 0.0 }
 0x463   : > { %v10377_v38 = vadd.f32 %v10376_v21, %v10375_v52 }
 0x464   : > { %v10289_v45 = vadd.f32 %v17585_v14, %v10250_v43  ;;  %v10380_v27 = vsel %vm10324_vm2, %v10320_v61, 0.0  ;;  %v10323_v63 = vmax.f32 %v10291_v12, 0.0 }
 0x465   : > { %v10379_v7 = vadd.f32 %v10378_v41, %v10377_v38 }
 0x466   : > { %v10321_v51 = vmax.f32 %v10289_v45, 0.0  ;;  %v10386_v11 = vsel %vm10324_vm2, %v10323_v63, 0.0 }
 0x467   : > { %v10381_v37 = vadd.f32 %v10380_v27, %v10379_v7 }
 0x468   : > { %v10382_v56 = vsel %vm10324_vm2, %v10321_v51, 0.0 }
 0x469   : > { %v10383_v62 = vadd.f32 %v10382_v56, %v10381_v37 }
 0x46b   : > { %v10385_v39 = vadd.f32 %v10384_v57, %v10383_v62 }
 0x46d   : > { %v10387_v49 = vadd.f32 %v10386_v11, %v10385_v39 }
 0x46f   : > { %v10388_v20 = vrot.slane %v10387_v49, 4 }
 0x471   : > { %v10389_v14 = vadd.f32 %v10388_v20, %v10387_v49 }
 0x473   : > { %v10390_v22 = vrot.slane %v10389_v14, 2 }
 0x475   : > { %v10391_v15 = vadd.f32 %v10390_v22, %v10389_v14 }
 0x477   : > { %v10392_v24 = vrot.slane %v10391_v15, 1 }
 0x479   : > { %v10393_v0 = vadd.f32 %v10392_v24, %v10391_v15 }
 0x47b   : > { %v10394_v40 = vmul.f32 0.00390625, %v10393_v0 }
 0x47d   : > { %12584 = vmatmul.mubr.msk.f32.vlgmr.msra.gmra.mxu0 %vm10324_vm2, %v10394_v40 }
 0x53d   : > { %v10473_v32 = vpop.f32.mrf.mxu0 }
 0x53e   : > { %v10474_v60 = vadd.f32 %v10473_v32, %v10403_v28 }
 0x53f   : > { %v12585_v5 = vpop.f32.mrf.mxu0 }
 0x540   : > { %10478 = vst.msk [vmem:[%s270_s23] sm:$0x1] %vm10477_vm3, %v10474_v60 }
 0x541   : > { %12795 = shalt.err (!%p12792_p3)
}
 0x542   : > { %s12796_s18 = scalar_lea.hbm %s17753_s13, 16  ;;  %s12800_s21 = scalar_lea.hbm %s17795_s7, 128 }
 0x543   : > { %p12797_p4 = scmp.ne.s32.totalorder %s17753_s13, %s12796_s18  ;;  %p12801_p9 = scmp.lt.s32.totalorder %s17753_s13, %s17795_s7 }
 0x544   : > { %p12802_p10 = scmp.lt.s32.totalorder %s12800_s21, %s12796_s18 }
 0x545   : > { %p12798_p7 = pnand %p12797_p4, %p12926_p5 }
 0x546   : > { %p12803_p11 = por %p12802_p10, %p12801_p9 }
 0x547   : > { %p12799_p8 = pneg %p12798_p7 }
 0x549   : > { %p12804_p12 = pnand %p12803_p11, %p12799_p8 }
 0x54b   : > { %12807 = shalt.err (!%p12804_p12)
}
 0x54c   : > { %12596 = dma.vmem_to_hbm [thread:$0]  (%p12926_p5), %s10493_s29, 16, %s17753_s13, %s10480_s14  }
 0x54d PF: > { %p12602_p13 = scmp.ge.s32.totalorder %s12842_s27, 2  ;;  %s10504_s8 = sand.u32 1, %s12830_s24  }
 0x54e   : > { %s10505_s9 = scalar_lea.sflag [#allocation4], %s10504_s8 }
 0x54f   : > { %p12599_p0 = pnand %p12602_p13, %p12930_p6 }
 0x551   : > { %p12600_p1 = pneg %p12599_p0 }
 0x553   : > { %12825 = dma.done.wait (%p12600_p1), %s10505_s9, 16  }
 0x554   : > { %12827 = vsyncadd (%p12600_p1), %s10505_s9, 4294967280  ;;  %p17_p2 = scmp.ge.s32.totalorder %s12913_s30, 10   ;;  %s18135_s24 = smov %s12834_s25 }
 0x555   : > { %s18136_s25 = smov %s12838_s26  ;;  %s18137_s26 = smov %s12924_s10 }
 0x556   : > { %s18138_s27 = smov %s12913_s30  ;;  %19 = sbr.rel (!%p17_p2) target bundleno = 3 (0x3), region = 103 }
 0x55b   :  { %10509 = vsyncpa [#allocation4], 1 }
 0x55c   :  { %10511 = vsyncpa [#allocation4 + $0x1], 1 }

</bundles_post_ra>
